<compile_context>
chip_gen: v7x
topology: tpu7x:2x2x1
jax: 0.10.0
libtpu: 0.0.40
codegen_flags: <defaults>
</compile_context>

<pallas_src>
import functools
import math

import jax
import jax.numpy as jnp
from jax.experimental import pallas as pl
from jax.experimental.pallas import tpu as pltpu


def _gelu_tanh(z):
    # TODO(synk): PyTorch nn.GELU() default is the exact erf GELU; the tanh
    # approximation used here (Mosaic-safe) deviates by <~3e-4 absolute.
    c = 0.7978845608028654  # sqrt(2/pi)
    return 0.5 * z * (1.0 + jnp.tanh(c * (z + 0.044715 * z * z * z)))


def _transformer_block_kernel(
    x_ref,                        # (Bb, S, D)
    ln1_w_ref, ln1_b_ref,         # (1, D) f32
    wqkv_ref,                     # (D, 3D) bf16, Q columns pre-scaled 1/sqrt(hd)
    wo_ref,                       # (D, D) bf16
    ln2_w_ref, ln2_b_ref,         # (1, D) f32
    w1_ref, b1_ref,               # (D, Dh) bf16, (1, Dh) f32
    w2_ref, b2_ref,               # (Dh, D) bf16, (1, D) f32
    o_ref,                        # (Bb, S, D)
    ctx_ref,                      # (Bb*S, D) bf16 VMEM scratch (head concat)
    *, num_heads, head_dim, eps, block_b, seq_len,
):
    Bb, S = block_b, seq_len
    D = num_heads * head_dim
    M = Bb * S

    x = x_ref[...].reshape(M, D).astype(jnp.float32)          # (M, D) f32

    def layernorm(v, w, b):
        mu = jnp.mean(v, axis=-1, keepdims=True)
        c = v - mu
        var = jnp.mean(c * c, axis=-1, keepdims=True)
        return c * jax.lax.rsqrt(var + eps) * w + b

    # ---- norm1 + fused QKV (one N=3D bf16 MXU pass) -------------------------
    h = layernorm(x, ln1_w_ref[...], ln1_b_ref[...]).astype(jnp.bfloat16)
    qkv = jnp.dot(h, wqkv_ref[...],
                  preferred_element_type=jnp.float32)          # (M, 3D) f32
    q = qkv[:, :D]                 # already scaled (folded into wqkv)
    k = qkv[:, D:2 * D]
    v = qkv[:, 2 * D:3 * D]

    # ---- attention: per head, batched over the Bb block ---------------------
    for hh in range(num_heads):    # small static unroll (H=4)
        lo = hh * head_dim
        hi = lo + head_dim
        qh = q[:, lo:hi].reshape(Bb, S, head_dim).astype(jnp.bfloat16)
        kh = k[:, lo:hi].reshape(Bb, S, head_dim).astype(jnp.bfloat16)
        vh = v[:, lo:hi].reshape(Bb, S, head_dim).astype(jnp.bfloat16)
        s = jnp.einsum("bqd,bkd->bqk", qh, kh,
                       preferred_element_type=jnp.float32)     # (Bb, S, S)
        s = s - jnp.max(s, axis=-1, keepdims=True)
        p = jnp.exp(s)
        p = p * pl.reciprocal(jnp.sum(p, axis=-1, keepdims=True), approx=True)
        oh = jnp.einsum("bqk,bkd->bqd", p.astype(jnp.bfloat16), vh,
                        preferred_element_type=jnp.float32)    # (Bb, S, hd)
        # Concatenate heads in a VMEM scratch -> single full-K Wo matmul later.
        ctx_ref[:, lo:hi] = oh.reshape(M, head_dim).astype(jnp.bfloat16)
    # TODO(synk): for large num_heads, replace this static unroll with a
    # head-major batched dot_general (or lax.fori_loop(unroll=True)) to bound
    # live vregs; at H=4 the unroll is cheap.

    attn = jnp.dot(ctx_ref[...], wo_ref[...],
                   preferred_element_type=jnp.float32)         # (M, D) f32
    x1 = x + attn

    # ---- norm2 + MLP (bf16 MXU feeds, f32 accumulation) ---------------------
    h2 = layernorm(x1, ln2_w_ref[...], ln2_b_ref[...]).astype(jnp.bfloat16)
    z = jnp.dot(h2, w1_ref[...],
                preferred_element_type=jnp.float32) + b1_ref[...]
    z = _gelu_tanh(z).astype(jnp.bfloat16)
    mlp_out = jnp.dot(z, w2_ref[...],
                      preferred_element_type=jnp.float32) + b2_ref[...]

    o_ref[...] = (x1 + mlp_out).reshape(Bb, S, D).astype(o_ref.dtype)


def basic_transformer_block(
    x, ln1_w, ln1_b, wq_t, wk_t, wv_t, wo_t, ln2_w, ln2_b, w1_t, b1, w2_t, b2,
    *, num_heads, eps=1e-5, block_b=None,
):
    """x: (B, S, D). Weight matrices are pre-transposed so y = h @ w."""
    B, S, D = x.shape
    Dh = w1_t.shape[1]
    assert D % num_heads == 0
    head_dim = D // num_heads

    if block_b is None:
        # Fatten M (rows per matmul) while keeping >= 2 grid steps on the
        # "parallel" batch axis so both v7x TensorCores get work.
        block_b = 1
        for cand in (8, 4, 2):
            if B % cand == 0 and B // cand >= 2:
                block_b = cand
                break
    assert B % block_b == 0

    scale = 1.0 / math.sqrt(head_dim)
    # Fused QKV weight; attention scale folded into the Q columns; bf16 feeds.
    wqkv = jnp.concatenate([wq_t * scale, wk_t, wv_t], axis=1).astype(jnp.bfloat16)
    wo_b = wo_t.astype(jnp.bfloat16)
    w1_b = w1_t.astype(jnp.bfloat16)
    w2_b = w2_t.astype(jnp.bfloat16)

    f32 = jnp.float32
    args = (
        x,
        ln1_w.reshape(1, D).astype(f32), ln1_b.reshape(1, D).astype(f32),
        wqkv, wo_b,
        ln2_w.reshape(1, D).astype(f32), ln2_b.reshape(1, D).astype(f32),
        w1_b, b1.reshape(1, Dh).astype(f32),
        w2_b, b2.reshape(1, D).astype(f32),
    )

    kernel = functools.partial(
        _transformer_block_kernel,
        num_heads=num_heads, head_dim=head_dim, eps=eps,
        block_b=block_b, seq_len=S)

    # Explicit VMEM budget from the actual footprint (with headroom), clamped
    # to a range that is legal on every generation (v7x has 64 MiB physical).
    itemsize = x.dtype.itemsize
    weight_bytes = (D * 3 * D + D * D + D * Dh + Dh * D) * 2 + (6 * D + Dh) * 4
    io_bytes = 2 * 2 * block_b * S * D * itemsize          # dbl-buffered in+out
    act_bytes = block_b * S * (3 * D + 2 * Dh + 8 * D) * 4 + 2 * block_b * S * S * 4
    scratch_bytes = block_b * S * D * 2
    est = weight_bytes + io_bytes + act_bytes + scratch_bytes
    vmem_limit = int(min(64 << 20, max(32 << 20, 2 * est)))

    def run(weight_mode):
        const = lambda b: (0, 0)
        if weight_mode is None:
            wspec = lambda shape: pl.BlockSpec(shape, const)
        else:
            wspec = lambda shape: pl.BlockSpec(shape, const,
                                               pipeline_mode=weight_mode)
        return pl.pallas_call(
            kernel,
            out_shape=jax.ShapeDtypeStruct((B, S, D), x.dtype),
            grid_spec=pltpu.PrefetchScalarGridSpec(
                num_scalar_prefetch=0,
                grid=(B // block_b,),
                in_specs=[
                    pl.BlockSpec((block_b, S, D), lambda b: (b, 0, 0)),  # x
                    wspec((1, D)), wspec((1, D)),                        # ln1
                    wspec((D, 3 * D)),                                   # wqkv
                    wspec((D, D)),                                       # wo
                    wspec((1, D)), wspec((1, D)),                        # ln2
                    wspec((D, Dh)), wspec((1, Dh)),                      # w1,b1
                    wspec((Dh, D)), wspec((1, D)),                       # w2,b2
                ],
                out_specs=pl.BlockSpec((block_b, S, D), lambda b: (b, 0, 0)),
                scratch_shapes=[pltpu.VMEM((block_b * S, D), jnp.bfloat16)],
            ),
            compiler_params=pltpu.CompilerParams(
                dimension_semantics=("parallel",),     # shards over v7x's 2 TCs
                vmem_limit_bytes=vmem_limit,
            ),
        )(*args)

    try:
        # Weights never change block index -> single-buffer them to halve
        # their VMEM footprint (decisive at realistic D/Dh on v7x/v5e).
        return run(pl.Buffered(1))
    except Exception:
        # Fallback if this JAX build rejects buffer_count=1: default
        # double-buffering (identical semantics, slightly more VMEM).
        return run(None)


def _reference(x, ln1_w, ln1_b, wq_t, wk_t, wv_t, wo_t, ln2_w, ln2_b,
               w1_t, b1, w2_t, b2, *, num_heads, eps):
    B, S, D = x.shape
    hd = D // num_heads

    def ln(v, w, b):
        mu = v.mean(-1, keepdims=True)
        var = ((v - mu) ** 2).mean(-1, keepdims=True)
        return (v - mu) / jnp.sqrt(var + eps) * w + b

    h = ln(x, ln1_w, ln1_b)
    q = (h @ wq_t).reshape(B, S, num_heads, hd).transpose(0, 2, 1, 3)
    k = (h @ wk_t).reshape(B, S, num_heads, hd).transpose(0, 2, 1, 3)
    v = (h @ wv_t).reshape(B, S, num_heads, hd).transpose(0, 2, 1, 3)
    s = jnp.einsum("bhqd,bhkd->bhqk", q, k) / (hd ** 0.5)
    p = jax.nn.softmax(s, axis=-1)
    o = jnp.einsum("bhqk,bhkd->bhqd", p, v).transpose(0, 2, 1, 3).reshape(B, S, D)
    x1 = x + o @ wo_t
    h2 = ln(x1, ln2_w, ln2_b)
    z = _gelu_tanh(h2 @ w1_t + b1)
    return x1 + (z @ w2_t + b2)


if __name__ == "__main__":
    # Small, TPU-friendly shapes: batch=4, seq=32, inner_dim=128, heads=4.
    B, S, D, H = 4, 32, 128, 4
    mlp_ratio = 4.0
    Dh = int(D * mlp_ratio)
    eps = 1e-5

    key = jax.random.PRNGKey(0)
    ks = jax.random.split(key, 13)
    f32 = jnp.float32

    x = jax.random.normal(ks[0], (B, S, D), dtype=f32)
    ln1_w = 1.0 + 0.1 * jax.random.normal(ks[1], (D,), dtype=f32)
    ln1_b = 0.1 * jax.random.normal(ks[2], (D,), dtype=f32)
    wq_t = 0.05 * jax.random.normal(ks[3], (D, D), dtype=f32)
    wk_t = 0.05 * jax.random.normal(ks[4], (D, D), dtype=f32)
    wv_t = 0.05 * jax.random.normal(ks[5], (D, D), dtype=f32)
    wo_t = 0.05 * jax.random.normal(ks[6], (D, D), dtype=f32)
    ln2_w = 1.0 + 0.1 * jax.random.normal(ks[7], (D,), dtype=f32)
    ln2_b = 0.1 * jax.random.normal(ks[8], (D,), dtype=f32)
    w1_t = 0.05 * jax.random.normal(ks[9], (D, Dh), dtype=f32)
    b1 = 0.05 * jax.random.normal(ks[10], (Dh,), dtype=f32)
    w2_t = 0.05 * jax.random.normal(ks[11], (Dh, D), dtype=f32)
    b2 = 0.05 * jax.random.normal(ks[12], (D,), dtype=f32)

    y = basic_transformer_block(
        x, ln1_w, ln1_b, wq_t, wk_t, wv_t, wo_t, ln2_w, ln2_b,
        w1_t, b1, w2_t, b2, num_heads=H, eps=eps)
    y = jax.block_until_ready(y)

    y_ref = _reference(
        x, ln1_w, ln1_b, wq_t, wk_t, wv_t, wo_t, ln2_w, ln2_b,
        w1_t, b1, w2_t, b2, num_heads=H, eps=eps)

    assert y.shape == (B, S, D)
    # bf16 MXU operands (f32 accumulation) -> loosened tolerance vs. f32 ref.
    assert jnp.allclose(y, y_ref, atol=5e-2, rtol=5e-2), \
        float(jnp.max(jnp.abs(y - y_ref)))

    print("KERNEL_OK")
</pallas_src>

<mosaic_0001>
module attributes {stable_mosaic.version = 11 : i64} {
  func.func @_transformer_block_kernel(%arg0: i32, %arg1: memref<2x32x128xf32, #tpu.memory_space<vmem>>, %arg2: memref<1x128xf32, #tpu.memory_space<vmem>>, %arg3: memref<1x128xf32, #tpu.memory_space<vmem>>, %arg4: memref<128x384xbf16, #tpu.memory_space<vmem>>, %arg5: memref<128x128xbf16, #tpu.memory_space<vmem>>, %arg6: memref<1x128xf32, #tpu.memory_space<vmem>>, %arg7: memref<1x128xf32, #tpu.memory_space<vmem>>, %arg8: memref<128x512xbf16, #tpu.memory_space<vmem>>, %arg9: memref<1x512xf32, #tpu.memory_space<vmem>>, %arg10: memref<512x128xbf16, #tpu.memory_space<vmem>>, %arg11: memref<1x128xf32, #tpu.memory_space<vmem>>, %arg12: memref<2x32x128xf32, #tpu.memory_space<vmem>>, %arg13: memref<64x128xbf16, #tpu.memory_space<vmem>>) attributes {dimension_semantics = [#tpu.dimension_semantics<parallel>], iteration_bounds = array<i64: 2>, scalar_prefetch = 0 : i64, scratch_operands = 1 : i64, tpu.core_type = #tpu.core_type<tc>, window_params = [{transform_indices = @transform_0, window_bounds = array<i64: 2, 32, 128>}, {pipeline_mode = #tpu.pipeline_mode<synchronous>, transform_indices = @transform_1, window_bounds = array<i64: 1, 128>}, {pipeline_mode = #tpu.pipeline_mode<synchronous>, transform_indices = @transform_2, window_bounds = array<i64: 1, 128>}, {pipeline_mode = #tpu.pipeline_mode<synchronous>, transform_indices = @transform_3, window_bounds = array<i64: 128, 384>}, {pipeline_mode = #tpu.pipeline_mode<synchronous>, transform_indices = @transform_4, window_bounds = array<i64: 128, 128>}, {pipeline_mode = #tpu.pipeline_mode<synchronous>, transform_indices = @transform_5, window_bounds = array<i64: 1, 128>}, {pipeline_mode = #tpu.pipeline_mode<synchronous>, transform_indices = @transform_6, window_bounds = array<i64: 1, 128>}, {pipeline_mode = #tpu.pipeline_mode<synchronous>, transform_indices = @transform_7, window_bounds = array<i64: 128, 512>}, {pipeline_mode = #tpu.pipeline_mode<synchronous>, transform_indices = @transform_8, window_bounds = array<i64: 1, 512>}, {pipeline_mode = #tpu.pipeline_mode<synchronous>, transform_indices = @transform_9, window_bounds = array<i64: 512, 128>}, {pipeline_mode = #tpu.pipeline_mode<synchronous>, transform_indices = @transform_10, window_bounds = array<i64: 1, 128>}, {transform_indices = @transform_11, window_bounds = array<i64: 2, 32, 128>}]} {
    %c0 = arith.constant 0 : index
    %c0_0 = arith.constant 0 : index
    %c0_1 = arith.constant 0 : index
    %0 = vector.load %arg1[%c0, %c0_0, %c0_1] : memref<2x32x128xf32, #tpu.memory_space<vmem>>, vector<2x32x128xf32>
    %1 = vector.shape_cast %0 : vector<2x32x128xf32> to vector<64x128xf32>
    %c0_2 = arith.constant 0 : index
    %c0_3 = arith.constant 0 : index
    %2 = vector.load %arg2[%c0_2, %c0_3] : memref<1x128xf32, #tpu.memory_space<vmem>>, vector<1x128xf32>
    %c0_4 = arith.constant 0 : index
    %c0_5 = arith.constant 0 : index
    %3 = vector.load %arg3[%c0_4, %c0_5] : memref<1x128xf32, #tpu.memory_space<vmem>>, vector<1x128xf32>
    %cst = arith.constant dense<0.000000e+00> : vector<64xf32>
    %4 = vector.multi_reduction <add>, %1, %cst [1] : vector<64x128xf32> to vector<64xf32>
    %5 = vector.shape_cast %4 : vector<64xf32> to vector<64x1xf32>
    %cst_6 = arith.constant 1.280000e+02 : f32
    %6 = vector.broadcast %cst_6 : f32 to vector<64x1xf32>
    %7 = arith.divf %5, %6 : vector<64x1xf32>
    %8 = vector.broadcast %7 : vector<64x1xf32> to vector<64x128xf32>
    %9 = arith.subf %1, %8 : vector<64x128xf32>
    %10 = arith.mulf %9, %9 : vector<64x128xf32>
    %cst_7 = arith.constant dense<0.000000e+00> : vector<64xf32>
    %11 = vector.multi_reduction <add>, %10, %cst_7 [1] : vector<64x128xf32> to vector<64xf32>
    %12 = vector.shape_cast %11 : vector<64xf32> to vector<64x1xf32>
    %cst_8 = arith.constant 1.280000e+02 : f32
    %13 = vector.broadcast %cst_8 : f32 to vector<64x1xf32>
    %14 = arith.divf %12, %13 : vector<64x1xf32>
    %cst_9 = arith.constant 9.99999974E-6 : f32
    %15 = vector.broadcast %cst_9 : f32 to vector<64x1xf32>
    %16 = arith.addf %14, %15 : vector<64x1xf32>
    %17 = math.rsqrt %16 : vector<64x1xf32>
    %18 = vector.broadcast %17 : vector<64x1xf32> to vector<64x128xf32>
    %19 = arith.mulf %9, %18 : vector<64x128xf32>
    %20 = vector.broadcast %2 : vector<1x128xf32> to vector<64x128xf32>
    %21 = arith.mulf %19, %20 : vector<64x128xf32>
    %22 = vector.broadcast %3 : vector<1x128xf32> to vector<64x128xf32>
    %23 = arith.addf %21, %22 : vector<64x128xf32>
    %24 = arith.truncf %23 : vector<64x128xf32> to vector<64x128xbf16>
    %c0_10 = arith.constant 0 : index
    %c0_11 = arith.constant 0 : index
    %25 = vector.load %arg4[%c0_10, %c0_11] : memref<128x384xbf16, #tpu.memory_space<vmem>>, vector<128x384xbf16>
    %cst_12 = arith.constant dense<0.000000e+00> : vector<64x384xf32>
    %26 = tpu.matmul %24, %25, %cst_12 {dimension_numbers = #tpu.dot_dimension_numbers<[1], [0], [0], [1], [0, 0, 1, 1], [], []>} : vector<64x128xbf16>, vector<128x384xbf16>, vector<64x384xf32> -> vector<64x384xf32>
    %27 = vector.extract_strided_slice %26 {offsets = [0, 0], sizes = [64, 128], strides = [1, 1]} : vector<64x384xf32> to vector<64x128xf32>
    %28 = vector.extract_strided_slice %26 {offsets = [0, 128], sizes = [64, 128], strides = [1, 1]} : vector<64x384xf32> to vector<64x128xf32>
    %29 = vector.extract_strided_slice %26 {offsets = [0, 256], sizes = [64, 128], strides = [1, 1]} : vector<64x384xf32> to vector<64x128xf32>
    %30 = vector.extract_strided_slice %27 {offsets = [0, 0], sizes = [64, 32], strides = [1, 1]} : vector<64x128xf32> to vector<64x32xf32>
    %31 = vector.shape_cast %30 : vector<64x32xf32> to vector<2x32x32xf32>
    %32 = arith.truncf %31 : vector<2x32x32xf32> to vector<2x32x32xbf16>
    %33 = vector.extract_strided_slice %28 {offsets = [0, 0], sizes = [64, 32], strides = [1, 1]} : vector<64x128xf32> to vector<64x32xf32>
    %34 = vector.shape_cast %33 : vector<64x32xf32> to vector<2x32x32xf32>
    %35 = arith.truncf %34 : vector<2x32x32xf32> to vector<2x32x32xbf16>
    %36 = vector.extract_strided_slice %29 {offsets = [0, 0], sizes = [64, 32], strides = [1, 1]} : vector<64x128xf32> to vector<64x32xf32>
    %37 = vector.shape_cast %36 : vector<64x32xf32> to vector<2x32x32xf32>
    %38 = arith.truncf %37 : vector<2x32x32xf32> to vector<2x32x32xbf16>
    "tpu.trace_start"() <{level = 10 : i32, message = "bqd,bkd->bqk"}> : () -> ()
    %cst_13 = arith.constant dense<0.000000e+00> : vector<2x32x32xf32>
    %39 = tpu.matmul %32, %35, %cst_13 {dimension_numbers = #tpu.dot_dimension_numbers<[2], [2], [1], [1], [0, 0, 0, 1, 1, 1], [0], [0]>} : vector<2x32x32xbf16>, vector<2x32x32xbf16>, vector<2x32x32xf32> -> vector<2x32x32xf32>
    "tpu.trace_stop"() : () -> ()
    %cst_14 = arith.constant dense<0xFF800000> : vector<2x32xf32>
    %40 = vector.multi_reduction <maximumf>, %39, %cst_14 [2] : vector<2x32x32xf32> to vector<2x32xf32>
    %41 = vector.shape_cast %40 : vector<2x32xf32> to vector<2x32x1xf32>
    %42 = vector.broadcast %41 : vector<2x32x1xf32> to vector<2x32x32xf32>
    %43 = arith.subf %39, %42 : vector<2x32x32xf32>
    %44 = math.exp %43 : vector<2x32x32xf32>
    %cst_15 = arith.constant dense<0.000000e+00> : vector<2x32xf32>
    %45 = vector.multi_reduction <add>, %44, %cst_15 [2] : vector<2x32x32xf32> to vector<2x32xf32>
    %46 = vector.shape_cast %45 : vector<2x32xf32> to vector<2x32x1xf32>
    %47 = tpu.reciprocal %46 {approx = true} : vector<2x32x1xf32> -> vector<2x32x1xf32>
    %48 = vector.broadcast %47 : vector<2x32x1xf32> to vector<2x32x32xf32>
    %49 = arith.mulf %44, %48 : vector<2x32x32xf32>
    %50 = arith.truncf %49 : vector<2x32x32xf32> to vector<2x32x32xbf16>
    "tpu.trace_start"() <{level = 10 : i32, message = "bqk,bkd->bqd"}> : () -> ()
    %cst_16 = arith.constant dense<0.000000e+00> : vector<2x32x32xf32>
    %51 = tpu.matmul %50, %38, %cst_16 {dimension_numbers = #tpu.dot_dimension_numbers<[2], [1], [1], [2], [0, 0, 0, 1, 1, 2], [0], [0]>} : vector<2x32x32xbf16>, vector<2x32x32xbf16>, vector<2x32x32xf32> -> vector<2x32x32xf32>
    "tpu.trace_stop"() : () -> ()
    %52 = vector.shape_cast %51 : vector<2x32x32xf32> to vector<64x32xf32>
    %53 = arith.truncf %52 : vector<64x32xf32> to vector<64x32xbf16>
    %c0_17 = arith.constant 0 : index
    %c0_18 = arith.constant 0 : index
    %54 = vector.load %arg13[%c0_17, %c0_18] : memref<64x128xbf16, #tpu.memory_space<vmem>>, vector<64x32xbf16>
    tpu.vector_store %arg13[%c0_17, %c0_18], %53 {strides = array<i32>} : memref<64x128xbf16, #tpu.memory_space<vmem>>, vector<64x32xbf16>,
    %55 = vector.extract_strided_slice %27 {offsets = [0, 32], sizes = [64, 32], strides = [1, 1]} : vector<64x128xf32> to vector<64x32xf32>
    %56 = vector.shape_cast %55 : vector<64x32xf32> to vector<2x32x32xf32>
    %57 = arith.truncf %56 : vector<2x32x32xf32> to vector<2x32x32xbf16>
    %58 = vector.extract_strided_slice %28 {offsets = [0, 32], sizes = [64, 32], strides = [1, 1]} : vector<64x128xf32> to vector<64x32xf32>
    %59 = vector.shape_cast %58 : vector<64x32xf32> to vector<2x32x32xf32>
    %60 = arith.truncf %59 : vector<2x32x32xf32> to vector<2x32x32xbf16>
    %61 = vector.extract_strided_slice %29 {offsets = [0, 32], sizes = [64, 32], strides = [1, 1]} : vector<64x128xf32> to vector<64x32xf32>
    %62 = vector.shape_cast %61 : vector<64x32xf32> to vector<2x32x32xf32>
    %63 = arith.truncf %62 : vector<2x32x32xf32> to vector<2x32x32xbf16>
    "tpu.trace_start"() <{level = 10 : i32, message = "bqd,bkd->bqk"}> : () -> ()
    %cst_19 = arith.constant dense<0.000000e+00> : vector<2x32x32xf32>
    %64 = tpu.matmul %57, %60, %cst_19 {dimension_numbers = #tpu.dot_dimension_numbers<[2], [2], [1], [1], [0, 0, 0, 1, 1, 1], [0], [0]>} : vector<2x32x32xbf16>, vector<2x32x32xbf16>, vector<2x32x32xf32> -> vector<2x32x32xf32>
    "tpu.trace_stop"() : () -> ()
    %cst_20 = arith.constant dense<0xFF800000> : vector<2x32xf32>
    %65 = vector.multi_reduction <maximumf>, %64, %cst_20 [2] : vector<2x32x32xf32> to vector<2x32xf32>
    %66 = vector.shape_cast %65 : vector<2x32xf32> to vector<2x32x1xf32>
    %67 = vector.broadcast %66 : vector<2x32x1xf32> to vector<2x32x32xf32>
    %68 = arith.subf %64, %67 : vector<2x32x32xf32>
    %69 = math.exp %68 : vector<2x32x32xf32>
    %cst_21 = arith.constant dense<0.000000e+00> : vector<2x32xf32>
    %70 = vector.multi_reduction <add>, %69, %cst_21 [2] : vector<2x32x32xf32> to vector<2x32xf32>
    %71 = vector.shape_cast %70 : vector<2x32xf32> to vector<2x32x1xf32>
    %72 = tpu.reciprocal %71 {approx = true} : vector<2x32x1xf32> -> vector<2x32x1xf32>
    %73 = vector.broadcast %72 : vector<2x32x1xf32> to vector<2x32x32xf32>
    %74 = arith.mulf %69, %73 : vector<2x32x32xf32>
    %75 = arith.truncf %74 : vector<2x32x32xf32> to vector<2x32x32xbf16>
    "tpu.trace_start"() <{level = 10 : i32, message = "bqk,bkd->bqd"}> : () -> ()
    %cst_22 = arith.constant dense<0.000000e+00> : vector<2x32x32xf32>
    %76 = tpu.matmul %75, %63, %cst_22 {dimension_numbers = #tpu.dot_dimension_numbers<[2], [1], [1], [2], [0, 0, 0, 1, 1, 2], [0], [0]>} : vector<2x32x32xbf16>, vector<2x32x32xbf16>, vector<2x32x32xf32> -> vector<2x32x32xf32>
    "tpu.trace_stop"() : () -> ()
    %77 = vector.shape_cast %76 : vector<2x32x32xf32> to vector<64x32xf32>
    %78 = arith.truncf %77 : vector<64x32xf32> to vector<64x32xbf16>
    %c0_23 = arith.constant 0 : index
    %c32 = arith.constant 32 : index
    %79 = vector.load %arg13[%c0_23, %c32] : memref<64x128xbf16, #tpu.memory_space<vmem>>, vector<64x32xbf16>
    tpu.vector_store %arg13[%c0_23, %c32], %78 {strides = array<i32>} : memref<64x128xbf16, #tpu.memory_space<vmem>>, vector<64x32xbf16>,
    %80 = vector.extract_strided_slice %27 {offsets = [0, 64], sizes = [64, 32], strides = [1, 1]} : vector<64x128xf32> to vector<64x32xf32>
    %81 = vector.shape_cast %80 : vector<64x32xf32> to vector<2x32x32xf32>
    %82 = arith.truncf %81 : vector<2x32x32xf32> to vector<2x32x32xbf16>
    %83 = vector.extract_strided_slice %28 {offsets = [0, 64], sizes = [64, 32], strides = [1, 1]} : vector<64x128xf32> to vector<64x32xf32>
    %84 = vector.shape_cast %83 : vector<64x32xf32> to vector<2x32x32xf32>
    %85 = arith.truncf %84 : vector<2x32x32xf32> to vector<2x32x32xbf16>
    %86 = vector.extract_strided_slice %29 {offsets = [0, 64], sizes = [64, 32], strides = [1, 1]} : vector<64x128xf32> to vector<64x32xf32>
    %87 = vector.shape_cast %86 : vector<64x32xf32> to vector<2x32x32xf32>
    %88 = arith.truncf %87 : vector<2x32x32xf32> to vector<2x32x32xbf16>
    "tpu.trace_start"() <{level = 10 : i32, message = "bqd,bkd->bqk"}> : () -> ()
    %cst_24 = arith.constant dense<0.000000e+00> : vector<2x32x32xf32>
    %89 = tpu.matmul %82, %85, %cst_24 {dimension_numbers = #tpu.dot_dimension_numbers<[2], [2], [1], [1], [0, 0, 0, 1, 1, 1], [0], [0]>} : vector<2x32x32xbf16>, vector<2x32x32xbf16>, vector<2x32x32xf32> -> vector<2x32x32xf32>
    "tpu.trace_stop"() : () -> ()
    %cst_25 = arith.constant dense<0xFF800000> : vector<2x32xf32>
    %90 = vector.multi_reduction <maximumf>, %89, %cst_25 [2] : vector<2x32x32xf32> to vector<2x32xf32>
    %91 = vector.shape_cast %90 : vector<2x32xf32> to vector<2x32x1xf32>
    %92 = vector.broadcast %91 : vector<2x32x1xf32> to vector<2x32x32xf32>
    %93 = arith.subf %89, %92 : vector<2x32x32xf32>
    %94 = math.exp %93 : vector<2x32x32xf32>
    %cst_26 = arith.constant dense<0.000000e+00> : vector<2x32xf32>
    %95 = vector.multi_reduction <add>, %94, %cst_26 [2] : vector<2x32x32xf32> to vector<2x32xf32>
    %96 = vector.shape_cast %95 : vector<2x32xf32> to vector<2x32x1xf32>
    %97 = tpu.reciprocal %96 {approx = true} : vector<2x32x1xf32> -> vector<2x32x1xf32>
    %98 = vector.broadcast %97 : vector<2x32x1xf32> to vector<2x32x32xf32>
    %99 = arith.mulf %94, %98 : vector<2x32x32xf32>
    %100 = arith.truncf %99 : vector<2x32x32xf32> to vector<2x32x32xbf16>
    "tpu.trace_start"() <{level = 10 : i32, message = "bqk,bkd->bqd"}> : () -> ()
    %cst_27 = arith.constant dense<0.000000e+00> : vector<2x32x32xf32>
    %101 = tpu.matmul %100, %88, %cst_27 {dimension_numbers = #tpu.dot_dimension_numbers<[2], [1], [1], [2], [0, 0, 0, 1, 1, 2], [0], [0]>} : vector<2x32x32xbf16>, vector<2x32x32xbf16>, vector<2x32x32xf32> -> vector<2x32x32xf32>
    "tpu.trace_stop"() : () -> ()
    %102 = vector.shape_cast %101 : vector<2x32x32xf32> to vector<64x32xf32>
    %103 = arith.truncf %102 : vector<64x32xf32> to vector<64x32xbf16>
    %c0_28 = arith.constant 0 : index
    %c64 = arith.constant 64 : index
    %104 = vector.load %arg13[%c0_28, %c64] : memref<64x128xbf16, #tpu.memory_space<vmem>>, vector<64x32xbf16>
    tpu.vector_store %arg13[%c0_28, %c64], %103 {strides = array<i32>} : memref<64x128xbf16, #tpu.memory_space<vmem>>, vector<64x32xbf16>,
    %105 = vector.extract_strided_slice %27 {offsets = [0, 96], sizes = [64, 32], strides = [1, 1]} : vector<64x128xf32> to vector<64x32xf32>
    %106 = vector.shape_cast %105 : vector<64x32xf32> to vector<2x32x32xf32>
    %107 = arith.truncf %106 : vector<2x32x32xf32> to vector<2x32x32xbf16>
    %108 = vector.extract_strided_slice %28 {offsets = [0, 96], sizes = [64, 32], strides = [1, 1]} : vector<64x128xf32> to vector<64x32xf32>
    %109 = vector.shape_cast %108 : vector<64x32xf32> to vector<2x32x32xf32>
    %110 = arith.truncf %109 : vector<2x32x32xf32> to vector<2x32x32xbf16>
    %111 = vector.extract_strided_slice %29 {offsets = [0, 96], sizes = [64, 32], strides = [1, 1]} : vector<64x128xf32> to vector<64x32xf32>
    %112 = vector.shape_cast %111 : vector<64x32xf32> to vector<2x32x32xf32>
    %113 = arith.truncf %112 : vector<2x32x32xf32> to vector<2x32x32xbf16>
    "tpu.trace_start"() <{level = 10 : i32, message = "bqd,bkd->bqk"}> : () -> ()
    %cst_29 = arith.constant dense<0.000000e+00> : vector<2x32x32xf32>
    %114 = tpu.matmul %107, %110, %cst_29 {dimension_numbers = #tpu.dot_dimension_numbers<[2], [2], [1], [1], [0, 0, 0, 1, 1, 1], [0], [0]>} : vector<2x32x32xbf16>, vector<2x32x32xbf16>, vector<2x32x32xf32> -> vector<2x32x32xf32>
    "tpu.trace_stop"() : () -> ()
    %cst_30 = arith.constant dense<0xFF800000> : vector<2x32xf32>
    %115 = vector.multi_reduction <maximumf>, %114, %cst_30 [2] : vector<2x32x32xf32> to vector<2x32xf32>
    %116 = vector.shape_cast %115 : vector<2x32xf32> to vector<2x32x1xf32>
    %117 = vector.broadcast %116 : vector<2x32x1xf32> to vector<2x32x32xf32>
    %118 = arith.subf %114, %117 : vector<2x32x32xf32>
    %119 = math.exp %118 : vector<2x32x32xf32>
    %cst_31 = arith.constant dense<0.000000e+00> : vector<2x32xf32>
    %120 = vector.multi_reduction <add>, %119, %cst_31 [2] : vector<2x32x32xf32> to vector<2x32xf32>
    %121 = vector.shape_cast %120 : vector<2x32xf32> to vector<2x32x1xf32>
    %122 = tpu.reciprocal %121 {approx = true} : vector<2x32x1xf32> -> vector<2x32x1xf32>
    %123 = vector.broadcast %122 : vector<2x32x1xf32> to vector<2x32x32xf32>
    %124 = arith.mulf %119, %123 : vector<2x32x32xf32>
    %125 = arith.truncf %124 : vector<2x32x32xf32> to vector<2x32x32xbf16>
    "tpu.trace_start"() <{level = 10 : i32, message = "bqk,bkd->bqd"}> : () -> ()
    %cst_32 = arith.constant dense<0.000000e+00> : vector<2x32x32xf32>
    %126 = tpu.matmul %125, %113, %cst_32 {dimension_numbers = #tpu.dot_dimension_numbers<[2], [1], [1], [2], [0, 0, 0, 1, 1, 2], [0], [0]>} : vector<2x32x32xbf16>, vector<2x32x32xbf16>, vector<2x32x32xf32> -> vector<2x32x32xf32>
    "tpu.trace_stop"() : () -> ()
    %127 = vector.shape_cast %126 : vector<2x32x32xf32> to vector<64x32xf32>
    %128 = arith.truncf %127 : vector<64x32xf32> to vector<64x32xbf16>
    %c0_33 = arith.constant 0 : index
    %c96 = arith.constant 96 : index
    %129 = vector.load %arg13[%c0_33, %c96] : memref<64x128xbf16, #tpu.memory_space<vmem>>, vector<64x32xbf16>
    tpu.vector_store %arg13[%c0_33, %c96], %128 {strides = array<i32>} : memref<64x128xbf16, #tpu.memory_space<vmem>>, vector<64x32xbf16>,
    %c0_34 = arith.constant 0 : index
    %c0_35 = arith.constant 0 : index
    %130 = vector.load %arg13[%c0_34, %c0_35] : memref<64x128xbf16, #tpu.memory_space<vmem>>, vector<64x128xbf16>
    %c0_36 = arith.constant 0 : index
    %c0_37 = arith.constant 0 : index
    %131 = vector.load %arg5[%c0_36, %c0_37] : memref<128x128xbf16, #tpu.memory_space<vmem>>, vector<128x128xbf16>
    %cst_38 = arith.constant dense<0.000000e+00> : vector<64x128xf32>
    %132 = tpu.matmul %130, %131, %cst_38 {dimension_numbers = #tpu.dot_dimension_numbers<[1], [0], [0], [1], [0, 0, 1, 1], [], []>} : vector<64x128xbf16>, vector<128x128xbf16>, vector<64x128xf32> -> vector<64x128xf32>
    %133 = arith.addf %1, %132 : vector<64x128xf32>
    %c0_39 = arith.constant 0 : index
    %c0_40 = arith.constant 0 : index
    %134 = vector.load %arg6[%c0_39, %c0_40] : memref<1x128xf32, #tpu.memory_space<vmem>>, vector<1x128xf32>
    %c0_41 = arith.constant 0 : index
    %c0_42 = arith.constant 0 : index
    %135 = vector.load %arg7[%c0_41, %c0_42] : memref<1x128xf32, #tpu.memory_space<vmem>>, vector<1x128xf32>
    %cst_43 = arith.constant dense<0.000000e+00> : vector<64xf32>
    %136 = vector.multi_reduction <add>, %133, %cst_43 [1] : vector<64x128xf32> to vector<64xf32>
    %137 = vector.shape_cast %136 : vector<64xf32> to vector<64x1xf32>
    %cst_44 = arith.constant 1.280000e+02 : f32
    %138 = vector.broadcast %cst_44 : f32 to vector<64x1xf32>
    %139 = arith.divf %137, %138 : vector<64x1xf32>
    %140 = vector.broadcast %139 : vector<64x1xf32> to vector<64x128xf32>
    %141 = arith.subf %133, %140 : vector<64x128xf32>
    %142 = arith.mulf %141, %141 : vector<64x128xf32>
    %cst_45 = arith.constant dense<0.000000e+00> : vector<64xf32>
    %143 = vector.multi_reduction <add>, %142, %cst_45 [1] : vector<64x128xf32> to vector<64xf32>
    %144 = vector.shape_cast %143 : vector<64xf32> to vector<64x1xf32>
    %cst_46 = arith.constant 1.280000e+02 : f32
    %145 = vector.broadcast %cst_46 : f32 to vector<64x1xf32>
    %146 = arith.divf %144, %145 : vector<64x1xf32>
    %cst_47 = arith.constant 9.99999974E-6 : f32
    %147 = vector.broadcast %cst_47 : f32 to vector<64x1xf32>
    %148 = arith.addf %146, %147 : vector<64x1xf32>
    %149 = math.rsqrt %148 : vector<64x1xf32>
    %150 = vector.broadcast %149 : vector<64x1xf32> to vector<64x128xf32>
    %151 = arith.mulf %141, %150 : vector<64x128xf32>
    %152 = vector.broadcast %134 : vector<1x128xf32> to vector<64x128xf32>
    %153 = arith.mulf %151, %152 : vector<64x128xf32>
    %154 = vector.broadcast %135 : vector<1x128xf32> to vector<64x128xf32>
    %155 = arith.addf %153, %154 : vector<64x128xf32>
    %156 = arith.truncf %155 : vector<64x128xf32> to vector<64x128xbf16>
    %c0_48 = arith.constant 0 : index
    %c0_49 = arith.constant 0 : index
    %157 = vector.load %arg8[%c0_48, %c0_49] : memref<128x512xbf16, #tpu.memory_space<vmem>>, vector<128x512xbf16>
    %cst_50 = arith.constant dense<0.000000e+00> : vector<64x512xf32>
    %158 = tpu.matmul %156, %157, %cst_50 {dimension_numbers = #tpu.dot_dimension_numbers<[1], [0], [0], [1], [0, 0, 1, 1], [], []>} : vector<64x128xbf16>, vector<128x512xbf16>, vector<64x512xf32> -> vector<64x512xf32>
    %c0_51 = arith.constant 0 : index
    %c0_52 = arith.constant 0 : index
    %159 = vector.load %arg9[%c0_51, %c0_52] : memref<1x512xf32, #tpu.memory_space<vmem>>, vector<1x512xf32>
    %160 = vector.broadcast %159 : vector<1x512xf32> to vector<64x512xf32>
    %161 = arith.addf %158, %160 : vector<64x512xf32>
    %cst_53 = arith.constant 5.000000e-01 : f32
    %162 = vector.broadcast %cst_53 : f32 to vector<64x512xf32>
    %163 = arith.mulf %162, %161 : vector<64x512xf32>
    %cst_54 = arith.constant 4.471500e-02 : f32
    %164 = vector.broadcast %cst_54 : f32 to vector<64x512xf32>
    %165 = arith.mulf %164, %161 : vector<64x512xf32>
    %166 = arith.mulf %165, %161 : vector<64x512xf32>
    %167 = arith.mulf %166, %161 : vector<64x512xf32>
    %168 = arith.addf %161, %167 : vector<64x512xf32>
    %cst_55 = arith.constant 0.797884583 : f32
    %169 = vector.broadcast %cst_55 : f32 to vector<64x512xf32>
    %170 = arith.mulf %169, %168 : vector<64x512xf32>
    %171 = math.tanh %170 : vector<64x512xf32>
    %cst_56 = arith.constant 1.000000e+00 : f32
    %172 = vector.broadcast %cst_56 : f32 to vector<64x512xf32>
    %173 = arith.addf %172, %171 : vector<64x512xf32>
    %174 = arith.mulf %163, %173 : vector<64x512xf32>
    %175 = arith.truncf %174 : vector<64x512xf32> to vector<64x512xbf16>
    %c0_57 = arith.constant 0 : index
    %c0_58 = arith.constant 0 : index
    %176 = vector.load %arg10[%c0_57, %c0_58] : memref<512x128xbf16, #tpu.memory_space<vmem>>, vector<512x128xbf16>
    %cst_59 = arith.constant dense<0.000000e+00> : vector<64x128xf32>
    %177 = tpu.matmul %175, %176, %cst_59 {dimension_numbers = #tpu.dot_dimension_numbers<[1], [0], [0], [1], [0, 0, 1, 1], [], []>} : vector<64x512xbf16>, vector<512x128xbf16>, vector<64x128xf32> -> vector<64x128xf32>
    %c0_60 = arith.constant 0 : index
    %c0_61 = arith.constant 0 : index
    %178 = vector.load %arg11[%c0_60, %c0_61] : memref<1x128xf32, #tpu.memory_space<vmem>>, vector<1x128xf32>
    %179 = vector.broadcast %178 : vector<1x128xf32> to vector<64x128xf32>
    %180 = arith.addf %177, %179 : vector<64x128xf32>
    %181 = arith.addf %133, %180 : vector<64x128xf32>
    %182 = vector.shape_cast %181 : vector<64x128xf32> to vector<2x32x128xf32>
    %c0_62 = arith.constant 0 : index
    %c0_63 = arith.constant 0 : index
    %c0_64 = arith.constant 0 : index
    %183 = vector.load %arg12[%c0_62, %c0_63, %c0_64] : memref<2x32x128xf32, #tpu.memory_space<vmem>>, vector<2x32x128xf32>
    tpu.vector_store %arg12[%c0_62, %c0_63, %c0_64], %182 {strides = array<i32>} : memref<2x32x128xf32, #tpu.memory_space<vmem>>, vector<2x32x128xf32>,
    return
  }
  func.func @transform_0(%arg0: i32) -> (i32, i32, i32) {
    %c0_i32 = arith.constant 0 : i32
    %c0_i32_0 = arith.constant 0 : i32
    %c0_i32_1 = arith.constant 0 : i32
    return %arg0, %c0_i32, %c0_i32_0 : i32, i32, i32
  }
  func.func @transform_1(%arg0: i32) -> (i32, i32) {
    %c0_i32 = arith.constant 0 : i32
    %c0_i32_0 = arith.constant 0 : i32
    %c0_i32_1 = arith.constant 0 : i32
    return %c0_i32, %c0_i32_0 : i32, i32
  }
  func.func @transform_2(%arg0: i32) -> (i32, i32) {
    %c0_i32 = arith.constant 0 : i32
    %c0_i32_0 = arith.constant 0 : i32
    %c0_i32_1 = arith.constant 0 : i32
    return %c0_i32, %c0_i32_0 : i32, i32
  }
  func.func @transform_3(%arg0: i32) -> (i32, i32) {
    %c0_i32 = arith.constant 0 : i32
    %c0_i32_0 = arith.constant 0 : i32
    %c0_i32_1 = arith.constant 0 : i32
    return %c0_i32, %c0_i32_0 : i32, i32
  }
  func.func @transform_4(%arg0: i32) -> (i32, i32) {
    %c0_i32 = arith.constant 0 : i32
    %c0_i32_0 = arith.constant 0 : i32
    %c0_i32_1 = arith.constant 0 : i32
    return %c0_i32, %c0_i32_0 : i32, i32
  }
  func.func @transform_5(%arg0: i32) -> (i32, i32) {
    %c0_i32 = arith.constant 0 : i32
    %c0_i32_0 = arith.constant 0 : i32
    %c0_i32_1 = arith.constant 0 : i32
    return %c0_i32, %c0_i32_0 : i32, i32
  }
  func.func @transform_6(%arg0: i32) -> (i32, i32) {
    %c0_i32 = arith.constant 0 : i32
    %c0_i32_0 = arith.constant 0 : i32
    %c0_i32_1 = arith.constant 0 : i32
    return %c0_i32, %c0_i32_0 : i32, i32
  }
  func.func @transform_7(%arg0: i32) -> (i32, i32) {
    %c0_i32 = arith.constant 0 : i32
    %c0_i32_0 = arith.constant 0 : i32
    %c0_i32_1 = arith.constant 0 : i32
    return %c0_i32, %c0_i32_0 : i32, i32
  }
  func.func @transform_8(%arg0: i32) -> (i32, i32) {
    %c0_i32 = arith.constant 0 : i32
    %c0_i32_0 = arith.constant 0 : i32
    %c0_i32_1 = arith.constant 0 : i32
    return %c0_i32, %c0_i32_0 : i32, i32
  }
  func.func @transform_9(%arg0: i32) -> (i32, i32) {
    %c0_i32 = arith.constant 0 : i32
    %c0_i32_0 = arith.constant 0 : i32
    %c0_i32_1 = arith.constant 0 : i32
    return %c0_i32, %c0_i32_0 : i32, i32
  }
  func.func @transform_10(%arg0: i32) -> (i32, i32) {
    %c0_i32 = arith.constant 0 : i32
    %c0_i32_0 = arith.constant 0 : i32
    %c0_i32_1 = arith.constant 0 : i32
    return %c0_i32, %c0_i32_0 : i32, i32
  }
  func.func @transform_11(%arg0: i32) -> (i32, i32, i32) {
    %c0_i32 = arith.constant 0 : i32
    %c0_i32_0 = arith.constant 0 : i32
    %c0_i32_1 = arith.constant 0 : i32
    return %arg0, %c0_i32, %c0_i32_0 : i32, i32, i32
  }
}

module attributes {stable_mosaic.version = 11 : i64} {
  func.func @_transformer_block_kernel(%arg0: i32, %arg1: memref<2x32x128xf32, #tpu.memory_space<vmem>>, %arg2: memref<1x128xf32, #tpu.memory_space<vmem>>, %arg3: memref<1x128xf32, #tpu.memory_space<vmem>>, %arg4: memref<128x384xbf16, #tpu.memory_space<vmem>>, %arg5: memref<128x128xbf16, #tpu.memory_space<vmem>>, %arg6: memref<1x128xf32, #tpu.memory_space<vmem>>, %arg7: memref<1x128xf32, #tpu.memory_space<vmem>>, %arg8: memref<128x512xbf16, #tpu.memory_space<vmem>>, %arg9: memref<1x512xf32, #tpu.memory_space<vmem>>, %arg10: memref<512x128xbf16, #tpu.memory_space<vmem>>, %arg11: memref<1x128xf32, #tpu.memory_space<vmem>>, %arg12: memref<2x32x128xf32, #tpu.memory_space<vmem>>, %arg13: memref<64x128xbf16, #tpu.memory_space<vmem>>) attributes {dimension_semantics = [#tpu.dimension_semantics<parallel>], iteration_bounds = array<i64: 2>, scalar_prefetch = 0 : i64, scratch_operands = 1 : i64, tpu.core_type = #tpu.core_type<tc>, window_params = [{transform_indices = @transform_0, window_bounds = array<i64: 2, 32, 128>}, {pipeline_mode = #tpu.pipeline_mode<synchronous>, transform_indices = @transform_1, window_bounds = array<i64: 1, 128>}, {pipeline_mode = #tpu.pipeline_mode<synchronous>, transform_indices = @transform_2, window_bounds = array<i64: 1, 128>}, {pipeline_mode = #tpu.pipeline_mode<synchronous>, transform_indices = @transform_3, window_bounds = array<i64: 128, 384>}, {pipeline_mode = #tpu.pipeline_mode<synchronous>, transform_indices = @transform_4, window_bounds = array<i64: 128, 128>}, {pipeline_mode = #tpu.pipeline_mode<synchronous>, transform_indices = @transform_5, window_bounds = array<i64: 1, 128>}, {pipeline_mode = #tpu.pipeline_mode<synchronous>, transform_indices = @transform_6, window_bounds = array<i64: 1, 128>}, {pipeline_mode = #tpu.pipeline_mode<synchronous>, transform_indices = @transform_7, window_bounds = array<i64: 128, 512>}, {pipeline_mode = #tpu.pipeline_mode<synchronous>, transform_indices = @transform_8, window_bounds = array<i64: 1, 512>}, {pipeline_mode = #tpu.pipeline_mode<synchronous>, transform_indices = @transform_9, window_bounds = array<i64: 512, 128>}, {pipeline_mode = #tpu.pipeline_mode<synchronous>, transform_indices = @transform_10, window_bounds = array<i64: 1, 128>}, {transform_indices = @transform_11, window_bounds = array<i64: 2, 32, 128>}]} {
    %c0 = arith.constant 0 : index
    %c0_0 = arith.constant 0 : index
    %c0_1 = arith.constant 0 : index
    %0 = vector.load %arg1[%c0, %c0_0, %c0_1] : memref<2x32x128xf32, #tpu.memory_space<vmem>>, vector<2x32x128xf32>
    %1 = vector.shape_cast %0 : vector<2x32x128xf32> to vector<64x128xf32>
    %c0_2 = arith.constant 0 : index
    %c0_3 = arith.constant 0 : index
    %2 = vector.load %arg2[%c0_2, %c0_3] : memref<1x128xf32, #tpu.memory_space<vmem>>, vector<1x128xf32>
    %c0_4 = arith.constant 0 : index
    %c0_5 = arith.constant 0 : index
    %3 = vector.load %arg3[%c0_4, %c0_5] : memref<1x128xf32, #tpu.memory_space<vmem>>, vector<1x128xf32>
    %cst = arith.constant dense<0.000000e+00> : vector<64xf32>
    %4 = vector.multi_reduction <add>, %1, %cst [1] : vector<64x128xf32> to vector<64xf32>
    %5 = vector.shape_cast %4 : vector<64xf32> to vector<64x1xf32>
    %cst_6 = arith.constant 1.280000e+02 : f32
    %6 = vector.broadcast %cst_6 : f32 to vector<64x1xf32>
    %7 = arith.divf %5, %6 : vector<64x1xf32>
    %8 = vector.broadcast %7 : vector<64x1xf32> to vector<64x128xf32>
    %9 = arith.subf %1, %8 : vector<64x128xf32>
    %10 = arith.mulf %9, %9 : vector<64x128xf32>
    %cst_7 = arith.constant dense<0.000000e+00> : vector<64xf32>
    %11 = vector.multi_reduction <add>, %10, %cst_7 [1] : vector<64x128xf32> to vector<64xf32>
    %12 = vector.shape_cast %11 : vector<64xf32> to vector<64x1xf32>
    %cst_8 = arith.constant 1.280000e+02 : f32
    %13 = vector.broadcast %cst_8 : f32 to vector<64x1xf32>
    %14 = arith.divf %12, %13 : vector<64x1xf32>
    %cst_9 = arith.constant 9.99999974E-6 : f32
    %15 = vector.broadcast %cst_9 : f32 to vector<64x1xf32>
    %16 = arith.addf %14, %15 : vector<64x1xf32>
    %17 = math.rsqrt %16 : vector<64x1xf32>
    %18 = vector.broadcast %17 : vector<64x1xf32> to vector<64x128xf32>
    %19 = arith.mulf %9, %18 : vector<64x128xf32>
    %20 = vector.broadcast %2 : vector<1x128xf32> to vector<64x128xf32>
    %21 = arith.mulf %19, %20 : vector<64x128xf32>
    %22 = vector.broadcast %3 : vector<1x128xf32> to vector<64x128xf32>
    %23 = arith.addf %21, %22 : vector<64x128xf32>
    %24 = arith.truncf %23 : vector<64x128xf32> to vector<64x128xbf16>
    %c0_10 = arith.constant 0 : index
    %c0_11 = arith.constant 0 : index
    %25 = vector.load %arg4[%c0_10, %c0_11] : memref<128x384xbf16, #tpu.memory_space<vmem>>, vector<128x384xbf16>
    %cst_12 = arith.constant dense<0.000000e+00> : vector<64x384xf32>
    %26 = tpu.matmul %24, %25, %cst_12 {dimension_numbers = #tpu.dot_dimension_numbers<[1], [0], [0], [1], [0, 0, 1, 1], [], []>} : vector<64x128xbf16>, vector<128x384xbf16>, vector<64x384xf32> -> vector<64x384xf32>
    %27 = vector.extract_strided_slice %26 {offsets = [0, 0], sizes = [64, 128], strides = [1, 1]} : vector<64x384xf32> to vector<64x128xf32>
    %28 = vector.extract_strided_slice %26 {offsets = [0, 128], sizes = [64, 128], strides = [1, 1]} : vector<64x384xf32> to vector<64x128xf32>
    %29 = vector.extract_strided_slice %26 {offsets = [0, 256], sizes = [64, 128], strides = [1, 1]} : vector<64x384xf32> to vector<64x128xf32>
    %30 = vector.extract_strided_slice %27 {offsets = [0, 0], sizes = [64, 32], strides = [1, 1]} : vector<64x128xf32> to vector<64x32xf32>
    %31 = vector.shape_cast %30 : vector<64x32xf32> to vector<2x32x32xf32>
    %32 = arith.truncf %31 : vector<2x32x32xf32> to vector<2x32x32xbf16>
    %33 = vector.extract_strided_slice %28 {offsets = [0, 0], sizes = [64, 32], strides = [1, 1]} : vector<64x128xf32> to vector<64x32xf32>
    %34 = vector.shape_cast %33 : vector<64x32xf32> to vector<2x32x32xf32>
    %35 = arith.truncf %34 : vector<2x32x32xf32> to vector<2x32x32xbf16>
    %36 = vector.extract_strided_slice %29 {offsets = [0, 0], sizes = [64, 32], strides = [1, 1]} : vector<64x128xf32> to vector<64x32xf32>
    %37 = vector.shape_cast %36 : vector<64x32xf32> to vector<2x32x32xf32>
    %38 = arith.truncf %37 : vector<2x32x32xf32> to vector<2x32x32xbf16>
    "tpu.trace_start"() <{level = 10 : i32, message = "bqd,bkd->bqk"}> : () -> ()
    %cst_13 = arith.constant dense<0.000000e+00> : vector<2x32x32xf32>
    %39 = tpu.matmul %32, %35, %cst_13 {dimension_numbers = #tpu.dot_dimension_numbers<[2], [2], [1], [1], [0, 0, 0, 1, 1, 1], [0], [0]>} : vector<2x32x32xbf16>, vector<2x32x32xbf16>, vector<2x32x32xf32> -> vector<2x32x32xf32>
    "tpu.trace_stop"() : () -> ()
    %cst_14 = arith.constant dense<0xFF800000> : vector<2x32xf32>
    %40 = vector.multi_reduction <maximumf>, %39, %cst_14 [2] : vector<2x32x32xf32> to vector<2x32xf32>
    %41 = vector.shape_cast %40 : vector<2x32xf32> to vector<2x32x1xf32>
    %42 = vector.broadcast %41 : vector<2x32x1xf32> to vector<2x32x32xf32>
    %43 = arith.subf %39, %42 : vector<2x32x32xf32>
    %44 = math.exp %43 : vector<2x32x32xf32>
    %cst_15 = arith.constant dense<0.000000e+00> : vector<2x32xf32>
    %45 = vector.multi_reduction <add>, %44, %cst_15 [2] : vector<2x32x32xf32> to vector<2x32xf32>
    %46 = vector.shape_cast %45 : vector<2x32xf32> to vector<2x32x1xf32>
    %47 = tpu.reciprocal %46 {approx = true} : vector<2x32x1xf32> -> vector<2x32x1xf32>
    %48 = vector.broadcast %47 : vector<2x32x1xf32> to vector<2x32x32xf32>
    %49 = arith.mulf %44, %48 : vector<2x32x32xf32>
    %50 = arith.truncf %49 : vector<2x32x32xf32> to vector<2x32x32xbf16>
    "tpu.trace_start"() <{level = 10 : i32, message = "bqk,bkd->bqd"}> : () -> ()
    %cst_16 = arith.constant dense<0.000000e+00> : vector<2x32x32xf32>
    %51 = tpu.matmul %50, %38, %cst_16 {dimension_numbers = #tpu.dot_dimension_numbers<[2], [1], [1], [2], [0, 0, 0, 1, 1, 2], [0], [0]>} : vector<2x32x32xbf16>, vector<2x32x32xbf16>, vector<2x32x32xf32> -> vector<2x32x32xf32>
    "tpu.trace_stop"() : () -> ()
    %52 = vector.shape_cast %51 : vector<2x32x32xf32> to vector<64x32xf32>
    %53 = arith.truncf %52 : vector<64x32xf32> to vector<64x32xbf16>
    %c0_17 = arith.constant 0 : index
    %c0_18 = arith.constant 0 : index
    %54 = vector.load %arg13[%c0_17, %c0_18] : memref<64x128xbf16, #tpu.memory_space<vmem>>, vector<64x32xbf16>
    tpu.vector_store %arg13[%c0_17, %c0_18], %53 {strides = array<i32>} : memref<64x128xbf16, #tpu.memory_space<vmem>>, vector<64x32xbf16>,
    %55 = vector.extract_strided_slice %27 {offsets = [0, 32], sizes = [64, 32], strides = [1, 1]} : vector<64x128xf32> to vector<64x32xf32>
    %56 = vector.shape_cast %55 : vector<64x32xf32> to vector<2x32x32xf32>
    %57 = arith.truncf %56 : vector<2x32x32xf32> to vector<2x32x32xbf16>
    %58 = vector.extract_strided_slice %28 {offsets = [0, 32], sizes = [64, 32], strides = [1, 1]} : vector<64x128xf32> to vector<64x32xf32>
    %59 = vector.shape_cast %58 : vector<64x32xf32> to vector<2x32x32xf32>
    %60 = arith.truncf %59 : vector<2x32x32xf32> to vector<2x32x32xbf16>
    %61 = vector.extract_strided_slice %29 {offsets = [0, 32], sizes = [64, 32], strides = [1, 1]} : vector<64x128xf32> to vector<64x32xf32>
    %62 = vector.shape_cast %61 : vector<64x32xf32> to vector<2x32x32xf32>
    %63 = arith.truncf %62 : vector<2x32x32xf32> to vector<2x32x32xbf16>
    "tpu.trace_start"() <{level = 10 : i32, message = "bqd,bkd->bqk"}> : () -> ()
    %cst_19 = arith.constant dense<0.000000e+00> : vector<2x32x32xf32>
    %64 = tpu.matmul %57, %60, %cst_19 {dimension_numbers = #tpu.dot_dimension_numbers<[2], [2], [1], [1], [0, 0, 0, 1, 1, 1], [0], [0]>} : vector<2x32x32xbf16>, vector<2x32x32xbf16>, vector<2x32x32xf32> -> vector<2x32x32xf32>
    "tpu.trace_stop"() : () -> ()
    %cst_20 = arith.constant dense<0xFF800000> : vector<2x32xf32>
    %65 = vector.multi_reduction <maximumf>, %64, %cst_20 [2] : vector<2x32x32xf32> to vector<2x32xf32>
    %66 = vector.shape_cast %65 : vector<2x32xf32> to vector<2x32x1xf32>
    %67 = vector.broadcast %66 : vector<2x32x1xf32> to vector<2x32x32xf32>
    %68 = arith.subf %64, %67 : vector<2x32x32xf32>
    %69 = math.exp %68 : vector<2x32x32xf32>
    %cst_21 = arith.constant dense<0.000000e+00> : vector<2x32xf32>
    %70 = vector.multi_reduction <add>, %69, %cst_21 [2] : vector<2x32x32xf32> to vector<2x32xf32>
    %71 = vector.shape_cast %70 : vector<2x32xf32> to vector<2x32x1xf32>
    %72 = tpu.reciprocal %71 {approx = true} : vector<2x32x1xf32> -> vector<2x32x1xf32>
    %73 = vector.broadcast %72 : vector<2x32x1xf32> to vector<2x32x32xf32>
    %74 = arith.mulf %69, %73 : vector<2x32x32xf32>
    %75 = arith.truncf %74 : vector<2x32x32xf32> to vector<2x32x32xbf16>
    "tpu.trace_start"() <{level = 10 : i32, message = "bqk,bkd->bqd"}> : () -> ()
    %cst_22 = arith.constant dense<0.000000e+00> : vector<2x32x32xf32>
    %76 = tpu.matmul %75, %63, %cst_22 {dimension_numbers = #tpu.dot_dimension_numbers<[2], [1], [1], [2], [0, 0, 0, 1, 1, 2], [0], [0]>} : vector<2x32x32xbf16>, vector<2x32x32xbf16>, vector<2x32x32xf32> -> vector<2x32x32xf32>
    "tpu.trace_stop"() : () -> ()
    %77 = vector.shape_cast %76 : vector<2x32x32xf32> to vector<64x32xf32>
    %78 = arith.truncf %77 : vector<64x32xf32> to vector<64x32xbf16>
    %c0_23 = arith.constant 0 : index
    %c32 = arith.constant 32 : index
    %79 = vector.load %arg13[%c0_23, %c32] : memref<64x128xbf16, #tpu.memory_space<vmem>>, vector<64x32xbf16>
    tpu.vector_store %arg13[%c0_23, %c32], %78 {strides = array<i32>} : memref<64x128xbf16, #tpu.memory_space<vmem>>, vector<64x32xbf16>,
    %80 = vector.extract_strided_slice %27 {offsets = [0, 64], sizes = [64, 32], strides = [1, 1]} : vector<64x128xf32> to vector<64x32xf32>
    %81 = vector.shape_cast %80 : vector<64x32xf32> to vector<2x32x32xf32>
    %82 = arith.truncf %81 : vector<2x32x32xf32> to vector<2x32x32xbf16>
    %83 = vector.extract_strided_slice %28 {offsets = [0, 64], sizes = [64, 32], strides = [1, 1]} : vector<64x128xf32> to vector<64x32xf32>
    %84 = vector.shape_cast %83 : vector<64x32xf32> to vector<2x32x32xf32>
    %85 = arith.truncf %84 : vector<2x32x32xf32> to vector<2x32x32xbf16>
    %86 = vector.extract_strided_slice %29 {offsets = [0, 64], sizes = [64, 32], strides = [1, 1]} : vector<64x128xf32> to vector<64x32xf32>
    %87 = vector.shape_cast %86 : vector<64x32xf32> to vector<2x32x32xf32>
    %88 = arith.truncf %87 : vector<2x32x32xf32> to vector<2x32x32xbf16>
    "tpu.trace_start"() <{level = 10 : i32, message = "bqd,bkd->bqk"}> : () -> ()
    %cst_24 = arith.constant dense<0.000000e+00> : vector<2x32x32xf32>
    %89 = tpu.matmul %82, %85, %cst_24 {dimension_numbers = #tpu.dot_dimension_numbers<[2], [2], [1], [1], [0, 0, 0, 1, 1, 1], [0], [0]>} : vector<2x32x32xbf16>, vector<2x32x32xbf16>, vector<2x32x32xf32> -> vector<2x32x32xf32>
    "tpu.trace_stop"() : () -> ()
    %cst_25 = arith.constant dense<0xFF800000> : vector<2x32xf32>
    %90 = vector.multi_reduction <maximumf>, %89, %cst_25 [2] : vector<2x32x32xf32> to vector<2x32xf32>
    %91 = vector.shape_cast %90 : vector<2x32xf32> to vector<2x32x1xf32>
    %92 = vector.broadcast %91 : vector<2x32x1xf32> to vector<2x32x32xf32>
    %93 = arith.subf %89, %92 : vector<2x32x32xf32>
    %94 = math.exp %93 : vector<2x32x32xf32>
    %cst_26 = arith.constant dense<0.000000e+00> : vector<2x32xf32>
    %95 = vector.multi_reduction <add>, %94, %cst_26 [2] : vector<2x32x32xf32> to vector<2x32xf32>
    %96 = vector.shape_cast %95 : vector<2x32xf32> to vector<2x32x1xf32>
    %97 = tpu.reciprocal %96 {approx = true} : vector<2x32x1xf32> -> vector<2x32x1xf32>
    %98 = vector.broadcast %97 : vector<2x32x1xf32> to vector<2x32x32xf32>
    %99 = arith.mulf %94, %98 : vector<2x32x32xf32>
    %100 = arith.truncf %99 : vector<2x32x32xf32> to vector<2x32x32xbf16>
    "tpu.trace_start"() <{level = 10 : i32, message = "bqk,bkd->bqd"}> : () -> ()
    %cst_27 = arith.constant dense<0.000000e+00> : vector<2x32x32xf32>
    %101 = tpu.matmul %100, %88, %cst_27 {dimension_numbers = #tpu.dot_dimension_numbers<[2], [1], [1], [2], [0, 0, 0, 1, 1, 2], [0], [0]>} : vector<2x32x32xbf16>, vector<2x32x32xbf16>, vector<2x32x32xf32> -> vector<2x32x32xf32>
    "tpu.trace_stop"() : () -> ()
    %102 = vector.shape_cast %101 : vector<2x32x32xf32> to vector<64x32xf32>
    %103 = arith.truncf %102 : vector<64x32xf32> to vector<64x32xbf16>
    %c0_28 = arith.constant 0 : index
    %c64 = arith.constant 64 : index
    %104 = vector.load %arg13[%c0_28, %c64] : memref<64x128xbf16, #tpu.memory_space<vmem>>, vector<64x32xbf16>
    tpu.vector_store %arg13[%c0_28, %c64], %103 {strides = array<i32>} : memref<64x128xbf16, #tpu.memory_space<vmem>>, vector<64x32xbf16>,
    %105 = vector.extract_strided_slice %27 {offsets = [0, 96], sizes = [64, 32], strides = [1, 1]} : vector<64x128xf32> to vector<64x32xf32>
    %106 = vector.shape_cast %105 : vector<64x32xf32> to vector<2x32x32xf32>
    %107 = arith.truncf %106 : vector<2x32x32xf32> to vector<2x32x32xbf16>
    %108 = vector.extract_strided_slice %28 {offsets = [0, 96], sizes = [64, 32], strides = [1, 1]} : vector<64x128xf32> to vector<64x32xf32>
    %109 = vector.shape_cast %108 : vector<64x32xf32> to vector<2x32x32xf32>
    %110 = arith.truncf %109 : vector<2x32x32xf32> to vector<2x32x32xbf16>
    %111 = vector.extract_strided_slice %29 {offsets = [0, 96], sizes = [64, 32], strides = [1, 1]} : vector<64x128xf32> to vector<64x32xf32>
    %112 = vector.shape_cast %111 : vector<64x32xf32> to vector<2x32x32xf32>
    %113 = arith.truncf %112 : vector<2x32x32xf32> to vector<2x32x32xbf16>
    "tpu.trace_start"() <{level = 10 : i32, message = "bqd,bkd->bqk"}> : () -> ()
    %cst_29 = arith.constant dense<0.000000e+00> : vector<2x32x32xf32>
    %114 = tpu.matmul %107, %110, %cst_29 {dimension_numbers = #tpu.dot_dimension_numbers<[2], [2], [1], [1], [0, 0, 0, 1, 1, 1], [0], [0]>} : vector<2x32x32xbf16>, vector<2x32x32xbf16>, vector<2x32x32xf32> -> vector<2x32x32xf32>
    "tpu.trace_stop"() : () -> ()
    %cst_30 = arith.constant dense<0xFF800000> : vector<2x32xf32>
    %115 = vector.multi_reduction <maximumf>, %114, %cst_30 [2] : vector<2x32x32xf32> to vector<2x32xf32>
    %116 = vector.shape_cast %115 : vector<2x32xf32> to vector<2x32x1xf32>
    %117 = vector.broadcast %116 : vector<2x32x1xf32> to vector<2x32x32xf32>
    %118 = arith.subf %114, %117 : vector<2x32x32xf32>
    %119 = math.exp %118 : vector<2x32x32xf32>
    %cst_31 = arith.constant dense<0.000000e+00> : vector<2x32xf32>
    %120 = vector.multi_reduction <add>, %119, %cst_31 [2] : vector<2x32x32xf32> to vector<2x32xf32>
    %121 = vector.shape_cast %120 : vector<2x32xf32> to vector<2x32x1xf32>
    %122 = tpu.reciprocal %121 {approx = true} : vector<2x32x1xf32> -> vector<2x32x1xf32>
    %123 = vector.broadcast %122 : vector<2x32x1xf32> to vector<2x32x32xf32>
    %124 = arith.mulf %119, %123 : vector<2x32x32xf32>
    %125 = arith.truncf %124 : vector<2x32x32xf32> to vector<2x32x32xbf16>
    "tpu.trace_start"() <{level = 10 : i32, message = "bqk,bkd->bqd"}> : () -> ()
    %cst_32 = arith.constant dense<0.000000e+00> : vector<2x32x32xf32>
    %126 = tpu.matmul %125, %113, %cst_32 {dimension_numbers = #tpu.dot_dimension_numbers<[2], [1], [1], [2], [0, 0, 0, 1, 1, 2], [0], [0]>} : vector<2x32x32xbf16>, vector<2x32x32xbf16>, vector<2x32x32xf32> -> vector<2x32x32xf32>
    "tpu.trace_stop"() : () -> ()
    %127 = vector.shape_cast %126 : vector<2x32x32xf32> to vector<64x32xf32>
    %128 = arith.truncf %127 : vector<64x32xf32> to vector<64x32xbf16>
    %c0_33 = arith.constant 0 : index
    %c96 = arith.constant 96 : index
    %129 = vector.load %arg13[%c0_33, %c96] : memref<64x128xbf16, #tpu.memory_space<vmem>>, vector<64x32xbf16>
    tpu.vector_store %arg13[%c0_33, %c96], %128 {strides = array<i32>} : memref<64x128xbf16, #tpu.memory_space<vmem>>, vector<64x32xbf16>,
    %c0_34 = arith.constant 0 : index
    %c0_35 = arith.constant 0 : index
    %130 = vector.load %arg13[%c0_34, %c0_35] : memref<64x128xbf16, #tpu.memory_space<vmem>>, vector<64x128xbf16>
    %c0_36 = arith.constant 0 : index
    %c0_37 = arith.constant 0 : index
    %131 = vector.load %arg5[%c0_36, %c0_37] : memref<128x128xbf16, #tpu.memory_space<vmem>>, vector<128x128xbf16>
    %cst_38 = arith.constant dense<0.000000e+00> : vector<64x128xf32>
    %132 = tpu.matmul %130, %131, %cst_38 {dimension_numbers = #tpu.dot_dimension_numbers<[1], [0], [0], [1], [0, 0, 1, 1], [], []>} : vector<64x128xbf16>, vector<128x128xbf16>, vector<64x128xf32> -> vector<64x128xf32>
    %133 = arith.addf %1, %132 : vector<64x128xf32>
    %c0_39 = arith.constant 0 : index
    %c0_40 = arith.constant 0 : index
    %134 = vector.load %arg6[%c0_39, %c0_40] : memref<1x128xf32, #tpu.memory_space<vmem>>, vector<1x128xf32>
    %c0_41 = arith.constant 0 : index
    %c0_42 = arith.constant 0 : index
    %135 = vector.load %arg7[%c0_41, %c0_42] : memref<1x128xf32, #tpu.memory_space<vmem>>, vector<1x128xf32>
    %cst_43 = arith.constant dense<0.000000e+00> : vector<64xf32>
    %136 = vector.multi_reduction <add>, %133, %cst_43 [1] : vector<64x128xf32> to vector<64xf32>
    %137 = vector.shape_cast %136 : vector<64xf32> to vector<64x1xf32>
    %cst_44 = arith.constant 1.280000e+02 : f32
    %138 = vector.broadcast %cst_44 : f32 to vector<64x1xf32>
    %139 = arith.divf %137, %138 : vector<64x1xf32>
    %140 = vector.broadcast %139 : vector<64x1xf32> to vector<64x128xf32>
    %141 = arith.subf %133, %140 : vector<64x128xf32>
    %142 = arith.mulf %141, %141 : vector<64x128xf32>
    %cst_45 = arith.constant dense<0.000000e+00> : vector<64xf32>
    %143 = vector.multi_reduction <add>, %142, %cst_45 [1] : vector<64x128xf32> to vector<64xf32>
    %144 = vector.shape_cast %143 : vector<64xf32> to vector<64x1xf32>
    %cst_46 = arith.constant 1.280000e+02 : f32
    %145 = vector.broadcast %cst_46 : f32 to vector<64x1xf32>
    %146 = arith.divf %144, %145 : vector<64x1xf32>
    %cst_47 = arith.constant 9.99999974E-6 : f32
    %147 = vector.broadcast %cst_47 : f32 to vector<64x1xf32>
    %148 = arith.addf %146, %147 : vector<64x1xf32>
    %149 = math.rsqrt %148 : vector<64x1xf32>
    %150 = vector.broadcast %149 : vector<64x1xf32> to vector<64x128xf32>
    %151 = arith.mulf %141, %150 : vector<64x128xf32>
    %152 = vector.broadcast %134 : vector<1x128xf32> to vector<64x128xf32>
    %153 = arith.mulf %151, %152 : vector<64x128xf32>
    %154 = vector.broadcast %135 : vector<1x128xf32> to vector<64x128xf32>
    %155 = arith.addf %153, %154 : vector<64x128xf32>
    %156 = arith.truncf %155 : vector<64x128xf32> to vector<64x128xbf16>
    %c0_48 = arith.constant 0 : index
    %c0_49 = arith.constant 0 : index
    %157 = vector.load %arg8[%c0_48, %c0_49] : memref<128x512xbf16, #tpu.memory_space<vmem>>, vector<128x512xbf16>
    %cst_50 = arith.constant dense<0.000000e+00> : vector<64x512xf32>
    %158 = tpu.matmul %156, %157, %cst_50 {dimension_numbers = #tpu.dot_dimension_numbers<[1], [0], [0], [1], [0, 0, 1, 1], [], []>} : vector<64x128xbf16>, vector<128x512xbf16>, vector<64x512xf32> -> vector<64x512xf32>
    %c0_51 = arith.constant 0 : index
    %c0_52 = arith.constant 0 : index
    %159 = vector.load %arg9[%c0_51, %c0_52] : memref<1x512xf32, #tpu.memory_space<vmem>>, vector<1x512xf32>
    %160 = vector.broadcast %159 : vector<1x512xf32> to vector<64x512xf32>
    %161 = arith.addf %158, %160 : vector<64x512xf32>
    %cst_53 = arith.constant 5.000000e-01 : f32
    %162 = vector.broadcast %cst_53 : f32 to vector<64x512xf32>
    %163 = arith.mulf %162, %161 : vector<64x512xf32>
    %cst_54 = arith.constant 4.471500e-02 : f32
    %164 = vector.broadcast %cst_54 : f32 to vector<64x512xf32>
    %165 = arith.mulf %164, %161 : vector<64x512xf32>
    %166 = arith.mulf %165, %161 : vector<64x512xf32>
    %167 = arith.mulf %166, %161 : vector<64x512xf32>
    %168 = arith.addf %161, %167 : vector<64x512xf32>
    %cst_55 = arith.constant 0.797884583 : f32
    %169 = vector.broadcast %cst_55 : f32 to vector<64x512xf32>
    %170 = arith.mulf %169, %168 : vector<64x512xf32>
    %171 = math.tanh %170 : vector<64x512xf32>
    %cst_56 = arith.constant 1.000000e+00 : f32
    %172 = vector.broadcast %cst_56 : f32 to vector<64x512xf32>
    %173 = arith.addf %172, %171 : vector<64x512xf32>
    %174 = arith.mulf %163, %173 : vector<64x512xf32>
    %175 = arith.truncf %174 : vector<64x512xf32> to vector<64x512xbf16>
    %c0_57 = arith.constant 0 : index
    %c0_58 = arith.constant 0 : index
    %176 = vector.load %arg10[%c0_57, %c0_58] : memref<512x128xbf16, #tpu.memory_space<vmem>>, vector<512x128xbf16>
    %cst_59 = arith.constant dense<0.000000e+00> : vector<64x128xf32>
    %177 = tpu.matmul %175, %176, %cst_59 {dimension_numbers = #tpu.dot_dimension_numbers<[1], [0], [0], [1], [0, 0, 1, 1], [], []>} : vector<64x512xbf16>, vector<512x128xbf16>, vector<64x128xf32> -> vector<64x128xf32>
    %c0_60 = arith.constant 0 : index
    %c0_61 = arith.constant 0 : index
    %178 = vector.load %arg11[%c0_60, %c0_61] : memref<1x128xf32, #tpu.memory_space<vmem>>, vector<1x128xf32>
    %179 = vector.broadcast %178 : vector<1x128xf32> to vector<64x128xf32>
    %180 = arith.addf %177, %179 : vector<64x128xf32>
    %181 = arith.addf %133, %180 : vector<64x128xf32>
    %182 = vector.shape_cast %181 : vector<64x128xf32> to vector<2x32x128xf32>
    %c0_62 = arith.constant 0 : index
    %c0_63 = arith.constant 0 : index
    %c0_64 = arith.constant 0 : index
    %183 = vector.load %arg12[%c0_62, %c0_63, %c0_64] : memref<2x32x128xf32, #tpu.memory_space<vmem>>, vector<2x32x128xf32>
    tpu.vector_store %arg12[%c0_62, %c0_63, %c0_64], %182 {strides = array<i32>} : memref<2x32x128xf32, #tpu.memory_space<vmem>>, vector<2x32x128xf32>,
    return
  }
  func.func @transform_0(%arg0: i32) -> (i32, i32, i32) {
    %c0_i32 = arith.constant 0 : i32
    %c0_i32_0 = arith.constant 0 : i32
    %c0_i32_1 = arith.constant 0 : i32
    return %arg0, %c0_i32, %c0_i32_0 : i32, i32, i32
  }
  func.func @transform_1(%arg0: i32) -> (i32, i32) {
    %c0_i32 = arith.constant 0 : i32
    %c0_i32_0 = arith.constant 0 : i32
    %c0_i32_1 = arith.constant 0 : i32
    return %c0_i32, %c0_i32_0 : i32, i32
  }
  func.func @transform_2(%arg0: i32) -> (i32, i32) {
    %c0_i32 = arith.constant 0 : i32
    %c0_i32_0 = arith.constant 0 : i32
    %c0_i32_1 = arith.constant 0 : i32
    return %c0_i32, %c0_i32_0 : i32, i32
  }
  func.func @transform_3(%arg0: i32) -> (i32, i32) {
    %c0_i32 = arith.constant 0 : i32
    %c0_i32_0 = arith.constant 0 : i32
    %c0_i32_1 = arith.constant 0 : i32
    return %c0_i32, %c0_i32_0 : i32, i32
  }
  func.func @transform_4(%arg0: i32) -> (i32, i32) {
    %c0_i32 = arith.constant 0 : i32
    %c0_i32_0 = arith.constant 0 : i32
    %c0_i32_1 = arith.constant 0 : i32
    return %c0_i32, %c0_i32_0 : i32, i32
  }
  func.func @transform_5(%arg0: i32) -> (i32, i32) {
    %c0_i32 = arith.constant 0 : i32
    %c0_i32_0 = arith.constant 0 : i32
    %c0_i32_1 = arith.constant 0 : i32
    return %c0_i32, %c0_i32_0 : i32, i32
  }
  func.func @transform_6(%arg0: i32) -> (i32, i32) {
    %c0_i32 = arith.constant 0 : i32
    %c0_i32_0 = arith.constant 0 : i32
    %c0_i32_1 = arith.constant 0 : i32
    return %c0_i32, %c0_i32_0 : i32, i32
  }
  func.func @transform_7(%arg0: i32) -> (i32, i32) {
    %c0_i32 = arith.constant 0 : i32
    %c0_i32_0 = arith.constant 0 : i32
    %c0_i32_1 = arith.constant 0 : i32
    return %c0_i32, %c0_i32_0 : i32, i32
  }
  func.func @transform_8(%arg0: i32) -> (i32, i32) {
    %c0_i32 = arith.constant 0 : i32
    %c0_i32_0 = arith.constant 0 : i32
    %c0_i32_1 = arith.constant 0 : i32
    return %c0_i32, %c0_i32_0 : i32, i32
  }
  func.func @transform_9(%arg0: i32) -> (i32, i32) {
    %c0_i32 = arith.constant 0 : i32
    %c0_i32_0 = arith.constant 0 : i32
    %c0_i32_1 = arith.constant 0 : i32
    return %c0_i32, %c0_i32_0 : i32, i32
  }
  func.func @transform_10(%arg0: i32) -> (i32, i32) {
    %c0_i32 = arith.constant 0 : i32
    %c0_i32_0 = arith.constant 0 : i32
    %c0_i32_1 = arith.constant 0 : i32
    return %c0_i32, %c0_i32_0 : i32, i32
  }
  func.func @transform_11(%arg0: i32) -> (i32, i32, i32) {
    %c0_i32 = arith.constant 0 : i32
    %c0_i32_0 = arith.constant 0 : i32
    %c0_i32_1 = arith.constant 0 : i32
    return %arg0, %c0_i32, %c0_i32_0 : i32, i32, i32
  }
}

</mosaic_0001>

<bundles_post_ra>
// kernel: tpu_custom_call.1
= control target key start
LH: loop header
LB: loop body
LE: loop exit
PB: predicated region body
PF: predicated region fallthrough
CT: control target
= control target key end

     0   :  { %s6319_s0 = inlined_call_operand.hbm [shape: f32[4,32,128], index: 0, kind: input, shape index: {}]   ;;  %s6320_s1 = inlined_call_operand.vmem [shape: f32[1,128], index: 1, kind: input, shape index: {}]   ;;  %s6321_s2 = inlined_call_operand.vmem [shape: f32[1,128], index: 2, kind: input, shape index: {}]   ;;  %s6322_s3 = inlined_call_operand.hbm [shape: bf16[128,384], index: 3, kind: input, shape index: {}]   ;;  %s6323_s4 = inlined_call_operand.hbm [shape: bf16[128,128], index: 4, kind: input, shape index: {}]   ;;  %s6324_s5 = inlined_call_operand.vmem [shape: f32[1,128], index: 5, kind: input, shape index: {}]   ;;  %s6325_s6 = inlined_call_operand.vmem [shape: f32[1,128], index: 6, kind: input, shape index: {}]   ;;  %s6326_s7 = inlined_call_operand.hbm [shape: bf16[128,512], index: 7, kind: input, shape index: {}]   ;;  %s6327_s8 = inlined_call_operand.vmem [shape: f32[1,512], index: 8, kind: input, shape index: {}]   ;;  %s6328_s9 = inlined_call_operand.hbm [shape: bf16[512,128], index: 9, kind: input, shape index: {}]   ;;  %s6329_s10 = inlined_call_operand.vmem [shape: f32[1,128], index: 10, kind: input, shape index: {}]   ;;  %s6330_s11 = inlined_call_operand.hbm [shape: f32[4,32,128], index: 11, kind: output, shape index: {}]  }
   0x1   :  { %6337 = sst [smem:[#allocation19_spill]] %s6322_s3 }
   0x2   :  { %6338 = sst [smem:[#allocation20_spill]] %s6329_s10 }
   0x3   :  { %6339 = sst [smem:[#allocation21_spill]] %s6330_s11 }
   0x4   :  { %16 = vsyncpa [#allocation4], 0 }
   0x5   :  { %18 = vsyncpa [#allocation4 + $0x1], 0 }
   0x6   :  { %19 = vsyncpa [#allocation7], 0 }
   0x7   :  { %20 = vsyncpa [#allocation10], 0 }
   0x8   :  { %21 = vsyncpa [#allocation5], 0 }
   0x9   :  { %23 = vsyncpa [#allocation5 + $0x1], 0  ;;  %s5118_s17 = smov 0   ;;  %s5120_s18 = smov 0  }
   0xa   :  { %s5122_s19 = smov 0   ;;  %s5124_s20 = smov 0  }
   0xb LB: > { %6340 = sst [smem:[#allocation17_spill]] %s5024_s17  ;;  %s5139_s21 = sadd.s32 4294967295, %s5036_s20   ;;  %s5036_s20 = sphi %s5124_s20, %s6366_s20   ;;  %s5032_s19 = sphi %s5122_s19, %s6365_s19   ;;  %s5028_s18 = sphi %s5120_s18, %s6364_s18   ;;  %s5024_s17 = sphi %s5118_s17, %s6363_s17  }
   0xc   : > { %s3846_s22 = sadd.s32 4294967294, %s5036_s20   ;;  %p49_p0 = scmp.ne.s32.totalorder %s5028_s18, %s5024_s17 }
   0xd   : > { %p6331_p1 = scmp.eq.s32.totalorder %s5139_s21, 0  ;;  %p289_p3 = scmp.eq.s32.totalorder %s3846_s22, 1 }
   0xe   : > { %p3847_p5 = scmp.ge.s32.totalorder %s5036_s20, 1  ;;  %p296_p7 = scmp.lt.s32.totalorder %s5036_s20, 3 }
   0xf   : > { %p5148_p4 = por %p6331_p1, %p49_p0  ;;  %p5153_p6 = por %p289_p3, %p49_p0 }
  0x10   : > { %p5158_p8 = pnand %p3847_p5, %p296_p7  ;;  %s5038_s26 = smov [#allocation6]  }
  0x11   : > { %s6341_s23 = scalar_select %p5148_p4, 1, 0 }
  0x12   : > { %s6342_s24 = scalar_select %p5153_p6, 1, 0 }
  0x13   : > { %s6344_s25 = scalar_select %p5158_p8, 1, 0 }
  0x14   : > { %6343 = sst [smem:[#allocation18_spill]] %s6342_s24  ;;  %s314_s27 = sshll.u32 %s5038_s26, 4  ;;  %s5162_s27 = int_to_ptr.vmem [resolvable:$true] %s314_s27 }
  0x15   : > { %p4387_p9 = pneg %p5158_p8  ;;  %s5039_s29 = smov [#allocation9]  }
  0x16   : > { %s346_s30 = sshll.u32 %s5039_s29, 4  ;;  %s6346_s3 = sld [smem:[#allocation19_spill]]  ;;  %s5173_s30 = int_to_ptr.vmem [resolvable:$true] %s346_s30 }
  0x17   : > { %p5169_p11 = pnand %p4387_p9, %p6331_p1 }
  0x19   : > { %p5183_p13 = pneg %p5169_p11 }
  0x1c   : > { %s4820_s14 = scalar_lea.hbm %s6346_s3, 3072 }
  0x1d   : > { %p4821_p12 = scmp.ne.s32.totalorder %s6346_s3, %s4820_s14  ;;  %p4827_p5 = scmp.lt.u32.totalorder %s4820_s14, %s6346_s3 }
  0x1f   : > { %p4823_p0 = pnand %p5183_p13, %p4821_p12 }
  0x21   : > { %p4824_p3 = pneg %p4823_p0 }
  0x23   : > { %p4829_p7 = pnand %p4827_p5, %p4824_p3 }
  0x25   : > { %4832 = shalt.err (!%p4829_p7)
}
  0x26   : > { %s4833_s12 = scalar_lea.vmem %s5162_s27, 3072  ;;  %p4841_p2 = scmp.lt.s32.totalorder %s5162_s27, %s5162_s27 }
  0x27   : > { %p4834_p9 = scmp.ne.s32.totalorder %s5162_s27, %s4833_s12  ;;  %p4842_p6 = scmp.lt.s32.totalorder %s4833_s12, %s4833_s12 }
  0x29   : > { %p4836_p10 = pnand %p4834_p9, %p5183_p13  ;;  %p4843_p12 = por %p4842_p6, %p4841_p2 }
  0x2b   : > { %p4837_p1 = pneg %p4836_p10 }
  0x2d   : > { %p4844_p0 = pnand %p4843_p12, %p4837_p1 }
  0x2f   : > { %4847 = shalt.err (!%p4844_p0)
}
  0x30   : > { %s5040_s13 = smov 192   ;;  %s5041_s14 = smov 12  }
  0x31   : > { %4390 = dma.hbm_to_vmem [thread:$0]  (!%p5169_p11), %s6346_s3, 3072, %s5162_s27, [#allocation7], %s5040_s13, %s5040_s13, %s5041_s14  }
  0x32   : > { %s4848_s24 = scalar_lea.hbm %s6326_s7, 4096 }
  0x33   : > { %p4849_p2 = scmp.ne.s32.totalorder %s6326_s7, %s4848_s24  ;;  %p4855_p10 = scmp.lt.u32.totalorder %s4848_s24, %s6326_s7 }
  0x35   : > { %p4851_p1 = pnand %p4849_p2, %p5183_p13 }
  0x37   : > { %p4852_p6 = pneg %p4851_p1 }
  0x39   : > { %p4857_p3 = pnand %p4855_p10, %p4852_p6 }
  0x3b   : > { %4860 = shalt.err (!%p4857_p3)
}
  0x3c   : > { %s4861_s27 = scalar_lea.vmem %s5173_s30, 4096  ;;  %p4869_p12 = scmp.lt.s32.totalorder %s5173_s30, %s5173_s30 }
  0x3d   : > { %p4862_p5 = scmp.ne.s32.totalorder %s5173_s30, %s4861_s27  ;;  %p4870_p0 = scmp.lt.s32.totalorder %s4861_s27, %s4861_s27 }
  0x3f   : > { %p4864_p7 = pnand %p4862_p5, %p5183_p13  ;;  %p4871_p2 = por %p4870_p0, %p4869_p12 }
  0x41   : > { %p4865_p9 = pneg %p4864_p7 }
  0x43   : > { %p4872_p1 = pnand %p4871_p2, %p4865_p9 }
  0x45   : > { %4875 = shalt.err (!%p4872_p1)
}
  0x46   : > { %s5042_s11 = smov 256   ;;  %s5043_s10 = smov 16  }
  0x47   : > { %4396 = dma.hbm_to_vmem [thread:$0]  (!%p5169_p11), %s6326_s7, 4096, %s5173_s30, [#allocation10], %s5042_s11, %s5042_s11, %s5043_s10  }
  0x48   : > { %s5044_s13 = smov [#allocation8]   ;;  %s4876_s26 = scalar_lea.hbm %s6323_s4, 1024 }
  0x49   : > { %s327_s14 = sshll.u32 %s5044_s13, 4  ;;  %p4877_p6 = scmp.ne.s32.totalorder %s6323_s4, %s4876_s26  ;;  %s328_s14 = int_to_ptr.vmem [resolvable:$true] %s327_s14 }
  0x4a   : > { %p4883_p5 = scmp.lt.u32.totalorder %s4876_s26, %s6323_s4 }
  0x4b   : > { %p4879_p10 = pnand %p4877_p6, %p5183_p13 }
  0x4d   : > { %p4880_p3 = pneg %p4879_p10 }
  0x4f   : > { %p4885_p7 = pnand %p4883_p5, %p4880_p3 }
  0x51   : > { %4888 = shalt.err (!%p4885_p7)
}
  0x52   : > { %s4889_s30 = scalar_lea.vmem %s328_s14, 1024  ;;  %p4897_p2 = scmp.lt.s32.totalorder %s328_s14, %s328_s14 }
  0x53   : > { %p4890_p9 = scmp.ne.s32.totalorder %s328_s14, %s4889_s30  ;;  %p4898_p1 = scmp.lt.s32.totalorder %s4889_s30, %s4889_s30 }
  0x55   : > { %p4892_p12 = pnand %p4890_p9, %p5183_p13  ;;  %p4899_p4 = por %p4898_p1, %p4897_p2 }
  0x57   : > { %p4893_p0 = pneg %p4892_p12 }
  0x59   : > { %p4900_p8 = pnand %p4899_p4, %p4893_p0 }
  0x5b   : > { %4903 = shalt.err (!%p4900_p8)
}
  0x5c   : > { %s5045_s11 = smov 64   ;;  %s5046_s10 = smov 4  }
  0x5d   : > { %4393 = dma.hbm_to_vmem [thread:$0]  (!%p5169_p11), %s6323_s4, 1024, %s328_s14, [#allocation7], %s5045_s11, %s5045_s11, %s5046_s10  }
  0x5e   : > { %s5047_s24 = smov [#allocation11]   ;;  %s4904_s26 = scalar_lea.hbm %s6328_s9, 4096 }
  0x5f   : > { %s362_s13 = sshll.u32 %s5047_s24, 4  ;;  %p4905_p4 = scmp.ne.s32.totalorder %s6328_s9, %s4904_s26  ;;  %s363_s13 = int_to_ptr.vmem [resolvable:$true] %s362_s13 }
  0x60   : > { %p4911_p10 = scmp.lt.u32.totalorder %s4904_s26, %s6328_s9 }
  0x61   : > { %p4907_p8 = pnand %p4905_p4, %p5183_p13 }
  0x63   : > { %p4908_p6 = pneg %p4907_p8 }
  0x65   : > { %p4913_p3 = pnand %p4911_p10, %p4908_p6 }
  0x67   : > { %4916 = shalt.err (!%p4913_p3)
}
  0x68   : > { %s4917_s14 = scalar_lea.vmem %s363_s13, 4096  ;;  %p4925_p12 = scmp.lt.s32.totalorder %s363_s13, %s363_s13 }
  0x69   : > { %p4918_p5 = scmp.ne.s32.totalorder %s363_s13, %s4917_s14  ;;  %p4926_p0 = scmp.lt.s32.totalorder %s4917_s14, %s4917_s14 }
  0x6b   : > { %p4920_p7 = pnand %p4918_p5, %p5183_p13  ;;  %p4927_p2 = por %p4926_p0, %p4925_p12 }
  0x6d   : > { %p4921_p9 = pneg %p4920_p7 }
  0x6f   : > { %p4928_p1 = pnand %p4927_p2, %p4921_p9 }
  0x71   : > { %4931 = shalt.err (!%p4928_p1)
}
  0x72   : > { %4399 = dma.hbm_to_vmem [thread:$0]  (!%p5169_p11), %s6328_s9, 4096, %s363_s13, [#allocation10], %s5045_s11, %s5045_s11, %s5046_s10  }
  0x73   : > { %s5264_s22 = sadd.s32 1, %s5036_s20   ;;  %s36_s24 = sadd.s32 1, %s5032_s19 }
  0x74   : > { %s33_s28 = ssub.s32 %s5036_s20, %s5264_s22  ;;  %p43_p13 = scmp.ne.s32.totalorder %s5032_s19, %s5028_s18 }
  0x75   : > { %p34_p4 = scmp.eq.s32.totalorder %s33_s28, 0  ;;  %p44_p8 = scmp.eq.s32.totalorder %s5036_s20, 0 }
  0x76   : > { %p6348_p6 = scmp.eq.s32.totalorder %s5139_s21, 1  ;;  %p4412_p3 = scmp.lt.s32.totalorder %s5036_s20, 2 }
  0x77   : > { %s5280_s16 = scalar_select %p34_p4, %s5032_s19, %s36_s24  }
  0x78   : > { %p5274_p10 = por %p6348_p6, %p43_p13  ;;  %p45_p5 = por %p44_p8, %p43_p13 }
  0x79   : > { %s379_s26 = sand.u32 1, %s5032_s19   ;;  %s4004_s11 = sshll.u32 %s5036_s20, 10 }
  0x7a   : > { %s3853_s29 = sshll.u32 %s379_s26, 6  ;;  %s5287_s12 = scalar_lea.hbm %s6319_s0, %s4004_s11 }
  0x7b   : > { %s383_s27 = scalar_lea.vmem [#allocation3], %s3853_s29  ;;  %p5291_p11 = pnand %p4412_p3, %p45_p5 }
  0x7c   : > { %s391_s30 = sshll.u32 %s383_s27, 4  ;;  %s5295_s3 = scalar_lea.sflag [#allocation4], %s379_s26  ;;  %s5289_s30 = int_to_ptr.vmem [resolvable:$true] %s391_s30 }
  0x7d   : > { %s4932_s17 = scalar_lea.hbm %s5287_s12, 1024  ;;  %p4934_p9 = pneg %p5291_p11 }
  0x7e   : > { %p4933_p7 = scmp.ne.s32.totalorder %s5287_s12, %s4932_s17  ;;  %s4937_s29 = scalar_lea.hbm %s6319_s0, 2048 }
  0x7f   : > { %p4938_p2 = scmp.lt.u32.totalorder %s5287_s12, %s6319_s0  ;;  %p4939_p1 = scmp.lt.u32.totalorder %s4937_s29, %s4932_s17 }
  0x80   : > { %p4935_p12 = pnand %p4934_p9, %p4933_p7  ;;  %p4941_p4 = scmp.lt.u32.totalorder %s4932_s17, %s5287_s12 }
  0x81   : > { %p4940_p13 = por %p4939_p1, %p4938_p2 }
  0x82   : > { %p4936_p0 = pneg %p4935_p12 }
  0x83   : > { %p4942_p8 = por %p4941_p4, %p4940_p13 }
  0x85   : > { %p4943_p6 = pnand %p4942_p8, %p4936_p0 }
  0x87   : > { %4946 = shalt.err (!%p4943_p6)
}
  0x88   : > { %s4947_s26 = scalar_lea.vmem %s5289_s30, 1024  ;;  %s5048_s13 = smov [#allocation3]  }
  0x89   : > { %p4948_p3 = scmp.ne.s32.totalorder %s5289_s30, %s4947_s26  ;;  %s4952_s27 = sshll.u32 %s5048_s13, 4  ;;  %s4953_s27 = int_to_ptr.vmem [resolvable:$false] %s4952_s27 }
  0x8a   : > { %s4954_s24 = scalar_lea.vmem %s4953_s27, 2048  ;;  %p4955_p12 = scmp.lt.s32.totalorder %s5289_s30, %s4953_s27 }
  0x8b   : > { %p4950_p5 = pnand %p4948_p3, %p4934_p9  ;;  %p4956_p2 = scmp.lt.s32.totalorder %s4954_s24, %s4947_s26 }
  0x8d   : > { %p4951_p7 = pneg %p4950_p5  ;;  %p4957_p1 = por %p4956_p2, %p4955_p12 }
  0x8f   : > { %p4958_p13 = pnand %p4957_p1, %p4951_p7 }
  0x91   : > { %4961 = shalt.err (!%p4958_p13)
}
  0x92   : > { %s5049_s17 = smov 128   ;;  %s5050_s28 = smov 8  }
  0x93   : > { %4403 = dma.hbm_to_vmem [thread:$0]  (!%p5291_p11), %s5287_s12, 1024, %s5289_s30, %s5295_s3, %s5049_s17, %s5049_s17, %s5050_s28  }
  0x94   : > { %p6351_p9 = scmp.ne.s32.totalorder %s6344_s25, 0 }
  0x95   : > { %s5326_s29 = sand.u32 (!%p6351_p9), 1, %s5028_s18   ;;  %p6352_p0 = scmp.ne.s32.totalorder (!%p6351_p9), %s6341_s23, 0 }
  0x96   : > { %403 = sbr.rel (%p6351_p9) target bundleno = 4424 (0x1148), region = 64  ;;  %s3858_s11 = sshll.u32 (!%p6351_p9), %s5326_s29, 6 }
  0x97   : > { %s406_s10 = scalar_lea.sflag (!%p6351_p9), [#allocation4], %s5326_s29  ;;  %s5332_s26 = scalar_lea.vmem (!%p6351_p9), [#allocation3], %s3858_s11 }
  0x9d   : > { %5007 = dma.done.wait (%p6352_p0), %s406_s10, 1024  }
  0x9e   : > { %5009 = vsyncadd (%p6352_p0), %s406_s10, 4294966272  ;;  %p6353_p11 = scmp.eq.s32.totalorder %s5139_s21, 0 }
  0xa0   : > { %5011 = dma.done.wait (%p6353_p11), [#allocation7], 4096   ;;  %p6354_p4 = pmov %p6353_p11 }
  0xa2   : > { %5013 = vsyncadd (%p6354_p4), [#allocation7], 4294963200  ;;  %p6355_p8 = pmov %p6354_p4 }
  0xa3   : > { %p6356_p6 = pmov %p6354_p4 }
  0xa4   : > { %5015 = dma.done.wait (%p6355_p8), [#allocation10], 8192  }
  0xa5   : > { %5017 = vsyncadd (%p6356_p6), [#allocation10], 4294959104  ;;  %v467_v0 = vld [vmem:[%s5332_s26] sm:$0xff]  ;;  %v469_v1 = vld [vmem:[%s5332_s26 + $0x10] sm:$0xff]  ;;  %v5051_v63 = vmov 0   ;;  %vm908_vm0 = vcmask 261120  }
  0xa6   : > { %477 = vadd.xlane.f32.xlu0 %v467_v0  ;;  %481 = vadd.xlane.f32.xlu1 %v469_v1  ;;  %v468_v2 = vld [vmem:[%s5332_s26 + $0x8] sm:$0xff]  ;;  %v470_v3 = vld [vmem:[%s5332_s26 + $0x18] sm:$0xff]  ;;  %v471_v4 = vld [vmem:[%s5332_s26 + $0x20] sm:$0xff]  ;;  %s5052_s14 = smov 96   ;;  %s5053_s3 = smov 64   ;;  %vm1625_vm1 = vcmask 523520  }
  0xa7   : > { %v472_v5 = vld [vmem:[%s5332_s26 + $0x28] sm:$0xff]  ;;  %v473_v6 = vld [vmem:[%s5332_s26 + $0x30] sm:$0xff]  ;;  %v474_v7 = vld [vmem:[%s5332_s26 + $0x38] sm:$0xff]  ;;  %790 = vmatprep.mubr.bf16.mxu0 %v5051_v63  ;;  %s5054_s13 = smov 32   ;;  %vm2002_vm2 = vcmask 785920   ;;  %vm2379_vm3 = vcmask 1048320  }
  0xa8   : > { %v4468_v8 = vld [vmem:[#allocation6 + $0x4] ss:$12 sps:$4 sm:$0xff]   ;;  %v4470_v9 = vld [vmem:[#allocation6] ss:$12 sps:$4 sm:$0xff]   ;;  %v4471_v10 = vld [vmem:[#allocation6 + $0x1c] ss:$12 sps:$4 sm:$0xff]  }
  0xa9   : > { %v4473_v11 = vld [vmem:[#allocation6 + $0x8] ss:$12 sps:$4 sm:$0xff]   ;;  %758 = vmatprep.subr.bf16.mxu0 %v4468_v8  ;;  %v4474_v44 = vld [vmem:[#allocation6 + $0x18] ss:$12 sps:$4 sm:$0xff]   ;;  %v4477_v46 = vld [vmem:[#allocation6 + $0x20] ss:$12 sps:$4 sm:$0xff]  }
  0xaa   : > { %479 = vadd.xlane.f32.xlu0 %v468_v2  ;;  %483 = vadd.xlane.f32.xlu1 %v470_v3  ;;  %v4475_v45 = vld [vmem:[#allocation6 + $0x34] ss:$12 sps:$4 sm:$0xff]   ;;  %v4478_v47 = vld [vmem:[#allocation6 + $0x30] ss:$12 sps:$4 sm:$0xff]   ;;  %v4479_v48 = vld [vmem:[#allocation6 + $0x4c] ss:$12 sps:$4 sm:$0xff]  }
  0xab   : > { %759 = vmatpush1.bf16.msra.mxu0 %v4470_v9  ;;  %4175 = vmatprep.subr.bf16.mxu1 %v4473_v11  ;;  %v4481_v49 = vld [vmem:[#allocation6 + $0x38] ss:$12 sps:$4 sm:$0xff]   ;;  %v4482_v50 = vld [vmem:[#allocation6 + $0x48] ss:$12 sps:$4 sm:$0xff]   ;;  %v4485_v52 = vld [vmem:[#allocation6 + $0x50] ss:$12 sps:$4 sm:$0xff]  }
  0xac   : > { %760 = vmatprep.subr.bf16.mxu0 %v4471_v10  ;;  %4176 = vmatpush3.bf16.msra.mxu1 %v4473_v11  ;;  %v4483_v51 = vld [vmem:[#allocation6 + $0x64] ss:$12 sps:$4 sm:$0xff]   ;;  %v4486_v53 = vld [vmem:[#allocation6 + $0x60] ss:$12 sps:$4 sm:$0xff]   ;;  %v4487_v54 = vld [vmem:[#allocation6 + $0x7c] ss:$12 sps:$4 sm:$0xff]  }
  0xad   : > { %4177 = vmatprep.subr.bf16.mxu1 %v4477_v46  ;;  %v4489_v55 = vld [vmem:[#allocation6 + $0x68] ss:$12 sps:$4 sm:$0xff]   ;;  %v4490_v56 = vld [vmem:[#allocation6 + $0x78] ss:$12 sps:$4 sm:$0xff]   ;;  %v4493_v58 = vld [vmem:[#allocation6 + $0x80] ss:$12 sps:$4 sm:$0xff]  }
  0xae   : > { %485 = vadd.xlane.f32.xlu0 %v471_v4  ;;  %487 = vadd.xlane.f32.xlu1 %v472_v5  ;;  %v4491_v57 = vld [vmem:[#allocation6 + $0x94] ss:$12 sps:$4 sm:$0xff]   ;;  %v4494_v59 = vld [vmem:[#allocation6 + $0x90] ss:$12 sps:$4 sm:$0xff]   ;;  %v4495_v60 = vld [vmem:[#allocation6 + $0xac] ss:$12 sps:$4 sm:$0xff]  }
  0xaf   : > { %761 = vmatpush1.bf16.msra.mxu0 %v4474_v44  ;;  %v4497_v61 = vld [vmem:[#allocation6 + $0x98] ss:$12 sps:$4 sm:$0xff]   ;;  %v4498_v62 = vld [vmem:[#allocation6 + $0xa8] ss:$12 sps:$4 sm:$0xff]   ;;  %s6357_s12 = sld [smem:[#allocation20_spill]]  ;;  %s6245_s30 = scalar_lea.vmem [#allocation12], %s3858_s11 }
  0xb0   : > { %762 = vmatprep.subr.bf16.mxu0 %v4475_v45  ;;  %4178 = vmatpush3.bf16.msra.mxu1 %v4477_v46  ;;  %s4006_s11 = sshll.u32 %s5139_s21, 10  ;;  %s6358_s27 = sld [smem:[#allocation21_spill]] }
  0xb1   : > { %4179 = vmatprep.subr.bf16.mxu1 %v4481_v49  ;;  %s3721_s17 = scalar_lea.sflag [#allocation5], %s5326_s29  ;;  %s5055_s28 = smov [#allocation12]  }
  0xb2   : > { %489 = vadd.xlane.f32.xlu0 %v473_v6  ;;  %491 = vadd.xlane.f32.xlu1 %v474_v7  ;;  %s4966_s10 = sshll.u32 %s5055_s28, 4  ;;  %s4967_s10 = int_to_ptr.vmem [resolvable:$false] %s4966_s10 }
  0xb3   : > { %763 = vmatpush1.bf16.msra.mxu0 %v4478_v47 }
  0xb4   : > { %764 = vmatprep.subr.bf16.mxu0 %v4479_v48  ;;  %4180 = vmatpush3.bf16.msra.mxu1 %v4481_v49 }
  0xb5   : > { %4181 = vmatprep.subr.bf16.mxu1 %v4485_v52 }
  0xb6   : > { %s6270_s24 = scalar_lea.hbm %s6358_s27, %s4006_s11 }
  0xb7   : > { %765 = vmatpush1.bf16.msra.mxu0 %v4482_v50 }
  0xb8   : > { %766 = vmatprep.subr.bf16.mxu0 %v4483_v51  ;;  %4182 = vmatpush3.bf16.msra.mxu1 %v4485_v52 }
  0xb9   : > { %4183 = vmatprep.subr.bf16.mxu1 %v4489_v55 }
  0xbb   : > { %767 = vmatpush1.bf16.msra.mxu0 %v4486_v53 }
  0xbc   : > { %768 = vmatprep.subr.bf16.mxu0 %v4487_v54  ;;  %4184 = vmatpush3.bf16.msra.mxu1 %v4489_v55 }
  0xbd   : > { %4185 = vmatprep.subr.bf16.mxu1 %v4493_v58 }
  0xbf   : > { %769 = vmatpush1.bf16.msra.mxu0 %v4490_v56 }
  0xc0   : > { %770 = vmatprep.subr.bf16.mxu0 %v4491_v57  ;;  %4186 = vmatpush3.bf16.msra.mxu1 %v4493_v58 }
  0xc1   : > { %4187 = vmatprep.subr.bf16.mxu1 %v4497_v61 }
  0xc3   : > { %771 = vmatpush1.bf16.msra.mxu0 %v4494_v59 }
  0xc4   : > { %772 = vmatprep.subr.bf16.mxu0 %v4495_v60  ;;  %4188 = vmatpush3.bf16.msra.mxu1 %v4497_v61 }
  0xc7   : > { %773 = vmatpush1.bf16.msra.mxu0 %v4498_v62 }
 0x133   : > { %v478_v12 = vpop.xlane.xlu0 %477  ;;  %v482_v13 = vpop.xlane.xlu1 %481 }
 0x134   : > { %v494_v14 = vmul.f32 0.0078125, %v478_v12  ;;  %v496_v15 = vmul.f32 0.0078125, %v482_v13 }
 0x136   : > { %v5354_v16 = vsub.f32 %v467_v0, %v494_v14  ;;  %v5356_v17 = vsub.f32 %v469_v1, %v496_v15  ;;  %v4499_v0 = vld [vmem:[#allocation6 + $0xb0] ss:$12 sps:$4 sm:$0xff]  }
 0x137   : > { %v480_v18 = vpop.xlane.xlu0 %479  ;;  %v484_v19 = vpop.xlane.xlu1 %483  ;;  %4189 = vmatprep.subr.bf16.mxu1 %v4499_v0 }
 0x138   : > { %v495_v20 = vmul.f32 0.0078125, %v480_v18  ;;  %v510_v21 = vmul.f32 %v5354_v16, %v5354_v16  ;;  %v497_v22 = vmul.f32 0.0078125, %v484_v19  ;;  %v512_v23 = vmul.f32 %v5356_v17, %v5356_v17  ;;  %4190 = vmatpush3.bf16.msra.mxu1 %v4499_v0 }
 0x13a   : > { %518 = vadd.xlane.f32.xlu0 %v510_v21  ;;  %v5362_v24 = vsub.f32 %v468_v2, %v495_v20  ;;  %v5364_v25 = vsub.f32 %v470_v3, %v497_v22 }
 0x13b   : > { %v486_v26 = vpop.xlane.xlu0 %485  ;;  %v488_v27 = vpop.xlane.xlu1 %487 }
 0x13c   : > { %v498_v28 = vmul.f32 0.0078125, %v486_v26  ;;  %v511_v29 = vmul.f32 %v5362_v24, %v5362_v24  ;;  %v499_v30 = vmul.f32 0.0078125, %v488_v27  ;;  %v513_v31 = vmul.f32 %v5364_v25, %v5364_v25 }
 0x13e   : > { %522 = vadd.xlane.f32.xlu0 %v512_v23  ;;  %520 = vadd.xlane.f32.xlu1 %v511_v29  ;;  %v5370_v32 = vsub.f32 %v471_v4, %v498_v28  ;;  %v5372_v33 = vsub.f32 %v472_v5, %v499_v30  ;;  %v3864_v30 = vld [vmem:[%s6320_s1] ss:$0 sm:$0xff] }
 0x13f   : > { %v490_v34 = vpop.xlane.xlu0 %489  ;;  %v492_v35 = vpop.xlane.xlu1 %491 }
 0x140   : > { %v500_v36 = vmul.f32 0.0078125, %v490_v34  ;;  %v514_v37 = vmul.f32 %v5370_v32, %v5370_v32  ;;  %v501_v38 = vmul.f32 0.0078125, %v492_v35  ;;  %v515_v39 = vmul.f32 %v5372_v33, %v5372_v33 }
 0x142   : > { %524 = vadd.xlane.f32.xlu1 %v513_v31  ;;  %526 = vadd.xlane.f32.xlu0 %v514_v37  ;;  %v5378_v40 = vsub.f32 %v473_v6, %v500_v36  ;;  %v5380_v41 = vsub.f32 %v474_v7, %v501_v38  ;;  %v3865_v38 = vld [vmem:[%s6321_s2] ss:$0 sm:$0xff] }
 0x144   : > { %v516_v42 = vmul.f32 %v5378_v40, %v5378_v40  ;;  %v517_v43 = vmul.f32 %v5380_v41, %v5380_v41 }
 0x146   : > { %528 = vadd.xlane.f32.xlu1 %v515_v39  ;;  %530 = vadd.xlane.f32.xlu0 %v516_v42 }
 0x14a   : > { %532 = vadd.xlane.f32.xlu1 %v517_v43 }
 0x1c7   : > { %v519_v1 = vpop.xlane.xlu0 %518 }
 0x1c8   : > { %v534_v2 = vmul.f32 0.0078125, %v519_v1 }
 0x1ca   : > { %v542_v3 = vadd.f32 1e-05, %v534_v2 }
 0x1cb   : > { %v521_v4 = vpop.xlane.xlu1 %520  ;;  %v523_v5 = vpop.xlane.xlu0 %522 }
 0x1cc   : > { %4588 = vrsqrt.f32 %v542_v3  ;;  %v535_v6 = vmul.f32 0.0078125, %v521_v4  ;;  %v536_v7 = vmul.f32 0.0078125, %v523_v5 }
 0x1ce   : > { %v543_v8 = vadd.f32 1e-05, %v535_v6  ;;  %v544_v9 = vadd.f32 1e-05, %v536_v7 }
 0x1cf   : > { %v525_v10 = vpop.xlane.xlu1 %524  ;;  %v527_v11 = vpop.xlane.xlu0 %526 }
 0x1d0   : > { %4590 = vrsqrt.f32 %v543_v8  ;;  %v537_v12 = vmul.f32 0.0078125, %v525_v10  ;;  %v538_v13 = vmul.f32 0.0078125, %v527_v11 }
 0x1d1   : > { %4592 = vrsqrt.f32 %v544_v9 }
 0x1d2   : > { %v545_v14 = vadd.f32 1e-05, %v537_v12  ;;  %v546_v15 = vadd.f32 1e-05, %v538_v13 }
 0x1d3   : > { %v529_v18 = vpop.xlane.xlu1 %528  ;;  %v531_v19 = vpop.xlane.xlu0 %530 }
 0x1d4   : > { %4594 = vrsqrt.f32 %v545_v14  ;;  %v539_v20 = vmul.f32 0.0078125, %v529_v18  ;;  %v540_v21 = vmul.f32 0.0078125, %v531_v19 }
 0x1d5   : > { %4596 = vrsqrt.f32 %v546_v15 }
 0x1d6   : > { %v4589_v22 = vpop.eup %4588  ;;  %v547_v23 = vadd.f32 1e-05, %v539_v20  ;;  %v548_v26 = vadd.f32 1e-05, %v540_v21 }
 0x1d7   : > { %v533_v27 = vpop.xlane.xlu1 %532  ;;  %v558_v28 = vmul.f32 %v4589_v22, %v5354_v16 }
 0x1d8   : > { %4598 = vrsqrt.f32 %v547_v23  ;;  %v541_v29 = vmul.f32 0.0078125, %v533_v27 }
 0x1d9   : > { %4600 = vrsqrt.f32 %v548_v26  ;;  %v572_v37 = vmul.f32 %v3864_v30, %v558_v28 }
 0x1da   : > { %v4591_v31 = vpop.eup %4590  ;;  %v549_v34 = vadd.f32 1e-05, %v541_v29 }
 0x1db   : > { %v4593_v35 = vpop.eup %4592  ;;  %v559_v36 = vmul.f32 %v4591_v31, %v5362_v24  ;;  %v586_v45 = vadd.f32 %v3865_v38, %v572_v37 }
 0x1dc   : > { %4602 = vrsqrt.f32 %v549_v34  ;;  %v560_v16 = vmul.f32 %v4593_v35, %v5356_v17 }
 0x1dd   : > { %v573_v39 = vmul.f32 %v3864_v30, %v559_v36 }
 0x1de   : > { %v4595_v42 = vpop.eup %4594  ;;  %v574_v43 = vmul.f32 %v3864_v30, %v560_v16 }
 0x1df   : > { %v4597_v44 = vpop.eup %4596  ;;  %v587_v46 = vadd.f32 %v3865_v38, %v573_v39  ;;  %v561_v47 = vmul.f32 %v4595_v42, %v5364_v25 }
 0x1e0   : > { %v562_v48 = vmul.f32 %v4597_v44, %v5370_v32  ;;  %v588_v51 = vadd.f32 %v3865_v38, %v574_v43 }
 0x1e1   : > { %v594_v49 = vpack.c.bf16 %v587_v46, %v586_v45  ;;  %v575_v24 = vmul.f32 %v3864_v30, %v561_v47 }
 0x1e2   : > { %v4599_v50 = vpop.eup %4598  ;;  %v576_v54 = vmul.f32 %v3864_v30, %v562_v48 }
 0x1e3   : > { %v4601_v52 = vpop.eup %4600  ;;  %791 = vmatmul.mubr.bf16.vlgmr.msra.gmra.mrb[0].mxu0 %v594_v49  ;;  %4191 = vmatprep.mubr.bf16.mxu1 %v594_v49  ;;  %v589_v53 = vadd.f32 %v3865_v38, %v575_v24  ;;  %v563_v17 = vmul.f32 %v4599_v50, %v5372_v33 }
 0x1e4   : > { %800 = vmatprep.mubr.bf16.mxu0 %v5051_v63  ;;  %v564_v55 = vmul.f32 %v4601_v52, %v5378_v40  ;;  %v590_v32 = vadd.f32 %v3865_v38, %v576_v54 }
 0x1e5   : > { %v595_v56 = vpack.c.bf16 %v589_v53, %v588_v51  ;;  %v577_v57 = vmul.f32 %v3864_v30, %v563_v17 }
 0x1e6   : > { %v4603_v25 = vpop.eup %4602  ;;  %v578_v60 = vmul.f32 %v3864_v30, %v564_v55 }
 0x1e7   : > { %4192 = vmatmul.mubr.bf16.vlgmr.msra.gmra.mrb[0].mxu1 %v595_v56  ;;  %v591_v58 = vadd.f32 %v3865_v38, %v577_v57  ;;  %v565_v59 = vmul.f32 %v4603_v25, %v5380_v41 }
 0x1e8   : > { %v592_v0 = vadd.f32 %v3865_v38, %v578_v60 }
 0x1e9   : > { %v596_v61 = vpack.c.bf16 %v591_v58, %v590_v32  ;;  %v579_v62 = vmul.f32 %v3864_v30, %v565_v59 }
 0x1eb   : > { %801 = vmatmul.mubr.bf16.gmra.mrb[4].mxu0 %v595_v56  ;;  %4195 = vmatprep.mubr.bf16.mxu1 %v596_v61  ;;  %v593_v33 = vadd.f32 %v3865_v38, %v579_v62 }
 0x1ec   : > { %810 = vmatprep.mubr.bf16.mxu0 %v5051_v63 }
 0x1ed   : > { %v597_v1 = vpack.c.bf16 %v593_v33, %v592_v0 }
 0x1ef   : > { %4196 = vmatmul.mubr.bf16.gmra.mrb[4].mxu1 %v597_v1 }
 0x1f3   : > { %811 = vmatmul.mubr.bf16.gmra.mrb[8].mxu0 %v596_v61 }
 0x1f4   : > { %820 = vmatprep.mubr.bf16.mxu0 %v5051_v63 }
 0x1fb   : > { %821 = vmatmul.mubr.bf16.gmra.mrb[12].mxu0 %v597_v1 }
 0x2b6   : > { %v792_v40 = vpop.f32.mrb[0].mxu0 }
 0x2b7   : > { %v794_v2 = vpop.f32.mrb[1].mxu0 }
 0x2b8   : > { %v796_v3 = vpop.f32.mrb[2].mxu0 }
 0x2b9   : > { %v5404_v41 = vpack.c.bf16 %v796_v3, %v792_v40  ;;  %v798_v4 = vpop.f32.mrb[3].mxu0 }
 0x2ba   : > { %v5406_v5 = vpack.c.bf16 %v798_v4, %v794_v2  ;;  %v4193_v6 = vpop.f32.mrb[0].mxu1 }
 0x2bb   : > { %v865_v7 = vpop.f32.mrb[1].mxu1  ;;  %4203 = vmatprep.mubr.msk.bf16.mxu1 %vm908_vm0, %v5404_v41 }
 0x2bc   : > { %v4194_v8 = vpop.f32.mrb[2].mxu1  ;;  %4351 = vmatprep.subr.msk.bf16.mxu1 %vm908_vm0, %v5406_v5  ;;  %v916_v9 = vsel %vm908_vm0, %v5406_v5, 0 }
 0x2bd   : > { %v5414_v10 = vpack.c.bf16 %v4194_v8, %v4193_v6  ;;  %v868_v11 = vpop.f32.mrb[3].mxu1  ;;  %4200 = vmatpush3.bf16.xpose.msra.mxu1 %v916_v9 }
 0x2be   : > { %v5416_v12 = vpack.c.bf16 %v868_v11, %v865_v7  ;;  %v802_v13 = vpop.f32.mrb[4].mxu0 }
 0x2bf   : > { %v804_v14 = vpop.f32.mrb[5].mxu0 }
 0x2c0   : > { %v806_v15 = vpop.f32.mrb[6].mxu0 }
 0x2c1   : > { %v5418_v18 = vpack.c.bf16 %v806_v15, %v802_v13  ;;  %v808_v19 = vpop.f32.mrb[7].mxu0 }
 0x2c2   : > { %v5420_v20 = vpack.c.bf16 %v808_v19, %v804_v14  ;;  %v4197_v21 = vpop.f32.mrb[4].mxu1 }
 0x2c3   : > { %v881_v22 = vpop.f32.mrb[5].mxu1 }
 0x2c4   : > { %v4198_v23 = vpop.f32.mrb[6].mxu1  ;;  %4352 = vmatprep.subr.msk.bf16.mxu1 %vm908_vm0, %v5420_v20  ;;  %v919_v26 = vsel %vm908_vm0, %v5420_v20, 0 }
 0x2c5   : > { %v5426_v27 = vpack.c.bf16 %v4198_v23, %v4197_v21  ;;  %v884_v28 = vpop.f32.mrb[7].mxu1  ;;  %4202 = vmatpush3.bf16.xpose.msra.mxu1 %v919_v26 }
 0x2c6   : > { %v5428_v29 = vpack.c.bf16 %v884_v28, %v881_v22  ;;  %v812_v30 = vpop.f32.mrb[8].mxu0 }
 0x2c7   : > { %v814_v31 = vpop.f32.mrb[9].mxu0 }
 0x2c8   : > { %v816_v34 = vpop.f32.mrb[10].mxu0 }
 0x2c9   : > { %v5430_v35 = vpack.c.bf16 %v816_v34, %v812_v30  ;;  %v818_v36 = vpop.f32.mrb[11].mxu0 }
 0x2ca   : > { %v5432_v37 = vpack.c.bf16 %v818_v36, %v814_v31 }
 0x2cc   : > { %4204 = vmatmul.mubr.msk.bf16.vlgmr.msra.gmra.mrb[8].mxu1 %vm908_vm0, %v5418_v18  ;;  %4353 = vmatprep.subr.msk.bf16.mxu1 %vm908_vm0, %v5432_v37  ;;  %v977_v38 = vsel %vm908_vm0, %v5432_v37, 0 }
 0x2cd   : > { %4208 = vmatpush3.bf16.xpose.msra.mxu1 %v977_v38  ;;  %4211 = vmatprep.mubr.msk.bf16.mxu1 %vm908_vm0, %v5430_v35 }
 0x2ce   : > { %v822_v16 = vpop.f32.mrb[12].mxu0 }
 0x2cf   : > { %v824_v39 = vpop.f32.mrb[13].mxu0 }
 0x2d0   : > { %v826_v42 = vpop.f32.mrb[14].mxu0 }
 0x2d1   : > { %v5442_v43 = vpack.c.bf16 %v826_v42, %v822_v16  ;;  %v828_v44 = vpop.f32.mrb[15].mxu0 }
 0x2d2   : > { %v5444_v45 = vpack.c.bf16 %v828_v44, %v824_v39 }
 0x2d4   : > { %4354 = vmatprep.subr.msk.bf16.mxu1 %vm908_vm0, %v5444_v45  ;;  %v980_v46 = vsel %vm908_vm0, %v5444_v45, 0 }
 0x2d5   : > { %4210 = vmatpush3.bf16.xpose.msra.mxu1 %v980_v46 }
 0x2d6   : > { %4215 = vmatprep.subr.bf16.mxu1 %v5416_v12 }
 0x2dc   : > { %4212 = vmatmul.mubr.msk.bf16.vlgmr.msra.gmra.mrb[12].mxu1 %vm908_vm0, %v5442_v43 }
 0x2dd   : > { %4216 = vmatpush3.bf16.msra.mxu1 %v5416_v12 }
 0x2de   : > { %4217 = vmatprep.subr.bf16.mxu1 %v5414_v10 }
 0x2e1   : > { %4218 = vmatpush3.bf16.msra.mxu1 %v5414_v10 }
 0x2e2   : > { %4223 = vmatprep.subr.bf16.mxu1 %v5428_v29 }
 0x39f   : > { %v4205_v47 = vpop.f32.mrb[8].mxu1 }
 0x3a0   : > { %v955_v48 = vpop.f32.mrb[9].mxu1  ;;  %v1037_v52 = vsel %vm908_vm0, %v4205_v47, -inf }
 0x3a1   : > { %v4206_v49 = vpop.f32.mrb[10].mxu1  ;;  %v1031_v24 = vsel %vm908_vm0, %v955_v48, -inf }
 0x3a2   : > { %1032 = vmax.xlane.f32.xlu0 %v1031_v24  ;;  %v958_v50 = vpop.f32.mrb[11].mxu1  ;;  %v1040_v53 = vsel %vm908_vm0, %v4206_v49, -inf }
 0x3a3   : > { %v1034_v51 = vsel %vm908_vm0, %v958_v50, -inf }
 0x3a4   : > { %1035 = vmax.xlane.f32.xlu1 %v1034_v51 }
 0x3a6   : > { %1038 = vmax.xlane.f32.xlu0 %v1037_v52 }
 0x3a8   : > { %1041 = vmax.xlane.f32.xlu1 %v1040_v53 }
 0x3af   : > { %v5461_v17 = vpop.f32.mrb[12].mxu1 }
 0x3b0   : > { %v5463_v54 = vpop.f32.mrb[13].mxu1  ;;  %v1049_v32 = vsel %vm908_vm0, %v5461_v17, -inf }
 0x3b1   : > { %v4214_v55 = vpop.f32.mrb[14].mxu1  ;;  %v1043_v56 = vsel %vm908_vm0, %v5463_v54, -inf }
 0x3b2   : > { %1044 = vmax.xlane.f32.xlu0 %v1043_v56  ;;  %v1019_v57 = vpop.f32.mrb[15].mxu1  ;;  %v1052_v58 = vsel %vm908_vm0, %v4214_v55, -inf }
 0x3b3   : > { %v1046_v25 = vsel %vm908_vm0, %v1019_v57, -inf }
 0x3b4   : > { %1047 = vmax.xlane.f32.xlu1 %v1046_v25 }
 0x3b6   : > { %1050 = vmax.xlane.f32.xlu0 %v1049_v32 }
 0x3b8   : > { %1053 = vmax.xlane.f32.xlu1 %v1052_v58 }
 0x3c9   : > { %1251 = vrot.lane.b32.xlu1 %v5420_v20, %s5052_s14 }
 0x3cd   : > { %1243 = vrot.lane.b32.xlu1 %v5404_v41, %s5052_s14 }
 0x42f   : > { %v1033_v59 = vpop.xlane.xlu0 %1032 }
 0x430   : > { %v1055_v60 = vsub.f32 %v955_v48, %v1033_v59 }
 0x431   : > { %v1036_v61 = vpop.xlane.xlu1 %1035 }
 0x432   : > { %v1056_v0 = vsub.f32 %v958_v50, %v1036_v61  ;;  %v1063_v1 = vmul.f32 1.442695, %v1055_v60 }
 0x433   : > { %v1039_v62 = vpop.xlane.xlu0 %1038 }
 0x434   : > { %v1057_v33 = vsub.f32 %v4205_v47, %v1039_v62  ;;  %v1065_v4 = vmul.f32 1.442695, %v1056_v0 }
 0x435   : > { %v1042_v40 = vpop.xlane.xlu1 %1041 }
 0x436   : > { %v1067_v2 = vmul.f32 1.442695, %v1057_v33  ;;  %v1058_v3 = vsub.f32 %v4206_v49, %v1042_v40 }
 0x438   : > { %4604 = vpow2.f32 %v1067_v2  ;;  %v1069_v6 = vmul.f32 1.442695, %v1058_v3 }
 0x439   : > { %4606 = vpow2.f32 %v1063_v1 }
 0x43a   : > { %4608 = vpow2.f32 %v1069_v6 }
 0x43b   : > { %4610 = vpow2.f32 %v1065_v4 }
 0x43f   : > { %v1045_v42 = vpop.xlane.xlu0 %1044 }
 0x440   : > { %v1059_v47 = vsub.f32 %v5463_v54, %v1045_v42 }
 0x441   : > { %v1048_v7 = vpop.xlane.xlu1 %1047 }
 0x442   : > { %v5475_v8 = vpop.eup %4604  ;;  %v1060_v14 = vsub.f32 %v1019_v57, %v1048_v7  ;;  %v1071_v49 = vmul.f32 1.442695, %v1059_v47 }
 0x443   : > { %v5477_v9 = vpop.eup %4606  ;;  %v1085_v11 = vsel %vm908_vm0, %v5475_v8, 0.0  ;;  %v1051_v44 = vpop.xlane.xlu0 %1050 }
 0x444   : > { %v4609_v13 = vpop.eup %4608  ;;  %1086 = vadd.xlane.f32.xlu0 %v1085_v11  ;;  %v1079_v23 = vsel %vm908_vm0, %v5477_v9, 0.0  ;;  %v1073_v26 = vmul.f32 1.442695, %v1060_v14  ;;  %v1061_v46 = vsub.f32 %v5461_v17, %v1051_v44 }
 0x445   : > { %v1054_v15 = vpop.xlane.xlu1 %1053  ;;  %v1088_v19 = vsel %vm908_vm0, %v4609_v13, 0.0  ;;  %v4611_v21 = vpop.eup %4610 }
 0x446   : > { %v1062_v22 = vsub.f32 %v4214_v55, %v1054_v15  ;;  %1089 = vadd.xlane.f32.xlu1 %v1088_v19  ;;  %v1082_v31 = vsel %vm908_vm0, %v4611_v21, 0.0  ;;  %v1075_v48 = vmul.f32 1.442695, %v1061_v46 }
 0x448   : > { %v1077_v28 = vmul.f32 1.442695, %v1062_v22  ;;  %1080 = vadd.xlane.f32.xlu0 %v1079_v23 }
 0x449   : > { %v1252_v30 = vpop.permute.xlu1 %1251 }
 0x44a   : > { %4612 = vpow2.f32 %v1077_v28  ;;  %1083 = vadd.xlane.f32.xlu1 %v1082_v31  ;;  %v1263_v61 = vsel %vm908_vm0, %v1252_v30, 0 }
 0x44b   : > { %4614 = vpow2.f32 %v1073_v26 }
 0x44c   : > { %4616 = vpow2.f32 %v1075_v48 }
 0x44d   : > { %v1244_v34 = vpop.permute.xlu1 %1243  ;;  %4618 = vpow2.f32 %v1071_v49 }
 0x44e   : > { %4235 = vmatprep.mubr.msk.bf16.mxu0 %vm908_vm0, %v1244_v34 }
 0x454   : > { %v5486_v36 = vpop.eup %4612 }
 0x455   : > { %v1100_v38 = vsel %vm908_vm0, %v5486_v36, 0.0  ;;  %v5490_v16 = vpop.eup %4614 }
 0x456   : > { %1101 = vadd.xlane.f32.xlu1 %v1100_v38  ;;  %v1094_v39 = vsel %vm908_vm0, %v5490_v16, 0.0  ;;  %v4617_v24 = vpop.eup %4616 }
 0x457   : > { %v1097_v50 = vsel %vm908_vm0, %v4617_v24, 0.0  ;;  %v4619_v51 = vpop.eup %4618 }
 0x458   : > { %v1091_v52 = vsel %vm908_vm0, %v4619_v51, 0.0 }
 0x45a   : > { %1095 = vadd.xlane.f32.xlu1 %v1094_v39 }
 0x45e   : > { %1249 = vrot.lane.b32.xlu0 %v5406_v5, %s5052_s14 }
 0x46b   : > { %1245 = vrot.lane.b32.xlu1 %v5418_v18, %s5052_s14 }
 0x46f   : > { %1324 = vrot.lane.b32.xlu1 %v5444_v45, %s5052_s14 }
 0x473   : > { %1318 = vrot.lane.b32.xlu1 %v5442_v43, %s5052_s14 }
 0x47d   : > { %1098 = vadd.xlane.f32.xlu0 %v1097_v50 }
 0x481   : > { %1092 = vadd.xlane.f32.xlu0 %v1091_v52 }
 0x497   : > { %1322 = vrot.lane.b32.xlu0 %v5432_v37, %s5052_s14 }
 0x49b   : > { %1316 = vrot.lane.b32.xlu0 %v5430_v35, %s5052_s14 }
 0x4d1   : > { %v1087_v53 = vpop.xlane.xlu0 %1086 }
 0x4d3   : > { %v1090_v17 = vpop.xlane.xlu1 %1089 }
 0x4d4   : > { %4620 = vrcp.f32 %v1090_v17 }
 0x4d5   : > { %v1081_v54 = vpop.xlane.xlu0 %1080 }
 0x4d6   : > { %4622 = vrcp.f32 %v1081_v54 }
 0x4d7   : > { %4624 = vrcp.f32 %v1087_v53  ;;  %v1084_v55 = vpop.xlane.xlu1 %1083 }
 0x4d8   : > { %4626 = vrcp.f32 %v1084_v55 }
 0x4d9   : > { %v1250_v56 = vpop.permute.xlu0 %1249 }
 0x4da   : > { %4355 = vmatprep.subr.msk.bf16.mxu0 %vm908_vm0, %v1250_v56  ;;  %v1260_v57 = vsel %vm908_vm0, %v1250_v56, 0 }
 0x4db   : > { %4232 = vmatpush3.bf16.xpose.msra.mxu0 %v1260_v57 }
 0x4dc   : > { %4356 = vmatprep.subr.msk.bf16.mxu0 %vm908_vm0, %v1252_v30 }
 0x4de   : > { %v4621_v25 = vpop.eup %4620 }
 0x4df   : > { %v1114_v60 = vmul.f32 %v4621_v25, %v4609_v13 }
 0x4e0   : > { %v4623_v32 = vpop.eup %4622 }
 0x4e1   : > { %v4625_v58 = vpop.eup %4624  ;;  %v1111_v0 = vmul.f32 %v4623_v32, %v5477_v9 }
 0x4e2   : > { %v4627_v59 = vpop.eup %4626  ;;  %v1113_v1 = vmul.f32 %v4625_v58, %v5475_v8 }
 0x4e3   : > { %4234 = vmatpush3.bf16.xpose.msra.mxu0 %v1263_v61  ;;  %v1102_v62 = vpop.xlane.xlu1 %1101  ;;  %v1112_v33 = vmul.f32 %v4627_v59, %v4611_v21 }
 0x4e4   : > { %v1120_v2 = vpack.c.bf16 %v1114_v60, %v1113_v1 }
 0x4e5   : > { %v1119_v40 = vpack.c.bf16 %v1112_v33, %v1111_v0 }
 0x4e7   : > { %4219 = vmatprep.mubr.msk.bf16.mxu1 %vm908_vm0, %v1119_v40  ;;  %v1096_v3 = vpop.xlane.xlu1 %1095 }
 0x4e8   : > { %4220 = vmatmul.mubr.msk.bf16.vlgmr.msra.gmra.mrb[16].mxu1 %vm908_vm0, %v1120_v2 }
 0x4e9   : > { %4224 = vmatpush3.bf16.msra.mxu1 %v5428_v29 }
 0x4ea   : > { %4225 = vmatprep.subr.bf16.mxu1 %v5426_v27 }
 0x4eb   : > { %v1246_v4 = vpop.permute.xlu1 %1245 }
 0x4ec   : > { %4236 = vmatmul.mubr.msk.bf16.vlgmr.msra.gmra.mrb[16].mxu0 %vm908_vm0, %v1246_v4 }
 0x4ed   : > { %4226 = vmatpush3.bf16.msra.mxu1 %v5426_v27 }
 0x4ef   : > { %v1325_v31 = vpop.permute.xlu1 %1324 }
 0x4f0   : > { %v1336_v34 = vsel %vm908_vm0, %v1325_v31, 0 }
 0x4f3   : > { %v1319_v38 = vpop.permute.xlu1 %1318 }
 0x50a   : > { %v1099_v6 = vpop.xlane.xlu0 %1098 }
 0x50b   : > { %4628 = vrcp.f32 %v1099_v6 }
 0x50c   : > { %4630 = vrcp.f32 %v1096_v3 }
 0x50d   : > { %4632 = vrcp.f32 %v1102_v62 }
 0x50e   : > { %v1093_v7 = vpop.xlane.xlu0 %1092 }
 0x50f   : > { %4634 = vrcp.f32 %v1093_v7 }
 0x512   : > { %v1323_v8 = vpop.permute.xlu0 %1322 }
 0x513   : > { %4357 = vmatprep.subr.msk.bf16.mxu1 %vm908_vm0, %v1323_v8  ;;  %v1333_v30 = vsel %vm908_vm0, %v1323_v8, 0 }
 0x515   : > { %v4629_v9 = vpop.eup %4628 }
 0x516   : > { %v4631_v11 = vpop.eup %4630  ;;  %v1117_v15 = vmul.f32 %v4629_v9, %v4617_v24  ;;  %v1317_v28 = vpop.permute.xlu0 %1316 }
 0x517   : > { %v4633_v13 = vpop.eup %4632  ;;  %v1116_v21 = vmul.f32 %v4631_v11, %v5490_v16 }
 0x518   : > { %v1118_v22 = vmul.f32 %v4633_v13, %v5486_v36 }
 0x519   : > { %v4635_v14 = vpop.eup %4634 }
 0x51a   : > { %v1115_v19 = vmul.f32 %v4635_v14, %v4619_v51  ;;  %v1122_v26 = vpack.c.bf16 %v1118_v22, %v1117_v15 }
 0x51c   : > { %v1121_v23 = vpack.c.bf16 %v1116_v21, %v1115_v19 }
 0x51e   : > { %4227 = vmatprep.mubr.msk.bf16.mxu1 %vm908_vm0, %v1121_v23 }
 0x51f   : > { %4228 = vmatmul.mubr.msk.bf16.vlgmr.msra.gmra.mrb[20].mxu1 %vm908_vm0, %v1122_v26 }
 0x520   : > { %4240 = vmatpush3.bf16.xpose.msra.mxu1 %v1333_v30  ;;  %4243 = vmatprep.mubr.msk.bf16.mxu1 %vm908_vm0, %v1317_v28 }
 0x521   : > { %4358 = vmatprep.subr.msk.bf16.mxu1 %vm908_vm0, %v1325_v31 }
 0x528   : > { %4242 = vmatpush3.bf16.xpose.msra.mxu1 %v1336_v34 }
 0x52f   : > { %4244 = vmatmul.mubr.msk.bf16.vlgmr.msra.gmra.mrb[24].mxu1 %vm908_vm0, %v1319_v38 }
 0x5bb   : > { %v4221_v36 = vpop.f32.mrb[16].mxu1 }
 0x5bc   : > { %v1163_v16 = vpop.f32.mrb[17].mxu1 }
 0x5bd   : > { %v4222_v39 = vpop.f32.mrb[18].mxu1 }
 0x5be   : > { %v1234_v42 = vpack.c.bf16 %v4222_v39, %v4221_v36  ;;  %v1166_v44 = vpop.f32.mrb[19].mxu1 }
 0x5bf   : > { %v1233_v46 = vpack.c.bf16 %v1166_v44, %v1163_v16  ;;  %v4237_v47 = vpop.f32.mrb[16].mxu0 }
 0x5c0   : > { %1238 = vst.msk [vmem:[#allocation2 + $0x8] sm:$0xff] %vm908_vm0, %v1234_v42  ;;  %v1299_v48 = vpop.f32.mrb[17].mxu0  ;;  %v1393_v52 = vsel %vm908_vm0, %v4237_v47, -inf }
 0x5c1   : > { %1237 = vst.msk [vmem:[#allocation2] sm:$0xff] %vm908_vm0, %v1233_v46  ;;  %v4238_v49 = vpop.f32.mrb[18].mxu0  ;;  %v1387_v24 = vsel %vm908_vm0, %v1299_v48, -inf }
 0x5c2   : > { %1388 = vmax.xlane.f32.xlu0 %v1387_v24  ;;  %v1302_v50 = vpop.f32.mrb[19].mxu0  ;;  %v1396_v53 = vsel %vm908_vm0, %v4238_v49, -inf }
 0x5c3   : > { %v1390_v51 = vsel %vm908_vm0, %v1302_v50, -inf }
 0x5c4   : > { %1391 = vmax.xlane.f32.xlu1 %v1390_v51 }
 0x5c6   : > { %1394 = vmax.xlane.f32.xlu0 %v1393_v52 }
 0x5ca   : > { %1397 = vmax.xlane.f32.xlu0 %v1396_v53 }
 0x5f2   : > { %v4229_v17 = vpop.f32.mrb[20].mxu1 }
 0x5f3   : > { %v1218_v54 = vpop.f32.mrb[21].mxu1 }
 0x5f4   : > { %v4230_v55 = vpop.f32.mrb[22].mxu1 }
 0x5f5   : > { %v1236_v56 = vpack.c.bf16 %v4230_v55, %v4229_v17  ;;  %v1221_v57 = vpop.f32.mrb[23].mxu1 }
 0x5f6   : > { %v1235_v25 = vpack.c.bf16 %v1221_v57, %v1218_v54 }
 0x5f7   : > { %1240 = vst.msk [vmem:[#allocation2 + $0x18] sm:$0xff] %vm908_vm0, %v1236_v56 }
 0x5f8   : > { %1239 = vst.msk [vmem:[#allocation2 + $0x10] sm:$0xff] %vm908_vm0, %v1235_v25 }
 0x602   : > { %v4245_v32 = vpop.f32.mrb[24].mxu1 }
 0x603   : > { %v1372_v58 = vpop.f32.mrb[25].mxu1  ;;  %v1405_v0 = vsel %vm908_vm0, %v4245_v32, -inf }
 0x604   : > { %v4246_v59 = vpop.f32.mrb[26].mxu1  ;;  %v1399_v60 = vsel %vm908_vm0, %v1372_v58, -inf }
 0x605   : > { %1400 = vmax.xlane.f32.xlu0 %v1399_v60  ;;  %v1375_v61 = vpop.f32.mrb[27].mxu1  ;;  %v1408_v33 = vsel %vm908_vm0, %v4246_v59, -inf }
 0x606   : > { %v1402_v62 = vsel %vm908_vm0, %v1375_v61, -inf }
 0x607   : > { %1403 = vmax.xlane.f32.xlu1 %v1402_v62 }
 0x609   : > { %1406 = vmax.xlane.f32.xlu0 %v1405_v0 }
 0x60b   : > { %1409 = vmax.xlane.f32.xlu1 %v1408_v33 }
 0x64f   : > { %v1389_v1 = vpop.xlane.xlu0 %1388 }
 0x650   : > { %v1411_v40 = vsub.f32 %v1299_v48, %v1389_v1 }
 0x651   : > { %v1392_v2 = vpop.xlane.xlu1 %1391 }
 0x652   : > { %v1419_v3 = vmul.f32 1.442695, %v1411_v40  ;;  %v1412_v4 = vsub.f32 %v1302_v50, %v1392_v2 }
 0x653   : > { %v1395_v6 = vpop.xlane.xlu0 %1394 }
 0x654   : > { %4636 = vpow2.f32 %v1419_v3  ;;  %v1421_v7 = vmul.f32 1.442695, %v1412_v4  ;;  %v1413_v8 = vsub.f32 %v4237_v47, %v1395_v6 }
 0x656   : > { %4638 = vpow2.f32 %v1421_v7  ;;  %v1423_v9 = vmul.f32 1.442695, %v1413_v8 }
 0x657   : > { %v1398_v11 = vpop.xlane.xlu0 %1397 }
 0x658   : > { %4640 = vpow2.f32 %v1423_v9  ;;  %v1414_v13 = vsub.f32 %v4238_v49, %v1398_v11 }
 0x65a   : > { %v1425_v14 = vmul.f32 1.442695, %v1414_v13 }
 0x65c   : > { %4642 = vpow2.f32 %v1425_v14 }
 0x65e   : > { %v5544_v15 = vpop.eup %4636 }
 0x65f   : > { %v1435_v19 = vsel %vm908_vm0, %v5544_v15, 0.0 }
 0x660   : > { %v5548_v21 = vpop.eup %4638  ;;  %1436 = vadd.xlane.f32.xlu0 %v1435_v19 }
 0x661   : > { %v1438_v22 = vsel %vm908_vm0, %v5548_v21, 0.0 }
 0x662   : > { %v5552_v23 = vpop.eup %4640  ;;  %1439 = vadd.xlane.f32.xlu1 %v1438_v22 }
 0x663   : > { %v1441_v26 = vsel %vm908_vm0, %v5552_v23, 0.0 }
 0x664   : > { %1442 = vadd.xlane.f32.xlu0 %v1441_v26 }
 0x666   : > { %v5556_v28 = vpop.eup %4642 }
 0x667   : > { %v1444_v30 = vsel %vm908_vm0, %v5556_v28, 0.0 }
 0x668   : > { %1445 = vadd.xlane.f32.xlu1 %v1444_v30 }
 0x679   : > { %1483 = vrot.lane.b32.xlu1 %v5414_v10, %s5052_s14 }
 0x67a   : > { %1481 = vrot.lane.b32.xlu0 %v5416_v12, %s5052_s14 }
 0x67d   : > { %1544 = vrot.lane.b32.xlu1 %v5428_v29, %s5052_s14 }
 0x67e   : > { %1634 = vrot.lane.b32.xlu0 %v5406_v5, %s5053_s3 }
 0x681   : > { %1636 = vrot.lane.b32.xlu1 %v5420_v20, %s5053_s3 }
 0x682   : > { %1546 = vrot.lane.b32.xlu0 %v5426_v27, %s5052_s14 }
 0x686   : > { %1630 = vrot.lane.b32.xlu0 %v5404_v41, %s5053_s3 }
 0x692   : > { %v1401_v31 = vpop.xlane.xlu0 %1400 }
 0x693   : > { %v1415_v34 = vsub.f32 %v1372_v58, %v1401_v31 }
 0x694   : > { %v1404_v38 = vpop.xlane.xlu1 %1403 }
 0x695   : > { %v1427_v36 = vmul.f32 1.442695, %v1415_v34  ;;  %v1416_v44 = vsub.f32 %v1375_v61, %v1404_v38 }
 0x696   : > { %v1407_v16 = vpop.xlane.xlu0 %1406 }
 0x697   : > { %4644 = vpow2.f32 %v1427_v36  ;;  %v1417_v39 = vsub.f32 %v4245_v32, %v1407_v16  ;;  %v1429_v49 = vmul.f32 1.442695, %v1416_v44 }
 0x698   : > { %v1410_v42 = vpop.xlane.xlu1 %1409 }
 0x699   : > { %v1431_v46 = vmul.f32 1.442695, %v1417_v39  ;;  %v1418_v47 = vsub.f32 %v4246_v59, %v1410_v42 }
 0x69b   : > { %4646 = vpow2.f32 %v1431_v46  ;;  %v1433_v48 = vmul.f32 1.442695, %v1418_v47 }
 0x69d   : > { %4648 = vpow2.f32 %v1433_v48 }
 0x69e   : > { %4650 = vpow2.f32 %v1429_v49 }
 0x6a1   : > { %v5574_v24 = vpop.eup %4644 }
 0x6a2   : > { %v1447_v50 = vsel %vm908_vm0, %v5574_v24, 0.0 }
 0x6a5   : > { %v5578_v51 = vpop.eup %4646  ;;  %1448 = vadd.xlane.f32.xlu0 %v1447_v50 }
 0x6a6   : > { %v1453_v52 = vsel %vm908_vm0, %v5578_v51, 0.0 }
 0x6a7   : > { %v5582_v53 = vpop.eup %4648  ;;  %1454 = vadd.xlane.f32.xlu1 %v1453_v52 }
 0x6a8   : > { %v1456_v17 = vsel %vm908_vm0, %v5582_v53, 0.0  ;;  %v5586_v54 = vpop.eup %4650 }
 0x6a9   : > { %v1450_v55 = vsel %vm908_vm0, %v5586_v54, 0.0 }
 0x6ab   : > { %1457 = vadd.xlane.f32.xlu1 %v1456_v17 }
 0x6af   : > { %1451 = vadd.xlane.f32.xlu1 %v1450_v55 }
 0x6bb   : > { %1703 = vrot.lane.b32.xlu0 %v5432_v37, %s5053_s3 }
 0x6bf   : > { %1699 = vrot.lane.b32.xlu0 %v5430_v35, %s5053_s3 }
 0x6c0   : > { %1632 = vrot.lane.b32.xlu1 %v5418_v18, %s5053_s3 }
 0x6c4   : > { %1705 = vrot.lane.b32.xlu1 %v5444_v45, %s5053_s3 }
 0x6c8   : > { %1701 = vrot.lane.b32.xlu1 %v5442_v43, %s5053_s3 }
 0x6ed   : > { %v1437_v56 = vpop.xlane.xlu0 %1436 }
 0x6ee   : > { %4652 = vrcp.f32 %v1437_v56 }
 0x6ef   : > { %v1440_v57 = vpop.xlane.xlu1 %1439 }
 0x6f0   : > { %4654 = vrcp.f32 %v1440_v57 }
 0x6f1   : > { %v1443_v25 = vpop.xlane.xlu0 %1442 }
 0x6f2   : > { %4656 = vrcp.f32 %v1443_v25 }
 0x6f5   : > { %v1482_v32 = vpop.permute.xlu0 %1481  ;;  %v1446_v58 = vpop.xlane.xlu1 %1445 }
 0x6f6   : > { %4658 = vrcp.f32 %v1446_v58  ;;  %4247 = vmatprep.subr.bf16.mxu0 %v1482_v32 }
 0x6f7   : > { %4248 = vmatpush3.bf16.msra.mxu0 %v1482_v32 }
 0x6f8   : > { %v4653_v59 = vpop.eup %4652 }
 0x6f9   : > { %v1635_v60 = vpop.permute.xlu0 %1634  ;;  %v1484_v61 = vpop.permute.xlu1 %1483  ;;  %v1467_v0 = vmul.f32 %v4653_v59, %v5544_v15 }
 0x6fa   : > { %v4655_v62 = vpop.eup %4654  ;;  %4249 = vmatprep.subr.bf16.mxu0 %v1484_v61  ;;  %v1645_v9 = vsel %vm908_vm0, %v1635_v60, 0 }
 0x6fb   : > { %4250 = vmatpush3.bf16.msra.mxu0 %v1484_v61  ;;  %v1468_v33 = vmul.f32 %v4655_v62, %v5548_v21 }
 0x6fc   : > { %4359 = vmatprep.subr.msk.bf16.mxu0 %vm908_vm0, %v1635_v60  ;;  %v4657_v2 = vpop.eup %4656 }
 0x6fd   : > { %v1545_v1 = vpop.permute.xlu1 %1544  ;;  %v1475_v40 = vpack.c.bf16 %v1468_v33, %v1467_v0  ;;  %v1547_v3 = vpop.permute.xlu0 %1546  ;;  %v1469_v6 = vmul.f32 %v4657_v2, %v5552_v23 }
 0x6fe   : > { %4255 = vmatprep.subr.bf16.mxu1 %v1545_v1 }
 0x6ff   : > { %4251 = vmatprep.mubr.msk.bf16.mxu0 %vm908_vm0, %v1475_v40  ;;  %4256 = vmatpush3.bf16.msra.mxu1 %v1545_v1 }
 0x700   : > { %v4659_v4 = vpop.eup %4658  ;;  %4257 = vmatprep.subr.bf16.mxu1 %v1547_v3 }
 0x701   : > { %v1470_v7 = vmul.f32 %v4659_v4, %v5556_v28  ;;  %v1631_v11 = vpop.permute.xlu0 %1630  ;;  %v1637_v13 = vpop.permute.xlu1 %1636 }
 0x702   : > { %v1648_v14 = vsel %vm908_vm0, %v1637_v13, 0 }
 0x703   : > { %4258 = vmatpush3.bf16.msra.mxu1 %v1547_v3  ;;  %v1476_v8 = vpack.c.bf16 %v1470_v7, %v1469_v6 }
 0x705   : > { %4252 = vmatmul.mubr.msk.bf16.vlgmr.msra.gmra.mrb[20].mxu0 %vm908_vm0, %v1476_v8 }
 0x706   : > { %4264 = vmatpush3.bf16.xpose.msra.mxu0 %v1645_v9  ;;  %4267 = vmatprep.mubr.msk.bf16.mxu0 %vm908_vm0, %v1631_v11 }
 0x707   : > { %4360 = vmatprep.subr.msk.bf16.mxu0 %vm908_vm0, %v1637_v13 }
 0x70e   : > { %4266 = vmatpush3.bf16.xpose.msra.mxu0 %v1648_v14 }
 0x732   : > { %v1449_v15 = vpop.xlane.xlu0 %1448 }
 0x734   : > { %v1455_v19 = vpop.xlane.xlu1 %1454 }
 0x736   : > { %v1704_v21 = vpop.permute.xlu0 %1703 }
 0x737   : > { %4361 = vmatprep.subr.msk.bf16.mxu1 %vm908_vm0, %v1704_v21  ;;  %v1714_v46 = vsel %vm908_vm0, %v1704_v21, 0 }
 0x738   : > { %v1458_v22 = vpop.xlane.xlu1 %1457 }
 0x739   : > { %4660 = vrcp.f32 %v1458_v22 }
 0x73a   : > { %4662 = vrcp.f32 %v1449_v15  ;;  %v1700_v47 = vpop.permute.xlu0 %1699 }
 0x73b   : > { %4664 = vrcp.f32 %v1455_v19 }
 0x73c   : > { %v1452_v23 = vpop.xlane.xlu1 %1451 }
 0x73d   : > { %4666 = vrcp.f32 %v1452_v23 }
 0x740   : > { %v1633_v26 = vpop.permute.xlu1 %1632 }
 0x741   : > { %4268 = vmatmul.mubr.msk.bf16.vlgmr.msra.gmra.mrb[24].mxu0 %vm908_vm0, %v1633_v26 }
 0x743   : > { %v4661_v28 = vpop.eup %4660 }
 0x744   : > { %v4663_v30 = vpop.eup %4662  ;;  %v1474_v38 = vmul.f32 %v4661_v28, %v5582_v53  ;;  %v1706_v48 = vpop.permute.xlu1 %1705 }
 0x745   : > { %v4665_v31 = vpop.eup %4664  ;;  %v1471_v36 = vmul.f32 %v4663_v30, %v5574_v24  ;;  %v1717_v49 = vsel %vm908_vm0, %v1706_v48, 0 }
 0x746   : > { %v1473_v39 = vmul.f32 %v4665_v31, %v5578_v51 }
 0x747   : > { %v4667_v34 = vpop.eup %4666 }
 0x748   : > { %v1472_v16 = vmul.f32 %v4667_v34, %v5586_v54  ;;  %v1478_v44 = vpack.c.bf16 %v1474_v38, %v1473_v39  ;;  %v1702_v24 = vpop.permute.xlu1 %1701 }
 0x74a   : > { %v1477_v42 = vpack.c.bf16 %v1472_v16, %v1471_v36 }
 0x74c   : > { %4259 = vmatprep.mubr.msk.bf16.mxu1 %vm908_vm0, %v1477_v42 }
 0x74d   : > { %4260 = vmatmul.mubr.msk.bf16.vlgmr.msra.gmra.mrb[28].mxu1 %vm908_vm0, %v1478_v44 }
 0x74e   : > { %4272 = vmatpush3.bf16.xpose.msra.mxu1 %v1714_v46  ;;  %4275 = vmatprep.mubr.msk.bf16.mxu1 %vm908_vm0, %v1700_v47 }
 0x74f   : > { %4362 = vmatprep.subr.msk.bf16.mxu1 %vm908_vm0, %v1706_v48 }
 0x756   : > { %4274 = vmatpush3.bf16.xpose.msra.mxu1 %v1717_v49 }
 0x75d   : > { %4276 = vmatmul.mubr.msk.bf16.vlgmr.msra.gmra.mrb[32].mxu1 %vm908_vm0, %v1702_v24 }
 0x7d8   : > { %v5624_v50 = vpop.f32.mrb[20].mxu0 }
 0x7d9   : > { %v5626_v51 = vpop.f32.mrb[21].mxu0 }
 0x7da   : > { %v5628_v52 = vpop.f32.mrb[22].mxu0 }
 0x7db   : > { %v1606_v53 = vpack.c.bf16 %v5628_v52, %v5624_v50  ;;  %v5632_v17 = vpop.f32.mrb[23].mxu0 }
 0x7dc   : > { %v1605_v54 = vpack.c.bf16 %v5632_v17, %v5626_v51 }
 0x814   : > { %v4269_v55 = vpop.f32.mrb[24].mxu0 }
 0x815   : > { %v1684_v56 = vpop.f32.mrb[25].mxu0  ;;  %v1774_v59 = vsel %vm908_vm0, %v4269_v55, -inf }
 0x816   : > { %v4270_v57 = vpop.f32.mrb[26].mxu0  ;;  %v1768_v25 = vsel %vm908_vm0, %v1684_v56, -inf }
 0x817   : > { %1769 = vmax.xlane.f32.xlu0 %v1768_v25  ;;  %v1687_v32 = vpop.f32.mrb[27].mxu0  ;;  %v1777_v60 = vsel %vm908_vm0, %v4270_v57, -inf }
 0x818   : > { %v1771_v58 = vsel %vm908_vm0, %v1687_v32, -inf }
 0x819   : > { %1772 = vmax.xlane.f32.xlu1 %v1771_v58 }
 0x81b   : > { %1775 = vmax.xlane.f32.xlu0 %v1774_v59 }
 0x81f   : > { %1778 = vmax.xlane.f32.xlu0 %v1777_v60 }
 0x820   : > { %v5640_v61 = vpop.f32.mrb[28].mxu1 }
 0x821   : > { %v5642_v62 = vpop.f32.mrb[29].mxu1 }
 0x822   : > { %v5644_v0 = vpop.f32.mrb[30].mxu1 }
 0x823   : > { %v1608_v33 = vpack.c.bf16 %v5644_v0, %v5640_v61  ;;  %v5648_v1 = vpop.f32.mrb[31].mxu1 }
 0x824   : > { %v1607_v40 = vpack.c.bf16 %v5648_v1, %v5642_v62 }
 0x830   : > { %v4277_v2 = vpop.f32.mrb[32].mxu1 }
 0x831   : > { %v1753_v3 = vpop.f32.mrb[33].mxu1  ;;  %v1786_v9 = vsel %vm908_vm0, %v4277_v2, -inf }
 0x832   : > { %v4278_v4 = vpop.f32.mrb[34].mxu1  ;;  %v1780_v6 = vsel %vm908_vm0, %v1753_v3, -inf }
 0x833   : > { %1781 = vmax.xlane.f32.xlu0 %v1780_v6  ;;  %v1756_v7 = vpop.f32.mrb[35].mxu1  ;;  %v1789_v11 = vsel %vm908_vm0, %v4278_v4, -inf }
 0x834   : > { %v1783_v8 = vsel %vm908_vm0, %v1756_v7, -inf }
 0x835   : > { %1784 = vmax.xlane.f32.xlu1 %v1783_v8 }
 0x837   : > { %1787 = vmax.xlane.f32.xlu0 %v1786_v9 }
 0x839   : > { %1790 = vmax.xlane.f32.xlu1 %v1789_v11 }
 0x8a4   : > { %v1770_v13 = vpop.xlane.xlu0 %1769 }
 0x8a5   : > { %v1792_v14 = vsub.f32 %v1684_v56, %v1770_v13 }
 0x8a6   : > { %v1773_v15 = vpop.xlane.xlu1 %1772 }
 0x8a7   : > { %v1800_v19 = vmul.f32 1.442695, %v1792_v14  ;;  %v1793_v21 = vsub.f32 %v1687_v32, %v1773_v15 }
 0x8a8   : > { %v1776_v22 = vpop.xlane.xlu0 %1775 }
 0x8a9   : > { %4668 = vpow2.f32 %v1800_v19  ;;  %v1802_v23 = vmul.f32 1.442695, %v1793_v21  ;;  %v1794_v26 = vsub.f32 %v4269_v55, %v1776_v22 }
 0x8ab   : > { %4670 = vpow2.f32 %v1802_v23  ;;  %v1804_v28 = vmul.f32 1.442695, %v1794_v26 }
 0x8ac   : > { %v1779_v30 = vpop.xlane.xlu0 %1778 }
 0x8ad   : > { %4672 = vpow2.f32 %v1804_v28  ;;  %v1795_v31 = vsub.f32 %v4270_v57, %v1779_v30 }
 0x8af   : > { %v1806_v34 = vmul.f32 1.442695, %v1795_v31 }
 0x8b1   : > { %4674 = vpow2.f32 %v1806_v34 }
 0x8b3   : > { %v5656_v38 = vpop.eup %4668 }
 0x8b4   : > { %v1816_v36 = vsel %vm908_vm0, %v5656_v38, 0.0 }
 0x8b5   : > { %v5660_v16 = vpop.eup %4670  ;;  %1817 = vadd.xlane.f32.xlu0 %v1816_v36 }
 0x8b6   : > { %v1819_v39 = vsel %vm908_vm0, %v5660_v16, 0.0 }
 0x8b7   : > { %v5664_v42 = vpop.eup %4672  ;;  %1820 = vadd.xlane.f32.xlu1 %v1819_v39 }
 0x8b8   : > { %v1822_v44 = vsel %vm908_vm0, %v5664_v42, 0.0 }
 0x8b9   : > { %1823 = vadd.xlane.f32.xlu0 %v1822_v44 }
 0x8bb   : > { %v5668_v46 = vpop.eup %4674 }
 0x8bc   : > { %v1825_v47 = vsel %vm908_vm0, %v5668_v46, 0.0 }
 0x8bd   : > { %1826 = vadd.xlane.f32.xlu1 %v1825_v47 }
 0x8c0   : > { %v1782_v48 = vpop.xlane.xlu0 %1781 }
 0x8c1   : > { %v1796_v55 = vsub.f32 %v1753_v3, %v1782_v48 }
 0x8c2   : > { %v1785_v49 = vpop.xlane.xlu1 %1784 }
 0x8c3   : > { %v1808_v25 = vmul.f32 1.442695, %v1796_v55 }
 0x8c4   : > { %v1788_v24 = vpop.xlane.xlu0 %1787 }
 0x8c5   : > { %v1798_v56 = vsub.f32 %v4277_v2, %v1788_v24  ;;  %4676 = vpow2.f32 %v1808_v25 }
 0x8c6   : > { %v1791_v57 = vpop.xlane.xlu1 %1790 }
 0x8c7   : > { %v1812_v32 = vmul.f32 1.442695, %v1798_v56  ;;  %v1799_v58 = vsub.f32 %v4278_v4, %v1791_v57 }
 0x8c9   : > { %4678 = vpow2.f32 %v1812_v32  ;;  %v1814_v59 = vmul.f32 1.442695, %v1799_v58 }
 0x8cb   : > { %4680 = vpow2.f32 %v1814_v59 }
 0x8ce   : > { %1862 = vrot.lane.b32.xlu1 %v5414_v10, %s5053_s3 }
 0x8cf   : > { %1860 = vrot.lane.b32.xlu0 %v5416_v12, %s5053_s3  ;;  %v5686_v60 = vpop.eup %4676 }
 0x8d2   : > { %1921 = vrot.lane.b32.xlu1 %v5428_v29, %s5053_s3 }
 0x8d3   : > { %2011 = vrot.lane.b32.xlu0 %v5406_v5, %s5054_s13  ;;  %v1797_v5 = vsub.f32 %v1756_v7, %v1785_v49  ;;  %v5688_v6 = vpop.eup %4678 }
 0x8d4   : > { %v1834_v2 = vsel %vm908_vm0, %v5688_v6, 0.0 }
 0x8d5   : > { %v5694_v3 = vpop.eup %4680 }
 0x8d6   : > { %2013 = vrot.lane.b32.xlu1 %v5420_v20, %s5054_s13  ;;  %v1810_v20 = vmul.f32 1.442695, %v1797_v5  ;;  %v1837_v4 = vsel %vm908_vm0, %v5694_v3, 0.0 }
 0x8d7   : > { %1923 = vrot.lane.b32.xlu0 %v5426_v27, %s5053_s3 }
 0x8d8   : > { %4682 = vpow2.f32 %v1810_v20 }
 0x8db   : > { %2007 = vrot.lane.b32.xlu0 %v5404_v41, %s5054_s13  ;;  %v1828_v41 = vsel %vm908_vm0, %v5686_v60, 0.0 }
 0x8e2   : > { %v5698_v7 = vpop.eup %4682 }
 0x8e3   : > { %v1831_v8 = vsel %vm908_vm0, %v5698_v7, 0.0 }
 0x8fa   : > { %1829 = vadd.xlane.f32.xlu0 %v1828_v41  ;;  %1835 = vadd.xlane.f32.xlu1 %v1834_v2 }
 0x8fe   : > { %1838 = vadd.xlane.f32.xlu1 %v1837_v4 }
 0x902   : > { %1832 = vadd.xlane.f32.xlu1 %v1831_v8 }
 0x910   : > { %2080 = vrot.lane.b32.xlu0 %v5432_v37, %s5054_s13 }
 0x913   : > { %2009 = vrot.lane.b32.xlu1 %v5418_v18, %s5054_s13 }
 0x914   : > { %2076 = vrot.lane.b32.xlu0 %v5430_v35, %s5054_s13 }
 0x917   : > { %2082 = vrot.lane.b32.xlu1 %v5444_v45, %s5054_s13 }
 0x91b   : > { %2078 = vrot.lane.b32.xlu1 %v5442_v43, %s5054_s13 }
 0x942   : > { %v1818_v9 = vpop.xlane.xlu0 %1817 }
 0x943   : > { %4684 = vrcp.f32 %v1818_v9 }
 0x944   : > { %v1821_v11 = vpop.xlane.xlu1 %1820 }
 0x945   : > { %4686 = vrcp.f32 %v1821_v11 }
 0x946   : > { %v1824_v13 = vpop.xlane.xlu0 %1823 }
 0x947   : > { %4688 = vrcp.f32 %v1824_v13 }
 0x94a   : > { %v1861_v14 = vpop.permute.xlu0 %1860  ;;  %v1827_v37 = vpop.xlane.xlu1 %1826 }
 0x94b   : > { %4690 = vrcp.f32 %v1827_v37  ;;  %4279 = vmatprep.subr.bf16.mxu0 %v1861_v14 }
 0x94c   : > { %4280 = vmatpush3.bf16.msra.mxu0 %v1861_v14 }
 0x94d   : > { %v4685_v18 = vpop.eup %4684 }
 0x94e   : > { %v2012_v15 = vpop.permute.xlu0 %2011  ;;  %v1863_v35 = vpop.permute.xlu1 %1862  ;;  %v1848_v45 = vmul.f32 %v4685_v18, %v5656_v38 }
 0x94f   : > { %v4687_v19 = vpop.eup %4686  ;;  %4281 = vmatprep.subr.bf16.mxu0 %v1863_v35  ;;  %v2022_v38 = vsel %vm908_vm0, %v2012_v15, 0 }
 0x950   : > { %4282 = vmatpush3.bf16.msra.mxu0 %v1863_v35  ;;  %v1849_v43 = vmul.f32 %v4687_v19, %v5660_v16 }
 0x951   : > { %4363 = vmatprep.subr.msk.bf16.mxu0 %vm908_vm0, %v2012_v15  ;;  %v4689_v23 = vpop.eup %4688 }
 0x952   : > { %v1922_v21 = vpop.permute.xlu1 %1921  ;;  %v1856_v22 = vpack.c.bf16 %v1849_v43, %v1848_v45  ;;  %v1924_v26 = vpop.permute.xlu0 %1923  ;;  %v1850_v30 = vmul.f32 %v4689_v23, %v5664_v42 }
 0x953   : > { %4287 = vmatprep.subr.bf16.mxu1 %v1922_v21 }
 0x954   : > { %4283 = vmatprep.mubr.msk.bf16.mxu0 %vm908_vm0, %v1856_v22  ;;  %4288 = vmatpush3.bf16.msra.mxu1 %v1922_v21 }
 0x955   : > { %v4691_v28 = vpop.eup %4690  ;;  %4289 = vmatprep.subr.bf16.mxu1 %v1924_v26 }
 0x956   : > { %v1851_v31 = vmul.f32 %v4691_v28, %v5668_v46  ;;  %v2008_v36 = vpop.permute.xlu0 %2007  ;;  %v2014_v16 = vpop.permute.xlu1 %2013 }
 0x957   : > { %v2025_v39 = vsel %vm908_vm0, %v2014_v16, 0 }
 0x958   : > { %4290 = vmatpush3.bf16.msra.mxu1 %v1924_v26  ;;  %v1857_v34 = vpack.c.bf16 %v1851_v31, %v1850_v30 }
 0x95a   : > { %4284 = vmatmul.mubr.msk.bf16.vlgmr.msra.gmra.mrb[28].mxu0 %vm908_vm0, %v1857_v34 }
 0x95b   : > { %4296 = vmatpush3.bf16.xpose.msra.mxu0 %v2022_v38  ;;  %4299 = vmatprep.mubr.msk.bf16.mxu0 %vm908_vm0, %v2008_v36 }
 0x95c   : > { %4364 = vmatprep.subr.msk.bf16.mxu0 %vm908_vm0, %v2014_v16 }
 0x963   : > { %4298 = vmatpush3.bf16.xpose.msra.mxu0 %v2025_v39 }
 0x987   : > { %v1830_v44 = vpop.xlane.xlu0 %1829  ;;  %v1836_v42 = vpop.xlane.xlu1 %1835 }
 0x98b   : > { %v2081_v47 = vpop.permute.xlu0 %2080  ;;  %v1839_v46 = vpop.xlane.xlu1 %1838 }
 0x98c   : > { %4365 = vmatprep.subr.msk.bf16.mxu1 %vm908_vm0, %v2081_v47  ;;  %4692 = vrcp.f32 %v1839_v46  ;;  %v2091_v41 = vsel %vm908_vm0, %v2081_v47, 0 }
 0x98d   : > { %4694 = vrcp.f32 %v1830_v44 }
 0x98e   : > { %4696 = vrcp.f32 %v1836_v42 }
 0x98f   : > { %v1833_v48 = vpop.xlane.xlu1 %1832  ;;  %v2077_v2 = vpop.permute.xlu0 %2076 }
 0x990   : > { %4698 = vrcp.f32 %v1833_v48 }
 0x993   : > { %v2010_v49 = vpop.permute.xlu1 %2009 }
 0x994   : > { %4300 = vmatmul.mubr.msk.bf16.vlgmr.msra.gmra.mrb[32].mxu0 %vm908_vm0, %v2010_v49 }
 0x996   : > { %v4693_v24 = vpop.eup %4692 }
 0x997   : > { %v4695_v55 = vpop.eup %4694  ;;  %v1855_v25 = vmul.f32 %v4693_v24, %v5694_v3  ;;  %v2083_v4 = vpop.permute.xlu1 %2082 }
 0x998   : > { %v4697_v56 = vpop.eup %4696  ;;  %v1852_v32 = vmul.f32 %v4695_v55, %v5686_v60  ;;  %v2094_v60 = vsel %vm908_vm0, %v2083_v4, 0 }
 0x999   : > { %v1854_v5 = vmul.f32 %v4697_v56, %v5688_v6 }
 0x99a   : > { %v4699_v57 = vpop.eup %4698 }
 0x99b   : > { %v1853_v58 = vmul.f32 %v4699_v57, %v5698_v7  ;;  %v1859_v20 = vpack.c.bf16 %v1855_v25, %v1854_v5  ;;  %v2079_v3 = vpop.permute.xlu1 %2078 }
 0x99d   : > { %v1858_v59 = vpack.c.bf16 %v1853_v58, %v1852_v32 }
 0x99f   : > { %4291 = vmatprep.mubr.msk.bf16.mxu1 %vm908_vm0, %v1858_v59 }
 0x9a0   : > { %4292 = vmatmul.mubr.msk.bf16.vlgmr.msra.gmra.mrb[36].mxu1 %vm908_vm0, %v1859_v20 }
 0x9a1   : > { %4304 = vmatpush3.bf16.xpose.msra.mxu1 %v2091_v41  ;;  %4307 = vmatprep.mubr.msk.bf16.mxu1 %vm908_vm0, %v2077_v2 }
 0x9a2   : > { %4366 = vmatprep.subr.msk.bf16.mxu1 %vm908_vm0, %v2083_v4 }
 0x9a9   : > { %4306 = vmatpush3.bf16.xpose.msra.mxu1 %v2094_v60 }
 0x9b0   : > { %4308 = vmatmul.mubr.msk.bf16.vlgmr.msra.gmra.mrb[40].mxu1 %vm908_vm0, %v2079_v3 }
 0xa2d   : > { %v5736_v6 = vpop.f32.mrb[28].mxu0 }
 0xa2e   : > { %v5738_v7 = vpop.f32.mrb[29].mxu0 }
 0xa2f   : > { %v5740_v8 = vpop.f32.mrb[30].mxu0 }
 0xa30   : > { %v1983_v9 = vpack.c.bf16 %v5740_v8, %v5736_v6  ;;  %v5744_v11 = vpop.f32.mrb[31].mxu0 }
 0xa31   : > { %v1982_v13 = vpack.c.bf16 %v5744_v11, %v5738_v7 }
 0xa67   : > { %v4301_v14 = vpop.f32.mrb[32].mxu0 }
 0xa68   : > { %v2061_v37 = vpop.f32.mrb[33].mxu0  ;;  %v2151_v45 = vsel %vm908_vm0, %v4301_v14, -inf }
 0xa69   : > { %v4302_v18 = vpop.f32.mrb[34].mxu0  ;;  %v2145_v15 = vsel %vm908_vm0, %v2061_v37, -inf }
 0xa6a   : > { %2146 = vmax.xlane.f32.xlu0 %v2145_v15  ;;  %v2064_v35 = vpop.f32.mrb[35].mxu0  ;;  %v2154_v43 = vsel %vm908_vm0, %v4302_v18, -inf }
 0xa6b   : > { %v2148_v19 = vsel %vm908_vm0, %v2064_v35, -inf }
 0xa6c   : > { %2149 = vmax.xlane.f32.xlu1 %v2148_v19 }
 0xa6e   : > { %2152 = vmax.xlane.f32.xlu0 %v2151_v45 }
 0xa72   : > { %2155 = vmax.xlane.f32.xlu0 %v2154_v43 }
 0xa73   : > { %v5752_v21 = vpop.f32.mrb[36].mxu1 }
 0xa74   : > { %v5754_v22 = vpop.f32.mrb[37].mxu1 }
 0xa75   : > { %v5756_v23 = vpop.f32.mrb[38].mxu1 }
 0xa76   : > { %v1985_v26 = vpack.c.bf16 %v5756_v23, %v5752_v21  ;;  %v5760_v28 = vpop.f32.mrb[39].mxu1 }
 0xa77   : > { %v1984_v30 = vpack.c.bf16 %v5760_v28, %v5754_v22 }
 0xa83   : > { %v4309_v31 = vpop.f32.mrb[40].mxu1 }
 0xa84   : > { %v2130_v34 = vpop.f32.mrb[41].mxu1  ;;  %v2163_v44 = vsel %vm908_vm0, %v4309_v31, -inf }
 0xa85   : > { %v4310_v38 = vpop.f32.mrb[42].mxu1  ;;  %v2157_v36 = vsel %vm908_vm0, %v2130_v34, -inf }
 0xa86   : > { %2158 = vmax.xlane.f32.xlu0 %v2157_v36  ;;  %v2133_v16 = vpop.f32.mrb[43].mxu1  ;;  %v2166_v42 = vsel %vm908_vm0, %v4310_v38, -inf }
 0xa87   : > { %v2160_v39 = vsel %vm908_vm0, %v2133_v16, -inf }
 0xa88   : > { %2161 = vmax.xlane.f32.xlu1 %v2160_v39 }
 0xa8a   : > { %2164 = vmax.xlane.f32.xlu0 %v2163_v44 }
 0xa8c   : > { %2167 = vmax.xlane.f32.xlu1 %v2166_v42 }
 0xaf7   : > { %v2147_v47 = vpop.xlane.xlu0 %2146 }
 0xaf8   : > { %v2169_v46 = vsub.f32 %v2061_v37, %v2147_v47 }
 0xaf9   : > { %v2150_v48 = vpop.xlane.xlu1 %2149 }
 0xafa   : > { %v2177_v49 = vmul.f32 1.442695, %v2169_v46  ;;  %v2170_v24 = vsub.f32 %v2064_v35, %v2150_v48 }
 0xafb   : > { %v2153_v55 = vpop.xlane.xlu0 %2152 }
 0xafc   : > { %4700 = vpow2.f32 %v2177_v49  ;;  %v2179_v56 = vmul.f32 1.442695, %v2170_v24  ;;  %v2171_v57 = vsub.f32 %v4301_v14, %v2153_v55 }
 0xafe   : > { %4702 = vpow2.f32 %v2179_v56  ;;  %v2181_v25 = vmul.f32 1.442695, %v2171_v57 }
 0xaff   : > { %v2156_v32 = vpop.xlane.xlu0 %2155 }
 0xb00   : > { %4704 = vpow2.f32 %v2181_v25  ;;  %v2172_v58 = vsub.f32 %v4302_v18, %v2156_v32 }
 0xb02   : > { %v2183_v5 = vmul.f32 1.442695, %v2172_v58 }
 0xb04   : > { %4706 = vpow2.f32 %v2183_v5 }
 0xb06   : > { %v4701_v59 = vpop.eup %4700 }
 0xb07   : > { %v2193_v20 = vsel %vm908_vm0, %v4701_v59, 0.0 }
 0xb08   : > { %v4703_v41 = vpop.eup %4702  ;;  %2194 = vadd.xlane.f32.xlu0 %v2193_v20 }
 0xb09   : > { %v2196_v2 = vsel %vm908_vm0, %v4703_v41, 0.0 }
 0xb0a   : > { %v5770_v4 = vpop.eup %4704  ;;  %2197 = vadd.xlane.f32.xlu1 %v2196_v2 }
 0xb0b   : > { %v2199_v60 = vsel %vm908_vm0, %v5770_v4, 0.0 }
 0xb0c   : > { %2200 = vadd.xlane.f32.xlu0 %v2199_v60 }
 0xb0e   : > { %v5774_v3 = vpop.eup %4706 }
 0xb0f   : > { %v2202_v14 = vsel %vm908_vm0, %v5774_v3, 0.0 }
 0xb10   : > { %2203 = vadd.xlane.f32.xlu1 %v2202_v14 }
 0xb13   : > { %v2159_v37 = vpop.xlane.xlu0 %2158 }
 0xb14   : > { %v2173_v18 = vsub.f32 %v2130_v34, %v2159_v37 }
 0xb15   : > { %v2162_v34 = vpop.xlane.xlu1 %2161 }
 0xb16   : > { %v2185_v19 = vmul.f32 1.442695, %v2173_v18  ;;  %v2174_v47 = vsub.f32 %v2133_v16, %v2162_v34  ;;  %v4503_v34 = vld [vmem:[#allocation8 + $0x18] sm:$0xff]  }
 0xb17   : > { %v2165_v15 = vpop.xlane.xlu0 %2164 }
 0xb18   : > { %v2175_v35 = vsub.f32 %v4309_v31, %v2165_v15  ;;  %v2187_v46 = vmul.f32 1.442695, %v2174_v47 }
 0xb19   : > { %v2168_v44 = vpop.xlane.xlu1 %2167 }
 0xb1a   : > { %v2189_v45 = vmul.f32 1.442695, %v2175_v35  ;;  %v2176_v42 = vsub.f32 %v4310_v38, %v2168_v44  ;;  %v4506_v44 = vld [vmem:[#allocation8 + $0x30] sm:$0xff]  }
 0xb1c   : > { %4708 = vpow2.f32 %v2189_v45  ;;  %v4500_v45 = vld [vmem:[#allocation8] sm:$0xff]  }
 0xb1d   : > { %4710 = vpow2.f32 %v2185_v19 }
 0xb21   : > { %2239 = vrot.lane.b32.xlu1 %v5414_v10, %s5054_s13  ;;  %v2191_v10 = vmul.f32 1.442695, %v2176_v42  ;;  %v4507_v42 = vld [vmem:[#allocation8 + $0x38] sm:$0xff]  }
 0xb23   : > { %4712 = vpow2.f32 %v2191_v10 }
 0xb24   : > { %4714 = vpow2.f32 %v2187_v46 }
 0xb25   : > { %2298 = vrot.lane.b32.xlu1 %v5428_v29, %s5054_s13 }
 0xb26   : > { %v5782_v43 = vpop.eup %4708 }
 0xb27   : > { %v2211_v36 = vsel %vm908_vm0, %v5782_v43, 0.0  ;;  %v5786_v39 = vpop.eup %4710 }
 0xb28   : > { %2212 = vadd.xlane.f32.xlu0 %v2211_v36  ;;  %v2205_v31 = vsel %vm908_vm0, %v5786_v39, 0.0  ;;  %v4501_v36 = vld [vmem:[#allocation8 + $0x8] sm:$0xff]  }
 0xb2c   : > { %2206 = vadd.xlane.f32.xlu0 %v2205_v31  ;;  %v4505_v31 = vld [vmem:[#allocation8 + $0x28] sm:$0xff]  }
 0xb2d   : > { %v5792_v29 = vpop.eup %4712 }
 0xb2e   : > { %v2214_v48 = vsel %vm908_vm0, %v5792_v29, 0.0  ;;  %v5800_v49 = vpop.eup %4714 }
 0xb42   : > { %2237 = vrot.lane.b32.xlu0 %v5416_v12, %s5054_s13  ;;  %v2208_v12 = vsel %vm908_vm0, %v5800_v49, 0.0 }
 0xb46   : > { %1613 = vrot.lane.b32.xlu0 %v1605_v54, %s5054_s13 }
 0xb49   : > { %2215 = vadd.xlane.f32.xlu1 %v2214_v48 }
 0xb4a   : > { %1990 = vrot.lane.b32.xlu0 %v1982_v13, %s5053_s3 }
 0xb4d   : > { %2209 = vadd.xlane.f32.xlu1 %v2208_v12 }
 0xb5e   : > { %2300 = vrot.lane.b32.xlu1 %v5426_v27, %s5054_s13 }
 0xb62   : > { %1615 = vrot.lane.b32.xlu1 %v1606_v53, %s5054_s13 }
 0xb66   : > { %1992 = vrot.lane.b32.xlu1 %v1983_v9, %s5053_s3 }
 0xb95   : > { %v2195_v51 = vpop.xlane.xlu0 %2194 }
 0xb96   : > { %4716 = vrcp.f32 %v2195_v51 }
 0xb97   : > { %v2198_v17 = vpop.xlane.xlu1 %2197 }
 0xb98   : > { %4718 = vrcp.f32 %v2198_v17 }
 0xb99   : > { %v2201_v50 = vpop.xlane.xlu0 %2200 }
 0xb9d   : > { %v2204_v54 = vpop.xlane.xlu1 %2203 }
 0xb9e   : > { %4720 = vrcp.f32 %v2204_v54 }
 0xb9f   : > { %4722 = vrcp.f32 %v2201_v50 }
 0xba0   : > { %v4717_v7 = vpop.eup %4716 }
 0xba1   : > { %v2240_v11 = vpop.permute.xlu1 %2239  ;;  %v2225_v38 = vmul.f32 %v4717_v7, %v4701_v59 }
 0xba2   : > { %v4719_v13 = vpop.eup %4718 }
 0xba3   : > { %v2226_v27 = vmul.f32 %v4719_v13, %v4703_v41 }
 0xba5   : > { %v2299_v16 = vpop.permute.xlu1 %2298  ;;  %v2233_v24 = vpack.c.bf16 %v2226_v27, %v2225_v38  ;;  %v4812_v27 = vld [vmem:[%s5332_s26] sm:$0xff] }
 0xba6   : > { %4319 = vmatprep.subr.bf16.mxu1 %v2299_v16 }
 0xba7   : > { %4315 = vmatprep.mubr.msk.bf16.mxu0 %vm908_vm0, %v2233_v24  ;;  %4320 = vmatpush3.bf16.msra.mxu1 %v2299_v16 }
 0xba8   : > { %v4721_v6 = vpop.eup %4720 }
 0xba9   : > { %v4723_v9 = vpop.eup %4722  ;;  %v2228_v55 = vmul.f32 %v4721_v6, %v5774_v3  ;;  %v4814_v6 = vld [vmem:[%s5332_s26 + $0x10] sm:$0xff] }
 0xbaa   : > { %v2227_v57 = vmul.f32 %v4723_v9, %v5770_v4  ;;  %v4815_v9 = vld [vmem:[%s5332_s26 + $0x18] sm:$0xff] }
 0xbac   : > { %v2234_v25 = vpack.c.bf16 %v2228_v55, %v2227_v57 }
 0xbb5   : > { %v2213_v52 = vpop.xlane.xlu0 %2212 }
 0xbb9   : > { %v2207_v53 = vpop.xlane.xlu0 %2206 }
 0xbbd   : > { %v2238_v8 = vpop.permute.xlu0 %2237 }
 0xbbe   : > { %4311 = vmatprep.subr.bf16.mxu0 %v2238_v8 }
 0xbbf   : > { %4312 = vmatpush3.bf16.msra.mxu0 %v2238_v8 }
 0xbc0   : > { %4313 = vmatprep.subr.bf16.mxu0 %v2240_v11 }
 0xbc1   : > { %v1614_v56 = vpop.permute.xlu0 %1613 }
 0xbc2   : > { %1626 = vst.msk [vmem:[#allocation2] sm:$0xff] %vm1625_vm1, %v1614_v56 }
 0xbc3   : > { %4314 = vmatpush3.bf16.msra.mxu0 %v2240_v11 }
 0xbc4   : > { %4327 = vmatprep.subr.bf16.mxu0 %v4500_v45 }
 0xbc5   : > { %v1991_v32 = vpop.permute.xlu0 %1990 }
 0xbc6   : > { %2003 = vst.msk [vmem:[#allocation2] sm:$0xff] %vm2002_vm2, %v1991_v32  ;;  %4316 = vmatmul.mubr.msk.bf16.vlgmr.msra.gmra.mrb[36].mxu0 %vm908_vm0, %v2234_v25  ;;  %v4816_v25 = vld [vmem:[%s5332_s26 + $0x20] sm:$0xff] }
 0xbc7   : > { %4328 = vmatpush3.bf16.msra.mxu0 %v4500_v45  ;;  %v4517_v45 = vld [vmem:[#allocation9 + $0x28] ss:$16 sps:$4 sm:$0xff]  }
 0xbc8   : > { %4329 = vmatprep.subr.bf16.mxu0 %v4501_v36 }
 0xbcb   : > { %4330 = vmatpush3.bf16.msra.mxu0 %v4501_v36 }
 0xbd6   : > { %v2216_v58 = vpop.xlane.xlu1 %2215 }
 0xbd7   : > { %4724 = vrcp.f32 %v2216_v58 }
 0xbd8   : > { %4726 = vrcp.f32 %v2207_v53 }
 0xbd9   : > { %4728 = vrcp.f32 %v2213_v52  ;;  %v4813_v52 = vld [vmem:[%s5332_s26 + $0x8] sm:$0xff] }
 0xbda   : > { %v2210_v5 = vpop.xlane.xlu1 %2209 }
 0xbdb   : > { %4730 = vrcp.f32 %v2210_v5 }
 0xbde   : > { %v2301_v59 = vpop.permute.xlu1 %2300 }
 0xbdf   : > { %4321 = vmatprep.subr.bf16.mxu1 %v2301_v59 }
 0xbe0   : > { %4322 = vmatpush3.bf16.msra.mxu1 %v2301_v59  ;;  %v4817_v59 = vld [vmem:[%s5332_s26 + $0x28] sm:$0xff] }
 0xbe1   : > { %v4725_v20 = vpop.eup %4724 }
 0xbe2   : > { %v1616_v41 = vpop.permute.xlu1 %1615  ;;  %v4727_v2 = vpop.eup %4726  ;;  %v2232_v3 = vmul.f32 %v4725_v20, %v5792_v29 }
 0xbe3   : > { %1627 = vst.msk [vmem:[#allocation2 + $0x8] sm:$0xff] %vm1625_vm1, %v1616_v41  ;;  %v4729_v4 = vpop.eup %4728  ;;  %v2229_v37 = vmul.f32 %v4727_v2, %v5786_v39  ;;  %v4502_v39 = vld [vmem:[#allocation8 + $0x10] sm:$0xff]  }
 0xbe4   : > { %v2231_v15 = vmul.f32 %v4729_v4, %v5782_v43  ;;  %4331 = vmatprep.subr.bf16.mxu0 %v4502_v39  ;;  %v4504_v43 = vld [vmem:[#allocation8 + $0x20] sm:$0xff]   ;;  %v4818_v41 = vld [vmem:[%s5332_s26 + $0x30] sm:$0xff]  ;;  %v4819_v4 = vld [vmem:[%s5332_s26 + $0x38] sm:$0xff]  ;;  %s4968_s26 = scalar_lea.vmem %s4967_s10, 2048 }
 0xbe5   : > { %v4731_v60 = vpop.eup %4730  ;;  %4332 = vmatpush3.bf16.msra.mxu0 %v4502_v39 }
 0xbe6   : > { %v1993_v14 = vpop.permute.xlu1 %1992  ;;  %v2230_v18 = vmul.f32 %v4731_v60, %v5800_v49  ;;  %v2236_v19 = vpack.c.bf16 %v2232_v3, %v2231_v15  ;;  %4333 = vmatprep.subr.bf16.mxu0 %v4503_v34  ;;  %v4508_v3 = vld [vmem:[#allocation9] ss:$16 sps:$4 sm:$0xff]   ;;  %v4516_v15 = vld [vmem:[#allocation9 + $0x24] ss:$16 sps:$4 sm:$0xff]  }
 0xbe7   : > { %2004 = vst.msk [vmem:[#allocation2 + $0x8] sm:$0xff] %vm2002_vm2, %v1993_v14  ;;  %v4510_v14 = vld [vmem:[#allocation9 + $0x4] ss:$16 sps:$4 sm:$0xff]  }
 0xbe8   : > { %v2235_v35 = vpack.c.bf16 %v2230_v18, %v2229_v37  ;;  %v4511_v37 = vld [vmem:[#allocation9 + $0x8] ss:$16 sps:$4 sm:$0xff]   ;;  %v4513_v18 = vld [vmem:[#allocation9 + $0xc] ss:$16 sps:$4 sm:$0xff]   ;;  %2861 = vmatprep.subr.bf16.mxu1 %v4510_v14 }
 0xbe9   : > { %4334 = vmatpush3.bf16.msra.mxu0 %v4503_v34 }
 0xbea   : > { %4323 = vmatprep.mubr.msk.bf16.mxu1 %vm908_vm0, %v2235_v35  ;;  %4335 = vmatprep.subr.bf16.mxu0 %v4504_v43  ;;  %v4519_v35 = vld [vmem:[#allocation9 + $0x2c] ss:$16 sps:$4 sm:$0xff]  }
 0xbeb   : > { %4324 = vmatmul.mubr.msk.bf16.vlgmr.msra.gmra.mrb[44].mxu1 %vm908_vm0, %v2236_v19  ;;  %v4514_v19 = vld [vmem:[#allocation9 + $0x20] ss:$16 sps:$4 sm:$0xff]  }
 0xbec   : > { %2893 = vmatprep.mubr.bf16.mxu1 %v5051_v63  ;;  %2862 = vmatpush1.bf16.msra.mxu1 %v4508_v3 }
 0xbed   : > { %4336 = vmatpush3.bf16.msra.mxu0 %v4504_v43  ;;  %2863 = vmatprep.subr.bf16.mxu1 %v4516_v15 }
 0xbee   : > { %4337 = vmatprep.subr.bf16.mxu0 %v4505_v31 }
 0xbf0   : > { %2864 = vmatpush1.bf16.msra.mxu1 %v4514_v19 }
 0xbf1   : > { %4338 = vmatpush3.bf16.msra.mxu0 %v4505_v31 }
 0xbf2   : > { %4339 = vmatprep.subr.bf16.mxu0 %v4506_v44 }
 0xbf5   : > { %4340 = vmatpush3.bf16.msra.mxu0 %v4506_v44 }
 0xbf6   : > { %4341 = vmatprep.subr.bf16.mxu0 %v4507_v42 }
 0xbf9   : > { %4342 = vmatpush3.bf16.msra.mxu0 %v4507_v42 }
 0xbfa   : > { %2934 = vmatprep.subr.bf16.mxu0 %v4513_v18 }
 0xc99   : > { %v4317_v47 = vpop.f32.mrb[36].mxu0 }
 0xc9a   : > { %v2283_v10 = vpop.f32.mrb[37].mxu0 }
 0xc9b   : > { %v4318_v46 = vpop.f32.mrb[38].mxu0 }
 0xc9c   : > { %v2360_v29 = vpack.c.bf16 %v4318_v46, %v4317_v47  ;;  %v2286_v48 = vpop.f32.mrb[39].mxu0 }
 0xc9d   : > { %v2359_v49 = vpack.c.bf16 %v2286_v48, %v2283_v10 }
 0xc9e   : > { %2369 = vrot.lane.b32.xlu1 %v2360_v29, %s5052_s14 }
 0xc9f   : > { %2367 = vrot.lane.b32.xlu0 %v2359_v49, %s5052_s14 }
 0xca2   : > { %1619 = vrot.lane.b32.xlu1 %v1608_v33, %s5054_s13 }
 0xca3   : > { %1617 = vrot.lane.b32.xlu0 %v1607_v40, %s5054_s13 }
 0xca6   : > { %1996 = vrot.lane.b32.xlu1 %v1985_v26, %s5053_s3 }
 0xca7   : > { %1994 = vrot.lane.b32.xlu0 %v1984_v30, %s5053_s3 }
 0xcbe   : > { %v4325_v12 = vpop.f32.mrb[44].mxu1 }
 0xcbf   : > { %v2344_v51 = vpop.f32.mrb[45].mxu1 }
 0xcc0   : > { %v4326_v17 = vpop.f32.mrb[46].mxu1 }
 0xcc1   : > { %v2362_v61 = vpack.c.bf16 %v4326_v17, %v4325_v12  ;;  %v2347_v0 = vpop.f32.mrb[47].mxu1 }
 0xcc2   : > { %v2361_v33 = vpack.c.bf16 %v2347_v0, %v2344_v51  ;;  %v4525_v0 = vld [vmem:[#allocation9 + $0x4c] ss:$16 sps:$4 sm:$0xff]  }
 0xcc3   : > { %2373 = vrot.lane.b32.xlu1 %v2362_v61, %s5052_s14  ;;  %v4522_v61 = vld [vmem:[#allocation9 + $0x44] ss:$16 sps:$4 sm:$0xff]  }
 0xcc4   : > { %2371 = vrot.lane.b32.xlu0 %v2361_v33, %s5052_s14  ;;  %v4520_v33 = vld [vmem:[#allocation9 + $0x40] ss:$16 sps:$4 sm:$0xff]   ;;  %2865 = vmatprep.subr.bf16.mxu1 %v4522_v61  ;;  %s3735_s14 = sshll.u32 %s6245_s30, 4  ;;  %s6272_s14 = int_to_ptr.vmem [resolvable:$true] %s3735_s14 }
 0xcc5   : > { %2866 = vmatpush1.bf16.msra.mxu1 %v4520_v33  ;;  %v3930_v33 = vld [vmem:[%s6324_s5] ss:$0 sm:$0xff]  ;;  %s4962_s21 = scalar_lea.vmem %s6272_s14, 1024  ;;  %p4969_p12 = scmp.lt.s32.totalorder %s6272_s14, %s4967_s10 }
 0xcc6   : > { %p4963_p3 = scmp.ne.s32.totalorder %s6272_s14, %s4962_s21  ;;  %p4970_p2 = scmp.lt.s32.totalorder %s4968_s26, %s4962_s21 }
 0xcc8   : > { %p4964_p5 = pnand %p4963_p3, %p5274_p10  ;;  %p4971_p1 = por %p4970_p2, %p4969_p12 }
 0xcca   : > { %p4965_p7 = pneg %p4964_p5 }
 0xccc   : > { %p4972_p13 = pnand %p4971_p1, %p4965_p7 }
 0xd10   : > { %v2370_v62 = vpop.permute.xlu1 %2369 }
 0xd11   : > { %2381 = vst.msk [vmem:[#allocation2 + $0x8] sm:$0xff] %vm2379_vm3, %v2370_v62  ;;  %v2368_v1 = vpop.permute.xlu0 %2367  ;;  %v4523_v62 = vld [vmem:[#allocation9 + $0x48] ss:$16 sps:$4 sm:$0xff]  }
 0xd12   : > { %2380 = vst.msk [vmem:[#allocation2] sm:$0xff] %vm2379_vm3, %v2368_v1  ;;  %v4528_v1 = vld [vmem:[#allocation9 + $0x64] ss:$16 sps:$4 sm:$0xff]  }
 0xd13   : > { %2867 = vmatprep.subr.bf16.mxu1 %v4528_v1 }
 0xd14   : > { %v1620_v40 = vpop.permute.xlu1 %1619 }
 0xd15   : > { %1629 = vst.msk [vmem:[#allocation2 + $0x18] sm:$0xff] %vm1625_vm1, %v1620_v40  ;;  %v1618_v21 = vpop.permute.xlu0 %1617  ;;  %v4531_v40 = vld [vmem:[#allocation9 + $0x6c] ss:$16 sps:$4 sm:$0xff]  }
 0xd16   : > { %1628 = vst.msk [vmem:[#allocation2 + $0x10] sm:$0xff] %vm1625_vm1, %v1618_v21  ;;  %v4526_v21 = vld [vmem:[#allocation9 + $0x60] ss:$16 sps:$4 sm:$0xff]  }
 0xd17   : > { %2868 = vmatpush1.bf16.msra.mxu1 %v4526_v21 }
 0xd18   : > { %v1997_v22 = vpop.permute.xlu1 %1996  ;;  %v2385_v28 = vld [vmem:[#allocation2 + $0x8] sm:$0xff] }
 0xd19   : > { %2006 = vst.msk [vmem:[#allocation2 + $0x18] sm:$0xff] %vm2002_vm2, %v1997_v22  ;;  %v1995_v23 = vpop.permute.xlu0 %1994  ;;  %v2384_v26 = vld [vmem:[#allocation2] sm:$0xff]  ;;  %v4529_v22 = vld [vmem:[#allocation9 + $0x68] ss:$16 sps:$4 sm:$0xff]  }
 0xd1a   : > { %2005 = vst.msk [vmem:[#allocation2 + $0x10] sm:$0xff] %vm2002_vm2, %v1995_v23  ;;  %4343 = vmatprep.mubr.bf16.mxu0 %v2384_v26  ;;  %v4534_v23 = vld [vmem:[#allocation9 + $0x84] ss:$16 sps:$4 sm:$0xff]   ;;  %v4537_v26 = vld [vmem:[#allocation9 + $0x8c] ss:$16 sps:$4 sm:$0xff]  }
 0xd1b   : > { %4344 = vmatmul.mubr.bf16.vlgmr.msra.gmra.mrb[40].mxu0 %v2385_v28  ;;  %v4532_v28 = vld [vmem:[#allocation9 + $0x80] ss:$16 sps:$4 sm:$0xff]   ;;  %2869 = vmatprep.subr.bf16.mxu1 %v4534_v23 }
 0xd1c   : > { %2935 = vmatpush1.bf16.msra.mxu0 %v4511_v37  ;;  %2870 = vmatpush1.bf16.msra.mxu1 %v4532_v28  ;;  %v3931_v23 = vld [vmem:[%s6325_s6] ss:$0 sm:$0xff] }
 0xd1d   : > { %2936 = vmatprep.subr.bf16.mxu0 %v4519_v35 }
 0xd20   : > { %2937 = vmatpush1.bf16.msra.mxu0 %v4517_v45 }
 0xd21   : > { %2938 = vmatprep.subr.bf16.mxu0 %v4525_v0 }
 0xd24   : > { %2939 = vmatpush1.bf16.msra.mxu0 %v4523_v62 }
 0xd25   : > { %2940 = vmatprep.subr.bf16.mxu0 %v4531_v40 }
 0xd28   : > { %2941 = vmatpush1.bf16.msra.mxu0 %v4529_v22 }
 0xd29   : > { %2942 = vmatprep.subr.bf16.mxu0 %v4537_v26 }
 0xd35   : > { %v2374_v30 = vpop.permute.xlu1 %2373 }
 0xd36   : > { %2383 = vst.msk [vmem:[#allocation2 + $0x18] sm:$0xff] %vm2379_vm3, %v2374_v30  ;;  %v2372_v54 = vpop.permute.xlu0 %2371  ;;  %v4535_v30 = vld [vmem:[#allocation9 + $0x88] ss:$16 sps:$4 sm:$0xff]  }
 0xd37   : > { %2382 = vst.msk [vmem:[#allocation2 + $0x10] sm:$0xff] %vm2379_vm3, %v2372_v54  ;;  %2943 = vmatpush1.bf16.msra.mxu0 %v4535_v30  ;;  %v4540_v54 = vld [vmem:[#allocation9 + $0xa4] ss:$16 sps:$4 sm:$0xff]  }
 0xd38   : > { %2871 = vmatprep.subr.bf16.mxu1 %v4540_v54 }
 0xd3d   : > { %v2387_v11 = vld [vmem:[#allocation2 + $0x18] sm:$0xff] }
 0xd3e   : > { %v2386_v7 = vld [vmem:[#allocation2 + $0x10] sm:$0xff] }
 0xd3f   : > { %4347 = vmatprep.mubr.bf16.mxu0 %v2386_v7  ;;  %v4543_v7 = vld [vmem:[#allocation9 + $0xac] ss:$16 sps:$4 sm:$0xff]  }
 0xd40   : > { %4348 = vmatmul.mubr.bf16.gmra.mrb[44].mxu0 %v2387_v11  ;;  %v4538_v11 = vld [vmem:[#allocation9 + $0xa0] ss:$16 sps:$4 sm:$0xff]   ;;  %2944 = vmatprep.subr.bf16.mxu0 %v4543_v7 }
 0xd41   : > { %2966 = vmatprep.mubr.bf16.mxu0 %v5051_v63  ;;  %2872 = vmatpush1.bf16.msra.mxu1 %v4538_v11 }
 0xdee   : > { %v4345_v13 = vpop.f32.mrb[40].mxu0 }
 0xdef   : > { %v2486_v38 = vpop.f32.mrb[41].mxu0  ;;  %v5870_v8 = vadd.f32 %v4814_v6, %v4345_v13  ;;  %v4541_v13 = vld [vmem:[#allocation9 + $0xa8] ss:$16 sps:$4 sm:$0xff]  }
 0xdf0   : > { %v5863_v16 = vadd.f32 %v4812_v27, %v2486_v38  ;;  %v4346_v24 = vpop.f32.mrb[42].mxu0  ;;  %2945 = vmatpush1.bf16.msra.mxu0 %v4541_v13  ;;  %v4546_v38 = vld [vmem:[#allocation9 + $0xc4] ss:$16 sps:$4 sm:$0xff]   ;;  %v4549_v27 = vld [vmem:[#allocation9 + $0xcc] ss:$16 sps:$4 sm:$0xff]  }
 0xdf1   : > { %v2489_v50 = vpop.f32.mrb[43].mxu0  ;;  %v5875_v55 = vadd.f32 %v4815_v9, %v4346_v24  ;;  %2873 = vmatprep.subr.bf16.mxu1 %v4546_v38  ;;  %2946 = vmatprep.subr.bf16.mxu0 %v4549_v27  ;;  %v4552_v9 = vld [vmem:[#allocation9 + $0xe4] ss:$16 sps:$4 sm:$0xff]  }
 0xdf2   : > { %v5866_v53 = vadd.f32 %v4813_v52, %v2489_v50  ;;  %2527 = vadd.xlane.f32.xlu0 %v5863_v16  ;;  %v4544_v50 = vld [vmem:[#allocation9 + $0xc0] ss:$16 sps:$4 sm:$0xff]   ;;  %v4547_v52 = vld [vmem:[#allocation9 + $0xc8] ss:$16 sps:$4 sm:$0xff]  }
 0xdf3   : > { %2874 = vmatpush1.bf16.msra.mxu1 %v4544_v50 }
 0xdf4   : > { %2529 = vadd.xlane.f32.xlu1 %v5866_v53  ;;  %2947 = vmatpush1.bf16.msra.mxu0 %v4547_v52 }
 0xdf5   : > { %2875 = vmatprep.subr.bf16.mxu1 %v4552_v9 }
 0xdf6   : > { %2531 = vadd.xlane.f32.xlu0 %v5870_v8 }
 0xdfa   : > { %2533 = vadd.xlane.f32.xlu0 %v5875_v55 }
 0xe13   : > { %v4349_v56 = vpop.f32.mrb[44].mxu0 }
 0xe14   : > { %v2502_v57 = vpop.f32.mrb[45].mxu0  ;;  %v5886_v2 = vadd.f32 %v4818_v41, %v4349_v56 }
 0xe15   : > { %v5879_v32 = vadd.f32 %v4816_v25, %v2502_v57  ;;  %v4350_v58 = vpop.f32.mrb[46].mxu0  ;;  %v4550_v57 = vld [vmem:[#allocation9 + $0xe0] ss:$16 sps:$4 sm:$0xff]   ;;  %v4553_v25 = vld [vmem:[#allocation9 + $0xe8] ss:$16 sps:$4 sm:$0xff]  }
 0xe16   : > { %v2505_v5 = vpop.f32.mrb[47].mxu0  ;;  %v5890_v60 = vadd.f32 %v4819_v4, %v4350_v58  ;;  %v4555_v58 = vld [vmem:[#allocation9 + $0xec] ss:$16 sps:$4 sm:$0xff]   ;;  %2876 = vmatpush1.bf16.msra.mxu1 %v4550_v57 }
 0xe17   : > { %v5882_v20 = vadd.f32 %v4817_v59, %v2505_v5  ;;  %2535 = vadd.xlane.f32.xlu0 %v5879_v32  ;;  %2948 = vmatprep.subr.bf16.mxu0 %v4555_v58 }
 0xe18   : > { %2949 = vmatpush1.bf16.msra.mxu0 %v4553_v25 }
 0xe19   : > { %2537 = vadd.xlane.f32.xlu1 %v5882_v20 }
 0xe1b   : > { %2539 = vadd.xlane.f32.xlu0 %v5886_v2 }
 0xe1d   : > { %2541 = vadd.xlane.f32.xlu1 %v5890_v60 }
 0xe7f   : > { %v2528_v36 = vpop.xlane.xlu0 %2527 }
 0xe80   : > { %v2543_v39 = vmul.f32 0.0078125, %v2528_v36 }
 0xe81   : > { %v2530_v34 = vpop.xlane.xlu1 %2529 }
 0xe82   : > { %v5895_v43 = vsub.f32 %v5863_v16, %v2543_v39  ;;  %v2544_v31 = vmul.f32 0.0078125, %v2530_v34 }
 0xe83   : > { %v2532_v44 = vpop.xlane.xlu0 %2531 }
 0xe84   : > { %v5898_v42 = vsub.f32 %v5866_v53, %v2544_v31  ;;  %v2545_v47 = vmul.f32 0.0078125, %v2532_v44  ;;  %v2559_v10 = vmul.f32 %v5895_v43, %v5895_v43 }
 0xe86   : > { %v5903_v46 = vsub.f32 %v5870_v8, %v2545_v47  ;;  %2567 = vadd.xlane.f32.xlu0 %v2559_v10  ;;  %v2560_v29 = vmul.f32 %v5898_v42, %v5898_v42 }
 0xe87   : > { %v2534_v48 = vpop.xlane.xlu0 %2533 }
 0xe88   : > { %v2546_v49 = vmul.f32 0.0078125, %v2534_v48  ;;  %2569 = vadd.xlane.f32.xlu1 %v2560_v29  ;;  %v2561_v12 = vmul.f32 %v5903_v46, %v5903_v46 }
 0xe8a   : > { %v5910_v51 = vsub.f32 %v5875_v55, %v2546_v49  ;;  %2571 = vadd.xlane.f32.xlu0 %v2561_v12 }
 0xe8c   : > { %v2562_v17 = vmul.f32 %v5910_v51, %v5910_v51 }
 0xe8e   : > { %2573 = vadd.xlane.f32.xlu1 %v2562_v17 }
 0xea4   : > { %v2536_v24 = vpop.xlane.xlu0 %2535 }
 0xea5   : > { %v2547_v6 = vmul.f32 0.0078125, %v2536_v24 }
 0xea6   : > { %v2538_v56 = vpop.xlane.xlu1 %2537 }
 0xea7   : > { %v5915_v5 = vsub.f32 %v5879_v32, %v2547_v6  ;;  %v2548_v59 = vmul.f32 0.0078125, %v2538_v56 }
 0xea8   : > { %v2540_v41 = vpop.xlane.xlu0 %2539 }
 0xea9   : > { %v5918_v4 = vsub.f32 %v5882_v20, %v2548_v59  ;;  %v2549_v3 = vmul.f32 0.0078125, %v2540_v41  ;;  %v2563_v14 = vmul.f32 %v5915_v5, %v5915_v5 }
 0xeaa   : > { %v2542_v37 = vpop.xlane.xlu1 %2541 }
 0xeab   : > { %v5923_v18 = vsub.f32 %v5886_v2, %v2549_v3  ;;  %v2550_v15 = vmul.f32 0.0078125, %v2542_v37  ;;  %2575 = vadd.xlane.f32.xlu0 %v2563_v14  ;;  %v2564_v35 = vmul.f32 %v5918_v4, %v5918_v4 }
 0xead   : > { %v5928_v19 = vsub.f32 %v5890_v60, %v2550_v15  ;;  %2577 = vadd.xlane.f32.xlu1 %v2564_v35  ;;  %v2565_v45 = vmul.f32 %v5923_v18, %v5923_v18 }
 0xeaf   : > { %2579 = vadd.xlane.f32.xlu0 %v2565_v45  ;;  %v2566_v36 = vmul.f32 %v5928_v19, %v5928_v19 }
 0xeb1   : > { %2581 = vadd.xlane.f32.xlu1 %v2566_v36 }
 0xf13   : > { %v2568_v39 = vpop.xlane.xlu0 %2567 }
 0xf14   : > { %v2583_v34 = vmul.f32 0.0078125, %v2568_v39 }
 0xf15   : > { %v2570_v31 = vpop.xlane.xlu1 %2569 }
 0xf16   : > { %v2591_v44 = vadd.f32 1e-05, %v2583_v34  ;;  %v2584_v47 = vmul.f32 0.0078125, %v2570_v31 }
 0xf17   : > { %v2572_v10 = vpop.xlane.xlu0 %2571 }
 0xf18   : > { %4732 = vrsqrt.f32 %v2591_v44  ;;  %v2592_v29 = vadd.f32 1e-05, %v2584_v47  ;;  %v2585_v48 = vmul.f32 0.0078125, %v2572_v10 }
 0xf1a   : > { %4734 = vrsqrt.f32 %v2592_v29  ;;  %v2593_v49 = vadd.f32 1e-05, %v2585_v48 }
 0xf1b   : > { %v2574_v12 = vpop.xlane.xlu1 %2573 }
 0xf1c   : > { %4736 = vrsqrt.f32 %v2593_v49  ;;  %v2586_v17 = vmul.f32 0.0078125, %v2574_v12  ;;  %v4556_v12 = vld [vmem:[#allocation11 + $0x40] sm:$0xff]  }
 0xf1d   : > { %4095 = vmatprep.subr.bf16.mxu1 %v4556_v12 }
 0xf1e   : > { %v2594_v61 = vadd.f32 1e-05, %v2586_v17  ;;  %v4557_v17 = vld [vmem:[#allocation11 + $0xc0] sm:$0xff]  }
 0xf1f   : > { %4135 = vmatprep.subr.bf16.mxu0 %v4557_v17 }
 0xf20   : > { %4738 = vrsqrt.f32 %v2594_v61  ;;  %v4560_v61 = vld [vmem:[#allocation11 + $0x48] sm:$0xff]  }
 0xf22   : > { %v4733_v0 = vpop.eup %4732 }
 0xf23   : > { %v2607_v62 = vmul.f32 %v4733_v0, %v5895_v43  ;;  %v4561_v0 = vld [vmem:[#allocation11 + $0xc8] sm:$0xff]  }
 0xf24   : > { %v4735_v1 = vpop.eup %4734 }
 0xf25   : > { %v2608_v40 = vmul.f32 %v4735_v1, %v5898_v42  ;;  %v2621_v21 = vmul.f32 %v3930_v33, %v2607_v62  ;;  %v4563_v62 = vld [vmem:[#allocation11 + $0x88] sm:$0xff]   ;;  %v4565_v1 = vld [vmem:[#allocation11 + $0xd0] sm:$0xff]  }
 0xf26   : > { %v4737_v22 = vpop.eup %4736 }
 0xf27   : > { %v2622_v26 = vmul.f32 %v3930_v33, %v2608_v40  ;;  %v2635_v28 = vadd.f32 %v3931_v23, %v2621_v21  ;;  %v2609_v54 = vmul.f32 %v4737_v22, %v5903_v46  ;;  %v4566_v40 = vld [vmem:[#allocation11 + $0x10] sm:$0xff]   ;;  %v4568_v22 = vld [vmem:[#allocation11 + $0x58] sm:$0xff]  }
 0xf28   : > { %v4567_v21 = vld [vmem:[#allocation11 + $0x90] sm:$0xff]  }
 0xf29   : > { %v2636_v30 = vadd.f32 %v3931_v23, %v2622_v26  ;;  %v2623_v43 = vmul.f32 %v3930_v33, %v2609_v54  ;;  %v4570_v26 = vld [vmem:[#allocation11 + $0x18] sm:$0xff]   ;;  %v4573_v54 = vld [vmem:[#allocation11 + $0xe0] sm:$0xff]  }
 0xf2a   : > { %v4739_v7 = vpop.eup %4738 }
 0xf2b   : > { %v2643_v11 = vpack.c.bf16 %v2636_v30, %v2635_v28  ;;  %v2610_v13 = vmul.f32 %v4739_v7, %v5910_v51  ;;  %v2637_v27 = vadd.f32 %v3931_v23, %v2623_v43  ;;  %v4571_v28 = vld [vmem:[#allocation11 + $0x98] sm:$0xff]   ;;  %v4572_v30 = vld [vmem:[#allocation11 + $0x60] sm:$0xff]   ;;  %v4577_v43 = vld [vmem:[#allocation11 + $0xe8] sm:$0xff]  }
 0xf2c   : > { %v4574_v7 = vld [vmem:[#allocation11 + $0x20] sm:$0xff]  }
 0xf2d   : > { %2894 = vmatmul.mubr.bf16.vlgmr.msra.gmra.mrb[48].mxu1 %v2643_v11  ;;  %2967 = vmatmul.mubr.bf16.vlgmr.msra.gmra.mrb[48].mxu0 %v2643_v11  ;;  %v2624_v38 = vmul.f32 %v3930_v33, %v2610_v13  ;;  %v4575_v11 = vld [vmem:[#allocation11 + $0xa0] sm:$0xff]   ;;  %v4576_v13 = vld [vmem:[#allocation11 + $0x68] sm:$0xff]  }
 0xf2e   : > { %2903 = vmatprep.mubr.bf16.mxu1 %v5051_v63  ;;  %2976 = vmatprep.mubr.bf16.mxu0 %v5051_v63 }
 0xf2f   : > { %v2638_v42 = vadd.f32 %v3931_v23, %v2624_v38  ;;  %v4578_v38 = vld [vmem:[#allocation11 + $0x28] sm:$0xff]  }
 0xf31   : > { %v2644_v24 = vpack.c.bf16 %v2638_v42, %v2637_v27  ;;  %v4579_v42 = vld [vmem:[#allocation11 + $0xa8] sm:$0xff]   ;;  %v4580_v27 = vld [vmem:[#allocation11 + $0x70] sm:$0xff]  }
 0xf35   : > { %2904 = vmatmul.mubr.bf16.gmra.mrb[52].mxu1 %v2644_v24  ;;  %2977 = vmatmul.mubr.bf16.gmra.mrb[52].mxu0 %v2644_v24  ;;  %v4581_v24 = vld [vmem:[#allocation11 + $0xf0] sm:$0xff]  }
 0xf36   : > { %2913 = vmatprep.mubr.bf16.mxu1 %v5051_v63  ;;  %2986 = vmatprep.mubr.bf16.mxu0 %v5051_v63 }
 0xf38   : > { %v2576_v46 = vpop.xlane.xlu0 %2575 }
 0xf39   : > { %v2587_v50 = vmul.f32 0.0078125, %v2576_v46  ;;  %v4582_v46 = vld [vmem:[#allocation11 + $0x30] sm:$0xff]  }
 0xf3a   : > { %v2578_v51 = vpop.xlane.xlu1 %2577 }
 0xf3b   : > { %v2595_v52 = vadd.f32 1e-05, %v2587_v50  ;;  %v2588_v6 = vmul.f32 0.0078125, %v2578_v51  ;;  %v4583_v50 = vld [vmem:[#allocation11 + $0xb0] sm:$0xff]   ;;  %v4584_v51 = vld [vmem:[#allocation11 + $0x78] sm:$0xff]  }
 0xf3c   : > { %v2580_v9 = vpop.xlane.xlu0 %2579 }
 0xf3d   : > { %4740 = vrsqrt.f32 %v2595_v52  ;;  %v2596_v56 = vadd.f32 1e-05, %v2588_v6  ;;  %v2589_v57 = vmul.f32 0.0078125, %v2580_v9  ;;  %v4585_v52 = vld [vmem:[#allocation11 + $0xf8] sm:$0xff]  }
 0xf3e   : > { %v2582_v25 = vpop.xlane.xlu1 %2581  ;;  %v4586_v6 = vld [vmem:[#allocation11 + $0x38] sm:$0xff]  }
 0xf3f   : > { %4742 = vrsqrt.f32 %v2596_v56  ;;  %v2597_v58 = vadd.f32 1e-05, %v2589_v57  ;;  %v2590_v59 = vmul.f32 0.0078125, %v2582_v25  ;;  %v4587_v9 = vld [vmem:[#allocation11 + $0xb8] sm:$0xff]   ;;  %v2681_v56 = vlaneseq }
 0xf41   : > { %4744 = vrsqrt.f32 %v2597_v58  ;;  %v2598_v41 = vadd.f32 1e-05, %v2590_v59  ;;  %v2682_v57 = vshrl.u32 %v2681_v56, 7  ;;  %v2679_v59 = vld [vmem:[%s6327_s8] sm:$0xf] }
 0xf43   : > { %4746 = vrsqrt.f32 %v2598_v41  ;;  %v2683_v25 = vsub.s32 0, %v2682_v57  ;;  %v2691_v58 = vsub.s32 2, %v2682_v57  ;;  %v2687_v41 = vsub.s32 1, %v2682_v57 }
 0xf47   : > { %v4741_v3 = vpop.eup %4740 }
 0xf48   : > { %v2611_v14 = vmul.f32 %v4741_v3, %v5915_v5  ;;  %v5957_v3 = vrot.slane %v2679_v59, %v2683_v25 }
 0xf49   : > { %v4743_v37 = vpop.eup %4742 }
 0xf4a   : > { %v2612_v15 = vmul.f32 %v4743_v37, %v5918_v4  ;;  %v2625_v35 = vmul.f32 %v3930_v33, %v2611_v14  ;;  %v5959_v14 = vrot.slane %v2679_v59, %v2691_v58  ;;  %v2695_v37 = vsub.s32 3, %v2682_v57 }
 0xf4b   : > { %v4745_v45 = vpop.eup %4744 }
 0xf4c   : > { %v2626_v36 = vmul.f32 %v3930_v33, %v2612_v15  ;;  %v2639_v34 = vadd.f32 %v3931_v23, %v2625_v35  ;;  %v2613_v44 = vmul.f32 %v4745_v45, %v5923_v18  ;;  %v4558_v18 = vld [vmem:[#allocation11] sm:$0xff]   ;;  %v5961_v45 = vrot.slane %v2679_v59, %v2687_v41 }
 0xf4d   : > { %v4747_v39 = vpop.eup %4746  ;;  %4096 = vmatpush3.bf16.msra.mxu1 %v4558_v18 }
 0xf4e   : > { %v2640_v31 = vadd.f32 %v3931_v23, %v2626_v36  ;;  %v2614_v47 = vmul.f32 %v4747_v39, %v5928_v19  ;;  %v2627_v48 = vmul.f32 %v3930_v33, %v2613_v44  ;;  %v4559_v19 = vld [vmem:[#allocation11 + $0x80] sm:$0xff]   ;;  %4097 = vmatprep.subr.bf16.mxu1 %v4560_v61  ;;  %v5967_v44 = vrot.slane %v2679_v59, %v2695_v37 }
 0xf4f   : > { %4136 = vmatpush3.bf16.msra.mxu0 %v4559_v19 }
 0xf50   : > { %v2645_v10 = vpack.c.bf16 %v2640_v31, %v2639_v34  ;;  %v2628_v29 = vmul.f32 %v3930_v33, %v2614_v47  ;;  %v2641_v4 = vadd.f32 %v3931_v23, %v2627_v48  ;;  %v4562_v33 = vld [vmem:[#allocation11 + $0x8] sm:$0xff]   ;;  %4137 = vmatprep.subr.bf16.mxu0 %v4561_v0 }
 0xf51   : > { %4098 = vmatpush3.bf16.msra.mxu1 %v4562_v33 }
 0xf52   : > { %2914 = vmatmul.mubr.bf16.gmra.mrb[56].mxu1 %v2645_v10  ;;  %2987 = vmatmul.mubr.bf16.gmra.mrb[56].mxu0 %v2645_v10  ;;  %v2642_v5 = vadd.f32 %v3931_v23, %v2628_v29  ;;  %v4569_v23 = vld [vmem:[#allocation11 + $0xd8] sm:$0xff]  }
 0xf53   : > { %2923 = vmatprep.mubr.bf16.mxu1 %v5051_v63  ;;  %2996 = vmatprep.mubr.bf16.mxu0 %v5051_v63  ;;  %v4564_v63 = vld [vmem:[#allocation11 + $0x50] sm:$0xff]  }
 0xf54   : > { %v2646_v49 = vpack.c.bf16 %v2642_v5, %v2641_v4  ;;  %4138 = vmatpush3.bf16.msra.mxu0 %v4563_v62  ;;  %4099 = vmatprep.subr.bf16.mxu1 %v4564_v63 }
 0xf55   : > { %4139 = vmatprep.subr.bf16.mxu0 %v4565_v1  ;;  %4100 = vmatpush3.bf16.msra.mxu1 %v4566_v40 }
 0xf56   : > { %4101 = vmatprep.subr.bf16.mxu1 %v4568_v22 }
 0xf58   : > { %4140 = vmatpush3.bf16.msra.mxu0 %v4567_v21 }
 0xf59   : > { %4141 = vmatprep.subr.bf16.mxu0 %v4569_v23  ;;  %4102 = vmatpush3.bf16.msra.mxu1 %v4570_v26 }
 0xf5a   : > { %2924 = vmatmul.mubr.bf16.gmra.mrb[60].mxu1 %v2646_v49  ;;  %2997 = vmatmul.mubr.bf16.gmra.mrb[60].mxu0 %v2646_v49 }
 0xf5b   : > { %4103 = vmatprep.subr.bf16.mxu1 %v4572_v30 }
 0xf5c   : > { %4142 = vmatpush3.bf16.msra.mxu0 %v4571_v28 }
 0xf5d   : > { %4143 = vmatprep.subr.bf16.mxu0 %v4573_v54  ;;  %4104 = vmatpush3.bf16.msra.mxu1 %v4574_v7 }
 0xf5e   : > { %4105 = vmatprep.subr.bf16.mxu1 %v4576_v13 }
 0xf60   : > { %4144 = vmatpush3.bf16.msra.mxu0 %v4575_v11 }
 0xf61   : > { %4145 = vmatprep.subr.bf16.mxu0 %v4577_v43  ;;  %4106 = vmatpush3.bf16.msra.mxu1 %v4578_v38 }
 0xf62   : > { %4107 = vmatprep.subr.bf16.mxu1 %v4580_v27 }
 0xf64   : > { %4146 = vmatpush3.bf16.msra.mxu0 %v4579_v42 }
 0xf65   : > { %4147 = vmatprep.subr.bf16.mxu0 %v4581_v24  ;;  %4108 = vmatpush3.bf16.msra.mxu1 %v4582_v46 }
 0xf66   : > { %4109 = vmatprep.subr.bf16.mxu1 %v4584_v51 }
 0xf68   : > { %4148 = vmatpush3.bf16.msra.mxu0 %v4583_v50 }
 0xf69   : > { %4149 = vmatprep.subr.bf16.mxu0 %v4585_v52  ;;  %4110 = vmatpush3.bf16.msra.mxu1 %v4586_v6 }
 0xf6c   : > { %4150 = vmatpush3.bf16.msra.mxu0 %v4587_v9 }
0x1000   : > { %v2895_v15 = vpop.f32.mrb[48].mxu1  ;;  %v2968_v35 = vpop.f32.mrb[48].mxu0 }
0x1001   : > { %v2896_v36 = vadd.f32 %v2895_v15, %v5957_v3  ;;  %v5965_v39 = vadd.f32 %v2968_v35, %v5959_v14  ;;  %v2897_v34 = vpop.f32.mrb[49].mxu1  ;;  %v2970_v31 = vpop.f32.mrb[49].mxu0 }
0x1002   : > { %v2899_v47 = vpop.f32.mrb[50].mxu1  ;;  %v2972_v10 = vpop.f32.mrb[50].mxu0  ;;  %v5971_v5 = vadd.f32 %v2897_v34, %v5961_v45  ;;  %v5984_v0 = vadd.f32 %v2970_v31, %v5967_v44 }
0x1003   : > { %v3039_v29 = vmul.f32 0.044715, %v2896_v36  ;;  %v3041_v48 = vmul.f32 0.044715, %v5965_v39  ;;  %v5974_v4 = vadd.f32 %v2899_v47, %v5957_v3  ;;  %v5977_v49 = vadd.f32 %v2972_v10, %v5959_v14  ;;  %v2901_v12 = vpop.f32.mrb[51].mxu1  ;;  %v2974_v17 = vpop.f32.mrb[51].mxu0 }
0x1004   : > { %v5981_v61 = vadd.f32 %v2901_v12, %v5961_v45  ;;  %v5988_v62 = vadd.f32 %v2974_v17, %v5967_v44  ;;  %v3040_v21 = vmul.f32 0.044715, %v5971_v5  ;;  %v3042_v43 = vmul.f32 0.044715, %v5984_v0 }
0x1005   : > { %v3071_v18 = vmul.f32 %v3039_v29, %v2896_v36  ;;  %v3073_v19 = vmul.f32 %v3041_v48, %v5965_v39  ;;  %v3043_v33 = vmul.f32 0.044715, %v5974_v4  ;;  %v3045_v40 = vmul.f32 0.044715, %v5977_v49 }
0x1006   : > { %v3044_v23 = vmul.f32 0.044715, %v5981_v61  ;;  %v3046_v42 = vmul.f32 0.044715, %v5988_v62  ;;  %v3072_v56 = vmul.f32 %v3040_v21, %v5971_v5  ;;  %v3074_v15 = vmul.f32 %v3042_v43, %v5984_v0 }
0x1007   : > { %v3103_v63 = vmul.f32 %v3071_v18, %v2896_v36  ;;  %v3105_v1 = vmul.f32 %v3073_v19, %v5965_v39  ;;  %v3075_v22 = vmul.f32 %v3043_v33, %v5974_v4  ;;  %v3077_v7 = vmul.f32 %v3045_v40, %v5977_v49 }
0x1008   : > { %v2905_v26 = vpop.f32.mrb[52].mxu1  ;;  %v2978_v28 = vpop.f32.mrb[52].mxu0  ;;  %v3076_v25 = vmul.f32 %v3044_v23, %v5981_v61  ;;  %v3078_v34 = vmul.f32 %v3046_v42, %v5988_v62  ;;  %v3007_v48 = vmul.f32 0.5, %v2896_v36  ;;  %v3104_v12 = vmul.f32 %v3072_v56, %v5971_v5 }
0x1009   : > { %v3135_v30 = vadd.f32 %v3103_v63, %v2896_v36  ;;  %v3137_v54 = vadd.f32 %v3105_v1, %v5965_v39  ;;  %v2907_v11 = vpop.f32.mrb[53].mxu1  ;;  %v2980_v13 = vpop.f32.mrb[53].mxu0  ;;  %v3107_v38 = vmul.f32 %v3075_v22, %v5974_v4  ;;  %v6001_v27 = vadd.f32 %v2905_v26, %v5957_v3 }
0x100a   : > { %v2909_v24 = vpop.f32.mrb[54].mxu1  ;;  %v2982_v46 = vpop.f32.mrb[54].mxu0  ;;  %v3109_v52 = vmul.f32 %v3077_v7, %v5977_v49  ;;  %v6008_v58 = vadd.f32 %v2978_v28, %v5959_v14  ;;  %v6013_v37 = vadd.f32 %v2907_v11, %v5961_v45  ;;  %v6019_v10 = vadd.f32 %v2980_v13, %v5967_v44 }
0x100b   : > { %v3167_v50 = vmul.f32 0.7978846, %v3135_v30  ;;  %v3169_v51 = vmul.f32 0.7978846, %v3137_v54  ;;  %v2911_v6 = vpop.f32.mrb[55].mxu1  ;;  %v2984_v9 = vpop.f32.mrb[55].mxu0  ;;  %v3139_v57 = vadd.f32 %v3107_v38, %v5974_v4  ;;  %v6022_v29 = vadd.f32 %v2909_v24, %v5957_v3 }
0x100c   : > { %v3141_v59 = vadd.f32 %v3109_v52, %v5977_v49  ;;  %v3047_v41 = vmul.f32 0.044715, %v6001_v27  ;;  %v3048_v47 = vmul.f32 0.044715, %v6013_v37  ;;  %v3108_v17 = vmul.f32 %v3076_v25, %v5981_v61 }
0x100d   : > { %4748 = vtanh.f32 %v3167_v50  ;;  %v3171_v35 = vmul.f32 0.7978846, %v3139_v57  ;;  %v3049_v19 = vmul.f32 0.044715, %v6008_v58  ;;  %v3050_v33 = vmul.f32 0.044715, %v6019_v10 }
0x100e   : > { %4750 = vtanh.f32 %v3169_v51  ;;  %v3173_v31 = vmul.f32 0.7978846, %v3141_v59  ;;  %v3079_v18 = vmul.f32 %v3047_v41, %v6001_v27  ;;  %v3009_v63 = vmul.f32 0.5, %v5965_v39 }
0x100f   : > { %4752 = vtanh.f32 %v3171_v35  ;;  %v3080_v1 = vmul.f32 %v3048_v47, %v6013_v37  ;;  %v6032_v40 = vadd.f32 %v2911_v6, %v5961_v45  ;;  %v6035_v36 = vadd.f32 %v2984_v9, %v5967_v44 }
0x1010   : > { %4754 = vtanh.f32 %v3173_v31  ;;  %v3106_v21 = vmul.f32 %v3074_v15, %v5984_v0  ;;  %v3011_v22 = vmul.f32 0.5, %v5974_v4  ;;  %v3110_v23 = vmul.f32 %v3078_v34, %v5988_v62 }
0x1011   : > { %v3051_v26 = vmul.f32 0.044715, %v6022_v29  ;;  %v3082_v28 = vmul.f32 %v3050_v33, %v6019_v10  ;;  %v3052_v39 = vmul.f32 0.044715, %v6032_v40  ;;  %v3054_v30 = vmul.f32 0.044715, %v6035_v36 }
0x1012   : > { %v3136_v54 = vadd.f32 %v3104_v12, %v5971_v5  ;;  %v3013_v7 = vmul.f32 0.5, %v5977_v49  ;;  %v3111_v11 = vmul.f32 %v3079_v18, %v6001_v27  ;;  %v3081_v13 = vmul.f32 %v3049_v19, %v6008_v58 }
0x1013   : > { %v3140_v4 = vadd.f32 %v3108_v17, %v5981_v61  ;;  %v3112_v43 = vmul.f32 %v3080_v1, %v6013_v37  ;;  %v3084_v38 = vmul.f32 %v3052_v39, %v6032_v40  ;;  %v3086_v42 = vmul.f32 %v3054_v30, %v6035_v36 }
0x1014   : > { %v3168_v24 = vmul.f32 0.7978846, %v3136_v54  ;;  %v6053_v51 = vadd.f32 %v2982_v46, %v5959_v14  ;;  %v3138_v49 = vadd.f32 %v3106_v21, %v5984_v0  ;;  %v3142_v6 = vadd.f32 %v3110_v23, %v5988_v62 }
0x1015   : > { %v3172_v52 = vmul.f32 0.7978846, %v3140_v4  ;;  %v3114_v56 = vmul.f32 %v3082_v28, %v6019_v10  ;;  %v3083_v57 = vmul.f32 %v3051_v26, %v6022_v29  ;;  %v3116_v25 = vmul.f32 %v3084_v38, %v6032_v40 }
0x1016   : > { %4756 = vtanh.f32 %v3168_v24  ;;  %v3170_v59 = vmul.f32 0.7978846, %v3138_v49  ;;  %v3174_v41 = vmul.f32 0.7978846, %v3142_v6  ;;  %v3113_v46 = vmul.f32 %v3081_v13, %v6008_v58 }
0x1017   : > { %v4749_v50 = vpop.eup %4748  ;;  %4758 = vtanh.f32 %v3172_v52  ;;  %v3118_v34 = vmul.f32 %v3086_v42, %v6035_v36  ;;  %v3144_v47 = vadd.f32 %v3112_v43, %v6013_v37  ;;  %v3053_v17 = vmul.f32 0.044715, %v6053_v51 }
0x1018   : > { %v4751_v9 = vpop.eup %4750  ;;  %v3231_v15 = vadd.f32 1.0, %v4749_v50  ;;  %4760 = vtanh.f32 %v3170_v59  ;;  %v3148_v19 = vadd.f32 %v3116_v25, %v6032_v40  ;;  %v3115_v33 = vmul.f32 %v3083_v57, %v6022_v29 }
0x1019   : > { %v4753_v35 = vpop.eup %4752  ;;  %v3233_v31 = vadd.f32 1.0, %v4751_v9  ;;  %4762 = vtanh.f32 %v3174_v41  ;;  %v3176_v21 = vmul.f32 0.7978846, %v3144_v47  ;;  %v3146_v39 = vadd.f32 %v3114_v56, %v6019_v10 }
0x101a   : > { %v4755_v12 = vpop.eup %4754  ;;  %v3235_v18 = vadd.f32 1.0, %v4753_v35  ;;  %v6066_v23 = vmul.f32 %v3231_v15, %v3007_v48  ;;  %v3180_v28 = vmul.f32 0.7978846, %v3148_v19  ;;  %v3150_v13 = vadd.f32 %v3118_v34, %v6035_v36 }
0x101b   : > { %v3237_v1 = vadd.f32 1.0, %v4755_v12  ;;  %v6071_v30 = vmul.f32 %v3233_v31, %v3009_v63  ;;  %4764 = vtanh.f32 %v3176_v21  ;;  %v3178_v43 = vmul.f32 0.7978846, %v3146_v39 }
0x101c   : > { %v6068_v26 = vmul.f32 %v3235_v18, %v3011_v22  ;;  %4766 = vtanh.f32 %v3180_v28  ;;  %v3182_v22 = vmul.f32 0.7978846, %v3150_v13  ;;  %v3143_v38 = vadd.f32 %v3111_v11, %v6001_v27 }
0x101d   : > { %v6073_v54 = vmul.f32 %v3237_v1, %v3013_v7  ;;  %v3147_v42 = vadd.f32 %v3115_v33, %v6022_v29  ;;  %v3085_v63 = vmul.f32 %v3053_v17, %v6053_v51  ;;  %4768 = vtanh.f32 %v3178_v43 }
0x101e   : > { %v3295_v4 = vpack.c.bf16 %v6068_v26, %v6066_v23  ;;  %v3145_v7 = vadd.f32 %v3113_v46, %v6008_v58  ;;  %4770 = vtanh.f32 %v3182_v22  ;;  %v3175_v50 = vmul.f32 0.7978846, %v3143_v38 }
0x101f   : > { %v3297_v48 = vpack.c.bf16 %v6073_v54, %v6071_v30  ;;  %v3179_v52 = vmul.f32 0.7978846, %v3147_v42  ;;  %v3008_v6 = vmul.f32 0.5, %v5971_v5  ;;  %v3012_v56 = vmul.f32 0.5, %v5981_v61 }
0x1020   : > { %v4757_v24 = vpop.eup %4756  ;;  %4772 = vtanh.f32 %v3175_v50  ;;  %v3117_v25 = vmul.f32 %v3085_v63, %v6053_v51  ;;  %v3177_v35 = vmul.f32 0.7978846, %v3145_v7  ;;  %v3010_v17 = vmul.f32 0.5, %v5984_v0 }
0x1021   : > { %v4759_v49 = vpop.eup %4758  ;;  %v3232_v9 = vadd.f32 1.0, %v4757_v24  ;;  %4774 = vtanh.f32 %v3179_v52  ;;  %v3014_v18 = vmul.f32 0.5, %v5988_v62  ;;  %v3016_v43 = vmul.f32 0.5, %v6013_v37 }
0x1022   : > { %v3236_v57 = vadd.f32 1.0, %v4759_v49  ;;  %v4761_v11 = vpop.eup %4760  ;;  %v3149_v42 = vadd.f32 %v3117_v25, %v6053_v51  ;;  %v3020_v7 = vmul.f32 0.5, %v6032_v40  ;;  %v3018_v24 = vmul.f32 0.5, %v6019_v10 }
0x1023   : > { %v3264_v59 = vmul.f32 %v3232_v9, %v3008_v6  ;;  %v4763_v46 = vpop.eup %4762  ;;  %v3234_v31 = vadd.f32 1.0, %v4761_v11  ;;  %4776 = vtanh.f32 %v3177_v35  ;;  %v3022_v49 = vmul.f32 0.5, %v6035_v36 }
0x1024   : > { %v3268_v34 = vmul.f32 %v3236_v57, %v3012_v56  ;;  %v3238_v19 = vadd.f32 1.0, %v4763_v46  ;;  %v3015_v6 = vmul.f32 0.5, %v6001_v27  ;;  %v3019_v40 = vmul.f32 0.5, %v6022_v29 }
0x1025   : > { %v2915_v41 = vpop.f32.mrb[56].mxu1  ;;  %v2988_v15 = vpop.f32.mrb[56].mxu0  ;;  %v3266_v38 = vmul.f32 %v3234_v31, %v3010_v17  ;;  %v6116_v10 = vmul.f32 0.5, %v6008_v58  ;;  %v6123_v36 = vmul.f32 0.5, %v6053_v51  ;;  %v3181_v27 = vmul.f32 0.7978846, %v3149_v42 }
0x1026   : > { %v6088_v47 = vadd.f32 %v2915_v41, %v5957_v3  ;;  %v6091_v5 = vadd.f32 %v2988_v15, %v5959_v14  ;;  %v2917_v61 = vpop.f32.mrb[57].mxu1  ;;  %v2990_v12 = vpop.f32.mrb[57].mxu0  ;;  %v3296_v26 = vpack.c.bf16 %v3268_v34, %v3264_v59  ;;  %v3270_v0 = vmul.f32 %v3238_v19, %v3014_v18 }
0x1027   : > { %v6096_v33 = vadd.f32 %v2917_v61, %v5961_v45  ;;  %v2919_v1 = vpop.f32.mrb[58].mxu1  ;;  %v2992_v21 = vpop.f32.mrb[58].mxu0  ;;  %v6099_v28 = vadd.f32 %v2990_v12, %v5967_v44  ;;  %4778 = vtanh.f32 %v3181_v27 }
0x1028   : > { %v4765_v23 = vpop.eup %4764  ;;  %v2921_v39 = vpop.f32.mrb[59].mxu1  ;;  %v3055_v62 = vmul.f32 0.044715, %v6088_v47  ;;  %3606 = vmatprep.mubr.bf16.mxu1 %v3296_v26  ;;  %v3057_v63 = vmul.f32 0.044715, %v6091_v5  ;;  %v3298_v52 = vpack.c.bf16 %v3270_v0, %v3266_v38  ;;  %v6112_v57 = vadd.f32 %v2919_v1, %v5957_v3 }
0x1029   : > { %v2994_v13 = vpop.f32.mrb[59].mxu0  ;;  %v4767_v22 = vpop.eup %4766  ;;  %3607 = vmatmul.mubr.bf16.vlgmr.msra.gmra.mrb[64].mxu1 %v3295_v4  ;;  %v3056_v37 = vmul.f32 0.044715, %v6096_v33  ;;  %v3058_v56 = vmul.f32 0.044715, %v6099_v28  ;;  %v6120_v11 = vadd.f32 %v2921_v39, %v5961_v45  ;;  %v3240_v15 = vadd.f32 1.0, %v4765_v23 }
0x102a   : > { %v4769_v50 = vpop.eup %4768  ;;  %3671 = vmatprep.mubr.bf16.mxu0 %v3298_v52  ;;  %v3087_v4 = vmul.f32 %v3055_v62, %v6088_v47  ;;  %v3089_v58 = vmul.f32 %v3057_v63, %v6091_v5  ;;  %v6130_v29 = vadd.f32 %v2994_v13, %v5967_v44  ;;  %v3244_v35 = vadd.f32 1.0, %v4767_v22 }
0x102b   : > { %v4771_v9 = vpop.eup %4770  ;;  %3672 = vmatmul.mubr.bf16.vlgmr.msra.gmra.mrb[64].mxu0 %v3297_v48  ;;  %v3088_v51 = vmul.f32 %v3056_v37, %v6096_v33  ;;  %v6134_v61 = vadd.f32 %v2992_v21, %v5959_v14  ;;  %v3242_v12 = vadd.f32 1.0, %v4769_v50  ;;  %v3090_v54 = vmul.f32 %v3058_v56, %v6099_v28 }
0x102c   : > { %v4773_v41 = vpop.eup %4772  ;;  %v3246_v17 = vadd.f32 1.0, %v4771_v9  ;;  %v3059_v48 = vmul.f32 0.044715, %v6112_v57  ;;  %v3272_v19 = vmul.f32 %v3240_v15, %v3016_v43  ;;  %v3276_v1 = vmul.f32 %v3244_v35, %v3020_v7 }
0x102d   : > { %v2925_v25 = vpop.f32.mrb[60].mxu1  ;;  %v2998_v59 = vpop.f32.mrb[60].mxu0  ;;  %v3060_v39 = vmul.f32 0.044715, %v6120_v11  ;;  %v3274_v13 = vmul.f32 %v3242_v12, %v3018_v24  ;;  %v3239_v38 = vadd.f32 1.0, %v4773_v41  ;;  %v3119_v42 = vmul.f32 %v3087_v4, %v6088_v47 }
0x102e   : > { %v2927_v46 = vpop.f32.mrb[61].mxu1  ;;  %v3000_v34 = vpop.f32.mrb[61].mxu0  ;;  %v3278_v22 = vmul.f32 %v3246_v17, %v3022_v49  ;;  %v3062_v21 = vmul.f32 0.044715, %v6130_v29  ;;  %v3300_v0 = vpack.c.bf16 %v3276_v1, %v3272_v19  ;;  %v3061_v63 = vmul.f32 0.044715, %v6134_v61 }
0x102f   : > { %v4775_v31 = vpop.eup %4774  ;;  %v2929_v18 = vpop.f32.mrb[62].mxu1  ;;  %v3271_v52 = vmul.f32 %v3239_v38, %v3015_v6  ;;  %v6143_v37 = vadd.f32 %v2925_v25, %v5957_v3  ;;  %v6146_v24 = vadd.f32 %v2998_v59, %v5959_v14  ;;  %v6149_v49 = vadd.f32 %v2927_v46, %v5961_v45 }
0x1030   : > { %v3002_v30 = vpop.f32.mrb[62].mxu0  ;;  %v2931_v23 = vpop.f32.mrb[63].mxu1  ;;  %v3243_v62 = vadd.f32 1.0, %v4775_v31  ;;  %v3302_v50 = vpack.c.bf16 %v3278_v22, %v3274_v13  ;;  %3614 = vmatprep.mubr.bf16.mxu1 %v3300_v0  ;;  %v3091_v9 = vmul.f32 %v3059_v48, %v6112_v57  ;;  %v3092_v56 = vmul.f32 %v3060_v39, %v6120_v11 }
0x1031   : > { %v3004_v26 = vpop.f32.mrb[63].mxu0  ;;  %v4777_v43 = vpop.eup %4776  ;;  %v6154_v4 = vadd.f32 %v3000_v34, %v5967_v44  ;;  %v6157_v6 = vadd.f32 %v2929_v18, %v5957_v3  ;;  %v6161_v25 = vadd.f32 %v3002_v30, %v5959_v14  ;;  %v6164_v59 = vadd.f32 %v2931_v23, %v5961_v45 }
0x1032   : > { %v3275_v7 = vmul.f32 %v3243_v62, %v3019_v40  ;;  %3679 = vmatprep.mubr.bf16.mxu0 %v3302_v50  ;;  %v3094_v40 = vmul.f32 %v3062_v21, %v6130_v29  ;;  %v3120_v41 = vmul.f32 %v3088_v51, %v6096_v33  ;;  %v3093_v15 = vmul.f32 %v3061_v63, %v6134_v61 }
0x1033   : > { %v3241_v35 = vadd.f32 1.0, %v4777_v43  ;;  %v3064_v46 = vmul.f32 0.044715, %v6149_v49  ;;  %v3063_v3 = vmul.f32 0.044715, %v6143_v37  ;;  %v6173_v14 = vadd.f32 %v3004_v26, %v5967_v44  ;;  %v4779_v26 = vpop.eup %4778 }
0x1034   : > { %v3299_v27 = vpack.c.bf16 %v3275_v7, %v3271_v52  ;;  %v3065_v34 = vmul.f32 0.044715, %v6146_v24  ;;  %v3066_v31 = vmul.f32 0.044715, %v6154_v4  ;;  %v3121_v45 = vmul.f32 %v3089_v58, %v6091_v5 }
0x1035   : > { %v3124_v12 = vmul.f32 %v3092_v56, %v6120_v11  ;;  %v3067_v51 = vmul.f32 0.044715, %v6157_v6  ;;  %v3068_v17 = vmul.f32 0.044715, %v6164_v59  ;;  %v3122_v18 = vmul.f32 %v3090_v54, %v6099_v28 }
0x1036   : > { %3615 = vmatmul.mubr.bf16.gmra.mrb[68].mxu1 %v3299_v27  ;;  %v3123_v30 = vmul.f32 %v3091_v9, %v6112_v57  ;;  %v3126_v48 = vmul.f32 %v3094_v40, %v6130_v29  ;;  %v3069_v19 = vmul.f32 0.044715, %v6161_v25  ;;  %v3125_v1 = vmul.f32 %v3093_v15, %v6134_v61 }
0x1037   : > { %v3273_v44 = vmul.f32 %v3241_v35, %v6116_v10  ;;  %v3096_v58 = vmul.f32 %v3064_v46, %v6149_v49  ;;  %v3070_v23 = vmul.f32 0.044715, %v6173_v14  ;;  %v3095_v39 = vmul.f32 %v3063_v3, %v6143_v37 }
0x1038   : > { %v3097_v13 = vmul.f32 %v3065_v34, %v6146_v24  ;;  %v3098_v54 = vmul.f32 %v3066_v31, %v6154_v4  ;;  %v3152_v22 = vadd.f32 %v3120_v41, %v6096_v33  ;;  %v3245_v38 = vadd.f32 1.0, %v4779_v26 }
0x1039   : > { %v3099_v21 = vmul.f32 %v3067_v51, %v6157_v6  ;;  %v3100_v0 = vmul.f32 %v3068_v17, %v6164_v59  ;;  %v3156_v10 = vadd.f32 %v3124_v12, %v6120_v11  ;;  %v3101_v62 = vmul.f32 %v3069_v19, %v6161_v25 }
0x103a   : > { %v3184_v63 = vmul.f32 0.7978846, %v3152_v22  ;;  %v3154_v50 = vadd.f32 %v3122_v18, %v6099_v28  ;;  %v3158_v52 = vadd.f32 %v3126_v48, %v6130_v29  ;;  %v3277_v43 = vmul.f32 %v3245_v38, %v6123_v36 }
0x103b   : > { %v3128_v7 = vmul.f32 %v3096_v58, %v6149_v49  ;;  %v3102_v9 = vmul.f32 %v3070_v23, %v6173_v14  ;;  %v3188_v56 = vmul.f32 0.7978846, %v3156_v10  ;;  %v3151_v41 = vadd.f32 %v3119_v42, %v6088_v47 }
0x103c   : > { %4780 = vtanh.f32 %v3184_v63  ;;  %v3186_v40 = vmul.f32 0.7978846, %v3154_v50  ;;  %v3190_v27 = vmul.f32 0.7978846, %v3158_v52  ;;  %v3301_v15 = vpack.c.bf16 %v3277_v43, %v3273_v44 }
0x103d   : > { %v3132_v35 = vmul.f32 %v3100_v0, %v6164_v59  ;;  %4782 = vtanh.f32 %v3188_v56  ;;  %v3155_v46 = vadd.f32 %v3123_v30, %v6112_v57  ;;  %v3130_v3 = vmul.f32 %v3098_v54, %v6154_v4 }
0x103e   : > { %4784 = vtanh.f32 %v3186_v40  ;;  %v3183_v36 = vmul.f32 0.7978846, %v3151_v41  ;;  %v3153_v34 = vadd.f32 %v3121_v45, %v6091_v5  ;;  %3680 = vmatmul.mubr.bf16.gmra.mrb[68].mxu0 %v3301_v15  ;;  %v3134_v31 = vmul.f32 %v3102_v9, %v6173_v14 }
0x103f   : > { %4786 = vtanh.f32 %v3190_v27  ;;  %v3187_v12 = vmul.f32 0.7978846, %v3155_v46  ;;  %v3157_v51 = vadd.f32 %v3125_v1, %v6134_v61  ;;  %v3127_v42 = vmul.f32 %v3095_v39, %v6143_v37 }
0x1040   : > { %4788 = vtanh.f32 %v3183_v36  ;;  %v3185_v17 = vmul.f32 0.7978846, %v3153_v34  ;;  %v3160_v18 = vadd.f32 %v3128_v7, %v6149_v49  ;;  %v3131_v30 = vmul.f32 %v3099_v21, %v6157_v6 }
0x1041   : > { %4790 = vtanh.f32 %v3187_v12  ;;  %v3189_v48 = vmul.f32 0.7978846, %v3157_v51  ;;  %v3164_v19 = vadd.f32 %v3132_v35, %v6164_v59  ;;  %v3129_v45 = vmul.f32 %v3097_v13, %v6146_v24 }
0x1042   : > { %4792 = vtanh.f32 %v3185_v17  ;;  %v3192_v44 = vmul.f32 0.7978846, %v3160_v18  ;;  %v3162_v58 = vadd.f32 %v3130_v3, %v6154_v4  ;;  %v3133_v1 = vmul.f32 %v3101_v62, %v6161_v25 }
0x1043   : > { %4794 = vtanh.f32 %v3189_v48  ;;  %v3196_v23 = vmul.f32 0.7978846, %v3164_v19  ;;  %v3166_v26 = vadd.f32 %v3134_v31, %v6173_v14  ;;  %v3159_v54 = vadd.f32 %v3127_v42, %v6143_v37 }
0x1044   : > { %4796 = vtanh.f32 %v3192_v44  ;;  %v3194_v39 = vmul.f32 0.7978846, %v3162_v58  ;;  %v3024_v22 = vmul.f32 0.5, %v6096_v33  ;;  %v3163_v13 = vadd.f32 %v3131_v30, %v6157_v6 }
0x1045   : > { %4798 = vtanh.f32 %v3196_v23  ;;  %v3198_v38 = vmul.f32 0.7978846, %v3166_v26  ;;  %v3028_v0 = vmul.f32 0.5, %v6120_v11  ;;  %v3191_v10 = vmul.f32 0.7978846, %v3159_v54 }
0x1046   : > { %v4781_v21 = vpop.eup %4780  ;;  %4800 = vtanh.f32 %v3194_v39  ;;  %v3161_v62 = vadd.f32 %v3129_v45, %v6146_v24  ;;  %v3195_v52 = vmul.f32 0.7978846, %v3163_v13  ;;  %v3165_v43 = vadd.f32 %v3133_v1, %v6161_v25 }
0x1047   : > { %v4783_v63 = vpop.eup %4782  ;;  %v3248_v50 = vadd.f32 1.0, %v4781_v21  ;;  %4802 = vtanh.f32 %v3198_v38  ;;  %v3026_v33 = vmul.f32 0.5, %v6099_v28  ;;  %v3030_v27 = vmul.f32 0.5, %v6130_v29 }
0x1048   : > { %v4785_v7 = vpop.eup %4784  ;;  %v3252_v9 = vadd.f32 1.0, %v4783_v63  ;;  %4804 = vtanh.f32 %v3191_v10  ;;  %v3193_v56 = vmul.f32 0.7978846, %v3161_v62  ;;  %v3197_v41 = vmul.f32 0.7978846, %v3165_v43 }
0x1049   : > { %v4787_v40 = vpop.eup %4786  ;;  %v3250_v11 = vadd.f32 1.0, %v4785_v7  ;;  %4806 = vtanh.f32 %v3195_v52  ;;  %v3280_v35 = vmul.f32 %v3248_v50, %v3024_v22  ;;  %v3023_v34 = vmul.f32 0.5, %v6088_v47 }
0x104a   : > { %v4789_v15 = vpop.eup %4788  ;;  %v3284_v46 = vmul.f32 %v3252_v9, %v3028_v0  ;;  %v3254_v3 = vadd.f32 1.0, %v4787_v40  ;;  %4808 = vtanh.f32 %v3193_v56  ;;  %v3027_v31 = vmul.f32 0.5, %v6112_v57 }
0x104b   : > { %v4791_v36 = vpop.eup %4790  ;;  %v3247_v12 = vadd.f32 1.0, %v4789_v15  ;;  %4810 = vtanh.f32 %v3197_v41  ;;  %v3282_v42 = vmul.f32 %v3250_v11, %v3026_v33  ;;  %v3025_v30 = vmul.f32 0.5, %v6091_v5 }
0x104c   : > { %v4793_v28 = vpop.eup %4792  ;;  %v3304_v51 = vpack.c.bf16 %v3284_v46, %v3280_v35  ;;  %v3286_v17 = vmul.f32 %v3254_v3, %v3030_v27  ;;  %v3251_v29 = vadd.f32 1.0, %v4791_v36  ;;  %v3029_v48 = vmul.f32 0.5, %v6134_v61 }
0x104d   : > { %v4795_v18 = vpop.eup %4794  ;;  %v3249_v19 = vadd.f32 1.0, %v4793_v28  ;;  %v3279_v58 = vmul.f32 %v3247_v12, %v3023_v34  ;;  %v3032_v23 = vmul.f32 0.5, %v6149_v49  ;;  %v3036_v26 = vmul.f32 0.5, %v6164_v59 }
0x104e   : > { %v4797_v45 = vpop.eup %4796  ;;  %3622 = vmatprep.mubr.bf16.mxu1 %v3304_v51  ;;  %v3306_v44 = vpack.c.bf16 %v3286_v17, %v3282_v42  ;;  %v3283_v47 = vmul.f32 %v3251_v29, %v3027_v31  ;;  %v3253_v1 = vadd.f32 1.0, %v4795_v18  ;;  %v3034_v21 = vmul.f32 0.5, %v6154_v4 }
0x104f   : > { %v4799_v57 = vpop.eup %4798  ;;  %v3256_v39 = vadd.f32 1.0, %v4797_v45  ;;  %v3281_v38 = vmul.f32 %v3249_v19, %v3025_v30  ;;  %v3038_v0 = vmul.f32 0.5, %v6173_v14  ;;  %v3031_v43 = vmul.f32 0.5, %v6143_v37 }
0x1050   : > { %v4801_v54 = vpop.eup %4800  ;;  %3687 = vmatprep.mubr.bf16.mxu0 %v3306_v44  ;;  %v3303_v22 = vpack.c.bf16 %v3283_v47, %v3279_v58  ;;  %v3285_v5 = vmul.f32 %v3253_v1, %v3029_v48  ;;  %v3260_v13 = vadd.f32 1.0, %v4799_v57  ;;  %v3035_v7 = vmul.f32 0.5, %v6157_v6 }
0x1051   : > { %v4803_v61 = vpop.eup %4802  ;;  %v3258_v10 = vadd.f32 1.0, %v4801_v54  ;;  %v3288_v50 = vmul.f32 %v3256_v39, %v3032_v23  ;;  %v3033_v11 = vmul.f32 0.5, %v6146_v24  ;;  %v3037_v41 = vmul.f32 0.5, %v6161_v25  ;;  %v6238_v24 = vld [vmem:[%s6357_s12] ss:$0 sm:$0xff] }
0x1052   : > { %v4805_v62 = vpop.eup %4804  ;;  %3623 = vmatmul.mubr.bf16.gmra.mrb[72].mxu1 %v3303_v22  ;;  %v3305_v63 = vpack.c.bf16 %v3285_v5, %v3281_v38  ;;  %v3292_v49 = vmul.f32 %v3260_v13, %v3036_v26  ;;  %v3262_v52 = vadd.f32 1.0, %v4803_v61 }
0x1053   : > { %v4807_v59 = vpop.eup %4806  ;;  %v3255_v9 = vadd.f32 1.0, %v4805_v62  ;;  %v3290_v40 = vmul.f32 %v3258_v10, %v3034_v21 }
0x1054   : > { %v4809_v33 = vpop.eup %4808  ;;  %3688 = vmatmul.mubr.bf16.gmra.mrb[72].mxu0 %v3305_v63  ;;  %v3308_v56 = vpack.c.bf16 %v3292_v49, %v3288_v50  ;;  %v3294_v4 = vmul.f32 %v3262_v52, %v3038_v0  ;;  %v3259_v27 = vadd.f32 1.0, %v4807_v59 }
0x1055   : > { %v4811_v14 = vpop.eup %4810  ;;  %v3257_v15 = vadd.f32 1.0, %v4809_v33  ;;  %v3287_v46 = vmul.f32 %v3255_v9, %v3031_v43 }
0x1056   : > { %3630 = vmatprep.mubr.bf16.mxu1 %v3308_v56  ;;  %v3310_v35 = vpack.c.bf16 %v3294_v4, %v3290_v40  ;;  %v3291_v3 = vmul.f32 %v3259_v27, %v3035_v7  ;;  %v3261_v37 = vadd.f32 1.0, %v4811_v14 }
0x1057   : > { %v3289_v36 = vmul.f32 %v3257_v15, %v3033_v11 }
0x1058   : > { %3695 = vmatprep.mubr.bf16.mxu0 %v3310_v35  ;;  %v3307_v6 = vpack.c.bf16 %v3291_v3, %v3287_v46  ;;  %v3293_v34 = vmul.f32 %v3261_v37, %v3037_v41 }
0x105a   : > { %3631 = vmatmul.mubr.bf16.gmra.mrb[76].mxu1 %v3307_v6  ;;  %v3309_v31 = vpack.c.bf16 %v3293_v34, %v3289_v36 }
0x105c   : > { %3696 = vmatmul.mubr.bf16.gmra.mrb[76].mxu0 %v3309_v31 }
0x10fc   : > { %v4111_v12 = vpop.f32.mrb[64].mxu1 }
0x10fd   : > { %v4112_v25 = vpop.f32.mrb[65].mxu1 }
0x10fe   : > { %v4113_v28 = vadd.f32 %v4112_v25, %v4111_v12  ;;  %v4114_v51 = vpop.f32.mrb[66].mxu1  ;;  %v4151_v42 = vpop.f32.mrb[64].mxu0 }
0x10ff   : > { %v4115_v17 = vpop.f32.mrb[67].mxu1  ;;  %v4152_v18 = vpop.f32.mrb[65].mxu0 }
0x1100   : > { %v3609_v29 = vadd.f32 %v4113_v28, %v6238_v24  ;;  %v4116_v30 = vadd.f32 %v4115_v17, %v4114_v51  ;;  %v4153_v48 = vadd.f32 %v4152_v18, %v4151_v42  ;;  %v4154_v19 = vpop.f32.mrb[66].mxu0 }
0x1101   : > { %v4155_v44 = vpop.f32.mrb[67].mxu0 }
0x1102   : > { %v3612_v45 = vadd.f32 %v4116_v30, %v6238_v24  ;;  %v3674_v58 = vadd.f32 %v4153_v48, %v3609_v29  ;;  %v4156_v47 = vadd.f32 %v4155_v44, %v4154_v19 }
0x1104   : > { %v3704_v1 = vadd.f32 %v3674_v58, %v5863_v16  ;;  %v3677_v57 = vadd.f32 %v4156_v47, %v3612_v45 }
0x1106   : > { %3712 = vst [vmem:[%s6245_s30] sm:$0xff] %v3704_v1  ;;  %v3705_v23 = vadd.f32 %v3677_v57, %v5866_v53 }
0x1108   : > { %3713 = vst [vmem:[%s6245_s30 + $0x8] sm:$0xff] %v3705_v23 }
0x1109   : > { %v4117_v26 = vpop.f32.mrb[68].mxu1 }
0x110a   : > { %v4118_v39 = vpop.f32.mrb[69].mxu1 }
0x110b   : > { %v4119_v54 = vadd.f32 %v4118_v39, %v4117_v26  ;;  %v4120_v22 = vpop.f32.mrb[70].mxu1 }
0x110c   : > { %v4121_v38 = vpop.f32.mrb[71].mxu1 }
0x110d   : > { %v4122_v5 = vadd.f32 %v4121_v38, %v4120_v22  ;;  %v3617_v16 = vadd.f32 %v4119_v54, %v6238_v24 }
0x110f   : > { %v3620_v10 = vadd.f32 %v4122_v5, %v6238_v24 }
0x1111   : > { %v4157_v13 = vpop.f32.mrb[68].mxu0 }
0x1112   : > { %v4158_v61 = vpop.f32.mrb[69].mxu0 }
0x1113   : > { %v4159_v21 = vadd.f32 %v4158_v61, %v4157_v13  ;;  %v4160_v0 = vpop.f32.mrb[70].mxu0 }
0x1114   : > { %v4161_v62 = vpop.f32.mrb[71].mxu0 }
0x1115   : > { %v3682_v63 = vadd.f32 %v4159_v21, %v3617_v16  ;;  %v4162_v53 = vadd.f32 %v4161_v62, %v4160_v0 }
0x1117   : > { %v3706_v50 = vadd.f32 %v3682_v63, %v5870_v8  ;;  %v3685_v49 = vadd.f32 %v4162_v53, %v3620_v10 }
0x1119   : > { %3714 = vst [vmem:[%s6245_s30 + $0x10] sm:$0xff] %v3706_v50  ;;  %v3707_v52 = vadd.f32 %v3685_v49, %v5875_v55 }
0x111b   : > { %3715 = vst [vmem:[%s6245_s30 + $0x18] sm:$0xff] %v3707_v52 }
0x1125   : > { %v4123_v59 = vpop.f32.mrb[72].mxu1 }
0x1126   : > { %v4124_v43 = vpop.f32.mrb[73].mxu1 }
0x1127   : > { %v4163_v7 = vpop.f32.mrb[72].mxu0  ;;  %v4125_v9 = vadd.f32 %v4124_v43, %v4123_v59  ;;  %v4126_v33 = vpop.f32.mrb[74].mxu1 }
0x1128   : > { %v4164_v56 = vpop.f32.mrb[73].mxu0  ;;  %v4127_v40 = vpop.f32.mrb[75].mxu1 }
0x1129   : > { %v3625_v4 = vadd.f32 %v4125_v9, %v6238_v24  ;;  %v4165_v27 = vadd.f32 %v4164_v56, %v4163_v7  ;;  %v4166_v14 = vpop.f32.mrb[74].mxu0  ;;  %v4128_v11 = vadd.f32 %v4127_v40, %v4126_v33 }
0x112a   : > { %v4167_v8 = vpop.f32.mrb[75].mxu0 }
0x112b   : > { %v3690_v41 = vadd.f32 %v4165_v27, %v3625_v4  ;;  %v3628_v15 = vadd.f32 %v4128_v11, %v6238_v24  ;;  %v4168_v55 = vadd.f32 %v4167_v8, %v4166_v14 }
0x112d   : > { %v3708_v35 = vadd.f32 %v3690_v41, %v5879_v32  ;;  %v3693_v46 = vadd.f32 %v4168_v55, %v3628_v15  ;;  %v4129_v3 = vpop.f32.mrb[76].mxu1 }
0x112e   : > { %v4130_v37 = vpop.f32.mrb[77].mxu1 }
0x112f   : > { %3716 = vst [vmem:[%s6245_s30 + $0x20] sm:$0xff] %v3708_v35  ;;  %v3709_v6 = vadd.f32 %v3693_v46, %v5882_v20  ;;  %v4169_v36 = vpop.f32.mrb[76].mxu0  ;;  %v4131_v34 = vadd.f32 %v4130_v37, %v4129_v3  ;;  %v4132_v31 = vpop.f32.mrb[78].mxu1 }
0x1130   : > { %v4170_v12 = vpop.f32.mrb[77].mxu0  ;;  %v4133_v25 = vpop.f32.mrb[79].mxu1 }
0x1131   : > { %3717 = vst [vmem:[%s6245_s30 + $0x28] sm:$0xff] %v3709_v6  ;;  %v3633_v28 = vadd.f32 %v4131_v34, %v6238_v24  ;;  %v4171_v51 = vadd.f32 %v4170_v12, %v4169_v36  ;;  %v4172_v32 = vpop.f32.mrb[78].mxu0  ;;  %v4134_v42 = vadd.f32 %v4133_v25, %v4132_v31 }
0x1132   : > { %v4173_v17 = vpop.f32.mrb[79].mxu0 }
0x1133   : > { %v3698_v29 = vadd.f32 %v4171_v51, %v3633_v28  ;;  %v3636_v20 = vadd.f32 %v4134_v42, %v6238_v24  ;;  %v4174_v18 = vadd.f32 %v4173_v17, %v4172_v32 }
0x1135   : > { %v3710_v30 = vadd.f32 %v3698_v29, %v5886_v2  ;;  %v3701_v48 = vadd.f32 %v4174_v18, %v3636_v20 }
0x1137   : > { %3718 = vst [vmem:[%s6245_s30 + $0x30] sm:$0xff] %v3710_v30  ;;  %v3711_v19 = vadd.f32 %v3701_v48, %v5890_v60 }
0x1139   : > { %3719 = vst [vmem:[%s6245_s30 + $0x38] sm:$0xff] %v3711_v19 }
0x113a   : > { %4975 = shalt.err (!%p4972_p13)
}
0x113b   : > { %s4976_s23 = scalar_lea.hbm %s6270_s24, 1024  ;;  %s4980_s30 = scalar_lea.hbm %s6358_s27, 2048 }
0x113c   : > { %p4977_p9 = scmp.ne.s32.totalorder %s6270_s24, %s4976_s23  ;;  %p4981_p4 = scmp.lt.u32.totalorder %s6270_s24, %s6358_s27 }
0x113d   : > { %p4982_p8 = scmp.lt.u32.totalorder %s4980_s30, %s4976_s23  ;;  %p4984_p3 = scmp.lt.u32.totalorder %s4976_s23, %s6270_s24 }
0x113e   : > { %p4978_p0 = pnand %p4977_p9, %p5274_p10 }
0x113f   : > { %p4983_p6 = por %p4982_p8, %p4981_p4 }
0x1140   : > { %p4979_p11 = pneg %p4978_p0 }
0x1141   : > { %p4985_p5 = por %p4984_p3, %p4983_p6 }
0x1143   : > { %p4986_p7 = pnand %p4985_p5, %p4979_p11 }
0x1145   : > { %4989 = shalt.err (!%p4986_p7)
}
0x1146   : > { %s5056_s13 = smov 128   ;;  %s5057_s21 = smov 8  }
0x1147   : > { %4385 = dma.vmem_to_hbm [thread:$0]  (%p5274_p10), %s6272_s14, 1024, %s6270_s24, %s3721_s17, %s5056_s13, %s5056_s13, %s5057_s21  }
0x1148 PF: > { %s6359_s28 = sld [smem:[#allocation17_spill]]  ;;  %s6360_s10 = sld [smem:[#allocation18_spill]] }
0x1149   : > { %p6362_p2 = scmp.ge.s32.totalorder %s5036_s20, 2 }
0x114e   : > { %s3750_s26 = sand.u32 1, %s6359_s28   ;;  %p6361_p12 = scmp.ne.s32.totalorder %s6360_s10, 0 }
0x114f   : > { %s3751_s23 = scalar_lea.sflag [#allocation5], %s3750_s26 }
0x1150   : > { %p4405_p1 = pnand %p6362_p2, %p6361_p12 }
0x1152   : > { %5019 = dma.done.wait (!%p4405_p1), %s3751_s23, 1024  }
0x1153   : > { %5021 = vsyncadd (!%p4405_p1), %s3751_s23, 4294966272  ;;  %p26_p13 = scmp.ge.s32.totalorder %s5264_s22, 4   ;;  %s6363_s17 = smov %s5028_s18 }
0x1154   : > { %s6364_s18 = smov %s5032_s19  ;;  %s6365_s19 = smov %s5280_s16 }
0x1155   : > { %s6366_s20 = smov %s5264_s22  ;;  %28 = sbr.rel (!%p26_p13) target bundleno = 11 (0xb), region = 125 }
0x115c   :  { %3756 = vsyncpa [#allocation4], 1 }
0x115d   :  { %3758 = vsyncpa [#allocation4 + $0x1], 1 }
0x115e   :  { %3759 = vsyncpa [#allocation7], 1 }
0x115f   :  { %3760 = vsyncpa [#allocation10], 1 }
0x1160   :  { %3761 = vsyncpa [#allocation5], 1 }
0x1161   :  { %3763 = vsyncpa [#allocation5 + $0x1], 1 }

// kernel: tpu_custom_call.1
= control target key start
LH: loop header
LB: loop body
LE: loop exit
PB: predicated region body
PF: predicated region fallthrough
CT: control target
= control target key end

     0   :  { %s6319_s0 = inlined_call_operand.hbm [shape: f32[4,32,128], index: 0, kind: input, shape index: {}]   ;;  %s6320_s1 = inlined_call_operand.vmem [shape: f32[1,128], index: 1, kind: input, shape index: {}]   ;;  %s6321_s2 = inlined_call_operand.vmem [shape: f32[1,128], index: 2, kind: input, shape index: {}]   ;;  %s6322_s3 = inlined_call_operand.hbm [shape: bf16[128,384], index: 3, kind: input, shape index: {}]   ;;  %s6323_s4 = inlined_call_operand.hbm [shape: bf16[128,128], index: 4, kind: input, shape index: {}]   ;;  %s6324_s5 = inlined_call_operand.vmem [shape: f32[1,128], index: 5, kind: input, shape index: {}]   ;;  %s6325_s6 = inlined_call_operand.vmem [shape: f32[1,128], index: 6, kind: input, shape index: {}]   ;;  %s6326_s7 = inlined_call_operand.hbm [shape: bf16[128,512], index: 7, kind: input, shape index: {}]   ;;  %s6327_s8 = inlined_call_operand.vmem [shape: f32[1,512], index: 8, kind: input, shape index: {}]   ;;  %s6328_s9 = inlined_call_operand.hbm [shape: bf16[512,128], index: 9, kind: input, shape index: {}]   ;;  %s6329_s10 = inlined_call_operand.vmem [shape: f32[1,128], index: 10, kind: input, shape index: {}]   ;;  %s6330_s11 = inlined_call_operand.hbm [shape: f32[4,32,128], index: 11, kind: output, shape index: {}]  }
   0x1   :  { %6337 = sst [smem:[#allocation19_spill]] %s6322_s3 }
   0x2   :  { %6338 = sst [smem:[#allocation20_spill]] %s6329_s10 }
   0x3   :  { %6339 = sst [smem:[#allocation21_spill]] %s6330_s11 }
   0x4   :  { %16 = vsyncpa [#allocation4], 0 }
   0x5   :  { %18 = vsyncpa [#allocation4 + $0x1], 0 }
   0x6   :  { %19 = vsyncpa [#allocation7], 0 }
   0x7   :  { %20 = vsyncpa [#allocation10], 0 }
   0x8   :  { %21 = vsyncpa [#allocation5], 0 }
   0x9   :  { %23 = vsyncpa [#allocation5 + $0x1], 0  ;;  %s5118_s17 = smov 0   ;;  %s5120_s18 = smov 0  }
   0xa   :  { %s5122_s19 = smov 0   ;;  %s5124_s20 = smov 0  }
   0xb LB: > { %6340 = sst [smem:[#allocation17_spill]] %s5024_s17  ;;  %s5139_s21 = sadd.s32 4294967295, %s5036_s20   ;;  %s5036_s20 = sphi %s5124_s20, %s6366_s20   ;;  %s5032_s19 = sphi %s5122_s19, %s6365_s19   ;;  %s5028_s18 = sphi %s5120_s18, %s6364_s18   ;;  %s5024_s17 = sphi %s5118_s17, %s6363_s17  }
   0xc   : > { %s3846_s22 = sadd.s32 4294967294, %s5036_s20   ;;  %p49_p0 = scmp.ne.s32.totalorder %s5028_s18, %s5024_s17 }
   0xd   : > { %p6331_p1 = scmp.eq.s32.totalorder %s5139_s21, 0  ;;  %p289_p3 = scmp.eq.s32.totalorder %s3846_s22, 1 }
   0xe   : > { %p3847_p5 = scmp.ge.s32.totalorder %s5036_s20, 1  ;;  %p296_p7 = scmp.lt.s32.totalorder %s5036_s20, 3 }
   0xf   : > { %p5148_p4 = por %p6331_p1, %p49_p0  ;;  %p5153_p6 = por %p289_p3, %p49_p0 }
  0x10   : > { %p5158_p8 = pnand %p3847_p5, %p296_p7  ;;  %s5038_s26 = smov [#allocation6]  }
  0x11   : > { %s6341_s23 = scalar_select %p5148_p4, 1, 0 }
  0x12   : > { %s6342_s24 = scalar_select %p5153_p6, 1, 0 }
  0x13   : > { %s6344_s25 = scalar_select %p5158_p8, 1, 0 }
  0x14   : > { %6343 = sst [smem:[#allocation18_spill]] %s6342_s24  ;;  %s314_s27 = sshll.u32 %s5038_s26, 4  ;;  %s5162_s27 = int_to_ptr.vmem [resolvable:$true] %s314_s27 }
  0x15   : > { %p4387_p9 = pneg %p5158_p8  ;;  %s5039_s29 = smov [#allocation9]  }
  0x16   : > { %s346_s30 = sshll.u32 %s5039_s29, 4  ;;  %s6346_s3 = sld [smem:[#allocation19_spill]]  ;;  %s5173_s30 = int_to_ptr.vmem [resolvable:$true] %s346_s30 }
  0x17   : > { %p5169_p11 = pnand %p4387_p9, %p6331_p1 }
  0x19   : > { %p5183_p13 = pneg %p5169_p11 }
  0x1c   : > { %s4820_s14 = scalar_lea.hbm %s6346_s3, 3072 }
  0x1d   : > { %p4821_p12 = scmp.ne.s32.totalorder %s6346_s3, %s4820_s14  ;;  %p4827_p5 = scmp.lt.u32.totalorder %s4820_s14, %s6346_s3 }
  0x1f   : > { %p4823_p0 = pnand %p5183_p13, %p4821_p12 }
  0x21   : > { %p4824_p3 = pneg %p4823_p0 }
  0x23   : > { %p4829_p7 = pnand %p4827_p5, %p4824_p3 }
  0x25   : > { %4832 = shalt.err (!%p4829_p7)
}
  0x26   : > { %s4833_s12 = scalar_lea.vmem %s5162_s27, 3072  ;;  %p4841_p2 = scmp.lt.s32.totalorder %s5162_s27, %s5162_s27 }
  0x27   : > { %p4834_p9 = scmp.ne.s32.totalorder %s5162_s27, %s4833_s12  ;;  %p4842_p6 = scmp.lt.s32.totalorder %s4833_s12, %s4833_s12 }
  0x29   : > { %p4836_p10 = pnand %p4834_p9, %p5183_p13  ;;  %p4843_p12 = por %p4842_p6, %p4841_p2 }
  0x2b   : > { %p4837_p1 = pneg %p4836_p10 }
  0x2d   : > { %p4844_p0 = pnand %p4843_p12, %p4837_p1 }
  0x2f   : > { %4847 = shalt.err (!%p4844_p0)
}
  0x30   : > { %s5040_s13 = smov 192   ;;  %s5041_s14 = smov 12  }
  0x31   : > { %4390 = dma.hbm_to_vmem [thread:$0]  (!%p5169_p11), %s6346_s3, 3072, %s5162_s27, [#allocation7], %s5040_s13, %s5040_s13, %s5041_s14  }
  0x32   : > { %s4848_s24 = scalar_lea.hbm %s6326_s7, 4096 }
  0x33   : > { %p4849_p2 = scmp.ne.s32.totalorder %s6326_s7, %s4848_s24  ;;  %p4855_p10 = scmp.lt.u32.totalorder %s4848_s24, %s6326_s7 }
  0x35   : > { %p4851_p1 = pnand %p4849_p2, %p5183_p13 }
  0x37   : > { %p4852_p6 = pneg %p4851_p1 }
  0x39   : > { %p4857_p3 = pnand %p4855_p10, %p4852_p6 }
  0x3b   : > { %4860 = shalt.err (!%p4857_p3)
}
  0x3c   : > { %s4861_s27 = scalar_lea.vmem %s5173_s30, 4096  ;;  %p4869_p12 = scmp.lt.s32.totalorder %s5173_s30, %s5173_s30 }
  0x3d   : > { %p4862_p5 = scmp.ne.s32.totalorder %s5173_s30, %s4861_s27  ;;  %p4870_p0 = scmp.lt.s32.totalorder %s4861_s27, %s4861_s27 }
  0x3f   : > { %p4864_p7 = pnand %p4862_p5, %p5183_p13  ;;  %p4871_p2 = por %p4870_p0, %p4869_p12 }
  0x41   : > { %p4865_p9 = pneg %p4864_p7 }
  0x43   : > { %p4872_p1 = pnand %p4871_p2, %p4865_p9 }
  0x45   : > { %4875 = shalt.err (!%p4872_p1)
}
  0x46   : > { %s5042_s11 = smov 256   ;;  %s5043_s10 = smov 16  }
  0x47   : > { %4396 = dma.hbm_to_vmem [thread:$0]  (!%p5169_p11), %s6326_s7, 4096, %s5173_s30, [#allocation10], %s5042_s11, %s5042_s11, %s5043_s10  }
  0x48   : > { %s5044_s13 = smov [#allocation8]   ;;  %s4876_s26 = scalar_lea.hbm %s6323_s4, 1024 }
  0x49   : > { %s327_s14 = sshll.u32 %s5044_s13, 4  ;;  %p4877_p6 = scmp.ne.s32.totalorder %s6323_s4, %s4876_s26  ;;  %s328_s14 = int_to_ptr.vmem [resolvable:$true] %s327_s14 }
  0x4a   : > { %p4883_p5 = scmp.lt.u32.totalorder %s4876_s26, %s6323_s4 }
  0x4b   : > { %p4879_p10 = pnand %p4877_p6, %p5183_p13 }
  0x4d   : > { %p4880_p3 = pneg %p4879_p10 }
  0x4f   : > { %p4885_p7 = pnand %p4883_p5, %p4880_p3 }
  0x51   : > { %4888 = shalt.err (!%p4885_p7)
}
  0x52   : > { %s4889_s30 = scalar_lea.vmem %s328_s14, 1024  ;;  %p4897_p2 = scmp.lt.s32.totalorder %s328_s14, %s328_s14 }
  0x53   : > { %p4890_p9 = scmp.ne.s32.totalorder %s328_s14, %s4889_s30  ;;  %p4898_p1 = scmp.lt.s32.totalorder %s4889_s30, %s4889_s30 }
  0x55   : > { %p4892_p12 = pnand %p4890_p9, %p5183_p13  ;;  %p4899_p4 = por %p4898_p1, %p4897_p2 }
  0x57   : > { %p4893_p0 = pneg %p4892_p12 }
  0x59   : > { %p4900_p8 = pnand %p4899_p4, %p4893_p0 }
  0x5b   : > { %4903 = shalt.err (!%p4900_p8)
}
  0x5c   : > { %s5045_s11 = smov 64   ;;  %s5046_s10 = smov 4  }
  0x5d   : > { %4393 = dma.hbm_to_vmem [thread:$0]  (!%p5169_p11), %s6323_s4, 1024, %s328_s14, [#allocation7], %s5045_s11, %s5045_s11, %s5046_s10  }
  0x5e   : > { %s5047_s24 = smov [#allocation11]   ;;  %s4904_s26 = scalar_lea.hbm %s6328_s9, 4096 }
  0x5f   : > { %s362_s13 = sshll.u32 %s5047_s24, 4  ;;  %p4905_p4 = scmp.ne.s32.totalorder %s6328_s9, %s4904_s26  ;;  %s363_s13 = int_to_ptr.vmem [resolvable:$true] %s362_s13 }
  0x60   : > { %p4911_p10 = scmp.lt.u32.totalorder %s4904_s26, %s6328_s9 }
  0x61   : > { %p4907_p8 = pnand %p4905_p4, %p5183_p13 }
  0x63   : > { %p4908_p6 = pneg %p4907_p8 }
  0x65   : > { %p4913_p3 = pnand %p4911_p10, %p4908_p6 }
  0x67   : > { %4916 = shalt.err (!%p4913_p3)
}
  0x68   : > { %s4917_s14 = scalar_lea.vmem %s363_s13, 4096  ;;  %p4925_p12 = scmp.lt.s32.totalorder %s363_s13, %s363_s13 }
  0x69   : > { %p4918_p5 = scmp.ne.s32.totalorder %s363_s13, %s4917_s14  ;;  %p4926_p0 = scmp.lt.s32.totalorder %s4917_s14, %s4917_s14 }
  0x6b   : > { %p4920_p7 = pnand %p4918_p5, %p5183_p13  ;;  %p4927_p2 = por %p4926_p0, %p4925_p12 }
  0x6d   : > { %p4921_p9 = pneg %p4920_p7 }
  0x6f   : > { %p4928_p1 = pnand %p4927_p2, %p4921_p9 }
  0x71   : > { %4931 = shalt.err (!%p4928_p1)
}
  0x72   : > { %4399 = dma.hbm_to_vmem [thread:$0]  (!%p5169_p11), %s6328_s9, 4096, %s363_s13, [#allocation10], %s5045_s11, %s5045_s11, %s5046_s10  }
  0x73   : > { %s5264_s22 = sadd.s32 1, %s5036_s20   ;;  %s36_s24 = sadd.s32 1, %s5032_s19 }
  0x74   : > { %s33_s28 = ssub.s32 %s5036_s20, %s5264_s22  ;;  %p43_p13 = scmp.ne.s32.totalorder %s5032_s19, %s5028_s18 }
  0x75   : > { %p34_p4 = scmp.eq.s32.totalorder %s33_s28, 0  ;;  %p44_p8 = scmp.eq.s32.totalorder %s5036_s20, 0 }
  0x76   : > { %p6348_p6 = scmp.eq.s32.totalorder %s5139_s21, 1  ;;  %p4412_p3 = scmp.lt.s32.totalorder %s5036_s20, 2 }
  0x77   : > { %s5280_s16 = scalar_select %p34_p4, %s5032_s19, %s36_s24  }
  0x78   : > { %p5274_p10 = por %p6348_p6, %p43_p13  ;;  %p45_p5 = por %p44_p8, %p43_p13 }
  0x79   : > { %s379_s26 = sand.u32 1, %s5032_s19   ;;  %s4004_s11 = sshll.u32 %s5036_s20, 10 }
  0x7a   : > { %s3853_s29 = sshll.u32 %s379_s26, 6  ;;  %s5287_s12 = scalar_lea.hbm %s6319_s0, %s4004_s11 }
  0x7b   : > { %s383_s27 = scalar_lea.vmem [#allocation3], %s3853_s29  ;;  %p5291_p11 = pnand %p4412_p3, %p45_p5 }
  0x7c   : > { %s391_s30 = sshll.u32 %s383_s27, 4  ;;  %s5295_s3 = scalar_lea.sflag [#allocation4], %s379_s26  ;;  %s5289_s30 = int_to_ptr.vmem [resolvable:$true] %s391_s30 }
  0x7d   : > { %s4932_s17 = scalar_lea.hbm %s5287_s12, 1024  ;;  %p4934_p9 = pneg %p5291_p11 }
  0x7e   : > { %p4933_p7 = scmp.ne.s32.totalorder %s5287_s12, %s4932_s17  ;;  %s4937_s29 = scalar_lea.hbm %s6319_s0, 2048 }
  0x7f   : > { %p4938_p2 = scmp.lt.u32.totalorder %s5287_s12, %s6319_s0  ;;  %p4939_p1 = scmp.lt.u32.totalorder %s4937_s29, %s4932_s17 }
  0x80   : > { %p4935_p12 = pnand %p4934_p9, %p4933_p7  ;;  %p4941_p4 = scmp.lt.u32.totalorder %s4932_s17, %s5287_s12 }
  0x81   : > { %p4940_p13 = por %p4939_p1, %p4938_p2 }
  0x82   : > { %p4936_p0 = pneg %p4935_p12 }
  0x83   : > { %p4942_p8 = por %p4941_p4, %p4940_p13 }
  0x85   : > { %p4943_p6 = pnand %p4942_p8, %p4936_p0 }
  0x87   : > { %4946 = shalt.err (!%p4943_p6)
}
  0x88   : > { %s4947_s26 = scalar_lea.vmem %s5289_s30, 1024  ;;  %s5048_s13 = smov [#allocation3]  }
  0x89   : > { %p4948_p3 = scmp.ne.s32.totalorder %s5289_s30, %s4947_s26  ;;  %s4952_s27 = sshll.u32 %s5048_s13, 4  ;;  %s4953_s27 = int_to_ptr.vmem [resolvable:$false] %s4952_s27 }
  0x8a   : > { %s4954_s24 = scalar_lea.vmem %s4953_s27, 2048  ;;  %p4955_p12 = scmp.lt.s32.totalorder %s5289_s30, %s4953_s27 }
  0x8b   : > { %p4950_p5 = pnand %p4948_p3, %p4934_p9  ;;  %p4956_p2 = scmp.lt.s32.totalorder %s4954_s24, %s4947_s26 }
  0x8d   : > { %p4951_p7 = pneg %p4950_p5  ;;  %p4957_p1 = por %p4956_p2, %p4955_p12 }
  0x8f   : > { %p4958_p13 = pnand %p4957_p1, %p4951_p7 }
  0x91   : > { %4961 = shalt.err (!%p4958_p13)
}
  0x92   : > { %s5049_s17 = smov 128   ;;  %s5050_s28 = smov 8  }
  0x93   : > { %4403 = dma.hbm_to_vmem [thread:$0]  (!%p5291_p11), %s5287_s12, 1024, %s5289_s30, %s5295_s3, %s5049_s17, %s5049_s17, %s5050_s28  }
  0x94   : > { %p6351_p9 = scmp.ne.s32.totalorder %s6344_s25, 0 }
  0x95   : > { %s5326_s29 = sand.u32 (!%p6351_p9), 1, %s5028_s18   ;;  %p6352_p0 = scmp.ne.s32.totalorder (!%p6351_p9), %s6341_s23, 0 }
  0x96   : > { %403 = sbr.rel (%p6351_p9) target bundleno = 4424 (0x1148), region = 64  ;;  %s3858_s11 = sshll.u32 (!%p6351_p9), %s5326_s29, 6 }
  0x97   : > { %s406_s10 = scalar_lea.sflag (!%p6351_p9), [#allocation4], %s5326_s29  ;;  %s5332_s26 = scalar_lea.vmem (!%p6351_p9), [#allocation3], %s3858_s11 }
  0x9d   : > { %5007 = dma.done.wait (%p6352_p0), %s406_s10, 1024  }
  0x9e   : > { %5009 = vsyncadd (%p6352_p0), %s406_s10, 4294966272  ;;  %p6353_p11 = scmp.eq.s32.totalorder %s5139_s21, 0 }
  0xa0   : > { %5011 = dma.done.wait (%p6353_p11), [#allocation7], 4096   ;;  %p6354_p4 = pmov %p6353_p11 }
  0xa2   : > { %5013 = vsyncadd (%p6354_p4), [#allocation7], 4294963200  ;;  %p6355_p8 = pmov %p6354_p4 }
  0xa3   : > { %p6356_p6 = pmov %p6354_p4 }
  0xa4   : > { %5015 = dma.done.wait (%p6355_p8), [#allocation10], 8192  }
  0xa5   : > { %5017 = vsyncadd (%p6356_p6), [#allocation10], 4294959104  ;;  %v467_v0 = vld [vmem:[%s5332_s26] sm:$0xff]  ;;  %v469_v1 = vld [vmem:[%s5332_s26 + $0x10] sm:$0xff]  ;;  %v5051_v63 = vmov 0   ;;  %vm908_vm0 = vcmask 261120  }
  0xa6   : > { %477 = vadd.xlane.f32.xlu0 %v467_v0  ;;  %481 = vadd.xlane.f32.xlu1 %v469_v1  ;;  %v468_v2 = vld [vmem:[%s5332_s26 + $0x8] sm:$0xff]  ;;  %v470_v3 = vld [vmem:[%s5332_s26 + $0x18] sm:$0xff]  ;;  %v471_v4 = vld [vmem:[%s5332_s26 + $0x20] sm:$0xff]  ;;  %s5052_s14 = smov 96   ;;  %s5053_s3 = smov 64   ;;  %vm1625_vm1 = vcmask 523520  }
  0xa7   : > { %v472_v5 = vld [vmem:[%s5332_s26 + $0x28] sm:$0xff]  ;;  %v473_v6 = vld [vmem:[%s5332_s26 + $0x30] sm:$0xff]  ;;  %v474_v7 = vld [vmem:[%s5332_s26 + $0x38] sm:$0xff]  ;;  %790 = vmatprep.mubr.bf16.mxu0 %v5051_v63  ;;  %s5054_s13 = smov 32   ;;  %vm2002_vm2 = vcmask 785920   ;;  %vm2379_vm3 = vcmask 1048320  }
  0xa8   : > { %v4468_v8 = vld [vmem:[#allocation6 + $0x4] ss:$12 sps:$4 sm:$0xff]   ;;  %v4470_v9 = vld [vmem:[#allocation6] ss:$12 sps:$4 sm:$0xff]   ;;  %v4471_v10 = vld [vmem:[#allocation6 + $0x1c] ss:$12 sps:$4 sm:$0xff]  }
  0xa9   : > { %v4473_v11 = vld [vmem:[#allocation6 + $0x8] ss:$12 sps:$4 sm:$0xff]   ;;  %758 = vmatprep.subr.bf16.mxu0 %v4468_v8  ;;  %v4474_v44 = vld [vmem:[#allocation6 + $0x18] ss:$12 sps:$4 sm:$0xff]   ;;  %v4477_v46 = vld [vmem:[#allocation6 + $0x20] ss:$12 sps:$4 sm:$0xff]  }
  0xaa   : > { %479 = vadd.xlane.f32.xlu0 %v468_v2  ;;  %483 = vadd.xlane.f32.xlu1 %v470_v3  ;;  %v4475_v45 = vld [vmem:[#allocation6 + $0x34] ss:$12 sps:$4 sm:$0xff]   ;;  %v4478_v47 = vld [vmem:[#allocation6 + $0x30] ss:$12 sps:$4 sm:$0xff]   ;;  %v4479_v48 = vld [vmem:[#allocation6 + $0x4c] ss:$12 sps:$4 sm:$0xff]  }
  0xab   : > { %759 = vmatpush1.bf16.msra.mxu0 %v4470_v9  ;;  %4175 = vmatprep.subr.bf16.mxu1 %v4473_v11  ;;  %v4481_v49 = vld [vmem:[#allocation6 + $0x38] ss:$12 sps:$4 sm:$0xff]   ;;  %v4482_v50 = vld [vmem:[#allocation6 + $0x48] ss:$12 sps:$4 sm:$0xff]   ;;  %v4485_v52 = vld [vmem:[#allocation6 + $0x50] ss:$12 sps:$4 sm:$0xff]  }
  0xac   : > { %760 = vmatprep.subr.bf16.mxu0 %v4471_v10  ;;  %4176 = vmatpush3.bf16.msra.mxu1 %v4473_v11  ;;  %v4483_v51 = vld [vmem:[#allocation6 + $0x64] ss:$12 sps:$4 sm:$0xff]   ;;  %v4486_v53 = vld [vmem:[#allocation6 + $0x60] ss:$12 sps:$4 sm:$0xff]   ;;  %v4487_v54 = vld [vmem:[#allocation6 + $0x7c] ss:$12 sps:$4 sm:$0xff]  }
  0xad   : > { %4177 = vmatprep.subr.bf16.mxu1 %v4477_v46  ;;  %v4489_v55 = vld [vmem:[#allocation6 + $0x68] ss:$12 sps:$4 sm:$0xff]   ;;  %v4490_v56 = vld [vmem:[#allocation6 + $0x78] ss:$12 sps:$4 sm:$0xff]   ;;  %v4493_v58 = vld [vmem:[#allocation6 + $0x80] ss:$12 sps:$4 sm:$0xff]  }
  0xae   : > { %485 = vadd.xlane.f32.xlu0 %v471_v4  ;;  %487 = vadd.xlane.f32.xlu1 %v472_v5  ;;  %v4491_v57 = vld [vmem:[#allocation6 + $0x94] ss:$12 sps:$4 sm:$0xff]   ;;  %v4494_v59 = vld [vmem:[#allocation6 + $0x90] ss:$12 sps:$4 sm:$0xff]   ;;  %v4495_v60 = vld [vmem:[#allocation6 + $0xac] ss:$12 sps:$4 sm:$0xff]  }
  0xaf   : > { %761 = vmatpush1.bf16.msra.mxu0 %v4474_v44  ;;  %v4497_v61 = vld [vmem:[#allocation6 + $0x98] ss:$12 sps:$4 sm:$0xff]   ;;  %v4498_v62 = vld [vmem:[#allocation6 + $0xa8] ss:$12 sps:$4 sm:$0xff]   ;;  %s6357_s12 = sld [smem:[#allocation20_spill]]  ;;  %s6245_s30 = scalar_lea.vmem [#allocation12], %s3858_s11 }
  0xb0   : > { %762 = vmatprep.subr.bf16.mxu0 %v4475_v45  ;;  %4178 = vmatpush3.bf16.msra.mxu1 %v4477_v46  ;;  %s4006_s11 = sshll.u32 %s5139_s21, 10  ;;  %s6358_s27 = sld [smem:[#allocation21_spill]] }
  0xb1   : > { %4179 = vmatprep.subr.bf16.mxu1 %v4481_v49  ;;  %s3721_s17 = scalar_lea.sflag [#allocation5], %s5326_s29  ;;  %s5055_s28 = smov [#allocation12]  }
  0xb2   : > { %489 = vadd.xlane.f32.xlu0 %v473_v6  ;;  %491 = vadd.xlane.f32.xlu1 %v474_v7  ;;  %s4966_s10 = sshll.u32 %s5055_s28, 4  ;;  %s4967_s10 = int_to_ptr.vmem [resolvable:$false] %s4966_s10 }
  0xb3   : > { %763 = vmatpush1.bf16.msra.mxu0 %v4478_v47 }
  0xb4   : > { %764 = vmatprep.subr.bf16.mxu0 %v4479_v48  ;;  %4180 = vmatpush3.bf16.msra.mxu1 %v4481_v49 }
  0xb5   : > { %4181 = vmatprep.subr.bf16.mxu1 %v4485_v52 }
  0xb6   : > { %s6270_s24 = scalar_lea.hbm %s6358_s27, %s4006_s11 }
  0xb7   : > { %765 = vmatpush1.bf16.msra.mxu0 %v4482_v50 }
  0xb8   : > { %766 = vmatprep.subr.bf16.mxu0 %v4483_v51  ;;  %4182 = vmatpush3.bf16.msra.mxu1 %v4485_v52 }
  0xb9   : > { %4183 = vmatprep.subr.bf16.mxu1 %v4489_v55 }
  0xbb   : > { %767 = vmatpush1.bf16.msra.mxu0 %v4486_v53 }
  0xbc   : > { %768 = vmatprep.subr.bf16.mxu0 %v4487_v54  ;;  %4184 = vmatpush3.bf16.msra.mxu1 %v4489_v55 }
  0xbd   : > { %4185 = vmatprep.subr.bf16.mxu1 %v4493_v58 }
  0xbf   : > { %769 = vmatpush1.bf16.msra.mxu0 %v4490_v56 }
  0xc0   : > { %770 = vmatprep.subr.bf16.mxu0 %v4491_v57  ;;  %4186 = vmatpush3.bf16.msra.mxu1 %v4493_v58 }
  0xc1   : > { %4187 = vmatprep.subr.bf16.mxu1 %v4497_v61 }
  0xc3   : > { %771 = vmatpush1.bf16.msra.mxu0 %v4494_v59 }
  0xc4   : > { %772 = vmatprep.subr.bf16.mxu0 %v4495_v60  ;;  %4188 = vmatpush3.bf16.msra.mxu1 %v4497_v61 }
  0xc7   : > { %773 = vmatpush1.bf16.msra.mxu0 %v4498_v62 }
 0x133   : > { %v478_v12 = vpop.xlane.xlu0 %477  ;;  %v482_v13 = vpop.xlane.xlu1 %481 }
 0x134   : > { %v494_v14 = vmul.f32 0.0078125, %v478_v12  ;;  %v496_v15 = vmul.f32 0.0078125, %v482_v13 }
 0x136   : > { %v5354_v16 = vsub.f32 %v467_v0, %v494_v14  ;;  %v5356_v17 = vsub.f32 %v469_v1, %v496_v15  ;;  %v4499_v0 = vld [vmem:[#allocation6 + $0xb0] ss:$12 sps:$4 sm:$0xff]  }
 0x137   : > { %v480_v18 = vpop.xlane.xlu0 %479  ;;  %v484_v19 = vpop.xlane.xlu1 %483  ;;  %4189 = vmatprep.subr.bf16.mxu1 %v4499_v0 }
 0x138   : > { %v495_v20 = vmul.f32 0.0078125, %v480_v18  ;;  %v510_v21 = vmul.f32 %v5354_v16, %v5354_v16  ;;  %v497_v22 = vmul.f32 0.0078125, %v484_v19  ;;  %v512_v23 = vmul.f32 %v5356_v17, %v5356_v17  ;;  %4190 = vmatpush3.bf16.msra.mxu1 %v4499_v0 }
 0x13a   : > { %518 = vadd.xlane.f32.xlu0 %v510_v21  ;;  %v5362_v24 = vsub.f32 %v468_v2, %v495_v20  ;;  %v5364_v25 = vsub.f32 %v470_v3, %v497_v22 }
 0x13b   : > { %v486_v26 = vpop.xlane.xlu0 %485  ;;  %v488_v27 = vpop.xlane.xlu1 %487 }
 0x13c   : > { %v498_v28 = vmul.f32 0.0078125, %v486_v26  ;;  %v511_v29 = vmul.f32 %v5362_v24, %v5362_v24  ;;  %v499_v30 = vmul.f32 0.0078125, %v488_v27  ;;  %v513_v31 = vmul.f32 %v5364_v25, %v5364_v25 }
 0x13e   : > { %522 = vadd.xlane.f32.xlu0 %v512_v23  ;;  %520 = vadd.xlane.f32.xlu1 %v511_v29  ;;  %v5370_v32 = vsub.f32 %v471_v4, %v498_v28  ;;  %v5372_v33 = vsub.f32 %v472_v5, %v499_v30  ;;  %v3864_v30 = vld [vmem:[%s6320_s1] ss:$0 sm:$0xff] }
 0x13f   : > { %v490_v34 = vpop.xlane.xlu0 %489  ;;  %v492_v35 = vpop.xlane.xlu1 %491 }
 0x140   : > { %v500_v36 = vmul.f32 0.0078125, %v490_v34  ;;  %v514_v37 = vmul.f32 %v5370_v32, %v5370_v32  ;;  %v501_v38 = vmul.f32 0.0078125, %v492_v35  ;;  %v515_v39 = vmul.f32 %v5372_v33, %v5372_v33 }
 0x142   : > { %524 = vadd.xlane.f32.xlu1 %v513_v31  ;;  %526 = vadd.xlane.f32.xlu0 %v514_v37  ;;  %v5378_v40 = vsub.f32 %v473_v6, %v500_v36  ;;  %v5380_v41 = vsub.f32 %v474_v7, %v501_v38  ;;  %v3865_v38 = vld [vmem:[%s6321_s2] ss:$0 sm:$0xff] }
 0x144   : > { %v516_v42 = vmul.f32 %v5378_v40, %v5378_v40  ;;  %v517_v43 = vmul.f32 %v5380_v41, %v5380_v41 }
 0x146   : > { %528 = vadd.xlane.f32.xlu1 %v515_v39  ;;  %530 = vadd.xlane.f32.xlu0 %v516_v42 }
 0x14a   : > { %532 = vadd.xlane.f32.xlu1 %v517_v43 }
 0x1c7   : > { %v519_v1 = vpop.xlane.xlu0 %518 }
 0x1c8   : > { %v534_v2 = vmul.f32 0.0078125, %v519_v1 }
 0x1ca   : > { %v542_v3 = vadd.f32 1e-05, %v534_v2 }
 0x1cb   : > { %v521_v4 = vpop.xlane.xlu1 %520  ;;  %v523_v5 = vpop.xlane.xlu0 %522 }
 0x1cc   : > { %4588 = vrsqrt.f32 %v542_v3  ;;  %v535_v6 = vmul.f32 0.0078125, %v521_v4  ;;  %v536_v7 = vmul.f32 0.0078125, %v523_v5 }
 0x1ce   : > { %v543_v8 = vadd.f32 1e-05, %v535_v6  ;;  %v544_v9 = vadd.f32 1e-05, %v536_v7 }
 0x1cf   : > { %v525_v10 = vpop.xlane.xlu1 %524  ;;  %v527_v11 = vpop.xlane.xlu0 %526 }
 0x1d0   : > { %4590 = vrsqrt.f32 %v543_v8  ;;  %v537_v12 = vmul.f32 0.0078125, %v525_v10  ;;  %v538_v13 = vmul.f32 0.0078125, %v527_v11 }
 0x1d1   : > { %4592 = vrsqrt.f32 %v544_v9 }
 0x1d2   : > { %v545_v14 = vadd.f32 1e-05, %v537_v12  ;;  %v546_v15 = vadd.f32 1e-05, %v538_v13 }
 0x1d3   : > { %v529_v18 = vpop.xlane.xlu1 %528  ;;  %v531_v19 = vpop.xlane.xlu0 %530 }
 0x1d4   : > { %4594 = vrsqrt.f32 %v545_v14  ;;  %v539_v20 = vmul.f32 0.0078125, %v529_v18  ;;  %v540_v21 = vmul.f32 0.0078125, %v531_v19 }
 0x1d5   : > { %4596 = vrsqrt.f32 %v546_v15 }
 0x1d6   : > { %v4589_v22 = vpop.eup %4588  ;;  %v547_v23 = vadd.f32 1e-05, %v539_v20  ;;  %v548_v26 = vadd.f32 1e-05, %v540_v21 }
 0x1d7   : > { %v533_v27 = vpop.xlane.xlu1 %532  ;;  %v558_v28 = vmul.f32 %v4589_v22, %v5354_v16 }
 0x1d8   : > { %4598 = vrsqrt.f32 %v547_v23  ;;  %v541_v29 = vmul.f32 0.0078125, %v533_v27 }
 0x1d9   : > { %4600 = vrsqrt.f32 %v548_v26  ;;  %v572_v37 = vmul.f32 %v3864_v30, %v558_v28 }
 0x1da   : > { %v4591_v31 = vpop.eup %4590  ;;  %v549_v34 = vadd.f32 1e-05, %v541_v29 }
 0x1db   : > { %v4593_v35 = vpop.eup %4592  ;;  %v559_v36 = vmul.f32 %v4591_v31, %v5362_v24  ;;  %v586_v45 = vadd.f32 %v3865_v38, %v572_v37 }
 0x1dc   : > { %4602 = vrsqrt.f32 %v549_v34  ;;  %v560_v16 = vmul.f32 %v4593_v35, %v5356_v17 }
 0x1dd   : > { %v573_v39 = vmul.f32 %v3864_v30, %v559_v36 }
 0x1de   : > { %v4595_v42 = vpop.eup %4594  ;;  %v574_v43 = vmul.f32 %v3864_v30, %v560_v16 }
 0x1df   : > { %v4597_v44 = vpop.eup %4596  ;;  %v587_v46 = vadd.f32 %v3865_v38, %v573_v39  ;;  %v561_v47 = vmul.f32 %v4595_v42, %v5364_v25 }
 0x1e0   : > { %v562_v48 = vmul.f32 %v4597_v44, %v5370_v32  ;;  %v588_v51 = vadd.f32 %v3865_v38, %v574_v43 }
 0x1e1   : > { %v594_v49 = vpack.c.bf16 %v587_v46, %v586_v45  ;;  %v575_v24 = vmul.f32 %v3864_v30, %v561_v47 }
 0x1e2   : > { %v4599_v50 = vpop.eup %4598  ;;  %v576_v54 = vmul.f32 %v3864_v30, %v562_v48 }
 0x1e3   : > { %v4601_v52 = vpop.eup %4600  ;;  %791 = vmatmul.mubr.bf16.vlgmr.msra.gmra.mrb[0].mxu0 %v594_v49  ;;  %4191 = vmatprep.mubr.bf16.mxu1 %v594_v49  ;;  %v589_v53 = vadd.f32 %v3865_v38, %v575_v24  ;;  %v563_v17 = vmul.f32 %v4599_v50, %v5372_v33 }
 0x1e4   : > { %800 = vmatprep.mubr.bf16.mxu0 %v5051_v63  ;;  %v564_v55 = vmul.f32 %v4601_v52, %v5378_v40  ;;  %v590_v32 = vadd.f32 %v3865_v38, %v576_v54 }
 0x1e5   : > { %v595_v56 = vpack.c.bf16 %v589_v53, %v588_v51  ;;  %v577_v57 = vmul.f32 %v3864_v30, %v563_v17 }
 0x1e6   : > { %v4603_v25 = vpop.eup %4602  ;;  %v578_v60 = vmul.f32 %v3864_v30, %v564_v55 }
 0x1e7   : > { %4192 = vmatmul.mubr.bf16.vlgmr.msra.gmra.mrb[0].mxu1 %v595_v56  ;;  %v591_v58 = vadd.f32 %v3865_v38, %v577_v57  ;;  %v565_v59 = vmul.f32 %v4603_v25, %v5380_v41 }
 0x1e8   : > { %v592_v0 = vadd.f32 %v3865_v38, %v578_v60 }
 0x1e9   : > { %v596_v61 = vpack.c.bf16 %v591_v58, %v590_v32  ;;  %v579_v62 = vmul.f32 %v3864_v30, %v565_v59 }
 0x1eb   : > { %801 = vmatmul.mubr.bf16.gmra.mrb[4].mxu0 %v595_v56  ;;  %4195 = vmatprep.mubr.bf16.mxu1 %v596_v61  ;;  %v593_v33 = vadd.f32 %v3865_v38, %v579_v62 }
 0x1ec   : > { %810 = vmatprep.mubr.bf16.mxu0 %v5051_v63 }
 0x1ed   : > { %v597_v1 = vpack.c.bf16 %v593_v33, %v592_v0 }
 0x1ef   : > { %4196 = vmatmul.mubr.bf16.gmra.mrb[4].mxu1 %v597_v1 }
 0x1f3   : > { %811 = vmatmul.mubr.bf16.gmra.mrb[8].mxu0 %v596_v61 }
 0x1f4   : > { %820 = vmatprep.mubr.bf16.mxu0 %v5051_v63 }
 0x1fb   : > { %821 = vmatmul.mubr.bf16.gmra.mrb[12].mxu0 %v597_v1 }
 0x2b6   : > { %v792_v40 = vpop.f32.mrb[0].mxu0 }
 0x2b7   : > { %v794_v2 = vpop.f32.mrb[1].mxu0 }
 0x2b8   : > { %v796_v3 = vpop.f32.mrb[2].mxu0 }
 0x2b9   : > { %v5404_v41 = vpack.c.bf16 %v796_v3, %v792_v40  ;;  %v798_v4 = vpop.f32.mrb[3].mxu0 }
 0x2ba   : > { %v5406_v5 = vpack.c.bf16 %v798_v4, %v794_v2  ;;  %v4193_v6 = vpop.f32.mrb[0].mxu1 }
 0x2bb   : > { %v865_v7 = vpop.f32.mrb[1].mxu1  ;;  %4203 = vmatprep.mubr.msk.bf16.mxu1 %vm908_vm0, %v5404_v41 }
 0x2bc   : > { %v4194_v8 = vpop.f32.mrb[2].mxu1  ;;  %4351 = vmatprep.subr.msk.bf16.mxu1 %vm908_vm0, %v5406_v5  ;;  %v916_v9 = vsel %vm908_vm0, %v5406_v5, 0 }
 0x2bd   : > { %v5414_v10 = vpack.c.bf16 %v4194_v8, %v4193_v6  ;;  %v868_v11 = vpop.f32.mrb[3].mxu1  ;;  %4200 = vmatpush3.bf16.xpose.msra.mxu1 %v916_v9 }
 0x2be   : > { %v5416_v12 = vpack.c.bf16 %v868_v11, %v865_v7  ;;  %v802_v13 = vpop.f32.mrb[4].mxu0 }
 0x2bf   : > { %v804_v14 = vpop.f32.mrb[5].mxu0 }
 0x2c0   : > { %v806_v15 = vpop.f32.mrb[6].mxu0 }
 0x2c1   : > { %v5418_v18 = vpack.c.bf16 %v806_v15, %v802_v13  ;;  %v808_v19 = vpop.f32.mrb[7].mxu0 }
 0x2c2   : > { %v5420_v20 = vpack.c.bf16 %v808_v19, %v804_v14  ;;  %v4197_v21 = vpop.f32.mrb[4].mxu1 }
 0x2c3   : > { %v881_v22 = vpop.f32.mrb[5].mxu1 }
 0x2c4   : > { %v4198_v23 = vpop.f32.mrb[6].mxu1  ;;  %4352 = vmatprep.subr.msk.bf16.mxu1 %vm908_vm0, %v5420_v20  ;;  %v919_v26 = vsel %vm908_vm0, %v5420_v20, 0 }
 0x2c5   : > { %v5426_v27 = vpack.c.bf16 %v4198_v23, %v4197_v21  ;;  %v884_v28 = vpop.f32.mrb[7].mxu1  ;;  %4202 = vmatpush3.bf16.xpose.msra.mxu1 %v919_v26 }
 0x2c6   : > { %v5428_v29 = vpack.c.bf16 %v884_v28, %v881_v22  ;;  %v812_v30 = vpop.f32.mrb[8].mxu0 }
 0x2c7   : > { %v814_v31 = vpop.f32.mrb[9].mxu0 }
 0x2c8   : > { %v816_v34 = vpop.f32.mrb[10].mxu0 }
 0x2c9   : > { %v5430_v35 = vpack.c.bf16 %v816_v34, %v812_v30  ;;  %v818_v36 = vpop.f32.mrb[11].mxu0 }
 0x2ca   : > { %v5432_v37 = vpack.c.bf16 %v818_v36, %v814_v31 }
 0x2cc   : > { %4204 = vmatmul.mubr.msk.bf16.vlgmr.msra.gmra.mrb[8].mxu1 %vm908_vm0, %v5418_v18  ;;  %4353 = vmatprep.subr.msk.bf16.mxu1 %vm908_vm0, %v5432_v37  ;;  %v977_v38 = vsel %vm908_vm0, %v5432_v37, 0 }
 0x2cd   : > { %4208 = vmatpush3.bf16.xpose.msra.mxu1 %v977_v38  ;;  %4211 = vmatprep.mubr.msk.bf16.mxu1 %vm908_vm0, %v5430_v35 }
 0x2ce   : > { %v822_v16 = vpop.f32.mrb[12].mxu0 }
 0x2cf   : > { %v824_v39 = vpop.f32.mrb[13].mxu0 }
 0x2d0   : > { %v826_v42 = vpop.f32.mrb[14].mxu0 }
 0x2d1   : > { %v5442_v43 = vpack.c.bf16 %v826_v42, %v822_v16  ;;  %v828_v44 = vpop.f32.mrb[15].mxu0 }
 0x2d2   : > { %v5444_v45 = vpack.c.bf16 %v828_v44, %v824_v39 }
 0x2d4   : > { %4354 = vmatprep.subr.msk.bf16.mxu1 %vm908_vm0, %v5444_v45  ;;  %v980_v46 = vsel %vm908_vm0, %v5444_v45, 0 }
 0x2d5   : > { %4210 = vmatpush3.bf16.xpose.msra.mxu1 %v980_v46 }
 0x2d6   : > { %4215 = vmatprep.subr.bf16.mxu1 %v5416_v12 }
 0x2dc   : > { %4212 = vmatmul.mubr.msk.bf16.vlgmr.msra.gmra.mrb[12].mxu1 %vm908_vm0, %v5442_v43 }
 0x2dd   : > { %4216 = vmatpush3.bf16.msra.mxu1 %v5416_v12 }
 0x2de   : > { %4217 = vmatprep.subr.bf16.mxu1 %v5414_v10 }
 0x2e1   : > { %4218 = vmatpush3.bf16.msra.mxu1 %v5414_v10 }
 0x2e2   : > { %4223 = vmatprep.subr.bf16.mxu1 %v5428_v29 }
 0x39f   : > { %v4205_v47 = vpop.f32.mrb[8].mxu1 }
 0x3a0   : > { %v955_v48 = vpop.f32.mrb[9].mxu1  ;;  %v1037_v52 = vsel %vm908_vm0, %v4205_v47, -inf }
 0x3a1   : > { %v4206_v49 = vpop.f32.mrb[10].mxu1  ;;  %v1031_v24 = vsel %vm908_vm0, %v955_v48, -inf }
 0x3a2   : > { %1032 = vmax.xlane.f32.xlu0 %v1031_v24  ;;  %v958_v50 = vpop.f32.mrb[11].mxu1  ;;  %v1040_v53 = vsel %vm908_vm0, %v4206_v49, -inf }
 0x3a3   : > { %v1034_v51 = vsel %vm908_vm0, %v958_v50, -inf }
 0x3a4   : > { %1035 = vmax.xlane.f32.xlu1 %v1034_v51 }
 0x3a6   : > { %1038 = vmax.xlane.f32.xlu0 %v1037_v52 }
 0x3a8   : > { %1041 = vmax.xlane.f32.xlu1 %v1040_v53 }
 0x3af   : > { %v5461_v17 = vpop.f32.mrb[12].mxu1 }
 0x3b0   : > { %v5463_v54 = vpop.f32.mrb[13].mxu1  ;;  %v1049_v32 = vsel %vm908_vm0, %v5461_v17, -inf }
 0x3b1   : > { %v4214_v55 = vpop.f32.mrb[14].mxu1  ;;  %v1043_v56 = vsel %vm908_vm0, %v5463_v54, -inf }
 0x3b2   : > { %1044 = vmax.xlane.f32.xlu0 %v1043_v56  ;;  %v1019_v57 = vpop.f32.mrb[15].mxu1  ;;  %v1052_v58 = vsel %vm908_vm0, %v4214_v55, -inf }
 0x3b3   : > { %v1046_v25 = vsel %vm908_vm0, %v1019_v57, -inf }
 0x3b4   : > { %1047 = vmax.xlane.f32.xlu1 %v1046_v25 }
 0x3b6   : > { %1050 = vmax.xlane.f32.xlu0 %v1049_v32 }
 0x3b8   : > { %1053 = vmax.xlane.f32.xlu1 %v1052_v58 }
 0x3c9   : > { %1251 = vrot.lane.b32.xlu1 %v5420_v20, %s5052_s14 }
 0x3cd   : > { %1243 = vrot.lane.b32.xlu1 %v5404_v41, %s5052_s14 }
 0x42f   : > { %v1033_v59 = vpop.xlane.xlu0 %1032 }
 0x430   : > { %v1055_v60 = vsub.f32 %v955_v48, %v1033_v59 }
 0x431   : > { %v1036_v61 = vpop.xlane.xlu1 %1035 }
 0x432   : > { %v1056_v0 = vsub.f32 %v958_v50, %v1036_v61  ;;  %v1063_v1 = vmul.f32 1.442695, %v1055_v60 }
 0x433   : > { %v1039_v62 = vpop.xlane.xlu0 %1038 }
 0x434   : > { %v1057_v33 = vsub.f32 %v4205_v47, %v1039_v62  ;;  %v1065_v4 = vmul.f32 1.442695, %v1056_v0 }
 0x435   : > { %v1042_v40 = vpop.xlane.xlu1 %1041 }
 0x436   : > { %v1067_v2 = vmul.f32 1.442695, %v1057_v33  ;;  %v1058_v3 = vsub.f32 %v4206_v49, %v1042_v40 }
 0x438   : > { %4604 = vpow2.f32 %v1067_v2  ;;  %v1069_v6 = vmul.f32 1.442695, %v1058_v3 }
 0x439   : > { %4606 = vpow2.f32 %v1063_v1 }
 0x43a   : > { %4608 = vpow2.f32 %v1069_v6 }
 0x43b   : > { %4610 = vpow2.f32 %v1065_v4 }
 0x43f   : > { %v1045_v42 = vpop.xlane.xlu0 %1044 }
 0x440   : > { %v1059_v47 = vsub.f32 %v5463_v54, %v1045_v42 }
 0x441   : > { %v1048_v7 = vpop.xlane.xlu1 %1047 }
 0x442   : > { %v5475_v8 = vpop.eup %4604  ;;  %v1060_v14 = vsub.f32 %v1019_v57, %v1048_v7  ;;  %v1071_v49 = vmul.f32 1.442695, %v1059_v47 }
 0x443   : > { %v5477_v9 = vpop.eup %4606  ;;  %v1085_v11 = vsel %vm908_vm0, %v5475_v8, 0.0  ;;  %v1051_v44 = vpop.xlane.xlu0 %1050 }
 0x444   : > { %v4609_v13 = vpop.eup %4608  ;;  %1086 = vadd.xlane.f32.xlu0 %v1085_v11  ;;  %v1079_v23 = vsel %vm908_vm0, %v5477_v9, 0.0  ;;  %v1073_v26 = vmul.f32 1.442695, %v1060_v14  ;;  %v1061_v46 = vsub.f32 %v5461_v17, %v1051_v44 }
 0x445   : > { %v1054_v15 = vpop.xlane.xlu1 %1053  ;;  %v1088_v19 = vsel %vm908_vm0, %v4609_v13, 0.0  ;;  %v4611_v21 = vpop.eup %4610 }
 0x446   : > { %v1062_v22 = vsub.f32 %v4214_v55, %v1054_v15  ;;  %1089 = vadd.xlane.f32.xlu1 %v1088_v19  ;;  %v1082_v31 = vsel %vm908_vm0, %v4611_v21, 0.0  ;;  %v1075_v48 = vmul.f32 1.442695, %v1061_v46 }
 0x448   : > { %v1077_v28 = vmul.f32 1.442695, %v1062_v22  ;;  %1080 = vadd.xlane.f32.xlu0 %v1079_v23 }
 0x449   : > { %v1252_v30 = vpop.permute.xlu1 %1251 }
 0x44a   : > { %4612 = vpow2.f32 %v1077_v28  ;;  %1083 = vadd.xlane.f32.xlu1 %v1082_v31  ;;  %v1263_v61 = vsel %vm908_vm0, %v1252_v30, 0 }
 0x44b   : > { %4614 = vpow2.f32 %v1073_v26 }
 0x44c   : > { %4616 = vpow2.f32 %v1075_v48 }
 0x44d   : > { %v1244_v34 = vpop.permute.xlu1 %1243  ;;  %4618 = vpow2.f32 %v1071_v49 }
 0x44e   : > { %4235 = vmatprep.mubr.msk.bf16.mxu0 %vm908_vm0, %v1244_v34 }
 0x454   : > { %v5486_v36 = vpop.eup %4612 }
 0x455   : > { %v1100_v38 = vsel %vm908_vm0, %v5486_v36, 0.0  ;;  %v5490_v16 = vpop.eup %4614 }
 0x456   : > { %1101 = vadd.xlane.f32.xlu1 %v1100_v38  ;;  %v1094_v39 = vsel %vm908_vm0, %v5490_v16, 0.0  ;;  %v4617_v24 = vpop.eup %4616 }
 0x457   : > { %v1097_v50 = vsel %vm908_vm0, %v4617_v24, 0.0  ;;  %v4619_v51 = vpop.eup %4618 }
 0x458   : > { %v1091_v52 = vsel %vm908_vm0, %v4619_v51, 0.0 }
 0x45a   : > { %1095 = vadd.xlane.f32.xlu1 %v1094_v39 }
 0x45e   : > { %1249 = vrot.lane.b32.xlu0 %v5406_v5, %s5052_s14 }
 0x46b   : > { %1245 = vrot.lane.b32.xlu1 %v5418_v18, %s5052_s14 }
 0x46f   : > { %1324 = vrot.lane.b32.xlu1 %v5444_v45, %s5052_s14 }
 0x473   : > { %1318 = vrot.lane.b32.xlu1 %v5442_v43, %s5052_s14 }
 0x47d   : > { %1098 = vadd.xlane.f32.xlu0 %v1097_v50 }
 0x481   : > { %1092 = vadd.xlane.f32.xlu0 %v1091_v52 }
 0x497   : > { %1322 = vrot.lane.b32.xlu0 %v5432_v37, %s5052_s14 }
 0x49b   : > { %1316 = vrot.lane.b32.xlu0 %v5430_v35, %s5052_s14 }
 0x4d1   : > { %v1087_v53 = vpop.xlane.xlu0 %1086 }
 0x4d3   : > { %v1090_v17 = vpop.xlane.xlu1 %1089 }
 0x4d4   : > { %4620 = vrcp.f32 %v1090_v17 }
 0x4d5   : > { %v1081_v54 = vpop.xlane.xlu0 %1080 }
 0x4d6   : > { %4622 = vrcp.f32 %v1081_v54 }
 0x4d7   : > { %4624 = vrcp.f32 %v1087_v53  ;;  %v1084_v55 = vpop.xlane.xlu1 %1083 }
 0x4d8   : > { %4626 = vrcp.f32 %v1084_v55 }
 0x4d9   : > { %v1250_v56 = vpop.permute.xlu0 %1249 }
 0x4da   : > { %4355 = vmatprep.subr.msk.bf16.mxu0 %vm908_vm0, %v1250_v56  ;;  %v1260_v57 = vsel %vm908_vm0, %v1250_v56, 0 }
 0x4db   : > { %4232 = vmatpush3.bf16.xpose.msra.mxu0 %v1260_v57 }
 0x4dc   : > { %4356 = vmatprep.subr.msk.bf16.mxu0 %vm908_vm0, %v1252_v30 }
 0x4de   : > { %v4621_v25 = vpop.eup %4620 }
 0x4df   : > { %v1114_v60 = vmul.f32 %v4621_v25, %v4609_v13 }
 0x4e0   : > { %v4623_v32 = vpop.eup %4622 }
 0x4e1   : > { %v4625_v58 = vpop.eup %4624  ;;  %v1111_v0 = vmul.f32 %v4623_v32, %v5477_v9 }
 0x4e2   : > { %v4627_v59 = vpop.eup %4626  ;;  %v1113_v1 = vmul.f32 %v4625_v58, %v5475_v8 }
 0x4e3   : > { %4234 = vmatpush3.bf16.xpose.msra.mxu0 %v1263_v61  ;;  %v1102_v62 = vpop.xlane.xlu1 %1101  ;;  %v1112_v33 = vmul.f32 %v4627_v59, %v4611_v21 }
 0x4e4   : > { %v1120_v2 = vpack.c.bf16 %v1114_v60, %v1113_v1 }
 0x4e5   : > { %v1119_v40 = vpack.c.bf16 %v1112_v33, %v1111_v0 }
 0x4e7   : > { %4219 = vmatprep.mubr.msk.bf16.mxu1 %vm908_vm0, %v1119_v40  ;;  %v1096_v3 = vpop.xlane.xlu1 %1095 }
 0x4e8   : > { %4220 = vmatmul.mubr.msk.bf16.vlgmr.msra.gmra.mrb[16].mxu1 %vm908_vm0, %v1120_v2 }
 0x4e9   : > { %4224 = vmatpush3.bf16.msra.mxu1 %v5428_v29 }
 0x4ea   : > { %4225 = vmatprep.subr.bf16.mxu1 %v5426_v27 }
 0x4eb   : > { %v1246_v4 = vpop.permute.xlu1 %1245 }
 0x4ec   : > { %4236 = vmatmul.mubr.msk.bf16.vlgmr.msra.gmra.mrb[16].mxu0 %vm908_vm0, %v1246_v4 }
 0x4ed   : > { %4226 = vmatpush3.bf16.msra.mxu1 %v5426_v27 }
 0x4ef   : > { %v1325_v31 = vpop.permute.xlu1 %1324 }
 0x4f0   : > { %v1336_v34 = vsel %vm908_vm0, %v1325_v31, 0 }
 0x4f3   : > { %v1319_v38 = vpop.permute.xlu1 %1318 }
 0x50a   : > { %v1099_v6 = vpop.xlane.xlu0 %1098 }
 0x50b   : > { %4628 = vrcp.f32 %v1099_v6 }
 0x50c   : > { %4630 = vrcp.f32 %v1096_v3 }
 0x50d   : > { %4632 = vrcp.f32 %v1102_v62 }
 0x50e   : > { %v1093_v7 = vpop.xlane.xlu0 %1092 }
 0x50f   : > { %4634 = vrcp.f32 %v1093_v7 }
 0x512   : > { %v1323_v8 = vpop.permute.xlu0 %1322 }
 0x513   : > { %4357 = vmatprep.subr.msk.bf16.mxu1 %vm908_vm0, %v1323_v8  ;;  %v1333_v30 = vsel %vm908_vm0, %v1323_v8, 0 }
 0x515   : > { %v4629_v9 = vpop.eup %4628 }
 0x516   : > { %v4631_v11 = vpop.eup %4630  ;;  %v1117_v15 = vmul.f32 %v4629_v9, %v4617_v24  ;;  %v1317_v28 = vpop.permute.xlu0 %1316 }
 0x517   : > { %v4633_v13 = vpop.eup %4632  ;;  %v1116_v21 = vmul.f32 %v4631_v11, %v5490_v16 }
 0x518   : > { %v1118_v22 = vmul.f32 %v4633_v13, %v5486_v36 }
 0x519   : > { %v4635_v14 = vpop.eup %4634 }
 0x51a   : > { %v1115_v19 = vmul.f32 %v4635_v14, %v4619_v51  ;;  %v1122_v26 = vpack.c.bf16 %v1118_v22, %v1117_v15 }
 0x51c   : > { %v1121_v23 = vpack.c.bf16 %v1116_v21, %v1115_v19 }
 0x51e   : > { %4227 = vmatprep.mubr.msk.bf16.mxu1 %vm908_vm0, %v1121_v23 }
 0x51f   : > { %4228 = vmatmul.mubr.msk.bf16.vlgmr.msra.gmra.mrb[20].mxu1 %vm908_vm0, %v1122_v26 }
 0x520   : > { %4240 = vmatpush3.bf16.xpose.msra.mxu1 %v1333_v30  ;;  %4243 = vmatprep.mubr.msk.bf16.mxu1 %vm908_vm0, %v1317_v28 }
 0x521   : > { %4358 = vmatprep.subr.msk.bf16.mxu1 %vm908_vm0, %v1325_v31 }
 0x528   : > { %4242 = vmatpush3.bf16.xpose.msra.mxu1 %v1336_v34 }
 0x52f   : > { %4244 = vmatmul.mubr.msk.bf16.vlgmr.msra.gmra.mrb[24].mxu1 %vm908_vm0, %v1319_v38 }
 0x5bb   : > { %v4221_v36 = vpop.f32.mrb[16].mxu1 }
 0x5bc   : > { %v1163_v16 = vpop.f32.mrb[17].mxu1 }
 0x5bd   : > { %v4222_v39 = vpop.f32.mrb[18].mxu1 }
 0x5be   : > { %v1234_v42 = vpack.c.bf16 %v4222_v39, %v4221_v36  ;;  %v1166_v44 = vpop.f32.mrb[19].mxu1 }
 0x5bf   : > { %v1233_v46 = vpack.c.bf16 %v1166_v44, %v1163_v16  ;;  %v4237_v47 = vpop.f32.mrb[16].mxu0 }
 0x5c0   : > { %1238 = vst.msk [vmem:[#allocation2 + $0x8] sm:$0xff] %vm908_vm0, %v1234_v42  ;;  %v1299_v48 = vpop.f32.mrb[17].mxu0  ;;  %v1393_v52 = vsel %vm908_vm0, %v4237_v47, -inf }
 0x5c1   : > { %1237 = vst.msk [vmem:[#allocation2] sm:$0xff] %vm908_vm0, %v1233_v46  ;;  %v4238_v49 = vpop.f32.mrb[18].mxu0  ;;  %v1387_v24 = vsel %vm908_vm0, %v1299_v48, -inf }
 0x5c2   : > { %1388 = vmax.xlane.f32.xlu0 %v1387_v24  ;;  %v1302_v50 = vpop.f32.mrb[19].mxu0  ;;  %v1396_v53 = vsel %vm908_vm0, %v4238_v49, -inf }
 0x5c3   : > { %v1390_v51 = vsel %vm908_vm0, %v1302_v50, -inf }
 0x5c4   : > { %1391 = vmax.xlane.f32.xlu1 %v1390_v51 }
 0x5c6   : > { %1394 = vmax.xlane.f32.xlu0 %v1393_v52 }
 0x5ca   : > { %1397 = vmax.xlane.f32.xlu0 %v1396_v53 }
 0x5f2   : > { %v4229_v17 = vpop.f32.mrb[20].mxu1 }
 0x5f3   : > { %v1218_v54 = vpop.f32.mrb[21].mxu1 }
 0x5f4   : > { %v4230_v55 = vpop.f32.mrb[22].mxu1 }
 0x5f5   : > { %v1236_v56 = vpack.c.bf16 %v4230_v55, %v4229_v17  ;;  %v1221_v57 = vpop.f32.mrb[23].mxu1 }
 0x5f6   : > { %v1235_v25 = vpack.c.bf16 %v1221_v57, %v1218_v54 }
 0x5f7   : > { %1240 = vst.msk [vmem:[#allocation2 + $0x18] sm:$0xff] %vm908_vm0, %v1236_v56 }
 0x5f8   : > { %1239 = vst.msk [vmem:[#allocation2 + $0x10] sm:$0xff] %vm908_vm0, %v1235_v25 }
 0x602   : > { %v4245_v32 = vpop.f32.mrb[24].mxu1 }
 0x603   : > { %v1372_v58 = vpop.f32.mrb[25].mxu1  ;;  %v1405_v0 = vsel %vm908_vm0, %v4245_v32, -inf }
 0x604   : > { %v4246_v59 = vpop.f32.mrb[26].mxu1  ;;  %v1399_v60 = vsel %vm908_vm0, %v1372_v58, -inf }
 0x605   : > { %1400 = vmax.xlane.f32.xlu0 %v1399_v60  ;;  %v1375_v61 = vpop.f32.mrb[27].mxu1  ;;  %v1408_v33 = vsel %vm908_vm0, %v4246_v59, -inf }
 0x606   : > { %v1402_v62 = vsel %vm908_vm0, %v1375_v61, -inf }
 0x607   : > { %1403 = vmax.xlane.f32.xlu1 %v1402_v62 }
 0x609   : > { %1406 = vmax.xlane.f32.xlu0 %v1405_v0 }
 0x60b   : > { %1409 = vmax.xlane.f32.xlu1 %v1408_v33 }
 0x64f   : > { %v1389_v1 = vpop.xlane.xlu0 %1388 }
 0x650   : > { %v1411_v40 = vsub.f32 %v1299_v48, %v1389_v1 }
 0x651   : > { %v1392_v2 = vpop.xlane.xlu1 %1391 }
 0x652   : > { %v1419_v3 = vmul.f32 1.442695, %v1411_v40  ;;  %v1412_v4 = vsub.f32 %v1302_v50, %v1392_v2 }
 0x653   : > { %v1395_v6 = vpop.xlane.xlu0 %1394 }
 0x654   : > { %4636 = vpow2.f32 %v1419_v3  ;;  %v1421_v7 = vmul.f32 1.442695, %v1412_v4  ;;  %v1413_v8 = vsub.f32 %v4237_v47, %v1395_v6 }
 0x656   : > { %4638 = vpow2.f32 %v1421_v7  ;;  %v1423_v9 = vmul.f32 1.442695, %v1413_v8 }
 0x657   : > { %v1398_v11 = vpop.xlane.xlu0 %1397 }
 0x658   : > { %4640 = vpow2.f32 %v1423_v9  ;;  %v1414_v13 = vsub.f32 %v4238_v49, %v1398_v11 }
 0x65a   : > { %v1425_v14 = vmul.f32 1.442695, %v1414_v13 }
 0x65c   : > { %4642 = vpow2.f32 %v1425_v14 }
 0x65e   : > { %v5544_v15 = vpop.eup %4636 }
 0x65f   : > { %v1435_v19 = vsel %vm908_vm0, %v5544_v15, 0.0 }
 0x660   : > { %v5548_v21 = vpop.eup %4638  ;;  %1436 = vadd.xlane.f32.xlu0 %v1435_v19 }
 0x661   : > { %v1438_v22 = vsel %vm908_vm0, %v5548_v21, 0.0 }
 0x662   : > { %v5552_v23 = vpop.eup %4640  ;;  %1439 = vadd.xlane.f32.xlu1 %v1438_v22 }
 0x663   : > { %v1441_v26 = vsel %vm908_vm0, %v5552_v23, 0.0 }
 0x664   : > { %1442 = vadd.xlane.f32.xlu0 %v1441_v26 }
 0x666   : > { %v5556_v28 = vpop.eup %4642 }
 0x667   : > { %v1444_v30 = vsel %vm908_vm0, %v5556_v28, 0.0 }
 0x668   : > { %1445 = vadd.xlane.f32.xlu1 %v1444_v30 }
 0x679   : > { %1483 = vrot.lane.b32.xlu1 %v5414_v10, %s5052_s14 }
 0x67a   : > { %1481 = vrot.lane.b32.xlu0 %v5416_v12, %s5052_s14 }
 0x67d   : > { %1544 = vrot.lane.b32.xlu1 %v5428_v29, %s5052_s14 }
 0x67e   : > { %1634 = vrot.lane.b32.xlu0 %v5406_v5, %s5053_s3 }
 0x681   : > { %1636 = vrot.lane.b32.xlu1 %v5420_v20, %s5053_s3 }
 0x682   : > { %1546 = vrot.lane.b32.xlu0 %v5426_v27, %s5052_s14 }
 0x686   : > { %1630 = vrot.lane.b32.xlu0 %v5404_v41, %s5053_s3 }
 0x692   : > { %v1401_v31 = vpop.xlane.xlu0 %1400 }
 0x693   : > { %v1415_v34 = vsub.f32 %v1372_v58, %v1401_v31 }
 0x694   : > { %v1404_v38 = vpop.xlane.xlu1 %1403 }
 0x695   : > { %v1427_v36 = vmul.f32 1.442695, %v1415_v34  ;;  %v1416_v44 = vsub.f32 %v1375_v61, %v1404_v38 }
 0x696   : > { %v1407_v16 = vpop.xlane.xlu0 %1406 }
 0x697   : > { %4644 = vpow2.f32 %v1427_v36  ;;  %v1417_v39 = vsub.f32 %v4245_v32, %v1407_v16  ;;  %v1429_v49 = vmul.f32 1.442695, %v1416_v44 }
 0x698   : > { %v1410_v42 = vpop.xlane.xlu1 %1409 }
 0x699   : > { %v1431_v46 = vmul.f32 1.442695, %v1417_v39  ;;  %v1418_v47 = vsub.f32 %v4246_v59, %v1410_v42 }
 0x69b   : > { %4646 = vpow2.f32 %v1431_v46  ;;  %v1433_v48 = vmul.f32 1.442695, %v1418_v47 }
 0x69d   : > { %4648 = vpow2.f32 %v1433_v48 }
 0x69e   : > { %4650 = vpow2.f32 %v1429_v49 }
 0x6a1   : > { %v5574_v24 = vpop.eup %4644 }
 0x6a2   : > { %v1447_v50 = vsel %vm908_vm0, %v5574_v24, 0.0 }
 0x6a5   : > { %v5578_v51 = vpop.eup %4646  ;;  %1448 = vadd.xlane.f32.xlu0 %v1447_v50 }
 0x6a6   : > { %v1453_v52 = vsel %vm908_vm0, %v5578_v51, 0.0 }
 0x6a7   : > { %v5582_v53 = vpop.eup %4648  ;;  %1454 = vadd.xlane.f32.xlu1 %v1453_v52 }
 0x6a8   : > { %v1456_v17 = vsel %vm908_vm0, %v5582_v53, 0.0  ;;  %v5586_v54 = vpop.eup %4650 }
 0x6a9   : > { %v1450_v55 = vsel %vm908_vm0, %v5586_v54, 0.0 }
 0x6ab   : > { %1457 = vadd.xlane.f32.xlu1 %v1456_v17 }
 0x6af   : > { %1451 = vadd.xlane.f32.xlu1 %v1450_v55 }
 0x6bb   : > { %1703 = vrot.lane.b32.xlu0 %v5432_v37, %s5053_s3 }
 0x6bf   : > { %1699 = vrot.lane.b32.xlu0 %v5430_v35, %s5053_s3 }
 0x6c0   : > { %1632 = vrot.lane.b32.xlu1 %v5418_v18, %s5053_s3 }
 0x6c4   : > { %1705 = vrot.lane.b32.xlu1 %v5444_v45, %s5053_s3 }
 0x6c8   : > { %1701 = vrot.lane.b32.xlu1 %v5442_v43, %s5053_s3 }
 0x6ed   : > { %v1437_v56 = vpop.xlane.xlu0 %1436 }
 0x6ee   : > { %4652 = vrcp.f32 %v1437_v56 }
 0x6ef   : > { %v1440_v57 = vpop.xlane.xlu1 %1439 }
 0x6f0   : > { %4654 = vrcp.f32 %v1440_v57 }
 0x6f1   : > { %v1443_v25 = vpop.xlane.xlu0 %1442 }
 0x6f2   : > { %4656 = vrcp.f32 %v1443_v25 }
 0x6f5   : > { %v1482_v32 = vpop.permute.xlu0 %1481  ;;  %v1446_v58 = vpop.xlane.xlu1 %1445 }
 0x6f6   : > { %4658 = vrcp.f32 %v1446_v58  ;;  %4247 = vmatprep.subr.bf16.mxu0 %v1482_v32 }
 0x6f7   : > { %4248 = vmatpush3.bf16.msra.mxu0 %v1482_v32 }
 0x6f8   : > { %v4653_v59 = vpop.eup %4652 }
 0x6f9   : > { %v1635_v60 = vpop.permute.xlu0 %1634  ;;  %v1484_v61 = vpop.permute.xlu1 %1483  ;;  %v1467_v0 = vmul.f32 %v4653_v59, %v5544_v15 }
 0x6fa   : > { %v4655_v62 = vpop.eup %4654  ;;  %4249 = vmatprep.subr.bf16.mxu0 %v1484_v61  ;;  %v1645_v9 = vsel %vm908_vm0, %v1635_v60, 0 }
 0x6fb   : > { %4250 = vmatpush3.bf16.msra.mxu0 %v1484_v61  ;;  %v1468_v33 = vmul.f32 %v4655_v62, %v5548_v21 }
 0x6fc   : > { %4359 = vmatprep.subr.msk.bf16.mxu0 %vm908_vm0, %v1635_v60  ;;  %v4657_v2 = vpop.eup %4656 }
 0x6fd   : > { %v1545_v1 = vpop.permute.xlu1 %1544  ;;  %v1475_v40 = vpack.c.bf16 %v1468_v33, %v1467_v0  ;;  %v1547_v3 = vpop.permute.xlu0 %1546  ;;  %v1469_v6 = vmul.f32 %v4657_v2, %v5552_v23 }
 0x6fe   : > { %4255 = vmatprep.subr.bf16.mxu1 %v1545_v1 }
 0x6ff   : > { %4251 = vmatprep.mubr.msk.bf16.mxu0 %vm908_vm0, %v1475_v40  ;;  %4256 = vmatpush3.bf16.msra.mxu1 %v1545_v1 }
 0x700   : > { %v4659_v4 = vpop.eup %4658  ;;  %4257 = vmatprep.subr.bf16.mxu1 %v1547_v3 }
 0x701   : > { %v1470_v7 = vmul.f32 %v4659_v4, %v5556_v28  ;;  %v1631_v11 = vpop.permute.xlu0 %1630  ;;  %v1637_v13 = vpop.permute.xlu1 %1636 }
 0x702   : > { %v1648_v14 = vsel %vm908_vm0, %v1637_v13, 0 }
 0x703   : > { %4258 = vmatpush3.bf16.msra.mxu1 %v1547_v3  ;;  %v1476_v8 = vpack.c.bf16 %v1470_v7, %v1469_v6 }
 0x705   : > { %4252 = vmatmul.mubr.msk.bf16.vlgmr.msra.gmra.mrb[20].mxu0 %vm908_vm0, %v1476_v8 }
 0x706   : > { %4264 = vmatpush3.bf16.xpose.msra.mxu0 %v1645_v9  ;;  %4267 = vmatprep.mubr.msk.bf16.mxu0 %vm908_vm0, %v1631_v11 }
 0x707   : > { %4360 = vmatprep.subr.msk.bf16.mxu0 %vm908_vm0, %v1637_v13 }
 0x70e   : > { %4266 = vmatpush3.bf16.xpose.msra.mxu0 %v1648_v14 }
 0x732   : > { %v1449_v15 = vpop.xlane.xlu0 %1448 }
 0x734   : > { %v1455_v19 = vpop.xlane.xlu1 %1454 }
 0x736   : > { %v1704_v21 = vpop.permute.xlu0 %1703 }
 0x737   : > { %4361 = vmatprep.subr.msk.bf16.mxu1 %vm908_vm0, %v1704_v21  ;;  %v1714_v46 = vsel %vm908_vm0, %v1704_v21, 0 }
 0x738   : > { %v1458_v22 = vpop.xlane.xlu1 %1457 }
 0x739   : > { %4660 = vrcp.f32 %v1458_v22 }
 0x73a   : > { %4662 = vrcp.f32 %v1449_v15  ;;  %v1700_v47 = vpop.permute.xlu0 %1699 }
 0x73b   : > { %4664 = vrcp.f32 %v1455_v19 }
 0x73c   : > { %v1452_v23 = vpop.xlane.xlu1 %1451 }
 0x73d   : > { %4666 = vrcp.f32 %v1452_v23 }
 0x740   : > { %v1633_v26 = vpop.permute.xlu1 %1632 }
 0x741   : > { %4268 = vmatmul.mubr.msk.bf16.vlgmr.msra.gmra.mrb[24].mxu0 %vm908_vm0, %v1633_v26 }
 0x743   : > { %v4661_v28 = vpop.eup %4660 }
 0x744   : > { %v4663_v30 = vpop.eup %4662  ;;  %v1474_v38 = vmul.f32 %v4661_v28, %v5582_v53  ;;  %v1706_v48 = vpop.permute.xlu1 %1705 }
 0x745   : > { %v4665_v31 = vpop.eup %4664  ;;  %v1471_v36 = vmul.f32 %v4663_v30, %v5574_v24  ;;  %v1717_v49 = vsel %vm908_vm0, %v1706_v48, 0 }
 0x746   : > { %v1473_v39 = vmul.f32 %v4665_v31, %v5578_v51 }
 0x747   : > { %v4667_v34 = vpop.eup %4666 }
 0x748   : > { %v1472_v16 = vmul.f32 %v4667_v34, %v5586_v54  ;;  %v1478_v44 = vpack.c.bf16 %v1474_v38, %v1473_v39  ;;  %v1702_v24 = vpop.permute.xlu1 %1701 }
 0x74a   : > { %v1477_v42 = vpack.c.bf16 %v1472_v16, %v1471_v36 }
 0x74c   : > { %4259 = vmatprep.mubr.msk.bf16.mxu1 %vm908_vm0, %v1477_v42 }
 0x74d   : > { %4260 = vmatmul.mubr.msk.bf16.vlgmr.msra.gmra.mrb[28].mxu1 %vm908_vm0, %v1478_v44 }
 0x74e   : > { %4272 = vmatpush3.bf16.xpose.msra.mxu1 %v1714_v46  ;;  %4275 = vmatprep.mubr.msk.bf16.mxu1 %vm908_vm0, %v1700_v47 }
 0x74f   : > { %4362 = vmatprep.subr.msk.bf16.mxu1 %vm908_vm0, %v1706_v48 }
 0x756   : > { %4274 = vmatpush3.bf16.xpose.msra.mxu1 %v1717_v49 }
 0x75d   : > { %4276 = vmatmul.mubr.msk.bf16.vlgmr.msra.gmra.mrb[32].mxu1 %vm908_vm0, %v1702_v24 }
 0x7d8   : > { %v5624_v50 = vpop.f32.mrb[20].mxu0 }
 0x7d9   : > { %v5626_v51 = vpop.f32.mrb[21].mxu0 }
 0x7da   : > { %v5628_v52 = vpop.f32.mrb[22].mxu0 }
 0x7db   : > { %v1606_v53 = vpack.c.bf16 %v5628_v52, %v5624_v50  ;;  %v5632_v17 = vpop.f32.mrb[23].mxu0 }
 0x7dc   : > { %v1605_v54 = vpack.c.bf16 %v5632_v17, %v5626_v51 }
 0x814   : > { %v4269_v55 = vpop.f32.mrb[24].mxu0 }
 0x815   : > { %v1684_v56 = vpop.f32.mrb[25].mxu0  ;;  %v1774_v59 = vsel %vm908_vm0, %v4269_v55, -inf }
 0x816   : > { %v4270_v57 = vpop.f32.mrb[26].mxu0  ;;  %v1768_v25 = vsel %vm908_vm0, %v1684_v56, -inf }
 0x817   : > { %1769 = vmax.xlane.f32.xlu0 %v1768_v25  ;;  %v1687_v32 = vpop.f32.mrb[27].mxu0  ;;  %v1777_v60 = vsel %vm908_vm0, %v4270_v57, -inf }
 0x818   : > { %v1771_v58 = vsel %vm908_vm0, %v1687_v32, -inf }
 0x819   : > { %1772 = vmax.xlane.f32.xlu1 %v1771_v58 }
 0x81b   : > { %1775 = vmax.xlane.f32.xlu0 %v1774_v59 }
 0x81f   : > { %1778 = vmax.xlane.f32.xlu0 %v1777_v60 }
 0x820   : > { %v5640_v61 = vpop.f32.mrb[28].mxu1 }
 0x821   : > { %v5642_v62 = vpop.f32.mrb[29].mxu1 }
 0x822   : > { %v5644_v0 = vpop.f32.mrb[30].mxu1 }
 0x823   : > { %v1608_v33 = vpack.c.bf16 %v5644_v0, %v5640_v61  ;;  %v5648_v1 = vpop.f32.mrb[31].mxu1 }
 0x824   : > { %v1607_v40 = vpack.c.bf16 %v5648_v1, %v5642_v62 }
 0x830   : > { %v4277_v2 = vpop.f32.mrb[32].mxu1 }
 0x831   : > { %v1753_v3 = vpop.f32.mrb[33].mxu1  ;;  %v1786_v9 = vsel %vm908_vm0, %v4277_v2, -inf }
 0x832   : > { %v4278_v4 = vpop.f32.mrb[34].mxu1  ;;  %v1780_v6 = vsel %vm908_vm0, %v1753_v3, -inf }
 0x833   : > { %1781 = vmax.xlane.f32.xlu0 %v1780_v6  ;;  %v1756_v7 = vpop.f32.mrb[35].mxu1  ;;  %v1789_v11 = vsel %vm908_vm0, %v4278_v4, -inf }
 0x834   : > { %v1783_v8 = vsel %vm908_vm0, %v1756_v7, -inf }
 0x835   : > { %1784 = vmax.xlane.f32.xlu1 %v1783_v8 }
 0x837   : > { %1787 = vmax.xlane.f32.xlu0 %v1786_v9 }
 0x839   : > { %1790 = vmax.xlane.f32.xlu1 %v1789_v11 }
 0x8a4   : > { %v1770_v13 = vpop.xlane.xlu0 %1769 }
 0x8a5   : > { %v1792_v14 = vsub.f32 %v1684_v56, %v1770_v13 }
 0x8a6   : > { %v1773_v15 = vpop.xlane.xlu1 %1772 }
 0x8a7   : > { %v1800_v19 = vmul.f32 1.442695, %v1792_v14  ;;  %v1793_v21 = vsub.f32 %v1687_v32, %v1773_v15 }
 0x8a8   : > { %v1776_v22 = vpop.xlane.xlu0 %1775 }
 0x8a9   : > { %4668 = vpow2.f32 %v1800_v19  ;;  %v1802_v23 = vmul.f32 1.442695, %v1793_v21  ;;  %v1794_v26 = vsub.f32 %v4269_v55, %v1776_v22 }
 0x8ab   : > { %4670 = vpow2.f32 %v1802_v23  ;;  %v1804_v28 = vmul.f32 1.442695, %v1794_v26 }
 0x8ac   : > { %v1779_v30 = vpop.xlane.xlu0 %1778 }
 0x8ad   : > { %4672 = vpow2.f32 %v1804_v28  ;;  %v1795_v31 = vsub.f32 %v4270_v57, %v1779_v30 }
 0x8af   : > { %v1806_v34 = vmul.f32 1.442695, %v1795_v31 }
 0x8b1   : > { %4674 = vpow2.f32 %v1806_v34 }
 0x8b3   : > { %v5656_v38 = vpop.eup %4668 }
 0x8b4   : > { %v1816_v36 = vsel %vm908_vm0, %v5656_v38, 0.0 }
 0x8b5   : > { %v5660_v16 = vpop.eup %4670  ;;  %1817 = vadd.xlane.f32.xlu0 %v1816_v36 }
 0x8b6   : > { %v1819_v39 = vsel %vm908_vm0, %v5660_v16, 0.0 }
 0x8b7   : > { %v5664_v42 = vpop.eup %4672  ;;  %1820 = vadd.xlane.f32.xlu1 %v1819_v39 }
 0x8b8   : > { %v1822_v44 = vsel %vm908_vm0, %v5664_v42, 0.0 }
 0x8b9   : > { %1823 = vadd.xlane.f32.xlu0 %v1822_v44 }
 0x8bb   : > { %v5668_v46 = vpop.eup %4674 }
 0x8bc   : > { %v1825_v47 = vsel %vm908_vm0, %v5668_v46, 0.0 }
 0x8bd   : > { %1826 = vadd.xlane.f32.xlu1 %v1825_v47 }
 0x8c0   : > { %v1782_v48 = vpop.xlane.xlu0 %1781 }
 0x8c1   : > { %v1796_v55 = vsub.f32 %v1753_v3, %v1782_v48 }
 0x8c2   : > { %v1785_v49 = vpop.xlane.xlu1 %1784 }
 0x8c3   : > { %v1808_v25 = vmul.f32 1.442695, %v1796_v55 }
 0x8c4   : > { %v1788_v24 = vpop.xlane.xlu0 %1787 }
 0x8c5   : > { %v1798_v56 = vsub.f32 %v4277_v2, %v1788_v24  ;;  %4676 = vpow2.f32 %v1808_v25 }
 0x8c6   : > { %v1791_v57 = vpop.xlane.xlu1 %1790 }
 0x8c7   : > { %v1812_v32 = vmul.f32 1.442695, %v1798_v56  ;;  %v1799_v58 = vsub.f32 %v4278_v4, %v1791_v57 }
 0x8c9   : > { %4678 = vpow2.f32 %v1812_v32  ;;  %v1814_v59 = vmul.f32 1.442695, %v1799_v58 }
 0x8cb   : > { %4680 = vpow2.f32 %v1814_v59 }
 0x8ce   : > { %1862 = vrot.lane.b32.xlu1 %v5414_v10, %s5053_s3 }
 0x8cf   : > { %1860 = vrot.lane.b32.xlu0 %v5416_v12, %s5053_s3  ;;  %v5686_v60 = vpop.eup %4676 }
 0x8d2   : > { %1921 = vrot.lane.b32.xlu1 %v5428_v29, %s5053_s3 }
 0x8d3   : > { %2011 = vrot.lane.b32.xlu0 %v5406_v5, %s5054_s13  ;;  %v1797_v5 = vsub.f32 %v1756_v7, %v1785_v49  ;;  %v5688_v6 = vpop.eup %4678 }
 0x8d4   : > { %v1834_v2 = vsel %vm908_vm0, %v5688_v6, 0.0 }
 0x8d5   : > { %v5694_v3 = vpop.eup %4680 }
 0x8d6   : > { %2013 = vrot.lane.b32.xlu1 %v5420_v20, %s5054_s13  ;;  %v1810_v20 = vmul.f32 1.442695, %v1797_v5  ;;  %v1837_v4 = vsel %vm908_vm0, %v5694_v3, 0.0 }
 0x8d7   : > { %1923 = vrot.lane.b32.xlu0 %v5426_v27, %s5053_s3 }
 0x8d8   : > { %4682 = vpow2.f32 %v1810_v20 }
 0x8db   : > { %2007 = vrot.lane.b32.xlu0 %v5404_v41, %s5054_s13  ;;  %v1828_v41 = vsel %vm908_vm0, %v5686_v60, 0.0 }
 0x8e2   : > { %v5698_v7 = vpop.eup %4682 }
 0x8e3   : > { %v1831_v8 = vsel %vm908_vm0, %v5698_v7, 0.0 }
 0x8fa   : > { %1829 = vadd.xlane.f32.xlu0 %v1828_v41  ;;  %1835 = vadd.xlane.f32.xlu1 %v1834_v2 }
 0x8fe   : > { %1838 = vadd.xlane.f32.xlu1 %v1837_v4 }
 0x902   : > { %1832 = vadd.xlane.f32.xlu1 %v1831_v8 }
 0x910   : > { %2080 = vrot.lane.b32.xlu0 %v5432_v37, %s5054_s13 }
 0x913   : > { %2009 = vrot.lane.b32.xlu1 %v5418_v18, %s5054_s13 }
 0x914   : > { %2076 = vrot.lane.b32.xlu0 %v5430_v35, %s5054_s13 }
 0x917   : > { %2082 = vrot.lane.b32.xlu1 %v5444_v45, %s5054_s13 }
 0x91b   : > { %2078 = vrot.lane.b32.xlu1 %v5442_v43, %s5054_s13 }
 0x942   : > { %v1818_v9 = vpop.xlane.xlu0 %1817 }
 0x943   : > { %4684 = vrcp.f32 %v1818_v9 }
 0x944   : > { %v1821_v11 = vpop.xlane.xlu1 %1820 }
 0x945   : > { %4686 = vrcp.f32 %v1821_v11 }
 0x946   : > { %v1824_v13 = vpop.xlane.xlu0 %1823 }
 0x947   : > { %4688 = vrcp.f32 %v1824_v13 }
 0x94a   : > { %v1861_v14 = vpop.permute.xlu0 %1860  ;;  %v1827_v37 = vpop.xlane.xlu1 %1826 }
 0x94b   : > { %4690 = vrcp.f32 %v1827_v37  ;;  %4279 = vmatprep.subr.bf16.mxu0 %v1861_v14 }
 0x94c   : > { %4280 = vmatpush3.bf16.msra.mxu0 %v1861_v14 }
 0x94d   : > { %v4685_v18 = vpop.eup %4684 }
 0x94e   : > { %v2012_v15 = vpop.permute.xlu0 %2011  ;;  %v1863_v35 = vpop.permute.xlu1 %1862  ;;  %v1848_v45 = vmul.f32 %v4685_v18, %v5656_v38 }
 0x94f   : > { %v4687_v19 = vpop.eup %4686  ;;  %4281 = vmatprep.subr.bf16.mxu0 %v1863_v35  ;;  %v2022_v38 = vsel %vm908_vm0, %v2012_v15, 0 }
 0x950   : > { %4282 = vmatpush3.bf16.msra.mxu0 %v1863_v35  ;;  %v1849_v43 = vmul.f32 %v4687_v19, %v5660_v16 }
 0x951   : > { %4363 = vmatprep.subr.msk.bf16.mxu0 %vm908_vm0, %v2012_v15  ;;  %v4689_v23 = vpop.eup %4688 }
 0x952   : > { %v1922_v21 = vpop.permute.xlu1 %1921  ;;  %v1856_v22 = vpack.c.bf16 %v1849_v43, %v1848_v45  ;;  %v1924_v26 = vpop.permute.xlu0 %1923  ;;  %v1850_v30 = vmul.f32 %v4689_v23, %v5664_v42 }
 0x953   : > { %4287 = vmatprep.subr.bf16.mxu1 %v1922_v21 }
 0x954   : > { %4283 = vmatprep.mubr.msk.bf16.mxu0 %vm908_vm0, %v1856_v22  ;;  %4288 = vmatpush3.bf16.msra.mxu1 %v1922_v21 }
 0x955   : > { %v4691_v28 = vpop.eup %4690  ;;  %4289 = vmatprep.subr.bf16.mxu1 %v1924_v26 }
 0x956   : > { %v1851_v31 = vmul.f32 %v4691_v28, %v5668_v46  ;;  %v2008_v36 = vpop.permute.xlu0 %2007  ;;  %v2014_v16 = vpop.permute.xlu1 %2013 }
 0x957   : > { %v2025_v39 = vsel %vm908_vm0, %v2014_v16, 0 }
 0x958   : > { %4290 = vmatpush3.bf16.msra.mxu1 %v1924_v26  ;;  %v1857_v34 = vpack.c.bf16 %v1851_v31, %v1850_v30 }
 0x95a   : > { %4284 = vmatmul.mubr.msk.bf16.vlgmr.msra.gmra.mrb[28].mxu0 %vm908_vm0, %v1857_v34 }
 0x95b   : > { %4296 = vmatpush3.bf16.xpose.msra.mxu0 %v2022_v38  ;;  %4299 = vmatprep.mubr.msk.bf16.mxu0 %vm908_vm0, %v2008_v36 }
 0x95c   : > { %4364 = vmatprep.subr.msk.bf16.mxu0 %vm908_vm0, %v2014_v16 }
 0x963   : > { %4298 = vmatpush3.bf16.xpose.msra.mxu0 %v2025_v39 }
 0x987   : > { %v1830_v44 = vpop.xlane.xlu0 %1829  ;;  %v1836_v42 = vpop.xlane.xlu1 %1835 }
 0x98b   : > { %v2081_v47 = vpop.permute.xlu0 %2080  ;;  %v1839_v46 = vpop.xlane.xlu1 %1838 }
 0x98c   : > { %4365 = vmatprep.subr.msk.bf16.mxu1 %vm908_vm0, %v2081_v47  ;;  %4692 = vrcp.f32 %v1839_v46  ;;  %v2091_v41 = vsel %vm908_vm0, %v2081_v47, 0 }
 0x98d   : > { %4694 = vrcp.f32 %v1830_v44 }
 0x98e   : > { %4696 = vrcp.f32 %v1836_v42 }
 0x98f   : > { %v1833_v48 = vpop.xlane.xlu1 %1832  ;;  %v2077_v2 = vpop.permute.xlu0 %2076 }
 0x990   : > { %4698 = vrcp.f32 %v1833_v48 }
 0x993   : > { %v2010_v49 = vpop.permute.xlu1 %2009 }
 0x994   : > { %4300 = vmatmul.mubr.msk.bf16.vlgmr.msra.gmra.mrb[32].mxu0 %vm908_vm0, %v2010_v49 }
 0x996   : > { %v4693_v24 = vpop.eup %4692 }
 0x997   : > { %v4695_v55 = vpop.eup %4694  ;;  %v1855_v25 = vmul.f32 %v4693_v24, %v5694_v3  ;;  %v2083_v4 = vpop.permute.xlu1 %2082 }
 0x998   : > { %v4697_v56 = vpop.eup %4696  ;;  %v1852_v32 = vmul.f32 %v4695_v55, %v5686_v60  ;;  %v2094_v60 = vsel %vm908_vm0, %v2083_v4, 0 }
 0x999   : > { %v1854_v5 = vmul.f32 %v4697_v56, %v5688_v6 }
 0x99a   : > { %v4699_v57 = vpop.eup %4698 }
 0x99b   : > { %v1853_v58 = vmul.f32 %v4699_v57, %v5698_v7  ;;  %v1859_v20 = vpack.c.bf16 %v1855_v25, %v1854_v5  ;;  %v2079_v3 = vpop.permute.xlu1 %2078 }
 0x99d   : > { %v1858_v59 = vpack.c.bf16 %v1853_v58, %v1852_v32 }
 0x99f   : > { %4291 = vmatprep.mubr.msk.bf16.mxu1 %vm908_vm0, %v1858_v59 }
 0x9a0   : > { %4292 = vmatmul.mubr.msk.bf16.vlgmr.msra.gmra.mrb[36].mxu1 %vm908_vm0, %v1859_v20 }
 0x9a1   : > { %4304 = vmatpush3.bf16.xpose.msra.mxu1 %v2091_v41  ;;  %4307 = vmatprep.mubr.msk.bf16.mxu1 %vm908_vm0, %v2077_v2 }
 0x9a2   : > { %4366 = vmatprep.subr.msk.bf16.mxu1 %vm908_vm0, %v2083_v4 }
 0x9a9   : > { %4306 = vmatpush3.bf16.xpose.msra.mxu1 %v2094_v60 }
 0x9b0   : > { %4308 = vmatmul.mubr.msk.bf16.vlgmr.msra.gmra.mrb[40].mxu1 %vm908_vm0, %v2079_v3 }
 0xa2d   : > { %v5736_v6 = vpop.f32.mrb[28].mxu0 }
 0xa2e   : > { %v5738_v7 = vpop.f32.mrb[29].mxu0 }
 0xa2f   : > { %v5740_v8 = vpop.f32.mrb[30].mxu0 }
 0xa30   : > { %v1983_v9 = vpack.c.bf16 %v5740_v8, %v5736_v6  ;;  %v5744_v11 = vpop.f32.mrb[31].mxu0 }
 0xa31   : > { %v1982_v13 = vpack.c.bf16 %v5744_v11, %v5738_v7 }
 0xa67   : > { %v4301_v14 = vpop.f32.mrb[32].mxu0 }
 0xa68   : > { %v2061_v37 = vpop.f32.mrb[33].mxu0  ;;  %v2151_v45 = vsel %vm908_vm0, %v4301_v14, -inf }
 0xa69   : > { %v4302_v18 = vpop.f32.mrb[34].mxu0  ;;  %v2145_v15 = vsel %vm908_vm0, %v2061_v37, -inf }
 0xa6a   : > { %2146 = vmax.xlane.f32.xlu0 %v2145_v15  ;;  %v2064_v35 = vpop.f32.mrb[35].mxu0  ;;  %v2154_v43 = vsel %vm908_vm0, %v4302_v18, -inf }
 0xa6b   : > { %v2148_v19 = vsel %vm908_vm0, %v2064_v35, -inf }
 0xa6c   : > { %2149 = vmax.xlane.f32.xlu1 %v2148_v19 }
 0xa6e   : > { %2152 = vmax.xlane.f32.xlu0 %v2151_v45 }
 0xa72   : > { %2155 = vmax.xlane.f32.xlu0 %v2154_v43 }
 0xa73   : > { %v5752_v21 = vpop.f32.mrb[36].mxu1 }
 0xa74   : > { %v5754_v22 = vpop.f32.mrb[37].mxu1 }
 0xa75   : > { %v5756_v23 = vpop.f32.mrb[38].mxu1 }
 0xa76   : > { %v1985_v26 = vpack.c.bf16 %v5756_v23, %v5752_v21  ;;  %v5760_v28 = vpop.f32.mrb[39].mxu1 }
 0xa77   : > { %v1984_v30 = vpack.c.bf16 %v5760_v28, %v5754_v22 }
 0xa83   : > { %v4309_v31 = vpop.f32.mrb[40].mxu1 }
 0xa84   : > { %v2130_v34 = vpop.f32.mrb[41].mxu1  ;;  %v2163_v44 = vsel %vm908_vm0, %v4309_v31, -inf }
 0xa85   : > { %v4310_v38 = vpop.f32.mrb[42].mxu1  ;;  %v2157_v36 = vsel %vm908_vm0, %v2130_v34, -inf }
 0xa86   : > { %2158 = vmax.xlane.f32.xlu0 %v2157_v36  ;;  %v2133_v16 = vpop.f32.mrb[43].mxu1  ;;  %v2166_v42 = vsel %vm908_vm0, %v4310_v38, -inf }
 0xa87   : > { %v2160_v39 = vsel %vm908_vm0, %v2133_v16, -inf }
 0xa88   : > { %2161 = vmax.xlane.f32.xlu1 %v2160_v39 }
 0xa8a   : > { %2164 = vmax.xlane.f32.xlu0 %v2163_v44 }
 0xa8c   : > { %2167 = vmax.xlane.f32.xlu1 %v2166_v42 }
 0xaf7   : > { %v2147_v47 = vpop.xlane.xlu0 %2146 }
 0xaf8   : > { %v2169_v46 = vsub.f32 %v2061_v37, %v2147_v47 }
 0xaf9   : > { %v2150_v48 = vpop.xlane.xlu1 %2149 }
 0xafa   : > { %v2177_v49 = vmul.f32 1.442695, %v2169_v46  ;;  %v2170_v24 = vsub.f32 %v2064_v35, %v2150_v48 }
 0xafb   : > { %v2153_v55 = vpop.xlane.xlu0 %2152 }
 0xafc   : > { %4700 = vpow2.f32 %v2177_v49  ;;  %v2179_v56 = vmul.f32 1.442695, %v2170_v24  ;;  %v2171_v57 = vsub.f32 %v4301_v14, %v2153_v55 }
 0xafe   : > { %4702 = vpow2.f32 %v2179_v56  ;;  %v2181_v25 = vmul.f32 1.442695, %v2171_v57 }
 0xaff   : > { %v2156_v32 = vpop.xlane.xlu0 %2155 }
 0xb00   : > { %4704 = vpow2.f32 %v2181_v25  ;;  %v2172_v58 = vsub.f32 %v4302_v18, %v2156_v32 }
 0xb02   : > { %v2183_v5 = vmul.f32 1.442695, %v2172_v58 }
 0xb04   : > { %4706 = vpow2.f32 %v2183_v5 }
 0xb06   : > { %v4701_v59 = vpop.eup %4700 }
 0xb07   : > { %v2193_v20 = vsel %vm908_vm0, %v4701_v59, 0.0 }
 0xb08   : > { %v4703_v41 = vpop.eup %4702  ;;  %2194 = vadd.xlane.f32.xlu0 %v2193_v20 }
 0xb09   : > { %v2196_v2 = vsel %vm908_vm0, %v4703_v41, 0.0 }
 0xb0a   : > { %v5770_v4 = vpop.eup %4704  ;;  %2197 = vadd.xlane.f32.xlu1 %v2196_v2 }
 0xb0b   : > { %v2199_v60 = vsel %vm908_vm0, %v5770_v4, 0.0 }
 0xb0c   : > { %2200 = vadd.xlane.f32.xlu0 %v2199_v60 }
 0xb0e   : > { %v5774_v3 = vpop.eup %4706 }
 0xb0f   : > { %v2202_v14 = vsel %vm908_vm0, %v5774_v3, 0.0 }
 0xb10   : > { %2203 = vadd.xlane.f32.xlu1 %v2202_v14 }
 0xb13   : > { %v2159_v37 = vpop.xlane.xlu0 %2158 }
 0xb14   : > { %v2173_v18 = vsub.f32 %v2130_v34, %v2159_v37 }
 0xb15   : > { %v2162_v34 = vpop.xlane.xlu1 %2161 }
 0xb16   : > { %v2185_v19 = vmul.f32 1.442695, %v2173_v18  ;;  %v2174_v47 = vsub.f32 %v2133_v16, %v2162_v34  ;;  %v4503_v34 = vld [vmem:[#allocation8 + $0x18] sm:$0xff]  }
 0xb17   : > { %v2165_v15 = vpop.xlane.xlu0 %2164 }
 0xb18   : > { %v2175_v35 = vsub.f32 %v4309_v31, %v2165_v15  ;;  %v2187_v46 = vmul.f32 1.442695, %v2174_v47 }
 0xb19   : > { %v2168_v44 = vpop.xlane.xlu1 %2167 }
 0xb1a   : > { %v2189_v45 = vmul.f32 1.442695, %v2175_v35  ;;  %v2176_v42 = vsub.f32 %v4310_v38, %v2168_v44  ;;  %v4506_v44 = vld [vmem:[#allocation8 + $0x30] sm:$0xff]  }
 0xb1c   : > { %4708 = vpow2.f32 %v2189_v45  ;;  %v4500_v45 = vld [vmem:[#allocation8] sm:$0xff]  }
 0xb1d   : > { %4710 = vpow2.f32 %v2185_v19 }
 0xb21   : > { %2239 = vrot.lane.b32.xlu1 %v5414_v10, %s5054_s13  ;;  %v2191_v10 = vmul.f32 1.442695, %v2176_v42  ;;  %v4507_v42 = vld [vmem:[#allocation8 + $0x38] sm:$0xff]  }
 0xb23   : > { %4712 = vpow2.f32 %v2191_v10 }
 0xb24   : > { %4714 = vpow2.f32 %v2187_v46 }
 0xb25   : > { %2298 = vrot.lane.b32.xlu1 %v5428_v29, %s5054_s13 }
 0xb26   : > { %v5782_v43 = vpop.eup %4708 }
 0xb27   : > { %v2211_v36 = vsel %vm908_vm0, %v5782_v43, 0.0  ;;  %v5786_v39 = vpop.eup %4710 }
 0xb28   : > { %2212 = vadd.xlane.f32.xlu0 %v2211_v36  ;;  %v2205_v31 = vsel %vm908_vm0, %v5786_v39, 0.0  ;;  %v4501_v36 = vld [vmem:[#allocation8 + $0x8] sm:$0xff]  }
 0xb2c   : > { %2206 = vadd.xlane.f32.xlu0 %v2205_v31  ;;  %v4505_v31 = vld [vmem:[#allocation8 + $0x28] sm:$0xff]  }
 0xb2d   : > { %v5792_v29 = vpop.eup %4712 }
 0xb2e   : > { %v2214_v48 = vsel %vm908_vm0, %v5792_v29, 0.0  ;;  %v5800_v49 = vpop.eup %4714 }
 0xb42   : > { %2237 = vrot.lane.b32.xlu0 %v5416_v12, %s5054_s13  ;;  %v2208_v12 = vsel %vm908_vm0, %v5800_v49, 0.0 }
 0xb46   : > { %1613 = vrot.lane.b32.xlu0 %v1605_v54, %s5054_s13 }
 0xb49   : > { %2215 = vadd.xlane.f32.xlu1 %v2214_v48 }
 0xb4a   : > { %1990 = vrot.lane.b32.xlu0 %v1982_v13, %s5053_s3 }
 0xb4d   : > { %2209 = vadd.xlane.f32.xlu1 %v2208_v12 }
 0xb5e   : > { %2300 = vrot.lane.b32.xlu1 %v5426_v27, %s5054_s13 }
 0xb62   : > { %1615 = vrot.lane.b32.xlu1 %v1606_v53, %s5054_s13 }
 0xb66   : > { %1992 = vrot.lane.b32.xlu1 %v1983_v9, %s5053_s3 }
 0xb95   : > { %v2195_v51 = vpop.xlane.xlu0 %2194 }
 0xb96   : > { %4716 = vrcp.f32 %v2195_v51 }
 0xb97   : > { %v2198_v17 = vpop.xlane.xlu1 %2197 }
 0xb98   : > { %4718 = vrcp.f32 %v2198_v17 }
 0xb99   : > { %v2201_v50 = vpop.xlane.xlu0 %2200 }
 0xb9d   : > { %v2204_v54 = vpop.xlane.xlu1 %2203 }
 0xb9e   : > { %4720 = vrcp.f32 %v2204_v54 }
 0xb9f   : > { %4722 = vrcp.f32 %v2201_v50 }
 0xba0   : > { %v4717_v7 = vpop.eup %4716 }
 0xba1   : > { %v2240_v11 = vpop.permute.xlu1 %2239  ;;  %v2225_v38 = vmul.f32 %v4717_v7, %v4701_v59 }
 0xba2   : > { %v4719_v13 = vpop.eup %4718 }
 0xba3   : > { %v2226_v27 = vmul.f32 %v4719_v13, %v4703_v41 }
 0xba5   : > { %v2299_v16 = vpop.permute.xlu1 %2298  ;;  %v2233_v24 = vpack.c.bf16 %v2226_v27, %v2225_v38  ;;  %v4812_v27 = vld [vmem:[%s5332_s26] sm:$0xff] }
 0xba6   : > { %4319 = vmatprep.subr.bf16.mxu1 %v2299_v16 }
 0xba7   : > { %4315 = vmatprep.mubr.msk.bf16.mxu0 %vm908_vm0, %v2233_v24  ;;  %4320 = vmatpush3.bf16.msra.mxu1 %v2299_v16 }
 0xba8   : > { %v4721_v6 = vpop.eup %4720 }
 0xba9   : > { %v4723_v9 = vpop.eup %4722  ;;  %v2228_v55 = vmul.f32 %v4721_v6, %v5774_v3  ;;  %v4814_v6 = vld [vmem:[%s5332_s26 + $0x10] sm:$0xff] }
 0xbaa   : > { %v2227_v57 = vmul.f32 %v4723_v9, %v5770_v4  ;;  %v4815_v9 = vld [vmem:[%s5332_s26 + $0x18] sm:$0xff] }
 0xbac   : > { %v2234_v25 = vpack.c.bf16 %v2228_v55, %v2227_v57 }
 0xbb5   : > { %v2213_v52 = vpop.xlane.xlu0 %2212 }
 0xbb9   : > { %v2207_v53 = vpop.xlane.xlu0 %2206 }
 0xbbd   : > { %v2238_v8 = vpop.permute.xlu0 %2237 }
 0xbbe   : > { %4311 = vmatprep.subr.bf16.mxu0 %v2238_v8 }
 0xbbf   : > { %4312 = vmatpush3.bf16.msra.mxu0 %v2238_v8 }
 0xbc0   : > { %4313 = vmatprep.subr.bf16.mxu0 %v2240_v11 }
 0xbc1   : > { %v1614_v56 = vpop.permute.xlu0 %1613 }
 0xbc2   : > { %1626 = vst.msk [vmem:[#allocation2] sm:$0xff] %vm1625_vm1, %v1614_v56 }
 0xbc3   : > { %4314 = vmatpush3.bf16.msra.mxu0 %v2240_v11 }
 0xbc4   : > { %4327 = vmatprep.subr.bf16.mxu0 %v4500_v45 }
 0xbc5   : > { %v1991_v32 = vpop.permute.xlu0 %1990 }
 0xbc6   : > { %2003 = vst.msk [vmem:[#allocation2] sm:$0xff] %vm2002_vm2, %v1991_v32  ;;  %4316 = vmatmul.mubr.msk.bf16.vlgmr.msra.gmra.mrb[36].mxu0 %vm908_vm0, %v2234_v25  ;;  %v4816_v25 = vld [vmem:[%s5332_s26 + $0x20] sm:$0xff] }
 0xbc7   : > { %4328 = vmatpush3.bf16.msra.mxu0 %v4500_v45  ;;  %v4517_v45 = vld [vmem:[#allocation9 + $0x28] ss:$16 sps:$4 sm:$0xff]  }
 0xbc8   : > { %4329 = vmatprep.subr.bf16.mxu0 %v4501_v36 }
 0xbcb   : > { %4330 = vmatpush3.bf16.msra.mxu0 %v4501_v36 }
 0xbd6   : > { %v2216_v58 = vpop.xlane.xlu1 %2215 }
 0xbd7   : > { %4724 = vrcp.f32 %v2216_v58 }
 0xbd8   : > { %4726 = vrcp.f32 %v2207_v53 }
 0xbd9   : > { %4728 = vrcp.f32 %v2213_v52  ;;  %v4813_v52 = vld [vmem:[%s5332_s26 + $0x8] sm:$0xff] }
 0xbda   : > { %v2210_v5 = vpop.xlane.xlu1 %2209 }
 0xbdb   : > { %4730 = vrcp.f32 %v2210_v5 }
 0xbde   : > { %v2301_v59 = vpop.permute.xlu1 %2300 }
 0xbdf   : > { %4321 = vmatprep.subr.bf16.mxu1 %v2301_v59 }
 0xbe0   : > { %4322 = vmatpush3.bf16.msra.mxu1 %v2301_v59  ;;  %v4817_v59 = vld [vmem:[%s5332_s26 + $0x28] sm:$0xff] }
 0xbe1   : > { %v4725_v20 = vpop.eup %4724 }
 0xbe2   : > { %v1616_v41 = vpop.permute.xlu1 %1615  ;;  %v4727_v2 = vpop.eup %4726  ;;  %v2232_v3 = vmul.f32 %v4725_v20, %v5792_v29 }
 0xbe3   : > { %1627 = vst.msk [vmem:[#allocation2 + $0x8] sm:$0xff] %vm1625_vm1, %v1616_v41  ;;  %v4729_v4 = vpop.eup %4728  ;;  %v2229_v37 = vmul.f32 %v4727_v2, %v5786_v39  ;;  %v4502_v39 = vld [vmem:[#allocation8 + $0x10] sm:$0xff]  }
 0xbe4   : > { %v2231_v15 = vmul.f32 %v4729_v4, %v5782_v43  ;;  %4331 = vmatprep.subr.bf16.mxu0 %v4502_v39  ;;  %v4504_v43 = vld [vmem:[#allocation8 + $0x20] sm:$0xff]   ;;  %v4818_v41 = vld [vmem:[%s5332_s26 + $0x30] sm:$0xff]  ;;  %v4819_v4 = vld [vmem:[%s5332_s26 + $0x38] sm:$0xff]  ;;  %s4968_s26 = scalar_lea.vmem %s4967_s10, 2048 }
 0xbe5   : > { %v4731_v60 = vpop.eup %4730  ;;  %4332 = vmatpush3.bf16.msra.mxu0 %v4502_v39 }
 0xbe6   : > { %v1993_v14 = vpop.permute.xlu1 %1992  ;;  %v2230_v18 = vmul.f32 %v4731_v60, %v5800_v49  ;;  %v2236_v19 = vpack.c.bf16 %v2232_v3, %v2231_v15  ;;  %4333 = vmatprep.subr.bf16.mxu0 %v4503_v34  ;;  %v4508_v3 = vld [vmem:[#allocation9] ss:$16 sps:$4 sm:$0xff]   ;;  %v4516_v15 = vld [vmem:[#allocation9 + $0x24] ss:$16 sps:$4 sm:$0xff]  }
 0xbe7   : > { %2004 = vst.msk [vmem:[#allocation2 + $0x8] sm:$0xff] %vm2002_vm2, %v1993_v14  ;;  %v4510_v14 = vld [vmem:[#allocation9 + $0x4] ss:$16 sps:$4 sm:$0xff]  }
 0xbe8   : > { %v2235_v35 = vpack.c.bf16 %v2230_v18, %v2229_v37  ;;  %v4511_v37 = vld [vmem:[#allocation9 + $0x8] ss:$16 sps:$4 sm:$0xff]   ;;  %v4513_v18 = vld [vmem:[#allocation9 + $0xc] ss:$16 sps:$4 sm:$0xff]   ;;  %2861 = vmatprep.subr.bf16.mxu1 %v4510_v14 }
 0xbe9   : > { %4334 = vmatpush3.bf16.msra.mxu0 %v4503_v34 }
 0xbea   : > { %4323 = vmatprep.mubr.msk.bf16.mxu1 %vm908_vm0, %v2235_v35  ;;  %4335 = vmatprep.subr.bf16.mxu0 %v4504_v43  ;;  %v4519_v35 = vld [vmem:[#allocation9 + $0x2c] ss:$16 sps:$4 sm:$0xff]  }
 0xbeb   : > { %4324 = vmatmul.mubr.msk.bf16.vlgmr.msra.gmra.mrb[44].mxu1 %vm908_vm0, %v2236_v19  ;;  %v4514_v19 = vld [vmem:[#allocation9 + $0x20] ss:$16 sps:$4 sm:$0xff]  }
 0xbec   : > { %2893 = vmatprep.mubr.bf16.mxu1 %v5051_v63  ;;  %2862 = vmatpush1.bf16.msra.mxu1 %v4508_v3 }
 0xbed   : > { %4336 = vmatpush3.bf16.msra.mxu0 %v4504_v43  ;;  %2863 = vmatprep.subr.bf16.mxu1 %v4516_v15 }
 0xbee   : > { %4337 = vmatprep.subr.bf16.mxu0 %v4505_v31 }
 0xbf0   : > { %2864 = vmatpush1.bf16.msra.mxu1 %v4514_v19 }
 0xbf1   : > { %4338 = vmatpush3.bf16.msra.mxu0 %v4505_v31 }
 0xbf2   : > { %4339 = vmatprep.subr.bf16.mxu0 %v4506_v44 }
 0xbf5   : > { %4340 = vmatpush3.bf16.msra.mxu0 %v4506_v44 }
 0xbf6   : > { %4341 = vmatprep.subr.bf16.mxu0 %v4507_v42 }
 0xbf9   : > { %4342 = vmatpush3.bf16.msra.mxu0 %v4507_v42 }
 0xbfa   : > { %2934 = vmatprep.subr.bf16.mxu0 %v4513_v18 }
 0xc99   : > { %v4317_v47 = vpop.f32.mrb[36].mxu0 }
 0xc9a   : > { %v2283_v10 = vpop.f32.mrb[37].mxu0 }
 0xc9b   : > { %v4318_v46 = vpop.f32.mrb[38].mxu0 }
 0xc9c   : > { %v2360_v29 = vpack.c.bf16 %v4318_v46, %v4317_v47  ;;  %v2286_v48 = vpop.f32.mrb[39].mxu0 }
 0xc9d   : > { %v2359_v49 = vpack.c.bf16 %v2286_v48, %v2283_v10 }
 0xc9e   : > { %2369 = vrot.lane.b32.xlu1 %v2360_v29, %s5052_s14 }
 0xc9f   : > { %2367 = vrot.lane.b32.xlu0 %v2359_v49, %s5052_s14 }
 0xca2   : > { %1619 = vrot.lane.b32.xlu1 %v1608_v33, %s5054_s13 }
 0xca3   : > { %1617 = vrot.lane.b32.xlu0 %v1607_v40, %s5054_s13 }
 0xca6   : > { %1996 = vrot.lane.b32.xlu1 %v1985_v26, %s5053_s3 }
 0xca7   : > { %1994 = vrot.lane.b32.xlu0 %v1984_v30, %s5053_s3 }
 0xcbe   : > { %v4325_v12 = vpop.f32.mrb[44].mxu1 }
 0xcbf   : > { %v2344_v51 = vpop.f32.mrb[45].mxu1 }
 0xcc0   : > { %v4326_v17 = vpop.f32.mrb[46].mxu1 }
 0xcc1   : > { %v2362_v61 = vpack.c.bf16 %v4326_v17, %v4325_v12  ;;  %v2347_v0 = vpop.f32.mrb[47].mxu1 }
 0xcc2   : > { %v2361_v33 = vpack.c.bf16 %v2347_v0, %v2344_v51  ;;  %v4525_v0 = vld [vmem:[#allocation9 + $0x4c] ss:$16 sps:$4 sm:$0xff]  }
 0xcc3   : > { %2373 = vrot.lane.b32.xlu1 %v2362_v61, %s5052_s14  ;;  %v4522_v61 = vld [vmem:[#allocation9 + $0x44] ss:$16 sps:$4 sm:$0xff]  }
 0xcc4   : > { %2371 = vrot.lane.b32.xlu0 %v2361_v33, %s5052_s14  ;;  %v4520_v33 = vld [vmem:[#allocation9 + $0x40] ss:$16 sps:$4 sm:$0xff]   ;;  %2865 = vmatprep.subr.bf16.mxu1 %v4522_v61  ;;  %s3735_s14 = sshll.u32 %s6245_s30, 4  ;;  %s6272_s14 = int_to_ptr.vmem [resolvable:$true] %s3735_s14 }
 0xcc5   : > { %2866 = vmatpush1.bf16.msra.mxu1 %v4520_v33  ;;  %v3930_v33 = vld [vmem:[%s6324_s5] ss:$0 sm:$0xff]  ;;  %s4962_s21 = scalar_lea.vmem %s6272_s14, 1024  ;;  %p4969_p12 = scmp.lt.s32.totalorder %s6272_s14, %s4967_s10 }
 0xcc6   : > { %p4963_p3 = scmp.ne.s32.totalorder %s6272_s14, %s4962_s21  ;;  %p4970_p2 = scmp.lt.s32.totalorder %s4968_s26, %s4962_s21 }
 0xcc8   : > { %p4964_p5 = pnand %p4963_p3, %p5274_p10  ;;  %p4971_p1 = por %p4970_p2, %p4969_p12 }
 0xcca   : > { %p4965_p7 = pneg %p4964_p5 }
 0xccc   : > { %p4972_p13 = pnand %p4971_p1, %p4965_p7 }
 0xd10   : > { %v2370_v62 = vpop.permute.xlu1 %2369 }
 0xd11   : > { %2381 = vst.msk [vmem:[#allocation2 + $0x8] sm:$0xff] %vm2379_vm3, %v2370_v62  ;;  %v2368_v1 = vpop.permute.xlu0 %2367  ;;  %v4523_v62 = vld [vmem:[#allocation9 + $0x48] ss:$16 sps:$4 sm:$0xff]  }
 0xd12   : > { %2380 = vst.msk [vmem:[#allocation2] sm:$0xff] %vm2379_vm3, %v2368_v1  ;;  %v4528_v1 = vld [vmem:[#allocation9 + $0x64] ss:$16 sps:$4 sm:$0xff]  }
 0xd13   : > { %2867 = vmatprep.subr.bf16.mxu1 %v4528_v1 }
 0xd14   : > { %v1620_v40 = vpop.permute.xlu1 %1619 }
 0xd15   : > { %1629 = vst.msk [vmem:[#allocation2 + $0x18] sm:$0xff] %vm1625_vm1, %v1620_v40  ;;  %v1618_v21 = vpop.permute.xlu0 %1617  ;;  %v4531_v40 = vld [vmem:[#allocation9 + $0x6c] ss:$16 sps:$4 sm:$0xff]  }
 0xd16   : > { %1628 = vst.msk [vmem:[#allocation2 + $0x10] sm:$0xff] %vm1625_vm1, %v1618_v21  ;;  %v4526_v21 = vld [vmem:[#allocation9 + $0x60] ss:$16 sps:$4 sm:$0xff]  }
 0xd17   : > { %2868 = vmatpush1.bf16.msra.mxu1 %v4526_v21 }
 0xd18   : > { %v1997_v22 = vpop.permute.xlu1 %1996  ;;  %v2385_v28 = vld [vmem:[#allocation2 + $0x8] sm:$0xff] }
 0xd19   : > { %2006 = vst.msk [vmem:[#allocation2 + $0x18] sm:$0xff] %vm2002_vm2, %v1997_v22  ;;  %v1995_v23 = vpop.permute.xlu0 %1994  ;;  %v2384_v26 = vld [vmem:[#allocation2] sm:$0xff]  ;;  %v4529_v22 = vld [vmem:[#allocation9 + $0x68] ss:$16 sps:$4 sm:$0xff]  }
 0xd1a   : > { %2005 = vst.msk [vmem:[#allocation2 + $0x10] sm:$0xff] %vm2002_vm2, %v1995_v23  ;;  %4343 = vmatprep.mubr.bf16.mxu0 %v2384_v26  ;;  %v4534_v23 = vld [vmem:[#allocation9 + $0x84] ss:$16 sps:$4 sm:$0xff]   ;;  %v4537_v26 = vld [vmem:[#allocation9 + $0x8c] ss:$16 sps:$4 sm:$0xff]  }
 0xd1b   : > { %4344 = vmatmul.mubr.bf16.vlgmr.msra.gmra.mrb[40].mxu0 %v2385_v28  ;;  %v4532_v28 = vld [vmem:[#allocation9 + $0x80] ss:$16 sps:$4 sm:$0xff]   ;;  %2869 = vmatprep.subr.bf16.mxu1 %v4534_v23 }
 0xd1c   : > { %2935 = vmatpush1.bf16.msra.mxu0 %v4511_v37  ;;  %2870 = vmatpush1.bf16.msra.mxu1 %v4532_v28  ;;  %v3931_v23 = vld [vmem:[%s6325_s6] ss:$0 sm:$0xff] }
 0xd1d   : > { %2936 = vmatprep.subr.bf16.mxu0 %v4519_v35 }
 0xd20   : > { %2937 = vmatpush1.bf16.msra.mxu0 %v4517_v45 }
 0xd21   : > { %2938 = vmatprep.subr.bf16.mxu0 %v4525_v0 }
 0xd24   : > { %2939 = vmatpush1.bf16.msra.mxu0 %v4523_v62 }
 0xd25   : > { %2940 = vmatprep.subr.bf16.mxu0 %v4531_v40 }
 0xd28   : > { %2941 = vmatpush1.bf16.msra.mxu0 %v4529_v22 }
 0xd29   : > { %2942 = vmatprep.subr.bf16.mxu0 %v4537_v26 }
 0xd35   : > { %v2374_v30 = vpop.permute.xlu1 %2373 }
 0xd36   : > { %2383 = vst.msk [vmem:[#allocation2 + $0x18] sm:$0xff] %vm2379_vm3, %v2374_v30  ;;  %v2372_v54 = vpop.permute.xlu0 %2371  ;;  %v4535_v30 = vld [vmem:[#allocation9 + $0x88] ss:$16 sps:$4 sm:$0xff]  }
 0xd37   : > { %2382 = vst.msk [vmem:[#allocation2 + $0x10] sm:$0xff] %vm2379_vm3, %v2372_v54  ;;  %2943 = vmatpush1.bf16.msra.mxu0 %v4535_v30  ;;  %v4540_v54 = vld [vmem:[#allocation9 + $0xa4] ss:$16 sps:$4 sm:$0xff]  }
 0xd38   : > { %2871 = vmatprep.subr.bf16.mxu1 %v4540_v54 }
 0xd3d   : > { %v2387_v11 = vld [vmem:[#allocation2 + $0x18] sm:$0xff] }
 0xd3e   : > { %v2386_v7 = vld [vmem:[#allocation2 + $0x10] sm:$0xff] }
 0xd3f   : > { %4347 = vmatprep.mubr.bf16.mxu0 %v2386_v7  ;;  %v4543_v7 = vld [vmem:[#allocation9 + $0xac] ss:$16 sps:$4 sm:$0xff]  }
 0xd40   : > { %4348 = vmatmul.mubr.bf16.gmra.mrb[44].mxu0 %v2387_v11  ;;  %v4538_v11 = vld [vmem:[#allocation9 + $0xa0] ss:$16 sps:$4 sm:$0xff]   ;;  %2944 = vmatprep.subr.bf16.mxu0 %v4543_v7 }
 0xd41   : > { %2966 = vmatprep.mubr.bf16.mxu0 %v5051_v63  ;;  %2872 = vmatpush1.bf16.msra.mxu1 %v4538_v11 }
 0xdee   : > { %v4345_v13 = vpop.f32.mrb[40].mxu0 }
 0xdef   : > { %v2486_v38 = vpop.f32.mrb[41].mxu0  ;;  %v5870_v8 = vadd.f32 %v4814_v6, %v4345_v13  ;;  %v4541_v13 = vld [vmem:[#allocation9 + $0xa8] ss:$16 sps:$4 sm:$0xff]  }
 0xdf0   : > { %v5863_v16 = vadd.f32 %v4812_v27, %v2486_v38  ;;  %v4346_v24 = vpop.f32.mrb[42].mxu0  ;;  %2945 = vmatpush1.bf16.msra.mxu0 %v4541_v13  ;;  %v4546_v38 = vld [vmem:[#allocation9 + $0xc4] ss:$16 sps:$4 sm:$0xff]   ;;  %v4549_v27 = vld [vmem:[#allocation9 + $0xcc] ss:$16 sps:$4 sm:$0xff]  }
 0xdf1   : > { %v2489_v50 = vpop.f32.mrb[43].mxu0  ;;  %v5875_v55 = vadd.f32 %v4815_v9, %v4346_v24  ;;  %2873 = vmatprep.subr.bf16.mxu1 %v4546_v38  ;;  %2946 = vmatprep.subr.bf16.mxu0 %v4549_v27  ;;  %v4552_v9 = vld [vmem:[#allocation9 + $0xe4] ss:$16 sps:$4 sm:$0xff]  }
 0xdf2   : > { %v5866_v53 = vadd.f32 %v4813_v52, %v2489_v50  ;;  %2527 = vadd.xlane.f32.xlu0 %v5863_v16  ;;  %v4544_v50 = vld [vmem:[#allocation9 + $0xc0] ss:$16 sps:$4 sm:$0xff]   ;;  %v4547_v52 = vld [vmem:[#allocation9 + $0xc8] ss:$16 sps:$4 sm:$0xff]  }
 0xdf3   : > { %2874 = vmatpush1.bf16.msra.mxu1 %v4544_v50 }
 0xdf4   : > { %2529 = vadd.xlane.f32.xlu1 %v5866_v53  ;;  %2947 = vmatpush1.bf16.msra.mxu0 %v4547_v52 }
 0xdf5   : > { %2875 = vmatprep.subr.bf16.mxu1 %v4552_v9 }
 0xdf6   : > { %2531 = vadd.xlane.f32.xlu0 %v5870_v8 }
 0xdfa   : > { %2533 = vadd.xlane.f32.xlu0 %v5875_v55 }
 0xe13   : > { %v4349_v56 = vpop.f32.mrb[44].mxu0 }
 0xe14   : > { %v2502_v57 = vpop.f32.mrb[45].mxu0  ;;  %v5886_v2 = vadd.f32 %v4818_v41, %v4349_v56 }
 0xe15   : > { %v5879_v32 = vadd.f32 %v4816_v25, %v2502_v57  ;;  %v4350_v58 = vpop.f32.mrb[46].mxu0  ;;  %v4550_v57 = vld [vmem:[#allocation9 + $0xe0] ss:$16 sps:$4 sm:$0xff]   ;;  %v4553_v25 = vld [vmem:[#allocation9 + $0xe8] ss:$16 sps:$4 sm:$0xff]  }
 0xe16   : > { %v2505_v5 = vpop.f32.mrb[47].mxu0  ;;  %v5890_v60 = vadd.f32 %v4819_v4, %v4350_v58  ;;  %v4555_v58 = vld [vmem:[#allocation9 + $0xec] ss:$16 sps:$4 sm:$0xff]   ;;  %2876 = vmatpush1.bf16.msra.mxu1 %v4550_v57 }
 0xe17   : > { %v5882_v20 = vadd.f32 %v4817_v59, %v2505_v5  ;;  %2535 = vadd.xlane.f32.xlu0 %v5879_v32  ;;  %2948 = vmatprep.subr.bf16.mxu0 %v4555_v58 }
 0xe18   : > { %2949 = vmatpush1.bf16.msra.mxu0 %v4553_v25 }
 0xe19   : > { %2537 = vadd.xlane.f32.xlu1 %v5882_v20 }
 0xe1b   : > { %2539 = vadd.xlane.f32.xlu0 %v5886_v2 }
 0xe1d   : > { %2541 = vadd.xlane.f32.xlu1 %v5890_v60 }
 0xe7f   : > { %v2528_v36 = vpop.xlane.xlu0 %2527 }
 0xe80   : > { %v2543_v39 = vmul.f32 0.0078125, %v2528_v36 }
 0xe81   : > { %v2530_v34 = vpop.xlane.xlu1 %2529 }
 0xe82   : > { %v5895_v43 = vsub.f32 %v5863_v16, %v2543_v39  ;;  %v2544_v31 = vmul.f32 0.0078125, %v2530_v34 }
 0xe83   : > { %v2532_v44 = vpop.xlane.xlu0 %2531 }
 0xe84   : > { %v5898_v42 = vsub.f32 %v5866_v53, %v2544_v31  ;;  %v2545_v47 = vmul.f32 0.0078125, %v2532_v44  ;;  %v2559_v10 = vmul.f32 %v5895_v43, %v5895_v43 }
 0xe86   : > { %v5903_v46 = vsub.f32 %v5870_v8, %v2545_v47  ;;  %2567 = vadd.xlane.f32.xlu0 %v2559_v10  ;;  %v2560_v29 = vmul.f32 %v5898_v42, %v5898_v42 }
 0xe87   : > { %v2534_v48 = vpop.xlane.xlu0 %2533 }
 0xe88   : > { %v2546_v49 = vmul.f32 0.0078125, %v2534_v48  ;;  %2569 = vadd.xlane.f32.xlu1 %v2560_v29  ;;  %v2561_v12 = vmul.f32 %v5903_v46, %v5903_v46 }
 0xe8a   : > { %v5910_v51 = vsub.f32 %v5875_v55, %v2546_v49  ;;  %2571 = vadd.xlane.f32.xlu0 %v2561_v12 }
 0xe8c   : > { %v2562_v17 = vmul.f32 %v5910_v51, %v5910_v51 }
 0xe8e   : > { %2573 = vadd.xlane.f32.xlu1 %v2562_v17 }
 0xea4   : > { %v2536_v24 = vpop.xlane.xlu0 %2535 }
 0xea5   : > { %v2547_v6 = vmul.f32 0.0078125, %v2536_v24 }
 0xea6   : > { %v2538_v56 = vpop.xlane.xlu1 %2537 }
 0xea7   : > { %v5915_v5 = vsub.f32 %v5879_v32, %v2547_v6  ;;  %v2548_v59 = vmul.f32 0.0078125, %v2538_v56 }
 0xea8   : > { %v2540_v41 = vpop.xlane.xlu0 %2539 }
 0xea9   : > { %v5918_v4 = vsub.f32 %v5882_v20, %v2548_v59  ;;  %v2549_v3 = vmul.f32 0.0078125, %v2540_v41  ;;  %v2563_v14 = vmul.f32 %v5915_v5, %v5915_v5 }
 0xeaa   : > { %v2542_v37 = vpop.xlane.xlu1 %2541 }
 0xeab   : > { %v5923_v18 = vsub.f32 %v5886_v2, %v2549_v3  ;;  %v2550_v15 = vmul.f32 0.0078125, %v2542_v37  ;;  %2575 = vadd.xlane.f32.xlu0 %v2563_v14  ;;  %v2564_v35 = vmul.f32 %v5918_v4, %v5918_v4 }
 0xead   : > { %v5928_v19 = vsub.f32 %v5890_v60, %v2550_v15  ;;  %2577 = vadd.xlane.f32.xlu1 %v2564_v35  ;;  %v2565_v45 = vmul.f32 %v5923_v18, %v5923_v18 }
 0xeaf   : > { %2579 = vadd.xlane.f32.xlu0 %v2565_v45  ;;  %v2566_v36 = vmul.f32 %v5928_v19, %v5928_v19 }
 0xeb1   : > { %2581 = vadd.xlane.f32.xlu1 %v2566_v36 }
 0xf13   : > { %v2568_v39 = vpop.xlane.xlu0 %2567 }
 0xf14   : > { %v2583_v34 = vmul.f32 0.0078125, %v2568_v39 }
 0xf15   : > { %v2570_v31 = vpop.xlane.xlu1 %2569 }
 0xf16   : > { %v2591_v44 = vadd.f32 1e-05, %v2583_v34  ;;  %v2584_v47 = vmul.f32 0.0078125, %v2570_v31 }
 0xf17   : > { %v2572_v10 = vpop.xlane.xlu0 %2571 }
 0xf18   : > { %4732 = vrsqrt.f32 %v2591_v44  ;;  %v2592_v29 = vadd.f32 1e-05, %v2584_v47  ;;  %v2585_v48 = vmul.f32 0.0078125, %v2572_v10 }
 0xf1a   : > { %4734 = vrsqrt.f32 %v2592_v29  ;;  %v2593_v49 = vadd.f32 1e-05, %v2585_v48 }
 0xf1b   : > { %v2574_v12 = vpop.xlane.xlu1 %2573 }
 0xf1c   : > { %4736 = vrsqrt.f32 %v2593_v49  ;;  %v2586_v17 = vmul.f32 0.0078125, %v2574_v12  ;;  %v4556_v12 = vld [vmem:[#allocation11 + $0x40] sm:$0xff]  }
 0xf1d   : > { %4095 = vmatprep.subr.bf16.mxu1 %v4556_v12 }
 0xf1e   : > { %v2594_v61 = vadd.f32 1e-05, %v2586_v17  ;;  %v4557_v17 = vld [vmem:[#allocation11 + $0xc0] sm:$0xff]  }
 0xf1f   : > { %4135 = vmatprep.subr.bf16.mxu0 %v4557_v17 }
 0xf20   : > { %4738 = vrsqrt.f32 %v2594_v61  ;;  %v4560_v61 = vld [vmem:[#allocation11 + $0x48] sm:$0xff]  }
 0xf22   : > { %v4733_v0 = vpop.eup %4732 }
 0xf23   : > { %v2607_v62 = vmul.f32 %v4733_v0, %v5895_v43  ;;  %v4561_v0 = vld [vmem:[#allocation11 + $0xc8] sm:$0xff]  }
 0xf24   : > { %v4735_v1 = vpop.eup %4734 }
 0xf25   : > { %v2608_v40 = vmul.f32 %v4735_v1, %v5898_v42  ;;  %v2621_v21 = vmul.f32 %v3930_v33, %v2607_v62  ;;  %v4563_v62 = vld [vmem:[#allocation11 + $0x88] sm:$0xff]   ;;  %v4565_v1 = vld [vmem:[#allocation11 + $0xd0] sm:$0xff]  }
 0xf26   : > { %v4737_v22 = vpop.eup %4736 }
 0xf27   : > { %v2622_v26 = vmul.f32 %v3930_v33, %v2608_v40  ;;  %v2635_v28 = vadd.f32 %v3931_v23, %v2621_v21  ;;  %v2609_v54 = vmul.f32 %v4737_v22, %v5903_v46  ;;  %v4566_v40 = vld [vmem:[#allocation11 + $0x10] sm:$0xff]   ;;  %v4568_v22 = vld [vmem:[#allocation11 + $0x58] sm:$0xff]  }
 0xf28   : > { %v4567_v21 = vld [vmem:[#allocation11 + $0x90] sm:$0xff]  }
 0xf29   : > { %v2636_v30 = vadd.f32 %v3931_v23, %v2622_v26  ;;  %v2623_v43 = vmul.f32 %v3930_v33, %v2609_v54  ;;  %v4570_v26 = vld [vmem:[#allocation11 + $0x18] sm:$0xff]   ;;  %v4573_v54 = vld [vmem:[#allocation11 + $0xe0] sm:$0xff]  }
 0xf2a   : > { %v4739_v7 = vpop.eup %4738 }
 0xf2b   : > { %v2643_v11 = vpack.c.bf16 %v2636_v30, %v2635_v28  ;;  %v2610_v13 = vmul.f32 %v4739_v7, %v5910_v51  ;;  %v2637_v27 = vadd.f32 %v3931_v23, %v2623_v43  ;;  %v4571_v28 = vld [vmem:[#allocation11 + $0x98] sm:$0xff]   ;;  %v4572_v30 = vld [vmem:[#allocation11 + $0x60] sm:$0xff]   ;;  %v4577_v43 = vld [vmem:[#allocation11 + $0xe8] sm:$0xff]  }
 0xf2c   : > { %v4574_v7 = vld [vmem:[#allocation11 + $0x20] sm:$0xff]  }
 0xf2d   : > { %2894 = vmatmul.mubr.bf16.vlgmr.msra.gmra.mrb[48].mxu1 %v2643_v11  ;;  %2967 = vmatmul.mubr.bf16.vlgmr.msra.gmra.mrb[48].mxu0 %v2643_v11  ;;  %v2624_v38 = vmul.f32 %v3930_v33, %v2610_v13  ;;  %v4575_v11 = vld [vmem:[#allocation11 + $0xa0] sm:$0xff]   ;;  %v4576_v13 = vld [vmem:[#allocation11 + $0x68] sm:$0xff]  }
 0xf2e   : > { %2903 = vmatprep.mubr.bf16.mxu1 %v5051_v63  ;;  %2976 = vmatprep.mubr.bf16.mxu0 %v5051_v63 }
 0xf2f   : > { %v2638_v42 = vadd.f32 %v3931_v23, %v2624_v38  ;;  %v4578_v38 = vld [vmem:[#allocation11 + $0x28] sm:$0xff]  }
 0xf31   : > { %v2644_v24 = vpack.c.bf16 %v2638_v42, %v2637_v27  ;;  %v4579_v42 = vld [vmem:[#allocation11 + $0xa8] sm:$0xff]   ;;  %v4580_v27 = vld [vmem:[#allocation11 + $0x70] sm:$0xff]  }
 0xf35   : > { %2904 = vmatmul.mubr.bf16.gmra.mrb[52].mxu1 %v2644_v24  ;;  %2977 = vmatmul.mubr.bf16.gmra.mrb[52].mxu0 %v2644_v24  ;;  %v4581_v24 = vld [vmem:[#allocation11 + $0xf0] sm:$0xff]  }
 0xf36   : > { %2913 = vmatprep.mubr.bf16.mxu1 %v5051_v63  ;;  %2986 = vmatprep.mubr.bf16.mxu0 %v5051_v63 }
 0xf38   : > { %v2576_v46 = vpop.xlane.xlu0 %2575 }
 0xf39   : > { %v2587_v50 = vmul.f32 0.0078125, %v2576_v46  ;;  %v4582_v46 = vld [vmem:[#allocation11 + $0x30] sm:$0xff]  }
 0xf3a   : > { %v2578_v51 = vpop.xlane.xlu1 %2577 }
 0xf3b   : > { %v2595_v52 = vadd.f32 1e-05, %v2587_v50  ;;  %v2588_v6 = vmul.f32 0.0078125, %v2578_v51  ;;  %v4583_v50 = vld [vmem:[#allocation11 + $0xb0] sm:$0xff]   ;;  %v4584_v51 = vld [vmem:[#allocation11 + $0x78] sm:$0xff]  }
 0xf3c   : > { %v2580_v9 = vpop.xlane.xlu0 %2579 }
 0xf3d   : > { %4740 = vrsqrt.f32 %v2595_v52  ;;  %v2596_v56 = vadd.f32 1e-05, %v2588_v6  ;;  %v2589_v57 = vmul.f32 0.0078125, %v2580_v9  ;;  %v4585_v52 = vld [vmem:[#allocation11 + $0xf8] sm:$0xff]  }
 0xf3e   : > { %v2582_v25 = vpop.xlane.xlu1 %2581  ;;  %v4586_v6 = vld [vmem:[#allocation11 + $0x38] sm:$0xff]  }
 0xf3f   : > { %4742 = vrsqrt.f32 %v2596_v56  ;;  %v2597_v58 = vadd.f32 1e-05, %v2589_v57  ;;  %v2590_v59 = vmul.f32 0.0078125, %v2582_v25  ;;  %v4587_v9 = vld [vmem:[#allocation11 + $0xb8] sm:$0xff]   ;;  %v2681_v56 = vlaneseq }
 0xf41   : > { %4744 = vrsqrt.f32 %v2597_v58  ;;  %v2598_v41 = vadd.f32 1e-05, %v2590_v59  ;;  %v2682_v57 = vshrl.u32 %v2681_v56, 7  ;;  %v2679_v59 = vld [vmem:[%s6327_s8] sm:$0xf] }
 0xf43   : > { %4746 = vrsqrt.f32 %v2598_v41  ;;  %v2683_v25 = vsub.s32 0, %v2682_v57  ;;  %v2691_v58 = vsub.s32 2, %v2682_v57  ;;  %v2687_v41 = vsub.s32 1, %v2682_v57 }
 0xf47   : > { %v4741_v3 = vpop.eup %4740 }
 0xf48   : > { %v2611_v14 = vmul.f32 %v4741_v3, %v5915_v5  ;;  %v5957_v3 = vrot.slane %v2679_v59, %v2683_v25 }
 0xf49   : > { %v4743_v37 = vpop.eup %4742 }
 0xf4a   : > { %v2612_v15 = vmul.f32 %v4743_v37, %v5918_v4  ;;  %v2625_v35 = vmul.f32 %v3930_v33, %v2611_v14  ;;  %v5959_v14 = vrot.slane %v2679_v59, %v2691_v58  ;;  %v2695_v37 = vsub.s32 3, %v2682_v57 }
 0xf4b   : > { %v4745_v45 = vpop.eup %4744 }
 0xf4c   : > { %v2626_v36 = vmul.f32 %v3930_v33, %v2612_v15  ;;  %v2639_v34 = vadd.f32 %v3931_v23, %v2625_v35  ;;  %v2613_v44 = vmul.f32 %v4745_v45, %v5923_v18  ;;  %v4558_v18 = vld [vmem:[#allocation11] sm:$0xff]   ;;  %v5961_v45 = vrot.slane %v2679_v59, %v2687_v41 }
 0xf4d   : > { %v4747_v39 = vpop.eup %4746  ;;  %4096 = vmatpush3.bf16.msra.mxu1 %v4558_v18 }
 0xf4e   : > { %v2640_v31 = vadd.f32 %v3931_v23, %v2626_v36  ;;  %v2614_v47 = vmul.f32 %v4747_v39, %v5928_v19  ;;  %v2627_v48 = vmul.f32 %v3930_v33, %v2613_v44  ;;  %v4559_v19 = vld [vmem:[#allocation11 + $0x80] sm:$0xff]   ;;  %4097 = vmatprep.subr.bf16.mxu1 %v4560_v61  ;;  %v5967_v44 = vrot.slane %v2679_v59, %v2695_v37 }
 0xf4f   : > { %4136 = vmatpush3.bf16.msra.mxu0 %v4559_v19 }
 0xf50   : > { %v2645_v10 = vpack.c.bf16 %v2640_v31, %v2639_v34  ;;  %v2628_v29 = vmul.f32 %v3930_v33, %v2614_v47  ;;  %v2641_v4 = vadd.f32 %v3931_v23, %v2627_v48  ;;  %v4562_v33 = vld [vmem:[#allocation11 + $0x8] sm:$0xff]   ;;  %4137 = vmatprep.subr.bf16.mxu0 %v4561_v0 }
 0xf51   : > { %4098 = vmatpush3.bf16.msra.mxu1 %v4562_v33 }
 0xf52   : > { %2914 = vmatmul.mubr.bf16.gmra.mrb[56].mxu1 %v2645_v10  ;;  %2987 = vmatmul.mubr.bf16.gmra.mrb[56].mxu0 %v2645_v10  ;;  %v2642_v5 = vadd.f32 %v3931_v23, %v2628_v29  ;;  %v4569_v23 = vld [vmem:[#allocation11 + $0xd8] sm:$0xff]  }
 0xf53   : > { %2923 = vmatprep.mubr.bf16.mxu1 %v5051_v63  ;;  %2996 = vmatprep.mubr.bf16.mxu0 %v5051_v63  ;;  %v4564_v63 = vld [vmem:[#allocation11 + $0x50] sm:$0xff]  }
 0xf54   : > { %v2646_v49 = vpack.c.bf16 %v2642_v5, %v2641_v4  ;;  %4138 = vmatpush3.bf16.msra.mxu0 %v4563_v62  ;;  %4099 = vmatprep.subr.bf16.mxu1 %v4564_v63 }
 0xf55   : > { %4139 = vmatprep.subr.bf16.mxu0 %v4565_v1  ;;  %4100 = vmatpush3.bf16.msra.mxu1 %v4566_v40 }
 0xf56   : > { %4101 = vmatprep.subr.bf16.mxu1 %v4568_v22 }
 0xf58   : > { %4140 = vmatpush3.bf16.msra.mxu0 %v4567_v21 }
 0xf59   : > { %4141 = vmatprep.subr.bf16.mxu0 %v4569_v23  ;;  %4102 = vmatpush3.bf16.msra.mxu1 %v4570_v26 }
 0xf5a   : > { %2924 = vmatmul.mubr.bf16.gmra.mrb[60].mxu1 %v2646_v49  ;;  %2997 = vmatmul.mubr.bf16.gmra.mrb[60].mxu0 %v2646_v49 }
 0xf5b   : > { %4103 = vmatprep.subr.bf16.mxu1 %v4572_v30 }
 0xf5c   : > { %4142 = vmatpush3.bf16.msra.mxu0 %v4571_v28 }
 0xf5d   : > { %4143 = vmatprep.subr.bf16.mxu0 %v4573_v54  ;;  %4104 = vmatpush3.bf16.msra.mxu1 %v4574_v7 }
 0xf5e   : > { %4105 = vmatprep.subr.bf16.mxu1 %v4576_v13 }
 0xf60   : > { %4144 = vmatpush3.bf16.msra.mxu0 %v4575_v11 }
 0xf61   : > { %4145 = vmatprep.subr.bf16.mxu0 %v4577_v43  ;;  %4106 = vmatpush3.bf16.msra.mxu1 %v4578_v38 }
 0xf62   : > { %4107 = vmatprep.subr.bf16.mxu1 %v4580_v27 }
 0xf64   : > { %4146 = vmatpush3.bf16.msra.mxu0 %v4579_v42 }
 0xf65   : > { %4147 = vmatprep.subr.bf16.mxu0 %v4581_v24  ;;  %4108 = vmatpush3.bf16.msra.mxu1 %v4582_v46 }
 0xf66   : > { %4109 = vmatprep.subr.bf16.mxu1 %v4584_v51 }
 0xf68   : > { %4148 = vmatpush3.bf16.msra.mxu0 %v4583_v50 }
 0xf69   : > { %4149 = vmatprep.subr.bf16.mxu0 %v4585_v52  ;;  %4110 = vmatpush3.bf16.msra.mxu1 %v4586_v6 }
 0xf6c   : > { %4150 = vmatpush3.bf16.msra.mxu0 %v4587_v9 }
0x1000   : > { %v2895_v15 = vpop.f32.mrb[48].mxu1  ;;  %v2968_v35 = vpop.f32.mrb[48].mxu0 }
0x1001   : > { %v2896_v36 = vadd.f32 %v2895_v15, %v5957_v3  ;;  %v5965_v39 = vadd.f32 %v2968_v35, %v5959_v14  ;;  %v2897_v34 = vpop.f32.mrb[49].mxu1  ;;  %v2970_v31 = vpop.f32.mrb[49].mxu0 }
0x1002   : > { %v2899_v47 = vpop.f32.mrb[50].mxu1  ;;  %v2972_v10 = vpop.f32.mrb[50].mxu0  ;;  %v5971_v5 = vadd.f32 %v2897_v34, %v5961_v45  ;;  %v5984_v0 = vadd.f32 %v2970_v31, %v5967_v44 }
0x1003   : > { %v3039_v29 = vmul.f32 0.044715, %v2896_v36  ;;  %v3041_v48 = vmul.f32 0.044715, %v5965_v39  ;;  %v5974_v4 = vadd.f32 %v2899_v47, %v5957_v3  ;;  %v5977_v49 = vadd.f32 %v2972_v10, %v5959_v14  ;;  %v2901_v12 = vpop.f32.mrb[51].mxu1  ;;  %v2974_v17 = vpop.f32.mrb[51].mxu0 }
0x1004   : > { %v5981_v61 = vadd.f32 %v2901_v12, %v5961_v45  ;;  %v5988_v62 = vadd.f32 %v2974_v17, %v5967_v44  ;;  %v3040_v21 = vmul.f32 0.044715, %v5971_v5  ;;  %v3042_v43 = vmul.f32 0.044715, %v5984_v0 }
0x1005   : > { %v3071_v18 = vmul.f32 %v3039_v29, %v2896_v36  ;;  %v3073_v19 = vmul.f32 %v3041_v48, %v5965_v39  ;;  %v3043_v33 = vmul.f32 0.044715, %v5974_v4  ;;  %v3045_v40 = vmul.f32 0.044715, %v5977_v49 }
0x1006   : > { %v3044_v23 = vmul.f32 0.044715, %v5981_v61  ;;  %v3046_v42 = vmul.f32 0.044715, %v5988_v62  ;;  %v3072_v56 = vmul.f32 %v3040_v21, %v5971_v5  ;;  %v3074_v15 = vmul.f32 %v3042_v43, %v5984_v0 }
0x1007   : > { %v3103_v63 = vmul.f32 %v3071_v18, %v2896_v36  ;;  %v3105_v1 = vmul.f32 %v3073_v19, %v5965_v39  ;;  %v3075_v22 = vmul.f32 %v3043_v33, %v5974_v4  ;;  %v3077_v7 = vmul.f32 %v3045_v40, %v5977_v49 }
0x1008   : > { %v2905_v26 = vpop.f32.mrb[52].mxu1  ;;  %v2978_v28 = vpop.f32.mrb[52].mxu0  ;;  %v3076_v25 = vmul.f32 %v3044_v23, %v5981_v61  ;;  %v3078_v34 = vmul.f32 %v3046_v42, %v5988_v62  ;;  %v3007_v48 = vmul.f32 0.5, %v2896_v36  ;;  %v3104_v12 = vmul.f32 %v3072_v56, %v5971_v5 }
0x1009   : > { %v3135_v30 = vadd.f32 %v3103_v63, %v2896_v36  ;;  %v3137_v54 = vadd.f32 %v3105_v1, %v5965_v39  ;;  %v2907_v11 = vpop.f32.mrb[53].mxu1  ;;  %v2980_v13 = vpop.f32.mrb[53].mxu0  ;;  %v3107_v38 = vmul.f32 %v3075_v22, %v5974_v4  ;;  %v6001_v27 = vadd.f32 %v2905_v26, %v5957_v3 }
0x100a   : > { %v2909_v24 = vpop.f32.mrb[54].mxu1  ;;  %v2982_v46 = vpop.f32.mrb[54].mxu0  ;;  %v3109_v52 = vmul.f32 %v3077_v7, %v5977_v49  ;;  %v6008_v58 = vadd.f32 %v2978_v28, %v5959_v14  ;;  %v6013_v37 = vadd.f32 %v2907_v11, %v5961_v45  ;;  %v6019_v10 = vadd.f32 %v2980_v13, %v5967_v44 }
0x100b   : > { %v3167_v50 = vmul.f32 0.7978846, %v3135_v30  ;;  %v3169_v51 = vmul.f32 0.7978846, %v3137_v54  ;;  %v2911_v6 = vpop.f32.mrb[55].mxu1  ;;  %v2984_v9 = vpop.f32.mrb[55].mxu0  ;;  %v3139_v57 = vadd.f32 %v3107_v38, %v5974_v4  ;;  %v6022_v29 = vadd.f32 %v2909_v24, %v5957_v3 }
0x100c   : > { %v3141_v59 = vadd.f32 %v3109_v52, %v5977_v49  ;;  %v3047_v41 = vmul.f32 0.044715, %v6001_v27  ;;  %v3048_v47 = vmul.f32 0.044715, %v6013_v37  ;;  %v3108_v17 = vmul.f32 %v3076_v25, %v5981_v61 }
0x100d   : > { %4748 = vtanh.f32 %v3167_v50  ;;  %v3171_v35 = vmul.f32 0.7978846, %v3139_v57  ;;  %v3049_v19 = vmul.f32 0.044715, %v6008_v58  ;;  %v3050_v33 = vmul.f32 0.044715, %v6019_v10 }
0x100e   : > { %4750 = vtanh.f32 %v3169_v51  ;;  %v3173_v31 = vmul.f32 0.7978846, %v3141_v59  ;;  %v3079_v18 = vmul.f32 %v3047_v41, %v6001_v27  ;;  %v3009_v63 = vmul.f32 0.5, %v5965_v39 }
0x100f   : > { %4752 = vtanh.f32 %v3171_v35  ;;  %v3080_v1 = vmul.f32 %v3048_v47, %v6013_v37  ;;  %v6032_v40 = vadd.f32 %v2911_v6, %v5961_v45  ;;  %v6035_v36 = vadd.f32 %v2984_v9, %v5967_v44 }
0x1010   : > { %4754 = vtanh.f32 %v3173_v31  ;;  %v3106_v21 = vmul.f32 %v3074_v15, %v5984_v0  ;;  %v3011_v22 = vmul.f32 0.5, %v5974_v4  ;;  %v3110_v23 = vmul.f32 %v3078_v34, %v5988_v62 }
0x1011   : > { %v3051_v26 = vmul.f32 0.044715, %v6022_v29  ;;  %v3082_v28 = vmul.f32 %v3050_v33, %v6019_v10  ;;  %v3052_v39 = vmul.f32 0.044715, %v6032_v40  ;;  %v3054_v30 = vmul.f32 0.044715, %v6035_v36 }
0x1012   : > { %v3136_v54 = vadd.f32 %v3104_v12, %v5971_v5  ;;  %v3013_v7 = vmul.f32 0.5, %v5977_v49  ;;  %v3111_v11 = vmul.f32 %v3079_v18, %v6001_v27  ;;  %v3081_v13 = vmul.f32 %v3049_v19, %v6008_v58 }
0x1013   : > { %v3140_v4 = vadd.f32 %v3108_v17, %v5981_v61  ;;  %v3112_v43 = vmul.f32 %v3080_v1, %v6013_v37  ;;  %v3084_v38 = vmul.f32 %v3052_v39, %v6032_v40  ;;  %v3086_v42 = vmul.f32 %v3054_v30, %v6035_v36 }
0x1014   : > { %v3168_v24 = vmul.f32 0.7978846, %v3136_v54  ;;  %v6053_v51 = vadd.f32 %v2982_v46, %v5959_v14  ;;  %v3138_v49 = vadd.f32 %v3106_v21, %v5984_v0  ;;  %v3142_v6 = vadd.f32 %v3110_v23, %v5988_v62 }
0x1015   : > { %v3172_v52 = vmul.f32 0.7978846, %v3140_v4  ;;  %v3114_v56 = vmul.f32 %v3082_v28, %v6019_v10  ;;  %v3083_v57 = vmul.f32 %v3051_v26, %v6022_v29  ;;  %v3116_v25 = vmul.f32 %v3084_v38, %v6032_v40 }
0x1016   : > { %4756 = vtanh.f32 %v3168_v24  ;;  %v3170_v59 = vmul.f32 0.7978846, %v3138_v49  ;;  %v3174_v41 = vmul.f32 0.7978846, %v3142_v6  ;;  %v3113_v46 = vmul.f32 %v3081_v13, %v6008_v58 }
0x1017   : > { %v4749_v50 = vpop.eup %4748  ;;  %4758 = vtanh.f32 %v3172_v52  ;;  %v3118_v34 = vmul.f32 %v3086_v42, %v6035_v36  ;;  %v3144_v47 = vadd.f32 %v3112_v43, %v6013_v37  ;;  %v3053_v17 = vmul.f32 0.044715, %v6053_v51 }
0x1018   : > { %v4751_v9 = vpop.eup %4750  ;;  %v3231_v15 = vadd.f32 1.0, %v4749_v50  ;;  %4760 = vtanh.f32 %v3170_v59  ;;  %v3148_v19 = vadd.f32 %v3116_v25, %v6032_v40  ;;  %v3115_v33 = vmul.f32 %v3083_v57, %v6022_v29 }
0x1019   : > { %v4753_v35 = vpop.eup %4752  ;;  %v3233_v31 = vadd.f32 1.0, %v4751_v9  ;;  %4762 = vtanh.f32 %v3174_v41  ;;  %v3176_v21 = vmul.f32 0.7978846, %v3144_v47  ;;  %v3146_v39 = vadd.f32 %v3114_v56, %v6019_v10 }
0x101a   : > { %v4755_v12 = vpop.eup %4754  ;;  %v3235_v18 = vadd.f32 1.0, %v4753_v35  ;;  %v6066_v23 = vmul.f32 %v3231_v15, %v3007_v48  ;;  %v3180_v28 = vmul.f32 0.7978846, %v3148_v19  ;;  %v3150_v13 = vadd.f32 %v3118_v34, %v6035_v36 }
0x101b   : > { %v3237_v1 = vadd.f32 1.0, %v4755_v12  ;;  %v6071_v30 = vmul.f32 %v3233_v31, %v3009_v63  ;;  %4764 = vtanh.f32 %v3176_v21  ;;  %v3178_v43 = vmul.f32 0.7978846, %v3146_v39 }
0x101c   : > { %v6068_v26 = vmul.f32 %v3235_v18, %v3011_v22  ;;  %4766 = vtanh.f32 %v3180_v28  ;;  %v3182_v22 = vmul.f32 0.7978846, %v3150_v13  ;;  %v3143_v38 = vadd.f32 %v3111_v11, %v6001_v27 }
0x101d   : > { %v6073_v54 = vmul.f32 %v3237_v1, %v3013_v7  ;;  %v3147_v42 = vadd.f32 %v3115_v33, %v6022_v29  ;;  %v3085_v63 = vmul.f32 %v3053_v17, %v6053_v51  ;;  %4768 = vtanh.f32 %v3178_v43 }
0x101e   : > { %v3295_v4 = vpack.c.bf16 %v6068_v26, %v6066_v23  ;;  %v3145_v7 = vadd.f32 %v3113_v46, %v6008_v58  ;;  %4770 = vtanh.f32 %v3182_v22  ;;  %v3175_v50 = vmul.f32 0.7978846, %v3143_v38 }
0x101f   : > { %v3297_v48 = vpack.c.bf16 %v6073_v54, %v6071_v30  ;;  %v3179_v52 = vmul.f32 0.7978846, %v3147_v42  ;;  %v3008_v6 = vmul.f32 0.5, %v5971_v5  ;;  %v3012_v56 = vmul.f32 0.5, %v5981_v61 }
0x1020   : > { %v4757_v24 = vpop.eup %4756  ;;  %4772 = vtanh.f32 %v3175_v50  ;;  %v3117_v25 = vmul.f32 %v3085_v63, %v6053_v51  ;;  %v3177_v35 = vmul.f32 0.7978846, %v3145_v7  ;;  %v3010_v17 = vmul.f32 0.5, %v5984_v0 }
0x1021   : > { %v4759_v49 = vpop.eup %4758  ;;  %v3232_v9 = vadd.f32 1.0, %v4757_v24  ;;  %4774 = vtanh.f32 %v3179_v52  ;;  %v3014_v18 = vmul.f32 0.5, %v5988_v62  ;;  %v3016_v43 = vmul.f32 0.5, %v6013_v37 }
0x1022   : > { %v3236_v57 = vadd.f32 1.0, %v4759_v49  ;;  %v4761_v11 = vpop.eup %4760  ;;  %v3149_v42 = vadd.f32 %v3117_v25, %v6053_v51  ;;  %v3020_v7 = vmul.f32 0.5, %v6032_v40  ;;  %v3018_v24 = vmul.f32 0.5, %v6019_v10 }
0x1023   : > { %v3264_v59 = vmul.f32 %v3232_v9, %v3008_v6  ;;  %v4763_v46 = vpop.eup %4762  ;;  %v3234_v31 = vadd.f32 1.0, %v4761_v11  ;;  %4776 = vtanh.f32 %v3177_v35  ;;  %v3022_v49 = vmul.f32 0.5, %v6035_v36 }
0x1024   : > { %v3268_v34 = vmul.f32 %v3236_v57, %v3012_v56  ;;  %v3238_v19 = vadd.f32 1.0, %v4763_v46  ;;  %v3015_v6 = vmul.f32 0.5, %v6001_v27  ;;  %v3019_v40 = vmul.f32 0.5, %v6022_v29 }
0x1025   : > { %v2915_v41 = vpop.f32.mrb[56].mxu1  ;;  %v2988_v15 = vpop.f32.mrb[56].mxu0  ;;  %v3266_v38 = vmul.f32 %v3234_v31, %v3010_v17  ;;  %v6116_v10 = vmul.f32 0.5, %v6008_v58  ;;  %v6123_v36 = vmul.f32 0.5, %v6053_v51  ;;  %v3181_v27 = vmul.f32 0.7978846, %v3149_v42 }
0x1026   : > { %v6088_v47 = vadd.f32 %v2915_v41, %v5957_v3  ;;  %v6091_v5 = vadd.f32 %v2988_v15, %v5959_v14  ;;  %v2917_v61 = vpop.f32.mrb[57].mxu1  ;;  %v2990_v12 = vpop.f32.mrb[57].mxu0  ;;  %v3296_v26 = vpack.c.bf16 %v3268_v34, %v3264_v59  ;;  %v3270_v0 = vmul.f32 %v3238_v19, %v3014_v18 }
0x1027   : > { %v6096_v33 = vadd.f32 %v2917_v61, %v5961_v45  ;;  %v2919_v1 = vpop.f32.mrb[58].mxu1  ;;  %v2992_v21 = vpop.f32.mrb[58].mxu0  ;;  %v6099_v28 = vadd.f32 %v2990_v12, %v5967_v44  ;;  %4778 = vtanh.f32 %v3181_v27 }
0x1028   : > { %v4765_v23 = vpop.eup %4764  ;;  %v2921_v39 = vpop.f32.mrb[59].mxu1  ;;  %v3055_v62 = vmul.f32 0.044715, %v6088_v47  ;;  %3606 = vmatprep.mubr.bf16.mxu1 %v3296_v26  ;;  %v3057_v63 = vmul.f32 0.044715, %v6091_v5  ;;  %v3298_v52 = vpack.c.bf16 %v3270_v0, %v3266_v38  ;;  %v6112_v57 = vadd.f32 %v2919_v1, %v5957_v3 }
0x1029   : > { %v2994_v13 = vpop.f32.mrb[59].mxu0  ;;  %v4767_v22 = vpop.eup %4766  ;;  %3607 = vmatmul.mubr.bf16.vlgmr.msra.gmra.mrb[64].mxu1 %v3295_v4  ;;  %v3056_v37 = vmul.f32 0.044715, %v6096_v33  ;;  %v3058_v56 = vmul.f32 0.044715, %v6099_v28  ;;  %v6120_v11 = vadd.f32 %v2921_v39, %v5961_v45  ;;  %v3240_v15 = vadd.f32 1.0, %v4765_v23 }
0x102a   : > { %v4769_v50 = vpop.eup %4768  ;;  %3671 = vmatprep.mubr.bf16.mxu0 %v3298_v52  ;;  %v3087_v4 = vmul.f32 %v3055_v62, %v6088_v47  ;;  %v3089_v58 = vmul.f32 %v3057_v63, %v6091_v5  ;;  %v6130_v29 = vadd.f32 %v2994_v13, %v5967_v44  ;;  %v3244_v35 = vadd.f32 1.0, %v4767_v22 }
0x102b   : > { %v4771_v9 = vpop.eup %4770  ;;  %3672 = vmatmul.mubr.bf16.vlgmr.msra.gmra.mrb[64].mxu0 %v3297_v48  ;;  %v3088_v51 = vmul.f32 %v3056_v37, %v6096_v33  ;;  %v6134_v61 = vadd.f32 %v2992_v21, %v5959_v14  ;;  %v3242_v12 = vadd.f32 1.0, %v4769_v50  ;;  %v3090_v54 = vmul.f32 %v3058_v56, %v6099_v28 }
0x102c   : > { %v4773_v41 = vpop.eup %4772  ;;  %v3246_v17 = vadd.f32 1.0, %v4771_v9  ;;  %v3059_v48 = vmul.f32 0.044715, %v6112_v57  ;;  %v3272_v19 = vmul.f32 %v3240_v15, %v3016_v43  ;;  %v3276_v1 = vmul.f32 %v3244_v35, %v3020_v7 }
0x102d   : > { %v2925_v25 = vpop.f32.mrb[60].mxu1  ;;  %v2998_v59 = vpop.f32.mrb[60].mxu0  ;;  %v3060_v39 = vmul.f32 0.044715, %v6120_v11  ;;  %v3274_v13 = vmul.f32 %v3242_v12, %v3018_v24  ;;  %v3239_v38 = vadd.f32 1.0, %v4773_v41  ;;  %v3119_v42 = vmul.f32 %v3087_v4, %v6088_v47 }
0x102e   : > { %v2927_v46 = vpop.f32.mrb[61].mxu1  ;;  %v3000_v34 = vpop.f32.mrb[61].mxu0  ;;  %v3278_v22 = vmul.f32 %v3246_v17, %v3022_v49  ;;  %v3062_v21 = vmul.f32 0.044715, %v6130_v29  ;;  %v3300_v0 = vpack.c.bf16 %v3276_v1, %v3272_v19  ;;  %v3061_v63 = vmul.f32 0.044715, %v6134_v61 }
0x102f   : > { %v4775_v31 = vpop.eup %4774  ;;  %v2929_v18 = vpop.f32.mrb[62].mxu1  ;;  %v3271_v52 = vmul.f32 %v3239_v38, %v3015_v6  ;;  %v6143_v37 = vadd.f32 %v2925_v25, %v5957_v3  ;;  %v6146_v24 = vadd.f32 %v2998_v59, %v5959_v14  ;;  %v6149_v49 = vadd.f32 %v2927_v46, %v5961_v45 }
0x1030   : > { %v3002_v30 = vpop.f32.mrb[62].mxu0  ;;  %v2931_v23 = vpop.f32.mrb[63].mxu1  ;;  %v3243_v62 = vadd.f32 1.0, %v4775_v31  ;;  %v3302_v50 = vpack.c.bf16 %v3278_v22, %v3274_v13  ;;  %3614 = vmatprep.mubr.bf16.mxu1 %v3300_v0  ;;  %v3091_v9 = vmul.f32 %v3059_v48, %v6112_v57  ;;  %v3092_v56 = vmul.f32 %v3060_v39, %v6120_v11 }
0x1031   : > { %v3004_v26 = vpop.f32.mrb[63].mxu0  ;;  %v4777_v43 = vpop.eup %4776  ;;  %v6154_v4 = vadd.f32 %v3000_v34, %v5967_v44  ;;  %v6157_v6 = vadd.f32 %v2929_v18, %v5957_v3  ;;  %v6161_v25 = vadd.f32 %v3002_v30, %v5959_v14  ;;  %v6164_v59 = vadd.f32 %v2931_v23, %v5961_v45 }
0x1032   : > { %v3275_v7 = vmul.f32 %v3243_v62, %v3019_v40  ;;  %3679 = vmatprep.mubr.bf16.mxu0 %v3302_v50  ;;  %v3094_v40 = vmul.f32 %v3062_v21, %v6130_v29  ;;  %v3120_v41 = vmul.f32 %v3088_v51, %v6096_v33  ;;  %v3093_v15 = vmul.f32 %v3061_v63, %v6134_v61 }
0x1033   : > { %v3241_v35 = vadd.f32 1.0, %v4777_v43  ;;  %v3064_v46 = vmul.f32 0.044715, %v6149_v49  ;;  %v3063_v3 = vmul.f32 0.044715, %v6143_v37  ;;  %v6173_v14 = vadd.f32 %v3004_v26, %v5967_v44  ;;  %v4779_v26 = vpop.eup %4778 }
0x1034   : > { %v3299_v27 = vpack.c.bf16 %v3275_v7, %v3271_v52  ;;  %v3065_v34 = vmul.f32 0.044715, %v6146_v24  ;;  %v3066_v31 = vmul.f32 0.044715, %v6154_v4  ;;  %v3121_v45 = vmul.f32 %v3089_v58, %v6091_v5 }
0x1035   : > { %v3124_v12 = vmul.f32 %v3092_v56, %v6120_v11  ;;  %v3067_v51 = vmul.f32 0.044715, %v6157_v6  ;;  %v3068_v17 = vmul.f32 0.044715, %v6164_v59  ;;  %v3122_v18 = vmul.f32 %v3090_v54, %v6099_v28 }
0x1036   : > { %3615 = vmatmul.mubr.bf16.gmra.mrb[68].mxu1 %v3299_v27  ;;  %v3123_v30 = vmul.f32 %v3091_v9, %v6112_v57  ;;  %v3126_v48 = vmul.f32 %v3094_v40, %v6130_v29  ;;  %v3069_v19 = vmul.f32 0.044715, %v6161_v25  ;;  %v3125_v1 = vmul.f32 %v3093_v15, %v6134_v61 }
0x1037   : > { %v3273_v44 = vmul.f32 %v3241_v35, %v6116_v10  ;;  %v3096_v58 = vmul.f32 %v3064_v46, %v6149_v49  ;;  %v3070_v23 = vmul.f32 0.044715, %v6173_v14  ;;  %v3095_v39 = vmul.f32 %v3063_v3, %v6143_v37 }
0x1038   : > { %v3097_v13 = vmul.f32 %v3065_v34, %v6146_v24  ;;  %v3098_v54 = vmul.f32 %v3066_v31, %v6154_v4  ;;  %v3152_v22 = vadd.f32 %v3120_v41, %v6096_v33  ;;  %v3245_v38 = vadd.f32 1.0, %v4779_v26 }
0x1039   : > { %v3099_v21 = vmul.f32 %v3067_v51, %v6157_v6  ;;  %v3100_v0 = vmul.f32 %v3068_v17, %v6164_v59  ;;  %v3156_v10 = vadd.f32 %v3124_v12, %v6120_v11  ;;  %v3101_v62 = vmul.f32 %v3069_v19, %v6161_v25 }
0x103a   : > { %v3184_v63 = vmul.f32 0.7978846, %v3152_v22  ;;  %v3154_v50 = vadd.f32 %v3122_v18, %v6099_v28  ;;  %v3158_v52 = vadd.f32 %v3126_v48, %v6130_v29  ;;  %v3277_v43 = vmul.f32 %v3245_v38, %v6123_v36 }
0x103b   : > { %v3128_v7 = vmul.f32 %v3096_v58, %v6149_v49  ;;  %v3102_v9 = vmul.f32 %v3070_v23, %v6173_v14  ;;  %v3188_v56 = vmul.f32 0.7978846, %v3156_v10  ;;  %v3151_v41 = vadd.f32 %v3119_v42, %v6088_v47 }
0x103c   : > { %4780 = vtanh.f32 %v3184_v63  ;;  %v3186_v40 = vmul.f32 0.7978846, %v3154_v50  ;;  %v3190_v27 = vmul.f32 0.7978846, %v3158_v52  ;;  %v3301_v15 = vpack.c.bf16 %v3277_v43, %v3273_v44 }
0x103d   : > { %v3132_v35 = vmul.f32 %v3100_v0, %v6164_v59  ;;  %4782 = vtanh.f32 %v3188_v56  ;;  %v3155_v46 = vadd.f32 %v3123_v30, %v6112_v57  ;;  %v3130_v3 = vmul.f32 %v3098_v54, %v6154_v4 }
0x103e   : > { %4784 = vtanh.f32 %v3186_v40  ;;  %v3183_v36 = vmul.f32 0.7978846, %v3151_v41  ;;  %v3153_v34 = vadd.f32 %v3121_v45, %v6091_v5  ;;  %3680 = vmatmul.mubr.bf16.gmra.mrb[68].mxu0 %v3301_v15  ;;  %v3134_v31 = vmul.f32 %v3102_v9, %v6173_v14 }
0x103f   : > { %4786 = vtanh.f32 %v3190_v27  ;;  %v3187_v12 = vmul.f32 0.7978846, %v3155_v46  ;;  %v3157_v51 = vadd.f32 %v3125_v1, %v6134_v61  ;;  %v3127_v42 = vmul.f32 %v3095_v39, %v6143_v37 }
0x1040   : > { %4788 = vtanh.f32 %v3183_v36  ;;  %v3185_v17 = vmul.f32 0.7978846, %v3153_v34  ;;  %v3160_v18 = vadd.f32 %v3128_v7, %v6149_v49  ;;  %v3131_v30 = vmul.f32 %v3099_v21, %v6157_v6 }
0x1041   : > { %4790 = vtanh.f32 %v3187_v12  ;;  %v3189_v48 = vmul.f32 0.7978846, %v3157_v51  ;;  %v3164_v19 = vadd.f32 %v3132_v35, %v6164_v59  ;;  %v3129_v45 = vmul.f32 %v3097_v13, %v6146_v24 }
0x1042   : > { %4792 = vtanh.f32 %v3185_v17  ;;  %v3192_v44 = vmul.f32 0.7978846, %v3160_v18  ;;  %v3162_v58 = vadd.f32 %v3130_v3, %v6154_v4  ;;  %v3133_v1 = vmul.f32 %v3101_v62, %v6161_v25 }
0x1043   : > { %4794 = vtanh.f32 %v3189_v48  ;;  %v3196_v23 = vmul.f32 0.7978846, %v3164_v19  ;;  %v3166_v26 = vadd.f32 %v3134_v31, %v6173_v14  ;;  %v3159_v54 = vadd.f32 %v3127_v42, %v6143_v37 }
0x1044   : > { %4796 = vtanh.f32 %v3192_v44  ;;  %v3194_v39 = vmul.f32 0.7978846, %v3162_v58  ;;  %v3024_v22 = vmul.f32 0.5, %v6096_v33  ;;  %v3163_v13 = vadd.f32 %v3131_v30, %v6157_v6 }
0x1045   : > { %4798 = vtanh.f32 %v3196_v23  ;;  %v3198_v38 = vmul.f32 0.7978846, %v3166_v26  ;;  %v3028_v0 = vmul.f32 0.5, %v6120_v11  ;;  %v3191_v10 = vmul.f32 0.7978846, %v3159_v54 }
0x1046   : > { %v4781_v21 = vpop.eup %4780  ;;  %4800 = vtanh.f32 %v3194_v39  ;;  %v3161_v62 = vadd.f32 %v3129_v45, %v6146_v24  ;;  %v3195_v52 = vmul.f32 0.7978846, %v3163_v13  ;;  %v3165_v43 = vadd.f32 %v3133_v1, %v6161_v25 }
0x1047   : > { %v4783_v63 = vpop.eup %4782  ;;  %v3248_v50 = vadd.f32 1.0, %v4781_v21  ;;  %4802 = vtanh.f32 %v3198_v38  ;;  %v3026_v33 = vmul.f32 0.5, %v6099_v28  ;;  %v3030_v27 = vmul.f32 0.5, %v6130_v29 }
0x1048   : > { %v4785_v7 = vpop.eup %4784  ;;  %v3252_v9 = vadd.f32 1.0, %v4783_v63  ;;  %4804 = vtanh.f32 %v3191_v10  ;;  %v3193_v56 = vmul.f32 0.7978846, %v3161_v62  ;;  %v3197_v41 = vmul.f32 0.7978846, %v3165_v43 }
0x1049   : > { %v4787_v40 = vpop.eup %4786  ;;  %v3250_v11 = vadd.f32 1.0, %v4785_v7  ;;  %4806 = vtanh.f32 %v3195_v52  ;;  %v3280_v35 = vmul.f32 %v3248_v50, %v3024_v22  ;;  %v3023_v34 = vmul.f32 0.5, %v6088_v47 }
0x104a   : > { %v4789_v15 = vpop.eup %4788  ;;  %v3284_v46 = vmul.f32 %v3252_v9, %v3028_v0  ;;  %v3254_v3 = vadd.f32 1.0, %v4787_v40  ;;  %4808 = vtanh.f32 %v3193_v56  ;;  %v3027_v31 = vmul.f32 0.5, %v6112_v57 }
0x104b   : > { %v4791_v36 = vpop.eup %4790  ;;  %v3247_v12 = vadd.f32 1.0, %v4789_v15  ;;  %4810 = vtanh.f32 %v3197_v41  ;;  %v3282_v42 = vmul.f32 %v3250_v11, %v3026_v33  ;;  %v3025_v30 = vmul.f32 0.5, %v6091_v5 }
0x104c   : > { %v4793_v28 = vpop.eup %4792  ;;  %v3304_v51 = vpack.c.bf16 %v3284_v46, %v3280_v35  ;;  %v3286_v17 = vmul.f32 %v3254_v3, %v3030_v27  ;;  %v3251_v29 = vadd.f32 1.0, %v4791_v36  ;;  %v3029_v48 = vmul.f32 0.5, %v6134_v61 }
0x104d   : > { %v4795_v18 = vpop.eup %4794  ;;  %v3249_v19 = vadd.f32 1.0, %v4793_v28  ;;  %v3279_v58 = vmul.f32 %v3247_v12, %v3023_v34  ;;  %v3032_v23 = vmul.f32 0.5, %v6149_v49  ;;  %v3036_v26 = vmul.f32 0.5, %v6164_v59 }
0x104e   : > { %v4797_v45 = vpop.eup %4796  ;;  %3622 = vmatprep.mubr.bf16.mxu1 %v3304_v51  ;;  %v3306_v44 = vpack.c.bf16 %v3286_v17, %v3282_v42  ;;  %v3283_v47 = vmul.f32 %v3251_v29, %v3027_v31  ;;  %v3253_v1 = vadd.f32 1.0, %v4795_v18  ;;  %v3034_v21 = vmul.f32 0.5, %v6154_v4 }
0x104f   : > { %v4799_v57 = vpop.eup %4798  ;;  %v3256_v39 = vadd.f32 1.0, %v4797_v45  ;;  %v3281_v38 = vmul.f32 %v3249_v19, %v3025_v30  ;;  %v3038_v0 = vmul.f32 0.5, %v6173_v14  ;;  %v3031_v43 = vmul.f32 0.5, %v6143_v37 }
0x1050   : > { %v4801_v54 = vpop.eup %4800  ;;  %3687 = vmatprep.mubr.bf16.mxu0 %v3306_v44  ;;  %v3303_v22 = vpack.c.bf16 %v3283_v47, %v3279_v58  ;;  %v3285_v5 = vmul.f32 %v3253_v1, %v3029_v48  ;;  %v3260_v13 = vadd.f32 1.0, %v4799_v57  ;;  %v3035_v7 = vmul.f32 0.5, %v6157_v6 }
0x1051   : > { %v4803_v61 = vpop.eup %4802  ;;  %v3258_v10 = vadd.f32 1.0, %v4801_v54  ;;  %v3288_v50 = vmul.f32 %v3256_v39, %v3032_v23  ;;  %v3033_v11 = vmul.f32 0.5, %v6146_v24  ;;  %v3037_v41 = vmul.f32 0.5, %v6161_v25  ;;  %v6238_v24 = vld [vmem:[%s6357_s12] ss:$0 sm:$0xff] }
0x1052   : > { %v4805_v62 = vpop.eup %4804  ;;  %3623 = vmatmul.mubr.bf16.gmra.mrb[72].mxu1 %v3303_v22  ;;  %v3305_v63 = vpack.c.bf16 %v3285_v5, %v3281_v38  ;;  %v3292_v49 = vmul.f32 %v3260_v13, %v3036_v26  ;;  %v3262_v52 = vadd.f32 1.0, %v4803_v61 }
0x1053   : > { %v4807_v59 = vpop.eup %4806  ;;  %v3255_v9 = vadd.f32 1.0, %v4805_v62  ;;  %v3290_v40 = vmul.f32 %v3258_v10, %v3034_v21 }
0x1054   : > { %v4809_v33 = vpop.eup %4808  ;;  %3688 = vmatmul.mubr.bf16.gmra.mrb[72].mxu0 %v3305_v63  ;;  %v3308_v56 = vpack.c.bf16 %v3292_v49, %v3288_v50  ;;  %v3294_v4 = vmul.f32 %v3262_v52, %v3038_v0  ;;  %v3259_v27 = vadd.f32 1.0, %v4807_v59 }
0x1055   : > { %v4811_v14 = vpop.eup %4810  ;;  %v3257_v15 = vadd.f32 1.0, %v4809_v33  ;;  %v3287_v46 = vmul.f32 %v3255_v9, %v3031_v43 }
0x1056   : > { %3630 = vmatprep.mubr.bf16.mxu1 %v3308_v56  ;;  %v3310_v35 = vpack.c.bf16 %v3294_v4, %v3290_v40  ;;  %v3291_v3 = vmul.f32 %v3259_v27, %v3035_v7  ;;  %v3261_v37 = vadd.f32 1.0, %v4811_v14 }
0x1057   : > { %v3289_v36 = vmul.f32 %v3257_v15, %v3033_v11 }
0x1058   : > { %3695 = vmatprep.mubr.bf16.mxu0 %v3310_v35  ;;  %v3307_v6 = vpack.c.bf16 %v3291_v3, %v3287_v46  ;;  %v3293_v34 = vmul.f32 %v3261_v37, %v3037_v41 }
0x105a   : > { %3631 = vmatmul.mubr.bf16.gmra.mrb[76].mxu1 %v3307_v6  ;;  %v3309_v31 = vpack.c.bf16 %v3293_v34, %v3289_v36 }
0x105c   : > { %3696 = vmatmul.mubr.bf16.gmra.mrb[76].mxu0 %v3309_v31 }
0x10fc   : > { %v4111_v12 = vpop.f32.mrb[64].mxu1 }
0x10fd   : > { %v4112_v25 = vpop.f32.mrb[65].mxu1 }
0x10fe   : > { %v4113_v28 = vadd.f32 %v4112_v25, %v4111_v12  ;;  %v4114_v51 = vpop.f32.mrb[66].mxu1  ;;  %v4151_v42 = vpop.f32.mrb[64].mxu0 }
0x10ff   : > { %v4115_v17 = vpop.f32.mrb[67].mxu1  ;;  %v4152_v18 = vpop.f32.mrb[65].mxu0 }
0x1100   : > { %v3609_v29 = vadd.f32 %v4113_v28, %v6238_v24  ;;  %v4116_v30 = vadd.f32 %v4115_v17, %v4114_v51  ;;  %v4153_v48 = vadd.f32 %v4152_v18, %v4151_v42  ;;  %v4154_v19 = vpop.f32.mrb[66].mxu0 }
0x1101   : > { %v4155_v44 = vpop.f32.mrb[67].mxu0 }
0x1102   : > { %v3612_v45 = vadd.f32 %v4116_v30, %v6238_v24  ;;  %v3674_v58 = vadd.f32 %v4153_v48, %v3609_v29  ;;  %v4156_v47 = vadd.f32 %v4155_v44, %v4154_v19 }
0x1104   : > { %v3704_v1 = vadd.f32 %v3674_v58, %v5863_v16  ;;  %v3677_v57 = vadd.f32 %v4156_v47, %v3612_v45 }
0x1106   : > { %3712 = vst [vmem:[%s6245_s30] sm:$0xff] %v3704_v1  ;;  %v3705_v23 = vadd.f32 %v3677_v57, %v5866_v53 }
0x1108   : > { %3713 = vst [vmem:[%s6245_s30 + $0x8] sm:$0xff] %v3705_v23 }
0x1109   : > { %v4117_v26 = vpop.f32.mrb[68].mxu1 }
0x110a   : > { %v4118_v39 = vpop.f32.mrb[69].mxu1 }
0x110b   : > { %v4119_v54 = vadd.f32 %v4118_v39, %v4117_v26  ;;  %v4120_v22 = vpop.f32.mrb[70].mxu1 }
0x110c   : > { %v4121_v38 = vpop.f32.mrb[71].mxu1 }
0x110d   : > { %v4122_v5 = vadd.f32 %v4121_v38, %v4120_v22  ;;  %v3617_v16 = vadd.f32 %v4119_v54, %v6238_v24 }
0x110f   : > { %v3620_v10 = vadd.f32 %v4122_v5, %v6238_v24 }
0x1111   : > { %v4157_v13 = vpop.f32.mrb[68].mxu0 }
0x1112   : > { %v4158_v61 = vpop.f32.mrb[69].mxu0 }
0x1113   : > { %v4159_v21 = vadd.f32 %v4158_v61, %v4157_v13  ;;  %v4160_v0 = vpop.f32.mrb[70].mxu0 }
0x1114   : > { %v4161_v62 = vpop.f32.mrb[71].mxu0 }
0x1115   : > { %v3682_v63 = vadd.f32 %v4159_v21, %v3617_v16  ;;  %v4162_v53 = vadd.f32 %v4161_v62, %v4160_v0 }
0x1117   : > { %v3706_v50 = vadd.f32 %v3682_v63, %v5870_v8  ;;  %v3685_v49 = vadd.f32 %v4162_v53, %v3620_v10 }
0x1119   : > { %3714 = vst [vmem:[%s6245_s30 + $0x10] sm:$0xff] %v3706_v50  ;;  %v3707_v52 = vadd.f32 %v3685_v49, %v5875_v55 }
0x111b   : > { %3715 = vst [vmem:[%s6245_s30 + $0x18] sm:$0xff] %v3707_v52 }
0x1125   : > { %v4123_v59 = vpop.f32.mrb[72].mxu1 }
0x1126   : > { %v4124_v43 = vpop.f32.mrb[73].mxu1 }
0x1127   : > { %v4163_v7 = vpop.f32.mrb[72].mxu0  ;;  %v4125_v9 = vadd.f32 %v4124_v43, %v4123_v59  ;;  %v4126_v33 = vpop.f32.mrb[74].mxu1 }
0x1128   : > { %v4164_v56 = vpop.f32.mrb[73].mxu0  ;;  %v4127_v40 = vpop.f32.mrb[75].mxu1 }
0x1129   : > { %v3625_v4 = vadd.f32 %v4125_v9, %v6238_v24  ;;  %v4165_v27 = vadd.f32 %v4164_v56, %v4163_v7  ;;  %v4166_v14 = vpop.f32.mrb[74].mxu0  ;;  %v4128_v11 = vadd.f32 %v4127_v40, %v4126_v33 }
0x112a   : > { %v4167_v8 = vpop.f32.mrb[75].mxu0 }
0x112b   : > { %v3690_v41 = vadd.f32 %v4165_v27, %v3625_v4  ;;  %v3628_v15 = vadd.f32 %v4128_v11, %v6238_v24  ;;  %v4168_v55 = vadd.f32 %v4167_v8, %v4166_v14 }
0x112d   : > { %v3708_v35 = vadd.f32 %v3690_v41, %v5879_v32  ;;  %v3693_v46 = vadd.f32 %v4168_v55, %v3628_v15  ;;  %v4129_v3 = vpop.f32.mrb[76].mxu1 }
0x112e   : > { %v4130_v37 = vpop.f32.mrb[77].mxu1 }
0x112f   : > { %3716 = vst [vmem:[%s6245_s30 + $0x20] sm:$0xff] %v3708_v35  ;;  %v3709_v6 = vadd.f32 %v3693_v46, %v5882_v20  ;;  %v4169_v36 = vpop.f32.mrb[76].mxu0  ;;  %v4131_v34 = vadd.f32 %v4130_v37, %v4129_v3  ;;  %v4132_v31 = vpop.f32.mrb[78].mxu1 }
0x1130   : > { %v4170_v12 = vpop.f32.mrb[77].mxu0  ;;  %v4133_v25 = vpop.f32.mrb[79].mxu1 }
0x1131   : > { %3717 = vst [vmem:[%s6245_s30 + $0x28] sm:$0xff] %v3709_v6  ;;  %v3633_v28 = vadd.f32 %v4131_v34, %v6238_v24  ;;  %v4171_v51 = vadd.f32 %v4170_v12, %v4169_v36  ;;  %v4172_v32 = vpop.f32.mrb[78].mxu0  ;;  %v4134_v42 = vadd.f32 %v4133_v25, %v4132_v31 }
0x1132   : > { %v4173_v17 = vpop.f32.mrb[79].mxu0 }
0x1133   : > { %v3698_v29 = vadd.f32 %v4171_v51, %v3633_v28  ;;  %v3636_v20 = vadd.f32 %v4134_v42, %v6238_v24  ;;  %v4174_v18 = vadd.f32 %v4173_v17, %v4172_v32 }
0x1135   : > { %v3710_v30 = vadd.f32 %v3698_v29, %v5886_v2  ;;  %v3701_v48 = vadd.f32 %v4174_v18, %v3636_v20 }
0x1137   : > { %3718 = vst [vmem:[%s6245_s30 + $0x30] sm:$0xff] %v3710_v30  ;;  %v3711_v19 = vadd.f32 %v3701_v48, %v5890_v60 }
0x1139   : > { %3719 = vst [vmem:[%s6245_s30 + $0x38] sm:$0xff] %v3711_v19 }
0x113a   : > { %4975 = shalt.err (!%p4972_p13)
}
0x113b   : > { %s4976_s23 = scalar_lea.hbm %s6270_s24, 1024  ;;  %s4980_s30 = scalar_lea.hbm %s6358_s27, 2048 }
0x113c   : > { %p4977_p9 = scmp.ne.s32.totalorder %s6270_s24, %s4976_s23  ;;  %p4981_p4 = scmp.lt.u32.totalorder %s6270_s24, %s6358_s27 }
0x113d   : > { %p4982_p8 = scmp.lt.u32.totalorder %s4980_s30, %s4976_s23  ;;  %p4984_p3 = scmp.lt.u32.totalorder %s4976_s23, %s6270_s24 }
0x113e   : > { %p4978_p0 = pnand %p4977_p9, %p5274_p10 }
0x113f   : > { %p4983_p6 = por %p4982_p8, %p4981_p4 }
0x1140   : > { %p4979_p11 = pneg %p4978_p0 }
0x1141   : > { %p4985_p5 = por %p4984_p3, %p4983_p6 }
0x1143   : > { %p4986_p7 = pnand %p4985_p5, %p4979_p11 }
0x1145   : > { %4989 = shalt.err (!%p4986_p7)
}
0x1146   : > { %s5056_s13 = smov 128   ;;  %s5057_s21 = smov 8  }
0x1147   : > { %4385 = dma.vmem_to_hbm [thread:$0]  (%p5274_p10), %s6272_s14, 1024, %s6270_s24, %s3721_s17, %s5056_s13, %s5056_s13, %s5057_s21  }
0x1148 PF: > { %s6359_s28 = sld [smem:[#allocation17_spill]]  ;;  %s6360_s10 = sld [smem:[#allocation18_spill]] }
0x1149   : > { %p6362_p2 = scmp.ge.s32.totalorder %s5036_s20, 2 }
0x114e   : > { %s3750_s26 = sand.u32 1, %s6359_s28   ;;  %p6361_p12 = scmp.ne.s32.totalorder %s6360_s10, 0 }
0x114f   : > { %s3751_s23 = scalar_lea.sflag [#allocation5], %s3750_s26 }
0x1150   : > { %p4405_p1 = pnand %p6362_p2, %p6361_p12 }
0x1152   : > { %5019 = dma.done.wait (!%p4405_p1), %s3751_s23, 1024  }
0x1153   : > { %5021 = vsyncadd (!%p4405_p1), %s3751_s23, 4294966272  ;;  %p26_p13 = scmp.ge.s32.totalorder %s5264_s22, 4   ;;  %s6363_s17 = smov %s5028_s18 }
0x1154   : > { %s6364_s18 = smov %s5032_s19  ;;  %s6365_s19 = smov %s5280_s16 }
0x1155   : > { %s6366_s20 = smov %s5264_s22  ;;  %28 = sbr.rel (!%p26_p13) target bundleno = 11 (0xb), region = 125 }
0x115c   :  { %3756 = vsyncpa [#allocation4], 1 }
0x115d   :  { %3758 = vsyncpa [#allocation4 + $0x1], 1 }
0x115e   :  { %3759 = vsyncpa [#allocation7], 1 }
0x115f   :  { %3760 = vsyncpa [#allocation10], 1 }
0x1160   :  { %3761 = vsyncpa [#allocation5], 1 }
0x1161   :  { %3763 = vsyncpa [#allocation5 + $0x1], 1 }

</bundles_post_ra>
